<compile_context>
chip_gen: v6e
topology: v6e:2x2x1
jax: 0.10.0
libtpu: 0.0.40
codegen_flags: <defaults>
</compile_context>

<pallas_src>
import numpy as np
import jax
import jax.numpy as jnp
from jax import lax
from jax.experimental import pallas as pl
from jax.experimental.pallas import tpu as pltpu

# ---------------- configuration (mirrors Policy.__init__) ----------------
INITIAL_SOFTMAX_TEMPERATURE = 1.0
SOFTMAX_TEMPERATURE_MIN = 0.02
STABILITY_EPSILON = 1e-6
POLICY_MEAN_ABS_CLIP = 10.0

DYN_JOINT_DES_DIM = 18
GENERAL_STATE_DIM = 16
DYN_JOINT_STATE_DIM = 3
SCALE = 3
MASK_DIM = 64 * SCALE                  # 192
JOINT_FEAT = 4 * SCALE                 # 12
ACTION_DIMS = (512, 256, 128 * SCALE)  # (512, 256, 384)
DES_LATENT_DIM = 128 * SCALE           # 384
POLICY_HIDDEN = 128 * SCALE            # 384
DJ_LATENT_DIM = MASK_DIM * JOINT_FEAT  # 2304
COMBINED_DIM = DJ_LATENT_DIM + GENERAL_STATE_DIM  # 2320
LN_EPS = 1e-6


# ---------------- small helpers used inside the kernel ----------------
def _elu(x):
    return jnp.where(x > 0, x, jnp.exp(x) - 1.0)


def _layer_norm(x, gamma, beta):
    # one-pass variance: E[x^2] - mean^2
    mu = jnp.mean(x, axis=-1, keepdims=True)
    var = jnp.mean(x * x, axis=-1, keepdims=True) - mu * mu
    return (x - mu) * lax.rsqrt(var + LN_EPS) * gamma + beta


# ---------------- fused kernel: whole forward pass for one batch tile ----------------
def policy_kernel(desc_ref, state_ref, gs_ref, scal_ref,
                  wdm_ref, bm1_ref, gj_ref, bj_ref, wm2_ref, bm2_ref,
                  wl_ref, bl_ref,
                  bd1_ref, gd_ref, bd_ref, wd2_ref, bd2_ref,
                  wa1xf_ref, wa1g_ref, ba1_ref, ga_ref, bA_ref,
                  wa2_ref, ba2_ref, wa3_ref, ba3_ref,
                  wp1a_ref, wp1l_ref, wp1d_ref, bp1_ref, gp_ref, bP_ref,
                  wpm2_ref,
                  mean_out):
    f32 = jnp.float32
    bf16 = jnp.bfloat16
    inv_temp = scal_ref[0, 0]          # 1 / (exp(log_temp) + temp_min), precomputed
    bpm2 = scal_ref[0, 1]

    desc = desc_ref[...]               # (M, 18)   with M = TB * J
    state = state_ref[...]             # (M, 3)
    gs = gs_ref[...]                   # (TB, 16)
    M = desc.shape[0]
    TB = gs.shape[0]
    J = M // TB

    # ---- fused desc projections: [action_description_latent1 | dyn_joint_state_mask1] ----
    hd = jnp.dot(desc.astype(bf16), wdm_ref[...], preferred_element_type=f32)      # (M, 576)
    d = _elu(_layer_norm(hd[:, :DES_LATENT_DIM] + bd1_ref[...], gd_ref[...], bd_ref[...]))
    h = _elu(_layer_norm(hd[:, DES_LATENT_DIM:] + bm1_ref[...], gj_ref[...], bj_ref[...]))

    # ---- dynamic joint state mask branch ----
    m = jnp.tanh(jnp.dot(h.astype(bf16), wm2_ref[...], preferred_element_type=f32)
                 + bm2_ref[...])
    m = jnp.clip(m, -1.0 + STABILITY_EPSILON, 1.0 - STABILITY_EPSILON)
    e = jnp.exp(m * inv_temp)          # matches torch (no max-subtraction); |m|<1 keeps it safe
    denom = jnp.sum(e, axis=-1, keepdims=True) + STABILITY_EPSILON
    mask = e * pl.reciprocal(denom, approx=True)                                    # (M, 192)

    # ---- latent dynamic joint state: K = 3, keep it on the VPU (exact f32) ----
    wl = wl_ref[...]                                                                # (3, 12)
    lat = (state[:, 0:1] * wl[0:1, :] + state[:, 1:2] * wl[1:2, :]
           + state[:, 2:3] * wl[2:3, :] + bl_ref[...])
    lat = _elu(lat)                                                                 # (M, 12)

    # ---- action description branch second layer ----
    adl = jnp.dot(d.astype(bf16), wd2_ref[...], preferred_element_type=f32) + bd2_ref[...]  # (M, 384)

    # ---- action MLP head (per batch row) ----
    # combined_input @ W1 = gs @ Wg + sum_f X[:, :, f] @ W[:, f, :],
    # where X[b, m, f] = sum_j mask[b, j, m] * lat[b, j, f]; this avoids the
    # (192,12) -> 2304 flatten entirely (weights pre-reordered on the host).
    a = jnp.dot(gs.astype(bf16), wa1g_ref[...], preferred_element_type=f32) + ba1_ref[...]  # (TB, 512)
    mask3 = mask.reshape(TB, J, MASK_DIM)     # hoisted: single relayout per grid step
    lat3 = lat.reshape(TB, J, JOINT_FEAT)     # hoisted: single relayout per grid step
    for f in range(JOINT_FEAT):
        mlat_f = jnp.sum(mask3 * lat3[:, :, f:f + 1], axis=1)                       # (TB, 192)
        a = a + jnp.dot(mlat_f.astype(bf16), wa1xf_ref[f], preferred_element_type=f32)
    a = _elu(_layer_norm(a, ga_ref[...], bA_ref[...]))
    a = _elu(jnp.dot(a.astype(bf16), wa2_ref[...], preferred_element_type=f32) + ba2_ref[...])
    a3 = jnp.dot(a.astype(bf16), wa3_ref[...], preferred_element_type=f32) + ba3_ref[...]   # (TB, 384)

    # ---- policy mean head (per joint); concat realised by split weights ----
    a3p = jnp.dot(a3.astype(bf16), wp1a_ref[...], preferred_element_type=f32) + bp1_ref[...]  # (TB, 384)
    latp = jnp.dot(lat.astype(bf16), wp1l_ref[...], preferred_element_type=f32)               # (M, 384)
    adlp = jnp.dot(adl.astype(bf16), wp1d_ref[...], preferred_element_type=f32)               # (M, 384)
    p = (a3p[:, None, :]
         + latp.reshape(TB, J, POLICY_HIDDEN)
         + adlp.reshape(TB, J, POLICY_HIDDEN))                                      # (TB, J, 384)
    p = _elu(_layer_norm(p, gp_ref[...], bP_ref[...]))
    # final 384 -> 1 projection as a VPU lane reduction (lane-dense (TB, J) output)
    mean = jnp.sum(p * wpm2_ref[...], axis=-1) + bpm2                               # (TB, J)
    mean_out[...] = jnp.clip(mean, -POLICY_MEAN_ABS_CLIP, POLICY_MEAN_ABS_CLIP)


# ---------------- parameter init (deterministic, PyTorch-style fan-in uniform) ----
def _linear(key, in_dim, out_dim):
    kw, kb = jax.random.split(key)
    bound = 1.0 / np.sqrt(in_dim)
    w = jax.random.uniform(kw, (out_dim, in_dim), jnp.float32, -bound, bound)
    b = jax.random.uniform(kb, (out_dim,), jnp.float32, -bound, bound)
    return w, b


def init_params(key):
    ks = jax.random.split(key, 12)
    p = {}
    p["wm1"], p["bm1"] = _linear(ks[0], DYN_JOINT_DES_DIM, MASK_DIM)
    p["g_joint"] = jnp.ones((MASK_DIM,), jnp.float32)
    p["b_joint"] = jnp.zeros((MASK_DIM,), jnp.float32)
    p["wm2"], p["bm2"] = _linear(ks[1], MASK_DIM, MASK_DIM)
    p["log_temp"] = jnp.log(jnp.array(
        INITIAL_SOFTMAX_TEMPERATURE - SOFTMAX_TEMPERATURE_MIN, jnp.float32))
    p["wl"], p["bl"] = _linear(ks[2], DYN_JOINT_STATE_DIM, JOINT_FEAT)
    p["wa1"], p["ba1"] = _linear(ks[3], COMBINED_DIM, ACTION_DIMS[0])
    p["g_act"] = jnp.ones((ACTION_DIMS[0],), jnp.float32)
    p["b_act"] = jnp.zeros((ACTION_DIMS[0],), jnp.float32)
    p["wa2"], p["ba2"] = _linear(ks[4], ACTION_DIMS[0], ACTION_DIMS[1])
    p["wa3"], p["ba3"] = _linear(ks[5], ACTION_DIMS[1], ACTION_DIMS[2])
    p["wd1"], p["bd1"] = _linear(ks[6], DYN_JOINT_DES_DIM, DES_LATENT_DIM)
    p["g_des"] = jnp.ones((DES_LATENT_DIM,), jnp.float32)
    p["b_des"] = jnp.zeros((DES_LATENT_DIM,), jnp.float32)
    p["wd2"], p["bd2"] = _linear(ks[7], DES_LATENT_DIM, DES_LATENT_DIM)
    policy_in = JOINT_FEAT + ACTION_DIMS[-1] + DES_LATENT_DIM   # 780
    p["wp1"], p["bp1"] = _linear(ks[8], policy_in, POLICY_HIDDEN)
    p["g_pol"] = jnp.ones((POLICY_HIDDEN,), jnp.float32)
    p["b_pol"] = jnp.zeros((POLICY_HIDDEN,), jnp.float32)
    p["wpm2"], p["bpm2"] = _linear(ks[9], POLICY_HIDDEN, 1)
    # policy_logstd_layer exists in __init__ but is unused in forward().
    p["wpls"], p["bpls"] = _linear(ks[10], POLICY_HIDDEN, 1)
    return p


# ---------------- one-time weight-layout preparation (hoisted out of forward) ----
_WEIGHT_ORDER = (
    "wdm", "bm1", "gj", "bj", "wm2t", "bm2",
    "wlt", "bl",
    "bd1", "gd", "bd", "wd2t", "bd2",
    "wa1xf", "wa1g", "ba1", "ga", "bA",
    "wa2t", "ba2", "wa3t", "ba3",
    "wp1a", "wp1l", "wp1d", "bp1", "gp", "bP",
    "wpm2",
)


def prepare_params(params):
    f32, bf16 = jnp.float32, jnp.bfloat16
    wa1 = params["wa1"]                                   # (512, 2320)
    wa1x = wa1[:, :DJ_LATENT_DIM].T                       # (2304, 512), row idx = m*12 + f
    # reorder to (f, m, out) so no in-kernel flatten/relayout is needed
    wa1xf = wa1x.reshape(MASK_DIM, JOINT_FEAT, ACTION_DIMS[0]).transpose(1, 0, 2)
    wa1g = wa1[:, DJ_LATENT_DIM:].T                       # (16, 512)
    wp1 = params["wp1"]                                   # (384, 780)
    a_dim = ACTION_DIMS[-1]
    inv_temp = 1.0 / (jnp.exp(params["log_temp"]) + SOFTMAX_TEMPERATURE_MIN)
    # fused K=18 weight: [action_description_latent1 | dynamic_joint_state_mask1]
    # (384-wide slice first so both in-kernel slices start on 128-lane boundaries)
    wdm = jnp.concatenate([params["wd1"].T, params["wm1"].T], axis=1)     # (18, 576)

    def F(x):  # f32: biases, layer-norm params, VPU weights
        return jnp.asarray(x, f32)

    def H(x):  # bf16: MXU matmul weights (f32 accumulation in-kernel)
        return jnp.asarray(x, bf16)

    return dict(
        wdm=H(wdm),
        bm1=F(params["bm1"][None]),
        gj=F(params["g_joint"][None]), bj=F(params["b_joint"][None]),
        wm2t=H(params["wm2"].T), bm2=F(params["bm2"][None]),
        wlt=F(params["wl"].T), bl=F(params["bl"][None]),
        bd1=F(params["bd1"][None]),
        gd=F(params["g_des"][None]), bd=F(params["b_des"][None]),
        wd2t=H(params["wd2"].T), bd2=F(params["bd2"][None]),
        wa1xf=H(wa1xf), wa1g=H(wa1g), ba1=F(params["ba1"][None]),
        ga=F(params["g_act"][None]), bA=F(params["b_act"][None]),
        wa2t=H(params["wa2"].T), ba2=F(params["ba2"][None]),
        wa3t=H(params["wa3"].T), ba3=F(params["ba3"][None]),
        wp1a=H(wp1[:, :a_dim].T),
        wp1l=H(wp1[:, a_dim:a_dim + JOINT_FEAT].T),
        wp1d=H(wp1[:, a_dim + JOINT_FEAT:].T),
        bp1=F(params["bp1"][None]),
        gp=F(params["g_pol"][None]), bP=F(params["b_pol"][None]),
        wpm2=F(params["wpm2"].reshape(1, POLICY_HIDDEN)),
        scalars=F(jnp.stack([inv_temp, params["bpm2"][0]]).reshape(1, 2)),
    )


def _const_index_map(ndim):
    zeros = (0,) * ndim
    return lambda b, _z=zeros: _z


def _default_tile_and_vmem():
    """Per-generation batch tile / vmem limit (conservative fallback if query fails)."""
    cap = 64 * 1024 * 1024
    try:
        cap = int(pltpu.get_tpu_info().vmem_capacity_bytes)
    except Exception:
        pass
    if cap >= 128 * 1024 * 1024:           # v5e / v6e: 128 MiB VMEM
        return 128, 96 * 1024 * 1024
    return 64, 48 * 1024 * 1024            # v7x: 64 MiB VMEM per TensorCore


# ---------------- wrapper ----------------
def policy_forward(prep, desc, state, gs, *, batch_tile=None):
    B, J, _ = desc.shape
    f32 = jnp.float32
    desc = desc.astype(f32)
    state = state.astype(f32)
    gs = gs.astype(f32)

    default_tile, vmem_limit = _default_tile_and_vmem()
    if batch_tile is None:
        batch_tile = default_tile

    # batch tile: TB rows per grid step (per-joint row count M = TB*J)
    if B >= batch_tile:
        TB = batch_tile
    else:
        TB = B
        # Give the "parallel" batch axis >= 2 grid steps when a multiple-of-8
        # split is possible, so both v7x TensorCores get work.
        if B > 8:
            half = -(-B // 2)
            half8 = -(-half // 8) * 8
            if half8 < B:
                TB = half8
    Bp = -(-B // TB) * TB
    if Bp != B:
        pad = Bp - B
        desc = jnp.pad(desc, ((0, pad), (0, 0), (0, 0)))
        state = jnp.pad(state, ((0, pad), (0, 0), (0, 0)))
        gs = jnp.pad(gs, ((0, pad), (0, 0)))

    # (B, J, d) -> (B*J, d): free host-side reshape; the kernel works on M = TB*J rows
    desc2d = desc.reshape(Bp * J, DYN_JOINT_DES_DIM)
    state2d = state.reshape(Bp * J, DYN_JOINT_STATE_DIM)
    M = TB * J

    weights = [prep[name] for name in _WEIGHT_ORDER]

    in_specs = [
        pl.BlockSpec((M, DYN_JOINT_DES_DIM), lambda b: (b, 0)),
        pl.BlockSpec((M, DYN_JOINT_STATE_DIM), lambda b: (b, 0)),
        pl.BlockSpec((TB, GENERAL_STATE_DIM), lambda b: (b, 0)),
        pl.BlockSpec(memory_space=pltpu.MemorySpace.SMEM),         # scalars
    ] + [pl.BlockSpec(w.shape, _const_index_map(w.ndim)) for w in weights]

    mean = pl.pallas_call(
        policy_kernel,
        out_shape=jax.ShapeDtypeStruct((Bp, J), f32),
        grid=(Bp // TB,),
        in_specs=in_specs,
        out_specs=pl.BlockSpec((TB, J), lambda b: (b, 0)),
        compiler_params=pltpu.CompilerParams(
            dimension_semantics=("parallel",),        # batch tiles are independent
            vmem_limit_bytes=vmem_limit,
        ),
    )(desc2d, state2d, gs, prep["scalars"], *weights)

    return mean[:B]                                   # (B, J)


# ---------------- pure-JAX reference (for verification) ----------------
def _layer_norm_ref(x, gamma, beta):
    mu = jnp.mean(x, axis=-1, keepdims=True)
    var = jnp.mean(jnp.square(x - mu), axis=-1, keepdims=True)
    return (x - mu) / jnp.sqrt(var + LN_EPS) * gamma + beta


def policy_forward_ref(p, desc, state, gs):
    m = desc @ p["wm1"].T + p["bm1"]
    m = _elu(_layer_norm_ref(m, p["g_joint"], p["b_joint"]))
    m = jnp.tanh(m @ p["wm2"].T + p["bm2"])
    m = jnp.clip(m, -1.0 + STABILITY_EPSILON, 1.0 - STABILITY_EPSILON)
    lat = _elu(state @ p["wl"].T + p["bl"])
    temp = jnp.exp(p["log_temp"]) + SOFTMAX_TEMPERATURE_MIN
    e = jnp.exp(m / temp)
    mask = e / (e.sum(-1, keepdims=True) + STABILITY_EPSILON)
    masked = mask[..., None] * lat[..., None, :]
    masked = masked.reshape(masked.shape[:-2] + (-1,))
    djl = masked.sum(-2)
    comb = jnp.concatenate([djl, gs], axis=-1)
    a = comb @ p["wa1"].T + p["ba1"]
    a = _elu(_layer_norm_ref(a, p["g_act"], p["b_act"]))
    a = _elu(a @ p["wa2"].T + p["ba2"])
    a3 = a @ p["wa3"].T + p["ba3"]
    d = desc @ p["wd1"].T + p["bd1"]
    d = _elu(_layer_norm_ref(d, p["g_des"], p["b_des"]))
    adl = d @ p["wd2"].T + p["bd2"]
    al = jnp.broadcast_to(a3[:, None, :], adl.shape[:-1] + (a3.shape[-1],))
    cal = jnp.concatenate([al, lat, adl], axis=-1)
    pm = cal @ p["wp1"].T + p["bp1"]
    pm = _elu(_layer_norm_ref(pm, p["g_pol"], p["b_pol"]))
    pm = pm @ p["wpm2"].T + p["bpm2"]
    pm = jnp.clip(pm, -POLICY_MEAN_ABS_CLIP, POLICY_MEAN_ABS_CLIP)
    return pm.squeeze(-1)


if __name__ == "__main__":
    key = jax.random.PRNGKey(0)
    k_param, k_desc, k_state, k_gs = jax.random.split(key, 4)

    B, J = 2, 8
    params = init_params(k_param)
    desc = jax.random.normal(k_desc, (B, J, DYN_JOINT_DES_DIM), jnp.float32)
    state = jax.random.normal(k_state, (B, J, DYN_JOINT_STATE_DIM), jnp.float32)
    gs = jax.random.normal(k_gs, (B, GENERAL_STATE_DIM), jnp.float32)

    prep = prepare_params(params)          # one-time weight re-layout / bf16 cast (hoisted)
    fwd = jax.jit(policy_forward, static_argnames=("batch_tile",))

    # small shape (single grid step)
    out = jax.block_until_ready(fwd(prep, desc, state, gs))
    assert out.shape == (B, J), out.shape
    ref = jax.block_until_ready(policy_forward_ref(params, desc, state, gs))
    np.testing.assert_allclose(np.asarray(out), np.asarray(ref), rtol=5e-2, atol=3e-2)

    # larger batch: exercises the batch-tiled grid and the padding path
    B2 = 100
    kd2, ks2, kg2 = jax.random.split(jax.random.PRNGKey(1), 3)
    desc2 = jax.random.normal(kd2, (B2, J, DYN_JOINT_DES_DIM), jnp.float32)
    state2 = jax.random.normal(ks2, (B2, J, DYN_JOINT_STATE_DIM), jnp.float32)
    gs2 = jax.random.normal(kg2, (B2, GENERAL_STATE_DIM), jnp.float32)
    out2 = jax.block_until_ready(fwd(prep, desc2, state2, gs2, batch_tile=32))
    assert out2.shape == (B2, J), out2.shape
    ref2 = jax.block_until_ready(policy_forward_ref(params, desc2, state2, gs2))
    np.testing.assert_allclose(np.asarray(out2), np.asarray(ref2), rtol=5e-2, atol=3e-2)

    print("KERNEL_OK")
</pallas_src>

<mosaic_0001>
module attributes {stable_mosaic.version = 11 : i64} {
  func.func @policy_kernel(%arg0: i32, %arg1: memref<16x18xf32, #tpu.memory_space<vmem>>, %arg2: memref<16x3xf32, #tpu.memory_space<vmem>>, %arg3: memref<2x16xf32, #tpu.memory_space<vmem>>, %arg4: memref<1x2xf32, #tpu.memory_space<smem>>, %arg5: memref<18x576xbf16, #tpu.memory_space<vmem>>, %arg6: memref<1x192xf32, #tpu.memory_space<vmem>>, %arg7: memref<1x192xf32, #tpu.memory_space<vmem>>, %arg8: memref<1x192xf32, #tpu.memory_space<vmem>>, %arg9: memref<192x192xbf16, #tpu.memory_space<vmem>>, %arg10: memref<1x192xf32, #tpu.memory_space<vmem>>, %arg11: memref<3x12xf32, #tpu.memory_space<vmem>>, %arg12: memref<1x12xf32, #tpu.memory_space<vmem>>, %arg13: memref<1x384xf32, #tpu.memory_space<vmem>>, %arg14: memref<1x384xf32, #tpu.memory_space<vmem>>, %arg15: memref<1x384xf32, #tpu.memory_space<vmem>>, %arg16: memref<384x384xbf16, #tpu.memory_space<vmem>>, %arg17: memref<1x384xf32, #tpu.memory_space<vmem>>, %arg18: memref<12x192x512xbf16, #tpu.memory_space<vmem>>, %arg19: memref<16x512xbf16, #tpu.memory_space<vmem>>, %arg20: memref<1x512xf32, #tpu.memory_space<vmem>>, %arg21: memref<1x512xf32, #tpu.memory_space<vmem>>, %arg22: memref<1x512xf32, #tpu.memory_space<vmem>>, %arg23: memref<512x256xbf16, #tpu.memory_space<vmem>>, %arg24: memref<1x256xf32, #tpu.memory_space<vmem>>, %arg25: memref<256x384xbf16, #tpu.memory_space<vmem>>, %arg26: memref<1x384xf32, #tpu.memory_space<vmem>>, %arg27: memref<384x384xbf16, #tpu.memory_space<vmem>>, %arg28: memref<12x384xbf16, #tpu.memory_space<vmem>>, %arg29: memref<384x384xbf16, #tpu.memory_space<vmem>>, %arg30: memref<1x384xf32, #tpu.memory_space<vmem>>, %arg31: memref<1x384xf32, #tpu.memory_space<vmem>>, %arg32: memref<1x384xf32, #tpu.memory_space<vmem>>, %arg33: memref<1x384xf32, #tpu.memory_space<vmem>>, %arg34: memref<2x8xf32, #tpu.memory_space<vmem>>) attributes {dimension_semantics = [#tpu.dimension_semantics<parallel>], iteration_bounds = array<i64: 1>, scalar_prefetch = 0 : i64, scratch_operands = 0 : i64, tpu.core_type = #tpu.core_type<tc>, window_params = [{transform_indices = @transform_0, window_bounds = array<i64: 16, 18>}, {transform_indices = @transform_1, window_bounds = array<i64: 16, 3>}, {transform_indices = @transform_2, window_bounds = array<i64: 2, 16>}, {transform_indices = @transform_3, window_bounds = array<i64: 1, 2>}, {pipeline_mode = #tpu.pipeline_mode<synchronous>, transform_indices = @transform_4, window_bounds = array<i64: 18, 576>}, {pipeline_mode = #tpu.pipeline_mode<synchronous>, transform_indices = @transform_5, window_bounds = array<i64: 1, 192>}, {pipeline_mode = #tpu.pipeline_mode<synchronous>, transform_indices = @transform_6, window_bounds = array<i64: 1, 192>}, {pipeline_mode = #tpu.pipeline_mode<synchronous>, transform_indices = @transform_7, window_bounds = array<i64: 1, 192>}, {pipeline_mode = #tpu.pipeline_mode<synchronous>, transform_indices = @transform_8, window_bounds = array<i64: 192, 192>}, {pipeline_mode = #tpu.pipeline_mode<synchronous>, transform_indices = @transform_9, window_bounds = array<i64: 1, 192>}, {pipeline_mode = #tpu.pipeline_mode<synchronous>, transform_indices = @transform_10, window_bounds = array<i64: 3, 12>}, {pipeline_mode = #tpu.pipeline_mode<synchronous>, transform_indices = @transform_11, window_bounds = array<i64: 1, 12>}, {pipeline_mode = #tpu.pipeline_mode<synchronous>, transform_indices = @transform_12, window_bounds = array<i64: 1, 384>}, {pipeline_mode = #tpu.pipeline_mode<synchronous>, transform_indices = @transform_13, window_bounds = array<i64: 1, 384>}, {pipeline_mode = #tpu.pipeline_mode<synchronous>, transform_indices = @transform_14, window_bounds = array<i64: 1, 384>}, {pipeline_mode = #tpu.pipeline_mode<synchronous>, transform_indices = @transform_15, window_bounds = array<i64: 384, 384>}, {pipeline_mode = #tpu.pipeline_mode<synchronous>, transform_indices = @transform_16, window_bounds = array<i64: 1, 384>}, {pipeline_mode = #tpu.pipeline_mode<synchronous>, transform_indices = @transform_17, window_bounds = array<i64: 12, 192, 512>}, {pipeline_mode = #tpu.pipeline_mode<synchronous>, transform_indices = @transform_18, window_bounds = array<i64: 16, 512>}, {pipeline_mode = #tpu.pipeline_mode<synchronous>, transform_indices = @transform_19, window_bounds = array<i64: 1, 512>}, {pipeline_mode = #tpu.pipeline_mode<synchronous>, transform_indices = @transform_20, window_bounds = array<i64: 1, 512>}, {pipeline_mode = #tpu.pipeline_mode<synchronous>, transform_indices = @transform_21, window_bounds = array<i64: 1, 512>}, {pipeline_mode = #tpu.pipeline_mode<synchronous>, transform_indices = @transform_22, window_bounds = array<i64: 512, 256>}, {pipeline_mode = #tpu.pipeline_mode<synchronous>, transform_indices = @transform_23, window_bounds = array<i64: 1, 256>}, {pipeline_mode = #tpu.pipeline_mode<synchronous>, transform_indices = @transform_24, window_bounds = array<i64: 256, 384>}, {pipeline_mode = #tpu.pipeline_mode<synchronous>, transform_indices = @transform_25, window_bounds = array<i64: 1, 384>}, {pipeline_mode = #tpu.pipeline_mode<synchronous>, transform_indices = @transform_26, window_bounds = array<i64: 384, 384>}, {pipeline_mode = #tpu.pipeline_mode<synchronous>, transform_indices = @transform_27, window_bounds = array<i64: 12, 384>}, {pipeline_mode = #tpu.pipeline_mode<synchronous>, transform_indices = @transform_28, window_bounds = array<i64: 384, 384>}, {pipeline_mode = #tpu.pipeline_mode<synchronous>, transform_indices = @transform_29, window_bounds = array<i64: 1, 384>}, {pipeline_mode = #tpu.pipeline_mode<synchronous>, transform_indices = @transform_30, window_bounds = array<i64: 1, 384>}, {pipeline_mode = #tpu.pipeline_mode<synchronous>, transform_indices = @transform_31, window_bounds = array<i64: 1, 384>}, {pipeline_mode = #tpu.pipeline_mode<synchronous>, transform_indices = @transform_32, window_bounds = array<i64: 1, 384>}, {transform_indices = @transform_33, window_bounds = array<i64: 2, 8>}]} {
    %c0 = arith.constant 0 : index
    %c0_0 = arith.constant 0 : index
    %0 = memref.load %arg4[%c0, %c0_0] : memref<1x2xf32, #tpu.memory_space<smem>>
    %c0_1 = arith.constant 0 : index
    %c1 = arith.constant 1 : index
    %1 = memref.load %arg4[%c0_1, %c1] : memref<1x2xf32, #tpu.memory_space<smem>>
    %c0_2 = arith.constant 0 : index
    %c0_3 = arith.constant 0 : index
    %2 = vector.load %arg1[%c0_2, %c0_3] : memref<16x18xf32, #tpu.memory_space<vmem>>, vector<16x18xf32>
    %c0_4 = arith.constant 0 : index
    %c0_5 = arith.constant 0 : index
    %3 = vector.load %arg2[%c0_4, %c0_5] : memref<16x3xf32, #tpu.memory_space<vmem>>, vector<16x3xf32>
    %c0_6 = arith.constant 0 : index
    %c0_7 = arith.constant 0 : index
    %4 = vector.load %arg3[%c0_6, %c0_7] : memref<2x16xf32, #tpu.memory_space<vmem>>, vector<2x16xf32>
    %5 = arith.truncf %2 : vector<16x18xf32> to vector<16x18xbf16>
    %c0_8 = arith.constant 0 : index
    %c0_9 = arith.constant 0 : index
    %6 = vector.load %arg5[%c0_8, %c0_9] : memref<18x576xbf16, #tpu.memory_space<vmem>>, vector<18x576xbf16>
    %cst = arith.constant dense<0.000000e+00> : vector<16x576xf32>
    %7 = tpu.matmul %5, %6, %cst {dimension_numbers = #tpu.dot_dimension_numbers<[1], [0], [0], [1], [0, 0, 1, 1], [], []>} : vector<16x18xbf16>, vector<18x576xbf16>, vector<16x576xf32> -> vector<16x576xf32>
    %8 = vector.extract_strided_slice %7 {offsets = [0, 0], sizes = [16, 384], strides = [1, 1]} : vector<16x576xf32> to vector<16x384xf32>
    %c0_10 = arith.constant 0 : index
    %c0_11 = arith.constant 0 : index
    %9 = vector.load %arg13[%c0_10, %c0_11] : memref<1x384xf32, #tpu.memory_space<vmem>>, vector<1x384xf32>
    %10 = vector.broadcast %9 : vector<1x384xf32> to vector<16x384xf32>
    %11 = arith.addf %8, %10 : vector<16x384xf32>
    %c0_12 = arith.constant 0 : index
    %c0_13 = arith.constant 0 : index
    %12 = vector.load %arg14[%c0_12, %c0_13] : memref<1x384xf32, #tpu.memory_space<vmem>>, vector<1x384xf32>
    %c0_14 = arith.constant 0 : index
    %c0_15 = arith.constant 0 : index
    %13 = vector.load %arg15[%c0_14, %c0_15] : memref<1x384xf32, #tpu.memory_space<vmem>>, vector<1x384xf32>
    %cst_16 = arith.constant dense<0.000000e+00> : vector<16xf32>
    %14 = vector.multi_reduction <add>, %11, %cst_16 [1] : vector<16x384xf32> to vector<16xf32>
    %15 = vector.shape_cast %14 : vector<16xf32> to vector<16x1xf32>
    %cst_17 = arith.constant 3.840000e+02 : f32
    %16 = vector.broadcast %cst_17 : f32 to vector<16x1xf32>
    %17 = arith.divf %15, %16 : vector<16x1xf32>
    %18 = arith.mulf %11, %11 : vector<16x384xf32>
    %cst_18 = arith.constant dense<0.000000e+00> : vector<16xf32>
    %19 = vector.multi_reduction <add>, %18, %cst_18 [1] : vector<16x384xf32> to vector<16xf32>
    %20 = vector.shape_cast %19 : vector<16xf32> to vector<16x1xf32>
    %cst_19 = arith.constant 3.840000e+02 : f32
    %21 = vector.broadcast %cst_19 : f32 to vector<16x1xf32>
    %22 = arith.divf %20, %21 : vector<16x1xf32>
    %23 = arith.mulf %17, %17 : vector<16x1xf32>
    %24 = arith.subf %22, %23 : vector<16x1xf32>
    %25 = vector.broadcast %17 : vector<16x1xf32> to vector<16x384xf32>
    %26 = arith.subf %11, %25 : vector<16x384xf32>
    %cst_20 = arith.constant 9.99999997E-7 : f32
    %27 = vector.broadcast %cst_20 : f32 to vector<16x1xf32>
    %28 = arith.addf %24, %27 : vector<16x1xf32>
    %29 = math.rsqrt %28 : vector<16x1xf32>
    %30 = vector.broadcast %29 : vector<16x1xf32> to vector<16x384xf32>
    %31 = arith.mulf %26, %30 : vector<16x384xf32>
    %32 = vector.broadcast %12 : vector<1x384xf32> to vector<16x384xf32>
    %33 = arith.mulf %31, %32 : vector<16x384xf32>
    %34 = vector.broadcast %13 : vector<1x384xf32> to vector<16x384xf32>
    %35 = arith.addf %33, %34 : vector<16x384xf32>
    %cst_21 = arith.constant 0.000000e+00 : f32
    %36 = vector.broadcast %cst_21 : f32 to vector<16x384xf32>
    %37 = arith.cmpf ogt, %35, %36 : vector<16x384xf32>
    %38 = math.exp %35 : vector<16x384xf32>
    %cst_22 = arith.constant 1.000000e+00 : f32
    %39 = vector.broadcast %cst_22 : f32 to vector<16x384xf32>
    %40 = arith.subf %38, %39 : vector<16x384xf32>
    %41 = arith.select %37, %35, %40 : vector<16x384xi1>, vector<16x384xf32>
    %42 = vector.extract_strided_slice %7 {offsets = [0, 384], sizes = [16, 192], strides = [1, 1]} : vector<16x576xf32> to vector<16x192xf32>
    %c0_23 = arith.constant 0 : index
    %c0_24 = arith.constant 0 : index
    %43 = vector.load %arg6[%c0_23, %c0_24] : memref<1x192xf32, #tpu.memory_space<vmem>>, vector<1x192xf32>
    %44 = vector.broadcast %43 : vector<1x192xf32> to vector<16x192xf32>
    %45 = arith.addf %42, %44 : vector<16x192xf32>
    %c0_25 = arith.constant 0 : index
    %c0_26 = arith.constant 0 : index
    %46 = vector.load %arg7[%c0_25, %c0_26] : memref<1x192xf32, #tpu.memory_space<vmem>>, vector<1x192xf32>
    %c0_27 = arith.constant 0 : index
    %c0_28 = arith.constant 0 : index
    %47 = vector.load %arg8[%c0_27, %c0_28] : memref<1x192xf32, #tpu.memory_space<vmem>>, vector<1x192xf32>
    %cst_29 = arith.constant dense<0.000000e+00> : vector<16xf32>
    %48 = vector.multi_reduction <add>, %45, %cst_29 [1] : vector<16x192xf32> to vector<16xf32>
    %49 = vector.shape_cast %48 : vector<16xf32> to vector<16x1xf32>
    %cst_30 = arith.constant 1.920000e+02 : f32
    %50 = vector.broadcast %cst_30 : f32 to vector<16x1xf32>
    %51 = arith.divf %49, %50 : vector<16x1xf32>
    %52 = arith.mulf %45, %45 : vector<16x192xf32>
    %cst_31 = arith.constant dense<0.000000e+00> : vector<16xf32>
    %53 = vector.multi_reduction <add>, %52, %cst_31 [1] : vector<16x192xf32> to vector<16xf32>
    %54 = vector.shape_cast %53 : vector<16xf32> to vector<16x1xf32>
    %cst_32 = arith.constant 1.920000e+02 : f32
    %55 = vector.broadcast %cst_32 : f32 to vector<16x1xf32>
    %56 = arith.divf %54, %55 : vector<16x1xf32>
    %57 = arith.mulf %51, %51 : vector<16x1xf32>
    %58 = arith.subf %56, %57 : vector<16x1xf32>
    %59 = vector.broadcast %51 : vector<16x1xf32> to vector<16x192xf32>
    %60 = arith.subf %45, %59 : vector<16x192xf32>
    %cst_33 = arith.constant 9.99999997E-7 : f32
    %61 = vector.broadcast %cst_33 : f32 to vector<16x1xf32>
    %62 = arith.addf %58, %61 : vector<16x1xf32>
    %63 = math.rsqrt %62 : vector<16x1xf32>
    %64 = vector.broadcast %63 : vector<16x1xf32> to vector<16x192xf32>
    %65 = arith.mulf %60, %64 : vector<16x192xf32>
    %66 = vector.broadcast %46 : vector<1x192xf32> to vector<16x192xf32>
    %67 = arith.mulf %65, %66 : vector<16x192xf32>
    %68 = vector.broadcast %47 : vector<1x192xf32> to vector<16x192xf32>
    %69 = arith.addf %67, %68 : vector<16x192xf32>
    %cst_34 = arith.constant 0.000000e+00 : f32
    %70 = vector.broadcast %cst_34 : f32 to vector<16x192xf32>
    %71 = arith.cmpf ogt, %69, %70 : vector<16x192xf32>
    %72 = math.exp %69 : vector<16x192xf32>
    %cst_35 = arith.constant 1.000000e+00 : f32
    %73 = vector.broadcast %cst_35 : f32 to vector<16x192xf32>
    %74 = arith.subf %72, %73 : vector<16x192xf32>
    %75 = arith.select %71, %69, %74 : vector<16x192xi1>, vector<16x192xf32>
    %76 = arith.truncf %75 : vector<16x192xf32> to vector<16x192xbf16>
    %c0_36 = arith.constant 0 : index
    %c0_37 = arith.constant 0 : index
    %77 = vector.load %arg9[%c0_36, %c0_37] : memref<192x192xbf16, #tpu.memory_space<vmem>>, vector<192x192xbf16>
    %cst_38 = arith.constant dense<0.000000e+00> : vector<16x192xf32>
    %78 = tpu.matmul %76, %77, %cst_38 {dimension_numbers = #tpu.dot_dimension_numbers<[1], [0], [0], [1], [0, 0, 1, 1], [], []>} : vector<16x192xbf16>, vector<192x192xbf16>, vector<16x192xf32> -> vector<16x192xf32>
    %c0_39 = arith.constant 0 : index
    %c0_40 = arith.constant 0 : index
    %79 = vector.load %arg10[%c0_39, %c0_40] : memref<1x192xf32, #tpu.memory_space<vmem>>, vector<1x192xf32>
    %80 = vector.broadcast %79 : vector<1x192xf32> to vector<16x192xf32>
    %81 = arith.addf %78, %80 : vector<16x192xf32>
    %82 = math.tanh %81 : vector<16x192xf32>
    %cst_41 = arith.constant -0.999998986 : f32
    %cst_42 = arith.constant 0.999998986 : f32
    %83 = vector.broadcast %cst_41 : f32 to vector<16x192xf32>
    %84 = arith.maximumf %83, %82 : vector<16x192xf32>
    %85 = vector.broadcast %cst_42 : f32 to vector<16x192xf32>
    %86 = arith.minimumf %85, %84 : vector<16x192xf32>
    %87 = vector.broadcast %0 : f32 to vector<16x192xf32>
    %88 = arith.mulf %86, %87 : vector<16x192xf32>
    %89 = math.exp %88 : vector<16x192xf32>
    %cst_43 = arith.constant dense<0.000000e+00> : vector<16xf32>
    %90 = vector.multi_reduction <add>, %89, %cst_43 [1] : vector<16x192xf32> to vector<16xf32>
    %91 = vector.shape_cast %90 : vector<16xf32> to vector<16x1xf32>
    %cst_44 = arith.constant 9.99999997E-7 : f32
    %92 = vector.broadcast %cst_44 : f32 to vector<16x1xf32>
    %93 = arith.addf %91, %92 : vector<16x1xf32>
    %94 = tpu.reciprocal %93 {approx = true} : vector<16x1xf32> -> vector<16x1xf32>
    %95 = vector.broadcast %94 : vector<16x1xf32> to vector<16x192xf32>
    %96 = arith.mulf %89, %95 : vector<16x192xf32>
    %c0_45 = arith.constant 0 : index
    %c0_46 = arith.constant 0 : index
    %97 = vector.load %arg11[%c0_45, %c0_46] : memref<3x12xf32, #tpu.memory_space<vmem>>, vector<3x12xf32>
    %98 = vector.extract_strided_slice %3 {offsets = [0, 0], sizes = [16, 1], strides = [1, 1]} : vector<16x3xf32> to vector<16x1xf32>
    %99 = vector.extract_strided_slice %97 {offsets = [0, 0], sizes = [1, 12], strides = [1, 1]} : vector<3x12xf32> to vector<1x12xf32>
    %100 = vector.broadcast %98 : vector<16x1xf32> to vector<16x12xf32>
    %101 = vector.broadcast %99 : vector<1x12xf32> to vector<16x12xf32>
    %102 = arith.mulf %100, %101 : vector<16x12xf32>
    %103 = vector.extract_strided_slice %3 {offsets = [0, 1], sizes = [16, 1], strides = [1, 1]} : vector<16x3xf32> to vector<16x1xf32>
    %104 = vector.extract_strided_slice %97 {offsets = [1, 0], sizes = [1, 12], strides = [1, 1]} : vector<3x12xf32> to vector<1x12xf32>
    %105 = vector.broadcast %103 : vector<16x1xf32> to vector<16x12xf32>
    %106 = vector.broadcast %104 : vector<1x12xf32> to vector<16x12xf32>
    %107 = arith.mulf %105, %106 : vector<16x12xf32>
    %108 = arith.addf %102, %107 : vector<16x12xf32>
    %109 = vector.extract_strided_slice %3 {offsets = [0, 2], sizes = [16, 1], strides = [1, 1]} : vector<16x3xf32> to vector<16x1xf32>
    %110 = vector.extract_strided_slice %97 {offsets = [2, 0], sizes = [1, 12], strides = [1, 1]} : vector<3x12xf32> to vector<1x12xf32>
    %111 = vector.broadcast %109 : vector<16x1xf32> to vector<16x12xf32>
    %112 = vector.broadcast %110 : vector<1x12xf32> to vector<16x12xf32>
    %113 = arith.mulf %111, %112 : vector<16x12xf32>
    %114 = arith.addf %108, %113 : vector<16x12xf32>
    %c0_47 = arith.constant 0 : index
    %c0_48 = arith.constant 0 : index
    %115 = vector.load %arg12[%c0_47, %c0_48] : memref<1x12xf32, #tpu.memory_space<vmem>>, vector<1x12xf32>
    %116 = vector.broadcast %115 : vector<1x12xf32> to vector<16x12xf32>
    %117 = arith.addf %114, %116 : vector<16x12xf32>
    %cst_49 = arith.constant 0.000000e+00 : f32
    %118 = vector.broadcast %cst_49 : f32 to vector<16x12xf32>
    %119 = arith.cmpf ogt, %117, %118 : vector<16x12xf32>
    %120 = math.exp %117 : vector<16x12xf32>
    %cst_50 = arith.constant 1.000000e+00 : f32
    %121 = vector.broadcast %cst_50 : f32 to vector<16x12xf32>
    %122 = arith.subf %120, %121 : vector<16x12xf32>
    %123 = arith.select %119, %117, %122 : vector<16x12xi1>, vector<16x12xf32>
    %124 = arith.truncf %41 : vector<16x384xf32> to vector<16x384xbf16>
    %c0_51 = arith.constant 0 : index
    %c0_52 = arith.constant 0 : index
    %125 = vector.load %arg16[%c0_51, %c0_52] : memref<384x384xbf16, #tpu.memory_space<vmem>>, vector<384x384xbf16>
    %cst_53 = arith.constant dense<0.000000e+00> : vector<16x384xf32>
    %126 = tpu.matmul %124, %125, %cst_53 {dimension_numbers = #tpu.dot_dimension_numbers<[1], [0], [0], [1], [0, 0, 1, 1], [], []>} : vector<16x384xbf16>, vector<384x384xbf16>, vector<16x384xf32> -> vector<16x384xf32>
    %c0_54 = arith.constant 0 : index
    %c0_55 = arith.constant 0 : index
    %127 = vector.load %arg17[%c0_54, %c0_55] : memref<1x384xf32, #tpu.memory_space<vmem>>, vector<1x384xf32>
    %128 = vector.broadcast %127 : vector<1x384xf32> to vector<16x384xf32>
    %129 = arith.addf %126, %128 : vector<16x384xf32>
    %130 = arith.truncf %4 : vector<2x16xf32> to vector<2x16xbf16>
    %c0_56 = arith.constant 0 : index
    %c0_57 = arith.constant 0 : index
    %131 = vector.load %arg19[%c0_56, %c0_57] : memref<16x512xbf16, #tpu.memory_space<vmem>>, vector<16x512xbf16>
    %cst_58 = arith.constant dense<0.000000e+00> : vector<2x512xf32>
    %132 = tpu.matmul %130, %131, %cst_58 {dimension_numbers = #tpu.dot_dimension_numbers<[1], [0], [0], [1], [0, 0, 1, 1], [], []>} : vector<2x16xbf16>, vector<16x512xbf16>, vector<2x512xf32> -> vector<2x512xf32>
    %c0_59 = arith.constant 0 : index
    %c0_60 = arith.constant 0 : index
    %133 = vector.load %arg20[%c0_59, %c0_60] : memref<1x512xf32, #tpu.memory_space<vmem>>, vector<1x512xf32>
    %134 = vector.broadcast %133 : vector<1x512xf32> to vector<2x512xf32>
    %135 = arith.addf %132, %134 : vector<2x512xf32>
    %136 = vector.shape_cast %96 : vector<16x192xf32> to vector<2x8x192xf32>
    %137 = vector.shape_cast %123 : vector<16x12xf32> to vector<2x8x12xf32>
    %138 = vector.extract_strided_slice %137 {offsets = [0, 0, 0], sizes = [2, 8, 1], strides = [1, 1, 1]} : vector<2x8x12xf32> to vector<2x8x1xf32>
    %139 = vector.broadcast %138 : vector<2x8x1xf32> to vector<2x8x192xf32>
    %140 = arith.mulf %136, %139 : vector<2x8x192xf32>
    %cst_61 = arith.constant dense<0.000000e+00> : vector<2x192xf32>
    %141 = vector.multi_reduction <add>, %140, %cst_61 [1] : vector<2x8x192xf32> to vector<2x192xf32>
    %142 = arith.truncf %141 : vector<2x192xf32> to vector<2x192xbf16>
    %c0_62 = arith.constant 0 : index
    %c0_63 = arith.constant 0 : index
    %c0_64 = arith.constant 0 : index
    %143 = vector.load %arg18[%c0_62, %c0_63, %c0_64] : memref<12x192x512xbf16, #tpu.memory_space<vmem>>, vector<1x192x512xbf16>
    %144 = vector.shape_cast %143 : vector<1x192x512xbf16> to vector<192x512xbf16>
    %cst_65 = arith.constant dense<0.000000e+00> : vector<2x512xf32>
    %145 = tpu.matmul %142, %144, %cst_65 {dimension_numbers = #tpu.dot_dimension_numbers<[1], [0], [0], [1], [0, 0, 1, 1], [], []>} : vector<2x192xbf16>, vector<192x512xbf16>, vector<2x512xf32> -> vector<2x512xf32>
    %146 = arith.addf %135, %145 : vector<2x512xf32>
    %147 = vector.extract_strided_slice %137 {offsets = [0, 0, 1], sizes = [2, 8, 1], strides = [1, 1, 1]} : vector<2x8x12xf32> to vector<2x8x1xf32>
    %148 = vector.broadcast %147 : vector<2x8x1xf32> to vector<2x8x192xf32>
    %149 = arith.mulf %136, %148 : vector<2x8x192xf32>
    %cst_66 = arith.constant dense<0.000000e+00> : vector<2x192xf32>
    %150 = vector.multi_reduction <add>, %149, %cst_66 [1] : vector<2x8x192xf32> to vector<2x192xf32>
    %151 = arith.truncf %150 : vector<2x192xf32> to vector<2x192xbf16>
    %c1_67 = arith.constant 1 : index
    %c0_68 = arith.constant 0 : index
    %c0_69 = arith.constant 0 : index
    %152 = vector.load %arg18[%c1_67, %c0_68, %c0_69] : memref<12x192x512xbf16, #tpu.memory_space<vmem>>, vector<1x192x512xbf16>
    %153 = vector.shape_cast %152 : vector<1x192x512xbf16> to vector<192x512xbf16>
    %cst_70 = arith.constant dense<0.000000e+00> : vector<2x512xf32>
    %154 = tpu.matmul %151, %153, %cst_70 {dimension_numbers = #tpu.dot_dimension_numbers<[1], [0], [0], [1], [0, 0, 1, 1], [], []>} : vector<2x192xbf16>, vector<192x512xbf16>, vector<2x512xf32> -> vector<2x512xf32>
    %155 = arith.addf %146, %154 : vector<2x512xf32>
    %156 = vector.extract_strided_slice %137 {offsets = [0, 0, 2], sizes = [2, 8, 1], strides = [1, 1, 1]} : vector<2x8x12xf32> to vector<2x8x1xf32>
    %157 = vector.broadcast %156 : vector<2x8x1xf32> to vector<2x8x192xf32>
    %158 = arith.mulf %136, %157 : vector<2x8x192xf32>
    %cst_71 = arith.constant dense<0.000000e+00> : vector<2x192xf32>
    %159 = vector.multi_reduction <add>, %158, %cst_71 [1] : vector<2x8x192xf32> to vector<2x192xf32>
    %160 = arith.truncf %159 : vector<2x192xf32> to vector<2x192xbf16>
    %c2 = arith.constant 2 : index
    %c0_72 = arith.constant 0 : index
    %c0_73 = arith.constant 0 : index
    %161 = vector.load %arg18[%c2, %c0_72, %c0_73] : memref<12x192x512xbf16, #tpu.memory_space<vmem>>, vector<1x192x512xbf16>
    %162 = vector.shape_cast %161 : vector<1x192x512xbf16> to vector<192x512xbf16>
    %cst_74 = arith.constant dense<0.000000e+00> : vector<2x512xf32>
    %163 = tpu.matmul %160, %162, %cst_74 {dimension_numbers = #tpu.dot_dimension_numbers<[1], [0], [0], [1], [0, 0, 1, 1], [], []>} : vector<2x192xbf16>, vector<192x512xbf16>, vector<2x512xf32> -> vector<2x512xf32>
    %164 = arith.addf %155, %163 : vector<2x512xf32>
    %165 = vector.extract_strided_slice %137 {offsets = [0, 0, 3], sizes = [2, 8, 1], strides = [1, 1, 1]} : vector<2x8x12xf32> to vector<2x8x1xf32>
    %166 = vector.broadcast %165 : vector<2x8x1xf32> to vector<2x8x192xf32>
    %167 = arith.mulf %136, %166 : vector<2x8x192xf32>
    %cst_75 = arith.constant dense<0.000000e+00> : vector<2x192xf32>
    %168 = vector.multi_reduction <add>, %167, %cst_75 [1] : vector<2x8x192xf32> to vector<2x192xf32>
    %169 = arith.truncf %168 : vector<2x192xf32> to vector<2x192xbf16>
    %c3 = arith.constant 3 : index
    %c0_76 = arith.constant 0 : index
    %c0_77 = arith.constant 0 : index
    %170 = vector.load %arg18[%c3, %c0_76, %c0_77] : memref<12x192x512xbf16, #tpu.memory_space<vmem>>, vector<1x192x512xbf16>
    %171 = vector.shape_cast %170 : vector<1x192x512xbf16> to vector<192x512xbf16>
    %cst_78 = arith.constant dense<0.000000e+00> : vector<2x512xf32>
    %172 = tpu.matmul %169, %171, %cst_78 {dimension_numbers = #tpu.dot_dimension_numbers<[1], [0], [0], [1], [0, 0, 1, 1], [], []>} : vector<2x192xbf16>, vector<192x512xbf16>, vector<2x512xf32> -> vector<2x512xf32>
    %173 = arith.addf %164, %172 : vector<2x512xf32>
    %174 = vector.extract_strided_slice %137 {offsets = [0, 0, 4], sizes = [2, 8, 1], strides = [1, 1, 1]} : vector<2x8x12xf32> to vector<2x8x1xf32>
    %175 = vector.broadcast %174 : vector<2x8x1xf32> to vector<2x8x192xf32>
    %176 = arith.mulf %136, %175 : vector<2x8x192xf32>
    %cst_79 = arith.constant dense<0.000000e+00> : vector<2x192xf32>
    %177 = vector.multi_reduction <add>, %176, %cst_79 [1] : vector<2x8x192xf32> to vector<2x192xf32>
    %178 = arith.truncf %177 : vector<2x192xf32> to vector<2x192xbf16>
    %c4 = arith.constant 4 : index
    %c0_80 = arith.constant 0 : index
    %c0_81 = arith.constant 0 : index
    %179 = vector.load %arg18[%c4, %c0_80, %c0_81] : memref<12x192x512xbf16, #tpu.memory_space<vmem>>, vector<1x192x512xbf16>
    %180 = vector.shape_cast %179 : vector<1x192x512xbf16> to vector<192x512xbf16>
    %cst_82 = arith.constant dense<0.000000e+00> : vector<2x512xf32>
    %181 = tpu.matmul %178, %180, %cst_82 {dimension_numbers = #tpu.dot_dimension_numbers<[1], [0], [0], [1], [0, 0, 1, 1], [], []>} : vector<2x192xbf16>, vector<192x512xbf16>, vector<2x512xf32> -> vector<2x512xf32>
    %182 = arith.addf %173, %181 : vector<2x512xf32>
    %183 = vector.extract_strided_slice %137 {offsets = [0, 0, 5], sizes = [2, 8, 1], strides = [1, 1, 1]} : vector<2x8x12xf32> to vector<2x8x1xf32>
    %184 = vector.broadcast %183 : vector<2x8x1xf32> to vector<2x8x192xf32>
    %185 = arith.mulf %136, %184 : vector<2x8x192xf32>
    %cst_83 = arith.constant dense<0.000000e+00> : vector<2x192xf32>
    %186 = vector.multi_reduction <add>, %185, %cst_83 [1] : vector<2x8x192xf32> to vector<2x192xf32>
    %187 = arith.truncf %186 : vector<2x192xf32> to vector<2x192xbf16>
    %c5 = arith.constant 5 : index
    %c0_84 = arith.constant 0 : index
    %c0_85 = arith.constant 0 : index
    %188 = vector.load %arg18[%c5, %c0_84, %c0_85] : memref<12x192x512xbf16, #tpu.memory_space<vmem>>, vector<1x192x512xbf16>
    %189 = vector.shape_cast %188 : vector<1x192x512xbf16> to vector<192x512xbf16>
    %cst_86 = arith.constant dense<0.000000e+00> : vector<2x512xf32>
    %190 = tpu.matmul %187, %189, %cst_86 {dimension_numbers = #tpu.dot_dimension_numbers<[1], [0], [0], [1], [0, 0, 1, 1], [], []>} : vector<2x192xbf16>, vector<192x512xbf16>, vector<2x512xf32> -> vector<2x512xf32>
    %191 = arith.addf %182, %190 : vector<2x512xf32>
    %192 = vector.extract_strided_slice %137 {offsets = [0, 0, 6], sizes = [2, 8, 1], strides = [1, 1, 1]} : vector<2x8x12xf32> to vector<2x8x1xf32>
    %193 = vector.broadcast %192 : vector<2x8x1xf32> to vector<2x8x192xf32>
    %194 = arith.mulf %136, %193 : vector<2x8x192xf32>
    %cst_87 = arith.constant dense<0.000000e+00> : vector<2x192xf32>
    %195 = vector.multi_reduction <add>, %194, %cst_87 [1] : vector<2x8x192xf32> to vector<2x192xf32>
    %196 = arith.truncf %195 : vector<2x192xf32> to vector<2x192xbf16>
    %c6 = arith.constant 6 : index
    %c0_88 = arith.constant 0 : index
    %c0_89 = arith.constant 0 : index
    %197 = vector.load %arg18[%c6, %c0_88, %c0_89] : memref<12x192x512xbf16, #tpu.memory_space<vmem>>, vector<1x192x512xbf16>
    %198 = vector.shape_cast %197 : vector<1x192x512xbf16> to vector<192x512xbf16>
    %cst_90 = arith.constant dense<0.000000e+00> : vector<2x512xf32>
    %199 = tpu.matmul %196, %198, %cst_90 {dimension_numbers = #tpu.dot_dimension_numbers<[1], [0], [0], [1], [0, 0, 1, 1], [], []>} : vector<2x192xbf16>, vector<192x512xbf16>, vector<2x512xf32> -> vector<2x512xf32>
    %200 = arith.addf %191, %199 : vector<2x512xf32>
    %201 = vector.extract_strided_slice %137 {offsets = [0, 0, 7], sizes = [2, 8, 1], strides = [1, 1, 1]} : vector<2x8x12xf32> to vector<2x8x1xf32>
    %202 = vector.broadcast %201 : vector<2x8x1xf32> to vector<2x8x192xf32>
    %203 = arith.mulf %136, %202 : vector<2x8x192xf32>
    %cst_91 = arith.constant dense<0.000000e+00> : vector<2x192xf32>
    %204 = vector.multi_reduction <add>, %203, %cst_91 [1] : vector<2x8x192xf32> to vector<2x192xf32>
    %205 = arith.truncf %204 : vector<2x192xf32> to vector<2x192xbf16>
    %c7 = arith.constant 7 : index
    %c0_92 = arith.constant 0 : index
    %c0_93 = arith.constant 0 : index
    %206 = vector.load %arg18[%c7, %c0_92, %c0_93] : memref<12x192x512xbf16, #tpu.memory_space<vmem>>, vector<1x192x512xbf16>
    %207 = vector.shape_cast %206 : vector<1x192x512xbf16> to vector<192x512xbf16>
    %cst_94 = arith.constant dense<0.000000e+00> : vector<2x512xf32>
    %208 = tpu.matmul %205, %207, %cst_94 {dimension_numbers = #tpu.dot_dimension_numbers<[1], [0], [0], [1], [0, 0, 1, 1], [], []>} : vector<2x192xbf16>, vector<192x512xbf16>, vector<2x512xf32> -> vector<2x512xf32>
    %209 = arith.addf %200, %208 : vector<2x512xf32>
    %210 = vector.extract_strided_slice %137 {offsets = [0, 0, 8], sizes = [2, 8, 1], strides = [1, 1, 1]} : vector<2x8x12xf32> to vector<2x8x1xf32>
    %211 = vector.broadcast %210 : vector<2x8x1xf32> to vector<2x8x192xf32>
    %212 = arith.mulf %136, %211 : vector<2x8x192xf32>
    %cst_95 = arith.constant dense<0.000000e+00> : vector<2x192xf32>
    %213 = vector.multi_reduction <add>, %212, %cst_95 [1] : vector<2x8x192xf32> to vector<2x192xf32>
    %214 = arith.truncf %213 : vector<2x192xf32> to vector<2x192xbf16>
    %c8 = arith.constant 8 : index
    %c0_96 = arith.constant 0 : index
    %c0_97 = arith.constant 0 : index
    %215 = vector.load %arg18[%c8, %c0_96, %c0_97] : memref<12x192x512xbf16, #tpu.memory_space<vmem>>, vector<1x192x512xbf16>
    %216 = vector.shape_cast %215 : vector<1x192x512xbf16> to vector<192x512xbf16>
    %cst_98 = arith.constant dense<0.000000e+00> : vector<2x512xf32>
    %217 = tpu.matmul %214, %216, %cst_98 {dimension_numbers = #tpu.dot_dimension_numbers<[1], [0], [0], [1], [0, 0, 1, 1], [], []>} : vector<2x192xbf16>, vector<192x512xbf16>, vector<2x512xf32> -> vector<2x512xf32>
    %218 = arith.addf %209, %217 : vector<2x512xf32>
    %219 = vector.extract_strided_slice %137 {offsets = [0, 0, 9], sizes = [2, 8, 1], strides = [1, 1, 1]} : vector<2x8x12xf32> to vector<2x8x1xf32>
    %220 = vector.broadcast %219 : vector<2x8x1xf32> to vector<2x8x192xf32>
    %221 = arith.mulf %136, %220 : vector<2x8x192xf32>
    %cst_99 = arith.constant dense<0.000000e+00> : vector<2x192xf32>
    %222 = vector.multi_reduction <add>, %221, %cst_99 [1] : vector<2x8x192xf32> to vector<2x192xf32>
    %223 = arith.truncf %222 : vector<2x192xf32> to vector<2x192xbf16>
    %c9 = arith.constant 9 : index
    %c0_100 = arith.constant 0 : index
    %c0_101 = arith.constant 0 : index
    %224 = vector.load %arg18[%c9, %c0_100, %c0_101] : memref<12x192x512xbf16, #tpu.memory_space<vmem>>, vector<1x192x512xbf16>
    %225 = vector.shape_cast %224 : vector<1x192x512xbf16> to vector<192x512xbf16>
    %cst_102 = arith.constant dense<0.000000e+00> : vector<2x512xf32>
    %226 = tpu.matmul %223, %225, %cst_102 {dimension_numbers = #tpu.dot_dimension_numbers<[1], [0], [0], [1], [0, 0, 1, 1], [], []>} : vector<2x192xbf16>, vector<192x512xbf16>, vector<2x512xf32> -> vector<2x512xf32>
    %227 = arith.addf %218, %226 : vector<2x512xf32>
    %228 = vector.extract_strided_slice %137 {offsets = [0, 0, 10], sizes = [2, 8, 1], strides = [1, 1, 1]} : vector<2x8x12xf32> to vector<2x8x1xf32>
    %229 = vector.broadcast %228 : vector<2x8x1xf32> to vector<2x8x192xf32>
    %230 = arith.mulf %136, %229 : vector<2x8x192xf32>
    %cst_103 = arith.constant dense<0.000000e+00> : vector<2x192xf32>
    %231 = vector.multi_reduction <add>, %230, %cst_103 [1] : vector<2x8x192xf32> to vector<2x192xf32>
    %232 = arith.truncf %231 : vector<2x192xf32> to vector<2x192xbf16>
    %c10 = arith.constant 10 : index
    %c0_104 = arith.constant 0 : index
    %c0_105 = arith.constant 0 : index
    %233 = vector.load %arg18[%c10, %c0_104, %c0_105] : memref<12x192x512xbf16, #tpu.memory_space<vmem>>, vector<1x192x512xbf16>
    %234 = vector.shape_cast %233 : vector<1x192x512xbf16> to vector<192x512xbf16>
    %cst_106 = arith.constant dense<0.000000e+00> : vector<2x512xf32>
    %235 = tpu.matmul %232, %234, %cst_106 {dimension_numbers = #tpu.dot_dimension_numbers<[1], [0], [0], [1], [0, 0, 1, 1], [], []>} : vector<2x192xbf16>, vector<192x512xbf16>, vector<2x512xf32> -> vector<2x512xf32>
    %236 = arith.addf %227, %235 : vector<2x512xf32>
    %237 = vector.extract_strided_slice %137 {offsets = [0, 0, 11], sizes = [2, 8, 1], strides = [1, 1, 1]} : vector<2x8x12xf32> to vector<2x8x1xf32>
    %238 = vector.broadcast %237 : vector<2x8x1xf32> to vector<2x8x192xf32>
    %239 = arith.mulf %136, %238 : vector<2x8x192xf32>
    %cst_107 = arith.constant dense<0.000000e+00> : vector<2x192xf32>
    %240 = vector.multi_reduction <add>, %239, %cst_107 [1] : vector<2x8x192xf32> to vector<2x192xf32>
    %241 = arith.truncf %240 : vector<2x192xf32> to vector<2x192xbf16>
    %c11 = arith.constant 11 : index
    %c0_108 = arith.constant 0 : index
    %c0_109 = arith.constant 0 : index
    %242 = vector.load %arg18[%c11, %c0_108, %c0_109] : memref<12x192x512xbf16, #tpu.memory_space<vmem>>, vector<1x192x512xbf16>
    %243 = vector.shape_cast %242 : vector<1x192x512xbf16> to vector<192x512xbf16>
    %cst_110 = arith.constant dense<0.000000e+00> : vector<2x512xf32>
    %244 = tpu.matmul %241, %243, %cst_110 {dimension_numbers = #tpu.dot_dimension_numbers<[1], [0], [0], [1], [0, 0, 1, 1], [], []>} : vector<2x192xbf16>, vector<192x512xbf16>, vector<2x512xf32> -> vector<2x512xf32>
    %245 = arith.addf %236, %244 : vector<2x512xf32>
    %c0_111 = arith.constant 0 : index
    %c0_112 = arith.constant 0 : index
    %246 = vector.load %arg21[%c0_111, %c0_112] : memref<1x512xf32, #tpu.memory_space<vmem>>, vector<1x512xf32>
    %c0_113 = arith.constant 0 : index
    %c0_114 = arith.constant 0 : index
    %247 = vector.load %arg22[%c0_113, %c0_114] : memref<1x512xf32, #tpu.memory_space<vmem>>, vector<1x512xf32>
    %cst_115 = arith.constant dense<0.000000e+00> : vector<2xf32>
    %248 = vector.multi_reduction <add>, %245, %cst_115 [1] : vector<2x512xf32> to vector<2xf32>
    %249 = vector.shape_cast %248 : vector<2xf32> to vector<2x1xf32>
    %cst_116 = arith.constant 5.120000e+02 : f32
    %250 = vector.broadcast %cst_116 : f32 to vector<2x1xf32>
    %251 = arith.divf %249, %250 : vector<2x1xf32>
    %252 = arith.mulf %245, %245 : vector<2x512xf32>
    %cst_117 = arith.constant dense<0.000000e+00> : vector<2xf32>
    %253 = vector.multi_reduction <add>, %252, %cst_117 [1] : vector<2x512xf32> to vector<2xf32>
    %254 = vector.shape_cast %253 : vector<2xf32> to vector<2x1xf32>
    %cst_118 = arith.constant 5.120000e+02 : f32
    %255 = vector.broadcast %cst_118 : f32 to vector<2x1xf32>
    %256 = arith.divf %254, %255 : vector<2x1xf32>
    %257 = arith.mulf %251, %251 : vector<2x1xf32>
    %258 = arith.subf %256, %257 : vector<2x1xf32>
    %259 = vector.broadcast %251 : vector<2x1xf32> to vector<2x512xf32>
    %260 = arith.subf %245, %259 : vector<2x512xf32>
    %cst_119 = arith.constant 9.99999997E-7 : f32
    %261 = vector.broadcast %cst_119 : f32 to vector<2x1xf32>
    %262 = arith.addf %258, %261 : vector<2x1xf32>
    %263 = math.rsqrt %262 : vector<2x1xf32>
    %264 = vector.broadcast %263 : vector<2x1xf32> to vector<2x512xf32>
    %265 = arith.mulf %260, %264 : vector<2x512xf32>
    %266 = vector.broadcast %246 : vector<1x512xf32> to vector<2x512xf32>
    %267 = arith.mulf %265, %266 : vector<2x512xf32>
    %268 = vector.broadcast %247 : vector<1x512xf32> to vector<2x512xf32>
    %269 = arith.addf %267, %268 : vector<2x512xf32>
    %cst_120 = arith.constant 0.000000e+00 : f32
    %270 = vector.broadcast %cst_120 : f32 to vector<2x512xf32>
    %271 = arith.cmpf ogt, %269, %270 : vector<2x512xf32>
    %272 = math.exp %269 : vector<2x512xf32>
    %cst_121 = arith.constant 1.000000e+00 : f32
    %273 = vector.broadcast %cst_121 : f32 to vector<2x512xf32>
    %274 = arith.subf %272, %273 : vector<2x512xf32>
    %275 = arith.select %271, %269, %274 : vector<2x512xi1>, vector<2x512xf32>
    %276 = arith.truncf %275 : vector<2x512xf32> to vector<2x512xbf16>
    %c0_122 = arith.constant 0 : index
    %c0_123 = arith.constant 0 : index
    %277 = vector.load %arg23[%c0_122, %c0_123] : memref<512x256xbf16, #tpu.memory_space<vmem>>, vector<512x256xbf16>
    %cst_124 = arith.constant dense<0.000000e+00> : vector<2x256xf32>
    %278 = tpu.matmul %276, %277, %cst_124 {dimension_numbers = #tpu.dot_dimension_numbers<[1], [0], [0], [1], [0, 0, 1, 1], [], []>} : vector<2x512xbf16>, vector<512x256xbf16>, vector<2x256xf32> -> vector<2x256xf32>
    %c0_125 = arith.constant 0 : index
    %c0_126 = arith.constant 0 : index
    %279 = vector.load %arg24[%c0_125, %c0_126] : memref<1x256xf32, #tpu.memory_space<vmem>>, vector<1x256xf32>
    %280 = vector.broadcast %279 : vector<1x256xf32> to vector<2x256xf32>
    %281 = arith.addf %278, %280 : vector<2x256xf32>
    %cst_127 = arith.constant 0.000000e+00 : f32
    %282 = vector.broadcast %cst_127 : f32 to vector<2x256xf32>
    %283 = arith.cmpf ogt, %281, %282 : vector<2x256xf32>
    %284 = math.exp %281 : vector<2x256xf32>
    %cst_128 = arith.constant 1.000000e+00 : f32
    %285 = vector.broadcast %cst_128 : f32 to vector<2x256xf32>
    %286 = arith.subf %284, %285 : vector<2x256xf32>
    %287 = arith.select %283, %281, %286 : vector<2x256xi1>, vector<2x256xf32>
    %288 = arith.truncf %287 : vector<2x256xf32> to vector<2x256xbf16>
    %c0_129 = arith.constant 0 : index
    %c0_130 = arith.constant 0 : index
    %289 = vector.load %arg25[%c0_129, %c0_130] : memref<256x384xbf16, #tpu.memory_space<vmem>>, vector<256x384xbf16>
    %cst_131 = arith.constant dense<0.000000e+00> : vector<2x384xf32>
    %290 = tpu.matmul %288, %289, %cst_131 {dimension_numbers = #tpu.dot_dimension_numbers<[1], [0], [0], [1], [0, 0, 1, 1], [], []>} : vector<2x256xbf16>, vector<256x384xbf16>, vector<2x384xf32> -> vector<2x384xf32>
    %c0_132 = arith.constant 0 : index
    %c0_133 = arith.constant 0 : index
    %291 = vector.load %arg26[%c0_132, %c0_133] : memref<1x384xf32, #tpu.memory_space<vmem>>, vector<1x384xf32>
    %292 = vector.broadcast %291 : vector<1x384xf32> to vector<2x384xf32>
    %293 = arith.addf %290, %292 : vector<2x384xf32>
    %294 = arith.truncf %293 : vector<2x384xf32> to vector<2x384xbf16>
    %c0_134 = arith.constant 0 : index
    %c0_135 = arith.constant 0 : index
    %295 = vector.load %arg27[%c0_134, %c0_135] : memref<384x384xbf16, #tpu.memory_space<vmem>>, vector<384x384xbf16>
    %cst_136 = arith.constant dense<0.000000e+00> : vector<2x384xf32>
    %296 = tpu.matmul %294, %295, %cst_136 {dimension_numbers = #tpu.dot_dimension_numbers<[1], [0], [0], [1], [0, 0, 1, 1], [], []>} : vector<2x384xbf16>, vector<384x384xbf16>, vector<2x384xf32> -> vector<2x384xf32>
    %c0_137 = arith.constant 0 : index
    %c0_138 = arith.constant 0 : index
    %297 = vector.load %arg30[%c0_137, %c0_138] : memref<1x384xf32, #tpu.memory_space<vmem>>, vector<1x384xf32>
    %298 = vector.broadcast %297 : vector<1x384xf32> to vector<2x384xf32>
    %299 = arith.addf %296, %298 : vector<2x384xf32>
    %300 = arith.truncf %123 : vector<16x12xf32> to vector<16x12xbf16>
    %c0_139 = arith.constant 0 : index
    %c0_140 = arith.constant 0 : index
    %301 = vector.load %arg28[%c0_139, %c0_140] : memref<12x384xbf16, #tpu.memory_space<vmem>>, vector<12x384xbf16>
    %cst_141 = arith.constant dense<0.000000e+00> : vector<16x384xf32>
    %302 = tpu.matmul %300, %301, %cst_141 {dimension_numbers = #tpu.dot_dimension_numbers<[1], [0], [0], [1], [0, 0, 1, 1], [], []>} : vector<16x12xbf16>, vector<12x384xbf16>, vector<16x384xf32> -> vector<16x384xf32>
    %303 = arith.truncf %129 : vector<16x384xf32> to vector<16x384xbf16>
    %c0_142 = arith.constant 0 : index
    %c0_143 = arith.constant 0 : index
    %304 = vector.load %arg29[%c0_142, %c0_143] : memref<384x384xbf16, #tpu.memory_space<vmem>>, vector<384x384xbf16>
    %cst_144 = arith.constant dense<0.000000e+00> : vector<16x384xf32>
    %305 = tpu.matmul %303, %304, %cst_144 {dimension_numbers = #tpu.dot_dimension_numbers<[1], [0], [0], [1], [0, 0, 1, 1], [], []>} : vector<16x384xbf16>, vector<384x384xbf16>, vector<16x384xf32> -> vector<16x384xf32>
    %306 = vector.shape_cast %299 : vector<2x384xf32> to vector<2x1x384xf32>
    %307 = vector.shape_cast %302 : vector<16x384xf32> to vector<2x8x384xf32>
    %308 = vector.broadcast %306 : vector<2x1x384xf32> to vector<2x8x384xf32>
    %309 = arith.addf %308, %307 : vector<2x8x384xf32>
    %310 = vector.shape_cast %305 : vector<16x384xf32> to vector<2x8x384xf32>
    %311 = arith.addf %309, %310 : vector<2x8x384xf32>
    %c0_145 = arith.constant 0 : index
    %c0_146 = arith.constant 0 : index
    %312 = vector.load %arg31[%c0_145, %c0_146] : memref<1x384xf32, #tpu.memory_space<vmem>>, vector<1x384xf32>
    %c0_147 = arith.constant 0 : index
    %c0_148 = arith.constant 0 : index
    %313 = vector.load %arg32[%c0_147, %c0_148] : memref<1x384xf32, #tpu.memory_space<vmem>>, vector<1x384xf32>
    %cst_149 = arith.constant dense<0.000000e+00> : vector<2x8xf32>
    %314 = vector.multi_reduction <add>, %311, %cst_149 [2] : vector<2x8x384xf32> to vector<2x8xf32>
    %315 = vector.shape_cast %314 : vector<2x8xf32> to vector<2x8x1xf32>
    %cst_150 = arith.constant 3.840000e+02 : f32
    %316 = vector.broadcast %cst_150 : f32 to vector<2x8x1xf32>
    %317 = arith.divf %315, %316 : vector<2x8x1xf32>
    %318 = arith.mulf %311, %311 : vector<2x8x384xf32>
    %cst_151 = arith.constant dense<0.000000e+00> : vector<2x8xf32>
    %319 = vector.multi_reduction <add>, %318, %cst_151 [2] : vector<2x8x384xf32> to vector<2x8xf32>
    %320 = vector.shape_cast %319 : vector<2x8xf32> to vector<2x8x1xf32>
    %cst_152 = arith.constant 3.840000e+02 : f32
    %321 = vector.broadcast %cst_152 : f32 to vector<2x8x1xf32>
    %322 = arith.divf %320, %321 : vector<2x8x1xf32>
    %323 = arith.mulf %317, %317 : vector<2x8x1xf32>
    %324 = arith.subf %322, %323 : vector<2x8x1xf32>
    %325 = vector.broadcast %317 : vector<2x8x1xf32> to vector<2x8x384xf32>
    %326 = arith.subf %311, %325 : vector<2x8x384xf32>
    %cst_153 = arith.constant 9.99999997E-7 : f32
    %327 = vector.broadcast %cst_153 : f32 to vector<2x8x1xf32>
    %328 = arith.addf %324, %327 : vector<2x8x1xf32>
    %329 = math.rsqrt %328 : vector<2x8x1xf32>
    %330 = vector.broadcast %329 : vector<2x8x1xf32> to vector<2x8x384xf32>
    %331 = arith.mulf %326, %330 : vector<2x8x384xf32>
    %332 = vector.shape_cast %312 : vector<1x384xf32> to vector<1x1x384xf32>
    %333 = vector.broadcast %332 : vector<1x1x384xf32> to vector<2x8x384xf32>
    %334 = arith.mulf %331, %333 : vector<2x8x384xf32>
    %335 = vector.shape_cast %313 : vector<1x384xf32> to vector<1x1x384xf32>
    %336 = vector.broadcast %335 : vector<1x1x384xf32> to vector<2x8x384xf32>
    %337 = arith.addf %334, %336 : vector<2x8x384xf32>
    %cst_154 = arith.constant 0.000000e+00 : f32
    %338 = vector.broadcast %cst_154 : f32 to vector<2x8x384xf32>
    %339 = arith.cmpf ogt, %337, %338 : vector<2x8x384xf32>
    %340 = math.exp %337 : vector<2x8x384xf32>
    %cst_155 = arith.constant 1.000000e+00 : f32
    %341 = vector.broadcast %cst_155 : f32 to vector<2x8x384xf32>
    %342 = arith.subf %340, %341 : vector<2x8x384xf32>
    %343 = arith.select %339, %337, %342 : vector<2x8x384xi1>, vector<2x8x384xf32>
    %c0_156 = arith.constant 0 : index
    %c0_157 = arith.constant 0 : index
    %344 = vector.load %arg33[%c0_156, %c0_157] : memref<1x384xf32, #tpu.memory_space<vmem>>, vector<1x384xf32>
    %345 = vector.shape_cast %344 : vector<1x384xf32> to vector<1x1x384xf32>
    %346 = vector.broadcast %345 : vector<1x1x384xf32> to vector<2x8x384xf32>
    %347 = arith.mulf %343, %346 : vector<2x8x384xf32>
    %cst_158 = arith.constant dense<0.000000e+00> : vector<2x8xf32>
    %348 = vector.multi_reduction <add>, %347, %cst_158 [2] : vector<2x8x384xf32> to vector<2x8xf32>
    %349 = vector.broadcast %1 : f32 to vector<2x8xf32>
    %350 = arith.addf %348, %349 : vector<2x8xf32>
    %cst_159 = arith.constant -1.000000e+01 : f32
    %cst_160 = arith.constant 1.000000e+01 : f32
    %351 = vector.broadcast %cst_159 : f32 to vector<2x8xf32>
    %352 = arith.maximumf %351, %350 : vector<2x8xf32>
    %353 = vector.broadcast %cst_160 : f32 to vector<2x8xf32>
    %354 = arith.minimumf %353, %352 : vector<2x8xf32>
    %c0_161 = arith.constant 0 : index
    %c0_162 = arith.constant 0 : index
    %355 = vector.load %arg34[%c0_161, %c0_162] : memref<2x8xf32, #tpu.memory_space<vmem>>, vector<2x8xf32>
    tpu.vector_store %arg34[%c0_161, %c0_162], %354 {strides = array<i32>} : memref<2x8xf32, #tpu.memory_space<vmem>>, vector<2x8xf32>,
    return
  }
  func.func @transform_0(%arg0: i32) -> (i32, i32) {
    %c0_i32 = arith.constant 0 : i32
    %c0_i32_0 = arith.constant 0 : i32
    return %arg0, %c0_i32 : i32, i32
  }
  func.func @transform_1(%arg0: i32) -> (i32, i32) {
    %c0_i32 = arith.constant 0 : i32
    %c0_i32_0 = arith.constant 0 : i32
    return %arg0, %c0_i32 : i32, i32
  }
  func.func @transform_2(%arg0: i32) -> (i32, i32) {
    %c0_i32 = arith.constant 0 : i32
    %c0_i32_0 = arith.constant 0 : i32
    return %arg0, %c0_i32 : i32, i32
  }
  func.func @transform_3(%arg0: i32) -> (i32, i32) {
    %c0_i32 = arith.constant 0 : i32
    %c0_i32_0 = arith.constant 0 : i32
    %c0_i32_1 = arith.constant 0 : i32
    return %c0_i32, %c0_i32_0 : i32, i32
  }
  func.func @transform_4(%arg0: i32) -> (i32, i32) {
    %c0_i32 = arith.constant 0 : i32
    %c0_i32_0 = arith.constant 0 : i32
    %c0_i32_1 = arith.constant 0 : i32
    return %c0_i32, %c0_i32_0 : i32, i32
  }
  func.func @transform_5(%arg0: i32) -> (i32, i32) {
    %c0_i32 = arith.constant 0 : i32
    %c0_i32_0 = arith.constant 0 : i32
    %c0_i32_1 = arith.constant 0 : i32
    return %c0_i32, %c0_i32_0 : i32, i32
  }
  func.func @transform_6(%arg0: i32) -> (i32, i32) {
    %c0_i32 = arith.constant 0 : i32
    %c0_i32_0 = arith.constant 0 : i32
    %c0_i32_1 = arith.constant 0 : i32
    return %c0_i32, %c0_i32_0 : i32, i32
  }
  func.func @transform_7(%arg0: i32) -> (i32, i32) {
    %c0_i32 = arith.constant 0 : i32
    %c0_i32_0 = arith.constant 0 : i32
    %c0_i32_1 = arith.constant 0 : i32
    return %c0_i32, %c0_i32_0 : i32, i32
  }
  func.func @transform_8(%arg0: i32) -> (i32, i32) {
    %c0_i32 = arith.constant 0 : i32
    %c0_i32_0 = arith.constant 0 : i32
    %c0_i32_1 = arith.constant 0 : i32
    return %c0_i32, %c0_i32_0 : i32, i32
  }
  func.func @transform_9(%arg0: i32) -> (i32, i32) {
    %c0_i32 = arith.constant 0 : i32
    %c0_i32_0 = arith.constant 0 : i32
    %c0_i32_1 = arith.constant 0 : i32
    return %c0_i32, %c0_i32_0 : i32, i32
  }
  func.func @transform_10(%arg0: i32) -> (i32, i32) {
    %c0_i32 = arith.constant 0 : i32
    %c0_i32_0 = arith.constant 0 : i32
    %c0_i32_1 = arith.constant 0 : i32
    return %c0_i32, %c0_i32_0 : i32, i32
  }
  func.func @transform_11(%arg0: i32) -> (i32, i32) {
    %c0_i32 = arith.constant 0 : i32
    %c0_i32_0 = arith.constant 0 : i32
    %c0_i32_1 = arith.constant 0 : i32
    return %c0_i32, %c0_i32_0 : i32, i32
  }
  func.func @transform_12(%arg0: i32) -> (i32, i32) {
    %c0_i32 = arith.constant 0 : i32
    %c0_i32_0 = arith.constant 0 : i32
    %c0_i32_1 = arith.constant 0 : i32
    return %c0_i32, %c0_i32_0 : i32, i32
  }
  func.func @transform_13(%arg0: i32) -> (i32, i32) {
    %c0_i32 = arith.constant 0 : i32
    %c0_i32_0 = arith.constant 0 : i32
    %c0_i32_1 = arith.constant 0 : i32
    return %c0_i32, %c0_i32_0 : i32, i32
  }
  func.func @transform_14(%arg0: i32) -> (i32, i32) {
    %c0_i32 = arith.constant 0 : i32
    %c0_i32_0 = arith.constant 0 : i32
    %c0_i32_1 = arith.constant 0 : i32
    return %c0_i32, %c0_i32_0 : i32, i32
  }
  func.func @transform_15(%arg0: i32) -> (i32, i32) {
    %c0_i32 = arith.constant 0 : i32
    %c0_i32_0 = arith.constant 0 : i32
    %c0_i32_1 = arith.constant 0 : i32
    return %c0_i32, %c0_i32_0 : i32, i32
  }
  func.func @transform_16(%arg0: i32) -> (i32, i32) {
    %c0_i32 = arith.constant 0 : i32
    %c0_i32_0 = arith.constant 0 : i32
    %c0_i32_1 = arith.constant 0 : i32
    return %c0_i32, %c0_i32_0 : i32, i32
  }
  func.func @transform_17(%arg0: i32) -> (i32, i32, i32) {
    %c0_i32 = arith.constant 0 : i32
    %c0_i32_0 = arith.constant 0 : i32
    %c0_i32_1 = arith.constant 0 : i32
    %c0_i32_2 = arith.constant 0 : i32
    return %c0_i32, %c0_i32_0, %c0_i32_1 : i32, i32, i32
  }
  func.func @transform_18(%arg0: i32) -> (i32, i32) {
    %c0_i32 = arith.constant 0 : i32
    %c0_i32_0 = arith.constant 0 : i32
    %c0_i32_1 = arith.constant 0 : i32
    return %c0_i32, %c0_i32_0 : i32, i32
  }
  func.func @transform_19(%arg0: i32) -> (i32, i32) {
    %c0_i32 = arith.constant 0 : i32
    %c0_i32_0 = arith.constant 0 : i32
    %c0_i32_1 = arith.constant 0 : i32
    return %c0_i32, %c0_i32_0 : i32, i32
  }
  func.func @transform_20(%arg0: i32) -> (i32, i32) {
    %c0_i32 = arith.constant 0 : i32
    %c0_i32_0 = arith.constant 0 : i32
    %c0_i32_1 = arith.constant 0 : i32
    return %c0_i32, %c0_i32_0 : i32, i32
  }
  func.func @transform_21(%arg0: i32) -> (i32, i32) {
    %c0_i32 = arith.constant 0 : i32
    %c0_i32_0 = arith.constant 0 : i32
    %c0_i32_1 = arith.constant 0 : i32
    return %c0_i32, %c0_i32_0 : i32, i32
  }
  func.func @transform_22(%arg0: i32) -> (i32, i32) {
    %c0_i32 = arith.constant 0 : i32
    %c0_i32_0 = arith.constant 0 : i32
    %c0_i32_1 = arith.constant 0 : i32
    return %c0_i32, %c0_i32_0 : i32, i32
  }
  func.func @transform_23(%arg0: i32) -> (i32, i32) {
    %c0_i32 = arith.constant 0 : i32
    %c0_i32_0 = arith.constant 0 : i32
    %c0_i32_1 = arith.constant 0 : i32
    return %c0_i32, %c0_i32_0 : i32, i32
  }
  func.func @transform_24(%arg0: i32) -> (i32, i32) {
    %c0_i32 = arith.constant 0 : i32
    %c0_i32_0 = arith.constant 0 : i32
    %c0_i32_1 = arith.constant 0 : i32
    return %c0_i32, %c0_i32_0 : i32, i32
  }
  func.func @transform_25(%arg0: i32) -> (i32, i32) {
    %c0_i32 = arith.constant 0 : i32
    %c0_i32_0 = arith.constant 0 : i32
    %c0_i32_1 = arith.constant 0 : i32
    return %c0_i32, %c0_i32_0 : i32, i32
  }
  func.func @transform_26(%arg0: i32) -> (i32, i32) {
    %c0_i32 = arith.constant 0 : i32
    %c0_i32_0 = arith.constant 0 : i32
    %c0_i32_1 = arith.constant 0 : i32
    return %c0_i32, %c0_i32_0 : i32, i32
  }
  func.func @transform_27(%arg0: i32) -> (i32, i32) {
    %c0_i32 = arith.constant 0 : i32
    %c0_i32_0 = arith.constant 0 : i32
    %c0_i32_1 = arith.constant 0 : i32
    return %c0_i32, %c0_i32_0 : i32, i32
  }
  func.func @transform_28(%arg0: i32) -> (i32, i32) {
    %c0_i32 = arith.constant 0 : i32
    %c0_i32_0 = arith.constant 0 : i32
    %c0_i32_1 = arith.constant 0 : i32
    return %c0_i32, %c0_i32_0 : i32, i32
  }
  func.func @transform_29(%arg0: i32) -> (i32, i32) {
    %c0_i32 = arith.constant 0 : i32
    %c0_i32_0 = arith.constant 0 : i32
    %c0_i32_1 = arith.constant 0 : i32
    return %c0_i32, %c0_i32_0 : i32, i32
  }
  func.func @transform_30(%arg0: i32) -> (i32, i32) {
    %c0_i32 = arith.constant 0 : i32
    %c0_i32_0 = arith.constant 0 : i32
    %c0_i32_1 = arith.constant 0 : i32
    return %c0_i32, %c0_i32_0 : i32, i32
  }
  func.func @transform_31(%arg0: i32) -> (i32, i32) {
    %c0_i32 = arith.constant 0 : i32
    %c0_i32_0 = arith.constant 0 : i32
    %c0_i32_1 = arith.constant 0 : i32
    return %c0_i32, %c0_i32_0 : i32, i32
  }
  func.func @transform_32(%arg0: i32) -> (i32, i32) {
    %c0_i32 = arith.constant 0 : i32
    %c0_i32_0 = arith.constant 0 : i32
    %c0_i32_1 = arith.constant 0 : i32
    return %c0_i32, %c0_i32_0 : i32, i32
  }
  func.func @transform_33(%arg0: i32) -> (i32, i32) {
    %c0_i32 = arith.constant 0 : i32
    %c0_i32_0 = arith.constant 0 : i32
    return %arg0, %c0_i32 : i32, i32
  }
}

</mosaic_0001>

<bundles_post_ra>
// kernel: policy_forward.1
= control target key start
LH: loop header
LB: loop body
LE: loop exit
PB: predicated region body
PF: predicated region fallthrough
CT: control target
= control target key end

     0   :  { %s13524_s6 = smov 1   ;;  %s13525_s10 = smov 2   ;;  %s14543_s0 = inlined_call_operand.smem [shape: u32[34], index: -1, kind: input, shape index: {}] }
   0x1   :  { %s13621_s5 = sld [smem:[%s14543_s0]]   ;;  %s13526_s14 = smov 3  }
   0x2   :  { %s13626_s9 = sld [smem:[%s14543_s0 + %s13524_s6]]   ;;  %s13527_s18 = smov 4  }
   0x3   :  { %s13631_s13 = sld [smem:[%s14543_s0 + %s13525_s10]]   ;;  %s13528_s22 = smov 5  }
   0x4   :  { %s13636_s17 = sld [smem:[%s14543_s0 + %s13526_s14]]   ;;  %s13529_s26 = smov 6  }
   0x5   :  { %s13641_s21 = sld [smem:[%s14543_s0 + %s13527_s18]]   ;;  %s13530_s30 = smov 7  }
   0x6   :  { %s13646_s25 = sld [smem:[%s14543_s0 + %s13528_s22]]   ;;  %s13531_s4 = smov 8  }
   0x7   :  { %14545 = sst [smem:[#allocation72_spill]] %s13621_s5  ;;  %s13532_s10 = smov 9  }
   0x8   :  { %14546 = sst [smem:[#allocation73_spill]] %s13626_s9  ;;  %s13533_s15 = smov 10  }
   0x9   :  { %s13651_s29 = sld [smem:[%s14543_s0 + %s13529_s26]]   ;;  %s13534_s20 = smov 11  }
   0xa   :  { %14547 = sst [smem:[#allocation74_spill]] %s13636_s17  ;;  %s13535_s26 = smov 12  }
   0xb   :  { %14548 = sst [smem:[#allocation75_spill]] %s13641_s21  ;;  %s13536_s1 = smov 13  }
   0xc   :  { %s13656_s3 = sld [smem:[%s14543_s0 + %s13530_s30]]   ;;  %s13537_s7 = smov 14  }
   0xd   :  { %s13661_s8 = sld [smem:[%s14543_s0 + %s13531_s4]]   ;;  %s13539_s22 = smov 16  }
   0xe   :  { %s13666_s14 = sld [smem:[%s14543_s0 + %s13532_s10]]   ;;  %s13540_s28 = smov 17  }
   0xf   :  { %14549 = sst [smem:[#allocation76_spill]] %s13651_s29 }
  0x10   :  { %s13671_s19 = sld [smem:[%s14543_s0 + %s13533_s15]]   ;;  %s13538_s15 = smov 15  }
  0x11   :  { %s13676_s24 = sld [smem:[%s14543_s0 + %s13534_s20]]  }
  0x12   :  { %s13681_s30 = sld [smem:[%s14543_s0 + %s13535_s26]]  }
  0x13   :  { %14550 = sst [smem:[#allocation77_spill]] %s13661_s8 }
  0x14   :  { %s13686_s6 = sld [smem:[%s14543_s0 + %s13536_s1]]  }
  0x15   :  { %s13691_s12 = sld [smem:[%s14543_s0 + %s13537_s7]]   ;;  %s13541_s7 = smov 18  }
  0x16   :  { %14551 = sst [smem:[#allocation78_spill]] %s13671_s19 }
  0x17   :  { %s13696_s20 = sld [smem:[%s14543_s0 + %s13538_s15]]   ;;  %s13542_s15 = smov 19  }
  0x18   :  { %14552 = sst [smem:[#allocation79_spill]] %s13681_s30 }
  0x19   :  { %s13701_s27 = sld [smem:[%s14543_s0 + %s13539_s22]]   ;;  %s13543_s22 = smov 20  }
  0x1a   :  { %s13706_s4 = sld [smem:[%s14543_s0 + %s13540_s28]]   ;;  %s13544_s28 = smov 21  }
  0x1b   :  { %14553 = sst [smem:[#allocation80_spill]] %s13691_s12 }
  0x1c   :  { %s13711_s9 = sld [smem:[%s14543_s0 + %s13541_s7]]   ;;  %s13545_s7 = smov 22  }
  0x1d   :  { %s13716_s12 = sld [smem:[%s14543_s0 + %s13542_s15]]   ;;  %s13546_s15 = smov 23  }
  0x1e   :  { %s13726_s30 = sld [smem:[%s14543_s0 + %s13544_s28]]   ;;  %s13548_s28 = smov 25  }
  0x1f   :  { %14554 = sst [smem:[#allocation81_spill]] %s13701_s27 }
  0x20   :  { %s13721_s27 = sld [smem:[%s14543_s0 + %s13543_s22]]   ;;  %s13547_s22 = smov 24  }
  0x21   :  { %s13736_s19 = sld [smem:[%s14543_s0 + %s13546_s15]]   ;;  %s13550_s15 = smov 27  }
  0x22   :  { %14555 = sst [smem:[#allocation82_spill]] %s13711_s9 }
  0x23   :  { %s13731_s9 = sld [smem:[%s14543_s0 + %s13545_s7]]   ;;  %s13549_s7 = smov 26  }
  0x24   :  { %s13746_s8 = sld [smem:[%s14543_s0 + %s13548_s28]]   ;;  %s13552_s28 = smov 29  }
  0x25   :  { %s13756_s29 = sld [smem:[%s14543_s0 + %s13550_s15]]   ;;  %s13554_s15 = smov 31  }
  0x26   :  { %14556 = sst [smem:[#allocation83_spill]] %s13721_s27 }
  0x27   :  { %s13741_s27 = sld [smem:[%s14543_s0 + %s13547_s22]]   ;;  %s13551_s22 = smov 28  }
  0x28   :  { %s13766_s21 = sld [smem:[%s14543_s0 + %s13552_s28]]   ;;  %s13556_s28 = smov 33  }
  0x29   :  { %14557 = sst [smem:[#allocation84_spill]] %s13731_s9 }
  0x2a   :  { %s13751_s9 = sld [smem:[%s14543_s0 + %s13549_s7]]   ;;  %s13553_s7 = smov 30  }
  0x2b   :  { %s13776_s17 = sld [smem:[%s14543_s0 + %s13554_s15]]  }
  0x2c   :  { %s13786_s5 = sld [smem:[%s14543_s0 + %s13556_s28]]  }
  0x2d   :  { %14558 = sst [smem:[#allocation85_spill]] %s13741_s27 }
  0x2e   :  { %s13761_s27 = sld [smem:[%s14543_s0 + %s13551_s22]]   ;;  %s13555_s22 = smov 32  }
  0x30   :  { %14559 = sst [smem:[#allocation86_spill]] %s13751_s9 }
  0x31   :  { %s13771_s9 = sld [smem:[%s14543_s0 + %s13553_s7]]  }
  0x34   :  { %14560 = sst [smem:[#allocation87_spill]] %s13761_s27 }
  0x35   :  { %s13781_s27 = sld [smem:[%s14543_s0 + %s13555_s22]]  }
  0x36   :  { %72 = vsyncpa [#allocation3], 0 }
  0x37   :  { %73 = vsyncpa [#allocation7], 0 }
  0x38   :  { %74 = vsyncpa [#allocation5], 0 }
  0x39   :  { %75 = vsyncpa [#allocation11], 0 }
  0x3a   :  { %76 = vsyncpa [#allocation14], 0 }
  0x3b   :  { %77 = vsyncpa [#allocation17], 0 }
  0x3c   :  { %78 = vsyncpa [#allocation20], 0 }
  0x3d   :  { %79 = vsyncpa [#allocation23], 0 }
  0x3e   :  { %80 = vsyncpa [#allocation26], 0 }
  0x3f   :  { %81 = vsyncpa [#allocation29], 0 }
  0x40   :  { %82 = vsyncpa [#allocation32], 0 }
  0x41   :  { %83 = vsyncpa [#allocation35], 0 }
  0x42   :  { %84 = vsyncpa [#allocation38], 0 }
  0x43   :  { %85 = vsyncpa [#allocation41], 0 }
  0x44   :  { %86 = vsyncpa [#allocation44], 0 }
  0x45   :  { %87 = vsyncpa [#allocation47], 0 }
  0x46   :  { %88 = vsyncpa [#allocation50], 0 }
  0x47   :  { %89 = vsyncpa [#allocation4], 0  ;;  %s13557_s0 = smov [#allocation6]   ;;  %s13558_s10 = smov [#allocation10]  }
  0x48   :  { %s110_s7 = sshll.u32 %s13557_s0, 4  ;;  %s140_s11 = sshll.u32 %s13558_s10, 4  ;;  %s111_s7 = int_to_ptr.vmem [resolvable:$true] %s110_s7  ;;  %s141_s11 = int_to_ptr.vmem [resolvable:$true] %s140_s11 }
  0x49   :  { %s12846_s15 = scalar_lea.vmem %s111_s7, 32  ;;  %p12851_p1 = scmp.lt.s32.totalorder %s111_s7, %s111_s7 }
  0x4a   :  { %p12847_p0 = scmp.ne.s32.totalorder %s111_s7, %s12846_s15  ;;  %p12852_p2 = scmp.lt.s32.totalorder %s12846_s15, %s12846_s15 }
  0x4c   :  { %p12853_p3 = por %p12852_p2, %p12851_p1 }
  0x4e   :  { %p12854_p4 = pnand %p12853_p3, %p12847_p0 }
  0x50   :  { %12857 = shalt.err (!%p12854_p4)
}
  0x51   :  { %113 = dma.hbm_to_vmem [thread:$0]  %s13631_s13, 32, %s111_s7, [#allocation7]  }
  0x52   :  { %s12866_s16 = scalar_lea.vmem %s141_s11, 32  ;;  %p12871_p6 = scmp.lt.s32.totalorder %s141_s11, %s141_s11 }
  0x53   :  { %p12867_p5 = scmp.ne.s32.totalorder %s141_s11, %s12866_s16  ;;  %p12872_p7 = scmp.lt.s32.totalorder %s12866_s16, %s12866_s16 }
  0x55   :  { %p12873_p8 = por %p12872_p7, %p12871_p6 }
  0x57   :  { %p12874_p9 = pnand %p12873_p8, %p12867_p5 }
  0x59   :  { %12877 = shalt.err (!%p12874_p9)
}
  0x5a   :  { %143 = dma.hbm_to_vmem [thread:$0]  %s13646_s25, 32, %s141_s11, [#allocation11]  }
  0x5b   :  { %s13559_s18 = smov [#allocation13]   ;;  %s13560_s23 = smov [#allocation16]  }
  0x5c   :  { %s160_s22 = sshll.u32 %s13559_s18, 4  ;;  %s182_s26 = sshll.u32 %s13560_s23, 4  ;;  %s161_s22 = int_to_ptr.vmem [resolvable:$true] %s160_s22  ;;  %s183_s26 = int_to_ptr.vmem [resolvable:$true] %s182_s26 }
  0x5d   :  { %s12886_s28 = scalar_lea.vmem %s161_s22, 32  ;;  %p12891_p11 = scmp.lt.s32.totalorder %s161_s22, %s161_s22 }
  0x5e   :  { %p12887_p10 = scmp.ne.s32.totalorder %s161_s22, %s12886_s28  ;;  %p12892_p12 = scmp.lt.s32.totalorder %s12886_s28, %s12886_s28 }
  0x60   :  { %p12893_p13 = por %p12892_p12, %p12891_p11 }
  0x62   :  { %p12894_p0 = pnand %p12893_p13, %p12887_p10 }
  0x64   :  { %12897 = shalt.err (!%p12894_p0)
}
  0x65   :  { %163 = dma.hbm_to_vmem [thread:$0]  %s13656_s3, 32, %s161_s22, [#allocation14]  }
  0x66   :  { %s12906_s13 = scalar_lea.vmem %s183_s26, 32  ;;  %p12911_p2 = scmp.lt.s32.totalorder %s183_s26, %s183_s26 }
  0x67   :  { %p12907_p1 = scmp.ne.s32.totalorder %s183_s26, %s12906_s13  ;;  %p12912_p3 = scmp.lt.s32.totalorder %s12906_s13, %s12906_s13 }
  0x69   :  { %p12913_p4 = por %p12912_p3, %p12911_p2 }
  0x6b   :  { %p12914_p5 = pnand %p12913_p4, %p12907_p1 }
  0x6d   :  { %12917 = shalt.err (!%p12914_p5)
}
  0x6e   :  { %185 = dma.hbm_to_vmem [thread:$0]  %s13666_s14, 32, %s183_s26, [#allocation17]  }
  0x6f   :  { %s13561_s25 = smov [#allocation19]   ;;  %s13562_s2 = smov [#allocation22]  }
  0x70   :  { %s202_s1 = sshll.u32 %s13561_s25, 4  ;;  %s222_s0 = sshll.u32 %s13562_s2, 4  ;;  %s203_s1 = int_to_ptr.vmem [resolvable:$true] %s202_s1  ;;  %s223_s0 = int_to_ptr.vmem [resolvable:$true] %s222_s0 }
  0x71   :  { %s12926_s7 = scalar_lea.vmem %s203_s1, 16  ;;  %s12930_s10 = scalar_lea.vmem %s203_s1, 32 }
  0x72   :  { %p12927_p6 = scmp.ne.s32.totalorder %s203_s1, %s12926_s7  ;;  %p12931_p7 = scmp.lt.s32.totalorder %s203_s1, %s203_s1 }
  0x73   :  { %p12932_p8 = scmp.lt.s32.totalorder %s12930_s10, %s12926_s7 }
  0x75   :  { %p12933_p9 = por %p12932_p8, %p12931_p7 }
  0x77   :  { %p12934_p10 = pnand %p12933_p9, %p12927_p6 }
  0x79   :  { %12937 = shalt.err (!%p12934_p10)
}
  0x7a   :  { %205 = dma.hbm_to_vmem [thread:$0]  %s13676_s24, 16, %s203_s1, [#allocation20]  }
  0x7b   :  { %s12946_s3 = scalar_lea.vmem %s223_s0, 48  ;;  %s12950_s11 = scalar_lea.vmem %s223_s0, 64 }
  0x7c   :  { %p12947_p11 = scmp.ne.s32.totalorder %s223_s0, %s12946_s3  ;;  %p12951_p12 = scmp.lt.s32.totalorder %s223_s0, %s223_s0 }
  0x7d   :  { %p12952_p13 = scmp.lt.s32.totalorder %s12950_s11, %s12946_s3 }
  0x7f   :  { %p12953_p0 = por %p12952_p13, %p12951_p12 }
  0x81   :  { %p12954_p1 = pnand %p12953_p0, %p12947_p11 }
  0x83   :  { %12957 = shalt.err (!%p12954_p1)
}
  0x84   :  { %225 = dma.hbm_to_vmem [thread:$0]  %s13686_s6, 48, %s223_s0, [#allocation23]  }
  0x85   :  { %s13563_s14 = smov [#allocation25]  }
  0x86   :  { %s241_s15 = sshll.u32 %s13563_s14, 4  ;;  %s242_s15 = int_to_ptr.vmem [resolvable:$true] %s241_s15 }
  0x87   :  { %s12966_s16 = scalar_lea.vmem %s242_s15, 9216  ;;  %p12971_p3 = scmp.lt.s32.totalorder %s242_s15, %s242_s15 }
  0x88   :  { %p12967_p2 = scmp.ne.s32.totalorder %s242_s15, %s12966_s16  ;;  %p12972_p4 = scmp.lt.s32.totalorder %s12966_s16, %s12966_s16 }
  0x8a   :  { %p12973_p5 = por %p12972_p4, %p12971_p3 }
  0x8c   :  { %p12974_p6 = pnand %p12973_p5, %p12967_p2 }
  0x8e   :  { %12977 = shalt.err (!%p12974_p6)
}
  0x8f   :  { %s13564_s24 = smov 192   ;;  %s13565_s18 = smov 12  }
  0x90   :  { %247 = dma.hbm_to_vmem [thread:$0]  %s13696_s20, 9216, %s242_s15, [#allocation26], %s13564_s24, %s13564_s24, %s13565_s18  }
  0x91   :  { %s13566_s22 = smov [#allocation28]  }
  0x92   :  { %s263_s23 = sshll.u32 %s13566_s22, 4  ;;  %s264_s23 = int_to_ptr.vmem [resolvable:$true] %s263_s23 }
  0x93   :  { %s12986_s6 = scalar_lea.vmem %s264_s23, 73728  ;;  %p12991_p8 = scmp.lt.s32.totalorder %s264_s23, %s264_s23 }
  0x94   :  { %p12987_p7 = scmp.ne.s32.totalorder %s264_s23, %s12986_s6  ;;  %p12992_p9 = scmp.lt.s32.totalorder %s12986_s6, %s12986_s6 }
  0x96   :  { %p12993_p10 = por %p12992_p9, %p12991_p8 }
  0x98   :  { %p12994_p11 = pnand %p12993_p10, %p12987_p7 }
  0x9a   :  { %12997 = shalt.err (!%p12994_p11)
}
  0x9b   :  { %s13567_s26 = smov 256   ;;  %s13568_s28 = smov 16  }
  0x9c   :  { %269 = dma.hbm_to_vmem [thread:$0]  %s13706_s4, 73728, %s264_s23, [#allocation29], %s13567_s26, %s13567_s26, %s13568_s28  }
  0x9d   :  { %s13569_s13 = smov [#allocation31]   ;;  %s13570_s20 = smov [#allocation34]  }
  0x9e   :  { %s288_s25 = sshll.u32 %s13569_s13, 4  ;;  %s308_s1 = sshll.u32 %s13570_s20, 4  ;;  %s289_s25 = int_to_ptr.vmem [resolvable:$true] %s288_s25  ;;  %s309_s1 = int_to_ptr.vmem [resolvable:$true] %s308_s1 }
  0x9f   :  { %s13006_s2 = scalar_lea.vmem %s289_s25, 64  ;;  %p13011_p13 = scmp.lt.s32.totalorder %s289_s25, %s289_s25 }
  0xa0   :  { %p13007_p12 = scmp.ne.s32.totalorder %s289_s25, %s13006_s2  ;;  %p13012_p0 = scmp.lt.s32.totalorder %s13006_s2, %s13006_s2 }
  0xa2   :  { %p13013_p1 = por %p13012_p0, %p13011_p13 }
  0xa4   :  { %p13014_p2 = pnand %p13013_p1, %p13007_p12 }
  0xa6   :  { %13017 = shalt.err (!%p13014_p2)
}
  0xa7   :  { %291 = dma.hbm_to_vmem [thread:$0]  %s13716_s12, 64, %s289_s25, [#allocation32]  }
  0xa8   :  { %s13026_s0 = scalar_lea.vmem %s309_s1, 64  ;;  %p13031_p4 = scmp.lt.s32.totalorder %s309_s1, %s309_s1 }
  0xa9   :  { %p13027_p3 = scmp.ne.s32.totalorder %s309_s1, %s13026_s0  ;;  %p13032_p5 = scmp.lt.s32.totalorder %s13026_s0, %s13026_s0 }
  0xab   :  { %p13033_p6 = por %p13032_p5, %p13031_p4 }
  0xad   :  { %p13034_p7 = pnand %p13033_p6, %p13027_p3 }
  0xaf   :  { %13037 = shalt.err (!%p13034_p7)
}
  0xb0   :  { %311 = dma.hbm_to_vmem [thread:$0]  %s13726_s30, 64, %s309_s1, [#allocation35]  }
  0xb1   :  { %s13571_s4 = smov [#allocation37]   ;;  %s13572_s10 = smov [#allocation40]  }
  0xb2   :  { %s330_s7 = sshll.u32 %s13571_s4, 4  ;;  %s352_s3 = sshll.u32 %s13572_s10, 4  ;;  %s331_s7 = int_to_ptr.vmem [resolvable:$true] %s330_s7  ;;  %s353_s3 = int_to_ptr.vmem [resolvable:$true] %s352_s3 }
  0xb3   :  { %s13046_s11 = scalar_lea.vmem %s331_s7, 32  ;;  %p13051_p9 = scmp.lt.s32.totalorder %s331_s7, %s331_s7 }
  0xb4   :  { %p13047_p8 = scmp.ne.s32.totalorder %s331_s7, %s13046_s11  ;;  %p13052_p10 = scmp.lt.s32.totalorder %s13046_s11, %s13046_s11 }
  0xb6   :  { %p13053_p11 = por %p13052_p10, %p13051_p9 }
  0xb8   :  { %p13054_p12 = pnand %p13053_p11, %p13047_p8 }
  0xba   :  { %13057 = shalt.err (!%p13054_p12)
}
  0xbb   :  { %333 = dma.hbm_to_vmem [thread:$0]  %s13736_s19, 32, %s331_s7, [#allocation38]  }
  0xbc   :  { %s13066_s12 = scalar_lea.vmem %s353_s3, 48  ;;  %s13070_s14 = scalar_lea.vmem %s353_s3, 64 }
  0xbd   :  { %p13067_p13 = scmp.ne.s32.totalorder %s353_s3, %s13066_s12  ;;  %p13071_p0 = scmp.lt.s32.totalorder %s353_s3, %s353_s3 }
  0xbe   :  { %p13072_p1 = scmp.lt.s32.totalorder %s13070_s14, %s13066_s12 }
  0xc0   :  { %p13073_p2 = por %p13072_p1, %p13071_p0 }
  0xc2   :  { %p13074_p3 = pnand %p13073_p2, %p13067_p13 }
  0xc4   :  { %13077 = shalt.err (!%p13074_p3)
}
  0xc5   :  { %355 = dma.hbm_to_vmem [thread:$0]  %s13746_s8, 48, %s353_s3, [#allocation41]  }
  0xc6   :  { %s13573_s30 = smov [#allocation43]   ;;  %s13574_s16 = smov [#allocation46]  }
  0xc7   :  { %s373_s15 = sshll.u32 %s13573_s30, 4  ;;  %s398_s22 = sshll.u32 %s13574_s16, 4  ;;  %s374_s15 = int_to_ptr.vmem [resolvable:$true] %s373_s15  ;;  %s399_s22 = int_to_ptr.vmem [resolvable:$true] %s398_s22 }
  0xc8   :  { %s13086_s23 = scalar_lea.vmem %s374_s15, 384  ;;  %p13091_p5 = scmp.lt.s32.totalorder %s374_s15, %s374_s15 }
  0xc9   :  { %p13087_p4 = scmp.ne.s32.totalorder %s374_s15, %s13086_s23  ;;  %p13092_p6 = scmp.lt.s32.totalorder %s13086_s23, %s13086_s23 }
  0xcb   :  { %p13093_p7 = por %p13092_p6, %p13091_p5 }
  0xcd   :  { %p13094_p8 = pnand %p13093_p7, %p13087_p4 }
  0xcf   :  { %13097 = shalt.err (!%p13094_p8)
}
  0xd0   :  { %379 = dma.hbm_to_vmem [thread:$0]  %s13756_s29, 384, %s374_s15, [#allocation44], %s13564_s24, %s13564_s24, %s13565_s18  }
  0xd1   :  { %s13106_s19 = scalar_lea.vmem %s399_s22, 48  ;;  %s13110_s8 = scalar_lea.vmem %s399_s22, 64 }
  0xd2   :  { %p13107_p9 = scmp.ne.s32.totalorder %s399_s22, %s13106_s19  ;;  %p13111_p10 = scmp.lt.s32.totalorder %s399_s22, %s399_s22 }
  0xd3   :  { %p13112_p11 = scmp.lt.s32.totalorder %s13110_s8, %s13106_s19 }
  0xd5   :  { %p13113_p12 = por %p13112_p11, %p13111_p10 }
  0xd7   :  { %p13114_p13 = pnand %p13113_p12, %p13107_p9 }
  0xd9   :  { %13117 = shalt.err (!%p13114_p13)
}
  0xda   :  { %401 = dma.hbm_to_vmem [thread:$0]  %s13766_s21, 48, %s399_s22, [#allocation47]  }
  0xdb   :  { %s13575_s6 = smov [#allocation49]   ;;  %s13576_s25 = smov [#allocation2]  }
  0xdc   :  { %s418_s13 = sshll.u32 %s13575_s6, 4  ;;  %s95_s20 = sshll.u32 %s13576_s25, 4  ;;  %s419_s13 = int_to_ptr.vmem [resolvable:$true] %s418_s13  ;;  %s96_s20 = int_to_ptr.vmem [resolvable:$true] %s95_s20 }
  0xdd   :  { %s13126_s1 = scalar_lea.vmem %s419_s13, 48  ;;  %s13130_s2 = scalar_lea.vmem %s419_s13, 64 }
  0xde   :  { %p13127_p0 = scmp.ne.s32.totalorder %s419_s13, %s13126_s1  ;;  %p13131_p1 = scmp.lt.s32.totalorder %s419_s13, %s419_s13 }
  0xdf   :  { %p13132_p2 = scmp.lt.s32.totalorder %s13130_s2, %s13126_s1 }
  0xe1   :  { %p13133_p3 = por %p13132_p2, %p13131_p1 }
  0xe3   :  { %p13134_p4 = pnand %p13133_p3, %p13127_p0 }
  0xe5   :  { %13137 = shalt.err (!%p13134_p4)
}
  0xe6   :  { %421 = dma.hbm_to_vmem [thread:$0]  %s13776_s17, 48, %s419_s13, [#allocation50]  }
  0xe7   :  { %s13146_s29 = scalar_lea.vmem %s96_s20, 256  ;;  %p13151_p6 = scmp.lt.s32.totalorder %s96_s20, %s96_s20 }
  0xe8   :  { %p13147_p5 = scmp.ne.s32.totalorder %s96_s20, %s13146_s29  ;;  %p13152_p7 = scmp.lt.s32.totalorder %s13146_s29, %s13146_s29 }
  0xea   :  { %p13153_p8 = por %p13152_p7, %p13151_p6 }
  0xec   :  { %p13154_p9 = pnand %p13153_p8, %p13147_p5 }
  0xee   :  { %13157 = shalt.err (!%p13154_p9)
}
  0xef   :  { %s13577_s21 = smov 128   ;;  %s14561_s0 = sld [smem:[#allocation72_spill]] }
  0xf0   :  { %s14562_s4 = sld [smem:[#allocation74_spill]]  ;;  %s13578_s7 = smov 8  }
  0xf1   :  { %s13579_s10 = smov [#allocation8]   ;;  %s13580_s3 = smov [#allocation9]  }
  0xf2   :  { %s127_s11 = sshll.u32 %s13580_s3, 4  ;;  %s128_s11 = int_to_ptr.vmem [resolvable:$true] %s127_s11 }
  0xf3   :  { %s13174_s17 = scalar_lea.vmem %s128_s11, 960  ;;  %p13179_p11 = scmp.lt.s32.totalorder %s128_s11, %s128_s11 }
  0xf4   :  { %p13175_p10 = scmp.ne.s32.totalorder %s128_s11, %s13174_s17  ;;  %p13180_p12 = scmp.lt.s32.totalorder %s13174_s17, %s13174_s17 }
  0xf5   :  { %101 = dma.hbm_to_vmem [thread:$0]  %s14561_s0, 256, %s96_s20, [#allocation3], %s13577_s21, %s13577_s21, %s13578_s7  }
  0xf6   :  { %121 = dma.hbm_to_smem %s14562_s4, 16, %s13579_s10, [#allocation5]  }
  0xf7   :  { %p13181_p13 = por %p13180_p12, %p13179_p11 }
  0xf9   :  { %p13182_p0 = pnand %p13181_p13, %p13175_p10 }
  0xfb   :  { %13185 = shalt.err (!%p13182_p0)
}
  0xfc   :  { %s13581_s12 = smov 320   ;;  %s14563_s14 = sld [smem:[#allocation75_spill]] }
  0xfd   :  { %s13582_s30 = smov 20   ;;  %s13583_s15 = smov [#allocation12]  }
  0xfe   :  { %s150_s16 = sshll.u32 %s13583_s15, 4  ;;  %s13584_s22 = smov [#allocation15]   ;;  %s151_s16 = int_to_ptr.vmem [resolvable:$true] %s150_s16 }
  0xff   :  { %s169_s23 = sshll.u32 %s13584_s22, 4  ;;  %s13194_s19 = scalar_lea.vmem %s151_s16, 32  ;;  %s170_s23 = int_to_ptr.vmem [resolvable:$true] %s169_s23 }
 0x100   :  { %p13195_p1 = scmp.ne.s32.totalorder %s151_s16, %s13194_s19  ;;  %p13199_p2 = scmp.lt.s32.totalorder %s151_s16, %s151_s16 }
 0x101   :  { %p13200_p3 = scmp.lt.s32.totalorder %s13194_s19, %s13194_s19 }
 0x102   :  { %133 = dma.hbm_to_vmem [thread:$0]  %s14563_s14, 960, %s128_s11, [#allocation7], %s13581_s12, %s13581_s12, %s13582_s30  }
 0x103   :  { %p13201_p4 = por %p13200_p3, %p13199_p2 }
 0x105   :  { %p13202_p5 = pnand %p13201_p4, %p13195_p1 }
 0x107   :  { %13205 = shalt.err (!%p13202_p5)
}
 0x108   :  { %s14564_s8 = sld [smem:[#allocation76_spill]]  ;;  %s13214_s6 = scalar_lea.vmem %s170_s23, 3072 }
 0x109   :  { %p13215_p6 = scmp.ne.s32.totalorder %s170_s23, %s13214_s6  ;;  %p13219_p7 = scmp.lt.s32.totalorder %s170_s23, %s170_s23 }
 0x10a   :  { %p13220_p8 = scmp.lt.s32.totalorder %s13214_s6, %s13214_s6 }
 0x10c   :  { %p13221_p9 = por %p13220_p8, %p13219_p7 }
 0x10e   :  { %153 = dma.hbm_to_vmem [thread:$0]  %s14564_s8, 32, %s151_s16, [#allocation11]  }
 0x10f   :  { %p13222_p10 = pnand %p13221_p9, %p13215_p6 }
 0x111   :  { %13225 = shalt.err (!%p13222_p10)
}
 0x112   :  { %s14565_s13 = sld [smem:[#allocation77_spill]]  ;;  %s13585_s25 = smov [#allocation18]  }
 0x113   :  { %s192_s20 = sshll.u32 %s13585_s25, 4  ;;  %s13586_s1 = smov [#allocation21]   ;;  %s193_s20 = int_to_ptr.vmem [resolvable:$true] %s192_s20 }
 0x114   :  { %s212_s2 = sshll.u32 %s13586_s1, 4  ;;  %s13234_s29 = scalar_lea.vmem %s193_s20, 64  ;;  %s213_s2 = int_to_ptr.vmem [resolvable:$true] %s212_s2 }
 0x115   :  { %p13235_p11 = scmp.ne.s32.totalorder %s193_s20, %s13234_s29  ;;  %p13239_p12 = scmp.lt.s32.totalorder %s193_s20, %s193_s20 }
 0x116   :  { %p13240_p13 = scmp.lt.s32.totalorder %s13234_s29, %s13234_s29 }
 0x118   :  { %175 = dma.hbm_to_vmem [thread:$0]  %s14565_s13, 3072, %s170_s23, [#allocation14], %s13577_s21, %s13577_s21, %s13578_s7  }
 0x119   :  { %p13241_p0 = por %p13240_p13, %p13239_p12 }
 0x11b   :  { %p13242_p1 = pnand %p13241_p0, %p13235_p11 }
 0x11d   :  { %13245 = shalt.err (!%p13242_p1)
}
 0x11e   :  { %s14566_s0 = sld [smem:[#allocation78_spill]]  ;;  %s13254_s4 = scalar_lea.vmem %s213_s2, 48 }
 0x11f   :  { %p13255_p2 = scmp.ne.s32.totalorder %s213_s2, %s13254_s4  ;;  %s13258_s10 = scalar_lea.vmem %s213_s2, 64 }
 0x120   :  { %p13259_p3 = scmp.lt.s32.totalorder %s213_s2, %s213_s2  ;;  %p13260_p4 = scmp.lt.s32.totalorder %s13258_s10, %s13254_s4 }
 0x122   :  { %p13261_p5 = por %p13260_p4, %p13259_p3 }
 0x124   :  { %195 = dma.hbm_to_vmem [thread:$0]  %s14566_s0, 64, %s193_s20, [#allocation17]  }
 0x125   :  { %p13262_p6 = pnand %p13261_p5, %p13255_p2 }
 0x127   :  { %13265 = shalt.err (!%p13262_p6)
}
 0x128   :  { %s14567_s3 = sld [smem:[#allocation79_spill]]  ;;  %s13587_s11 = smov [#allocation24]  }
 0x129   :  { %s232_s17 = sshll.u32 %s13587_s11, 4  ;;  %s13588_s12 = smov [#allocation27]   ;;  %s233_s17 = int_to_ptr.vmem [resolvable:$true] %s232_s17 }
 0x12a   :  { %s254_s14 = sshll.u32 %s13588_s12, 4  ;;  %s13274_s30 = scalar_lea.vmem %s233_s17, 48  ;;  %s255_s14 = int_to_ptr.vmem [resolvable:$true] %s254_s14 }
 0x12b   :  { %p13275_p7 = scmp.ne.s32.totalorder %s233_s17, %s13274_s30  ;;  %s13278_s15 = scalar_lea.vmem %s233_s17, 64 }
 0x12c   :  { %p13279_p8 = scmp.lt.s32.totalorder %s233_s17, %s233_s17  ;;  %p13280_p9 = scmp.lt.s32.totalorder %s13278_s15, %s13274_s30 }
 0x12e   :  { %215 = dma.hbm_to_vmem [thread:$0]  %s14567_s3, 48, %s213_s2, [#allocation20]  }
 0x12f   :  { %p13281_p10 = por %p13280_p9, %p13279_p8 }
 0x131   :  { %p13282_p11 = pnand %p13281_p10, %p13275_p7 }
 0x133   :  { %13285 = shalt.err (!%p13282_p11)
}
 0x134   :  { %s14568_s16 = sld [smem:[#allocation80_spill]]  ;;  %s13294_s22 = scalar_lea.vmem %s255_s14, 48 }
 0x135   :  { %p13295_p12 = scmp.ne.s32.totalorder %s255_s14, %s13294_s22  ;;  %s13298_s23 = scalar_lea.vmem %s255_s14, 64 }
 0x136   :  { %p13299_p13 = scmp.lt.s32.totalorder %s255_s14, %s255_s14  ;;  %p13300_p0 = scmp.lt.s32.totalorder %s13298_s23, %s13294_s22 }
 0x138   :  { %p13301_p1 = por %p13300_p0, %p13299_p13 }
 0x13a   :  { %235 = dma.hbm_to_vmem [thread:$0]  %s14568_s16, 48, %s233_s17, [#allocation23]  }
 0x13b   :  { %p13302_p2 = pnand %p13301_p1, %p13295_p12 }
 0x13d   :  { %13305 = shalt.err (!%p13302_p2)
}
 0x13e   :  { %s14569_s19 = sld [smem:[#allocation81_spill]]  ;;  %s13589_s8 = smov [#allocation30]  }
 0x13f   :  { %s275_s6 = sshll.u32 %s13589_s8, 4  ;;  %s13590_s13 = smov [#allocation33]   ;;  %s276_s6 = int_to_ptr.vmem [resolvable:$true] %s275_s6 }
 0x140   :  { %s298_s25 = sshll.u32 %s13590_s13, 4  ;;  %s13314_s20 = scalar_lea.vmem %s276_s6, 512  ;;  %s299_s25 = int_to_ptr.vmem [resolvable:$true] %s298_s25 }
 0x141   :  { %p13315_p3 = scmp.ne.s32.totalorder %s276_s6, %s13314_s20  ;;  %p13319_p4 = scmp.lt.s32.totalorder %s276_s6, %s276_s6 }
 0x142   :  { %p13320_p5 = scmp.lt.s32.totalorder %s13314_s20, %s13314_s20 }
 0x144   :  { %257 = dma.hbm_to_vmem [thread:$0]  %s14569_s19, 48, %s255_s14, [#allocation26]  }
 0x145   :  { %p13321_p6 = por %p13320_p5, %p13319_p4 }
 0x147   :  { %p13322_p7 = pnand %p13321_p6, %p13315_p3 }
 0x149   :  { %13325 = shalt.err (!%p13322_p7)
}
 0x14a   :  { %s14570_s1 = sld [smem:[#allocation82_spill]]  ;;  %s13334_s2 = scalar_lea.vmem %s299_s25, 64 }
 0x14b   :  { %p13335_p8 = scmp.ne.s32.totalorder %s299_s25, %s13334_s2  ;;  %p13339_p9 = scmp.lt.s32.totalorder %s299_s25, %s299_s25 }
 0x14c   :  { %p13340_p10 = scmp.lt.s32.totalorder %s13334_s2, %s13334_s2 }
 0x14e   :  { %p13341_p11 = por %p13340_p10, %p13339_p9 }
 0x150   :  { %281 = dma.hbm_to_vmem [thread:$0]  %s14570_s1, 512, %s276_s6, [#allocation29], %s13567_s26, %s13567_s26, %s13568_s28  }
 0x151   :  { %p13342_p12 = pnand %p13341_p11, %p13335_p8 }
 0x153   :  { %13345 = shalt.err (!%p13342_p12)
}
 0x154   :  { %s14571_s29 = sld [smem:[#allocation83_spill]]  ;;  %s13591_s0 = smov [#allocation36]  }
 0x155   :  { %s317_s4 = sshll.u32 %s13591_s0, 4  ;;  %s13592_s10 = smov [#allocation39]   ;;  %s318_s4 = int_to_ptr.vmem [resolvable:$true] %s317_s4 }
 0x156   :  { %s339_s3 = sshll.u32 %s13592_s10, 4  ;;  %s13354_s11 = scalar_lea.vmem %s318_s4, 8192  ;;  %s340_s3 = int_to_ptr.vmem [resolvable:$true] %s339_s3 }
 0x157   :  { %p13355_p13 = scmp.ne.s32.totalorder %s318_s4, %s13354_s11  ;;  %p13359_p0 = scmp.lt.s32.totalorder %s318_s4, %s318_s4 }
 0x158   :  { %p13360_p1 = scmp.lt.s32.totalorder %s13354_s11, %s13354_s11 }
 0x15a   :  { %301 = dma.hbm_to_vmem [thread:$0]  %s14571_s29, 64, %s299_s25, [#allocation32]  }
 0x15b   :  { %p13361_p2 = por %p13360_p1, %p13359_p0 }
 0x15d   :  { %p13362_p3 = pnand %p13361_p2, %p13355_p13 }
 0x15f   :  { %13365 = shalt.err (!%p13362_p3)
}
 0x160   :  { %s14572_s26 = sld [smem:[#allocation84_spill]]  ;;  %s13374_s28 = scalar_lea.vmem %s340_s3, 6144 }
 0x161   :  { %p13375_p4 = scmp.ne.s32.totalorder %s340_s3, %s13374_s28  ;;  %p13379_p5 = scmp.lt.s32.totalorder %s340_s3, %s340_s3 }
 0x162   :  { %p13380_p6 = scmp.lt.s32.totalorder %s13374_s28, %s13374_s28 }
 0x164   :  { %p13381_p7 = por %p13380_p6, %p13379_p5 }
 0x166   :  { %323 = dma.hbm_to_vmem [thread:$0]  %s14572_s26, 8192, %s318_s4, [#allocation35], %s13577_s21, %s13577_s21, %s13578_s7  }
 0x167   :  { %p13382_p8 = pnand %p13381_p7, %p13375_p4 }
 0x169   :  { %13385 = shalt.err (!%p13382_p8)
}
 0x16a   :  { %s14573_s17 = sld [smem:[#allocation85_spill]]  ;;  %s13593_s12 = smov [#allocation42]  }
 0x16b   :  { %s361_s14 = sshll.u32 %s13593_s12, 4  ;;  %s13594_s30 = smov [#allocation45]   ;;  %s362_s14 = int_to_ptr.vmem [resolvable:$true] %s361_s14 }
 0x16c   :  { %s385_s15 = sshll.u32 %s13594_s30, 4  ;;  %s13394_s16 = scalar_lea.vmem %s362_s14, 9216  ;;  %s386_s15 = int_to_ptr.vmem [resolvable:$true] %s385_s15 }
 0x16d   :  { %p13395_p9 = scmp.ne.s32.totalorder %s362_s14, %s13394_s16  ;;  %p13399_p10 = scmp.lt.s32.totalorder %s362_s14, %s362_s14 }
 0x16e   :  { %p13400_p11 = scmp.lt.s32.totalorder %s13394_s16, %s13394_s16 }
 0x170   :  { %345 = dma.hbm_to_vmem [thread:$0]  %s14573_s17, 6144, %s340_s3, [#allocation38], %s13564_s24, %s13564_s24, %s13565_s18  }
 0x171   :  { %p13401_p12 = por %p13400_p11, %p13399_p10 }
 0x173   :  { %p13402_p13 = pnand %p13401_p12, %p13395_p9 }
 0x175   :  { %13405 = shalt.err (!%p13402_p13)
}
 0x176   :  { %s14574_s21 = sld [smem:[#allocation86_spill]]  ;;  %s13414_s7 = scalar_lea.vmem %s386_s15, 9216 }
 0x177   :  { %p13415_p0 = scmp.ne.s32.totalorder %s386_s15, %s13414_s7  ;;  %p13419_p1 = scmp.lt.s32.totalorder %s386_s15, %s386_s15 }
 0x178   :  { %p13420_p2 = scmp.lt.s32.totalorder %s13414_s7, %s13414_s7 }
 0x17a   :  { %p13421_p3 = por %p13420_p2, %p13419_p1 }
 0x17c   :  { %367 = dma.hbm_to_vmem [thread:$0]  %s14574_s21, 9216, %s362_s14, [#allocation41], %s13564_s24, %s13564_s24, %s13565_s18  }
 0x17d   :  { %p13422_p4 = pnand %p13421_p3, %p13415_p0 }
 0x17f   :  { %13425 = shalt.err (!%p13422_p4)
}
 0x180   :  { %s14575_s22 = sld [smem:[#allocation87_spill]]  ;;  %s13595_s23 = smov [#allocation48]  }
 0x181   :  { %s408_s19 = sshll.u32 %s13595_s23, 4  ;;  %s13596_s8 = smov [#allocation51]   ;;  %s409_s19 = int_to_ptr.vmem [resolvable:$true] %s408_s19 }
 0x182   :  { %s428_s6 = sshll.u32 %s13596_s8, 4  ;;  %s13434_s13 = scalar_lea.vmem %s409_s19, 48  ;;  %s429_s6 = int_to_ptr.vmem [resolvable:$true] %s428_s6 }
 0x183   :  { %p13435_p5 = scmp.ne.s32.totalorder %s409_s19, %s13434_s13  ;;  %s13438_s25 = scalar_lea.vmem %s409_s19, 64 }
 0x184   :  { %p13439_p6 = scmp.lt.s32.totalorder %s409_s19, %s409_s19  ;;  %p13440_p7 = scmp.lt.s32.totalorder %s13438_s25, %s13434_s13 }
 0x186   :  { %391 = dma.hbm_to_vmem [thread:$0]  %s14575_s22, 9216, %s386_s15, [#allocation44], %s13564_s24, %s13564_s24, %s13565_s18  }
 0x187   :  { %p13441_p8 = por %p13440_p7, %p13439_p6 }
 0x189   :  { %p13442_p9 = pnand %p13441_p8, %p13435_p5 }
 0x18b   :  { %13445 = shalt.err (!%p13442_p9)
}
 0x18c   :  { %411 = dma.hbm_to_vmem [thread:$0]  %s13771_s9, 48, %s409_s19, [#allocation47]  }
 0x18d   :  { %s13454_s20 = scalar_lea.vmem %s429_s6, 48  ;;  %s13458_s1 = scalar_lea.vmem %s429_s6, 64 }
 0x18e   :  { %p13455_p10 = scmp.ne.s32.totalorder %s429_s6, %s13454_s20  ;;  %p13459_p11 = scmp.lt.s32.totalorder %s429_s6, %s429_s6 }
 0x18f   :  { %p13460_p12 = scmp.lt.s32.totalorder %s13458_s1, %s13454_s20 }
 0x191   :  { %p13461_p13 = por %p13460_p12, %p13459_p11 }
 0x193   :  { %p13462_p0 = pnand %p13461_p13, %p13455_p10 }
 0x195   :  { %13465 = shalt.err (!%p13462_p0)
}
 0x196   :  { %431 = dma.hbm_to_vmem [thread:$0]  %s13781_s27, 48, %s429_s6, [#allocation50]  }
 0x197   :  { %13486 = dma.done.wait [#allocation3], 256  }
 0x198   :  { %13487 = vsyncadd [#allocation3], 4294967040 }
 0x199   :  { %13488 = dma.done.wait [#allocation7], 32  }
 0x19a   :  { %13489 = vsyncadd [#allocation7], 4294967264 }
 0x19b   :  { %13490 = dma.done.wait [#allocation5], 16  }
 0x19c   :  { %13491 = vsyncadd [#allocation5], 4294967280 }
 0x19d   :  { %13492 = dma.done.wait [#allocation7], 960  }
 0x19e   :  { %13493 = vsyncadd [#allocation7], 4294966336 }
 0x19f   :  { %13494 = dma.done.wait [#allocation11], 64  }
 0x1a0   :  { %13495 = vsyncadd [#allocation11], 4294967232 }
 0x1a1   :  { %13496 = dma.done.wait [#allocation14], 3104  }
 0x1a2   :  { %13497 = vsyncadd [#allocation14], 4294964192 }
 0x1a3   :  { %13498 = dma.done.wait [#allocation17], 96  }
 0x1a4   :  { %13499 = vsyncadd [#allocation17], 4294967200 }
 0x1a5   :  { %13500 = dma.done.wait [#allocation20], 64  }
 0x1a6   :  { %13501 = vsyncadd [#allocation20], 4294967232 }
 0x1a7   :  { %13502 = dma.done.wait [#allocation23], 96  }
 0x1a8   :  { %13503 = vsyncadd [#allocation23], 4294967200 }
 0x1a9   :  { %13504 = dma.done.wait [#allocation26], 9264  }
 0x1aa   :  { %13505 = vsyncadd [#allocation26], 4294958032 }
 0x1ab   :  { %13506 = dma.done.wait [#allocation29], 74240  }
 0x1ac   :  { %13507 = vsyncadd [#allocation29], 4294893056 }
 0x1ad   :  { %13508 = dma.done.wait [#allocation32], 128  }
 0x1ae   :  { %13509 = vsyncadd [#allocation32], 4294967168 }
 0x1af   :  { %13510 = dma.done.wait [#allocation35], 8256  }
 0x1b0   :  { %13511 = vsyncadd [#allocation35], 4294959040 }
 0x1b1   :  { %13512 = dma.done.wait [#allocation38], 6176  }
 0x1b2   :  { %13513 = vsyncadd [#allocation38], 4294961120 }
 0x1b3   :  { %13514 = dma.done.wait [#allocation41], 9264  }
 0x1b4   :  { %13515 = vsyncadd [#allocation41], 4294958032 }
 0x1b5   :  { %13516 = dma.done.wait [#allocation44], 9600  }
 0x1b6   :  { %13517 = vsyncadd [#allocation44], 4294957696 }
 0x1b7   :  { %13518 = dma.done.wait [#allocation47], 96  }
 0x1b8   :  { %13519 = vsyncadd [#allocation47], 4294967200 }
 0x1b9   :  { %13520 = dma.done.wait [#allocation50], 96  }
 0x1ba   :  { %13521 = vsyncadd [#allocation50], 4294967200 }
 0x1bb   :  { %528 = sfence }
 0x1bc   :  { %v544_v0 = vld [vmem:[#allocation9 + $0x28] sm:$0x11]  ;;  %vm590_vm0 = vcmask 1040384   ;;  %v11388_v3 = vld [vmem:[#allocation9 + $0x4] ss:$20 sps:$4 sm:$0xff]   ;;  %v13597_v4 = vmov 0   ;;  %v735_v23 = vlaneseq }
 0x1bd   :  { %v10075_v1 = vcombine.high %v544_v0, %v544_v0  ;;  %v10074_v2 = vcombine.low %v544_v0, %v544_v0  ;;  %638 = vmatprep.mubr.bf16.mxu0 %v13597_v4  ;;  %11364 = vset.pattern.permute.xlu1 %v13597_v4  ;;  %v545_v5 = vld [vmem:[#allocation9 + $0x30] sm:$0x11]  ;;  %v533_v9 = vld [vmem:[#allocation2 + $0x8] sm:$0xff]  ;;  %v11395_v13 = vld [vmem:[#allocation9 + $0xc] ss:$20 sps:$4 sm:$0xff]   ;;  %vm586_vm1 = vcmask 146432  }
 0x1be   :  { %11363 = vset.pattern.permute.xlu0 %v13597_v4  ;;  %v11390_v7 = vld [vmem:[#allocation9] ss:$20 sps:$4 sm:$0xff]   ;;  %v10077_v10 = vcombine.high %v545_v5, %v545_v5  ;;  %v10076_v11 = vcombine.low %v545_v5, %v545_v5  ;;  %v11393_v15 = vld [vmem:[#allocation9 + $0x8] ss:$20 sps:$4 sm:$0xff]   ;;  %v13598_v17 = vmov 0.0   ;;  %vm13599_vm2 = vmmov 0  }
 0x1bf   :  { %10079 = vmatprep.subr.msk.bf16.mxu0 %vm590_vm0, %v10075_v1  ;;  %v592_v6 = vsel %vm590_vm0, %v10074_v2, 0  ;;  %v532_v8 = vld [vmem:[#allocation2] sm:$0xff]  ;;  %v11396_v16 = vld [vmem:[#allocation9 + $0x38] ss:$0 sps:$4 sm:$0x11]   ;;  %v13867_v26 = vshrl.u32 %v735_v23, 7 }
 0x1c0   :  { %619 = vmatpush1.bf16.msra.mxu0 %v592_v6  ;;  %v537_v12 = vpack.c.bf16 %v533_v9, %v532_v8  ;;  %v598_v14 = vsel %vm590_vm0, %v10076_v11, 0  ;;  %v604_v18 = vsel %vm590_vm0, %v11396_v16, 0  ;;  %v11397_v19 = vld [vmem:[#allocation9 + $0x10] ss:$20 sps:$4 sm:$0xff]   ;;  %v11398_v20 = vld [vmem:[#allocation25 + $0xa8] ss:$12 sps:$4 sm:$0xff]  }
 0x1c1   :  { %620 = vmatprep.subr.bf16.mxu0 %v11388_v3  ;;  %v11400_v21 = vld [vmem:[#allocation25 + $0xac] ss:$12 sps:$4 sm:$0xff]   ;;  %v879_v28 = vld [vmem:[#allocation10] sm:$0x3]  ;;  %v13870_v30 = vsub.s32 0, %v13867_v26  ;;  %v13873_v32 = vsub.s32 1, %v13867_v26 }
 0x1c2   :  { %v733_v36 = vld [vmem:[#allocation21] sm:$0x7]  ;;  %v13878_v38 = vsub.s32 2, %v13867_v26  ;;  %vm897_vm3 = vcmask 523264   ;;  %s14576_s9 = sld [smem:[#allocation73_spill]]  ;;  %vm2017_vm14 = vcmask 130048  }
 0x1c3   :  { %v884_v33 = vrot.slane %v879_v28, %v13870_v30  ;;  %v888_v35 = vrot.slane %v879_v28, %v13873_v32  ;;  %v742_v41 = vrot.slane %v733_v36, %v13873_v32  ;;  %v738_v44 = vrot.slane %v733_v36, %v13870_v30  ;;  %v11403_v16 = vld [vmem:[#allocation25 + $0x94] ss:$12 sps:$4 sm:$0xff]   ;;  %v11410_v28 = vld [vmem:[#allocation15 + $0x64] ss:$8 sps:$4 sm:$0xff]   ;;  %s530_s27 = sld [smem:[#allocation8]]  ;;  %s13612_s18 = smov [#allocation52]  }
 0x1c4   :  { %621 = vmatpush1.bf16.msra.mxu0 %v11390_v7  ;;  %v746_v47 = vrot.slane %v733_v36, %v13878_v38  ;;  %v11418_v36 = vld [vmem:[#allocation25 + $0x48] ss:$12 sps:$4 sm:$0xff]   ;;  %s10068_s24 = sld [smem:[#allocation8 + $0x1]]  ;;  %s10010_s2 = sshll.u32 %s13612_s18, 4  ;;  %s10011_s2 = int_to_ptr.vmem [resolvable:$true] %s10010_s2 }
 0x1c5   :  { %10081 = vmatprep.subr.msk.bf16.mxu0 %vm590_vm0, %v10077_v10  ;;  %s13466_s29 = scalar_lea.vmem %s10011_s2, 32  ;;  %p13471_p2 = scmp.lt.s32.totalorder %s10011_s2, %s10011_s2 }
 0x1c6   :  { %p13467_p1 = scmp.ne.s32.totalorder %s10011_s2, %s13466_s29  ;;  %p13472_p3 = scmp.lt.s32.totalorder %s13466_s29, %s13466_s29 }
 0x1c7   :  { %10080 = vmatmul.mubr.msk.bf16.vlgmr.msra.gmra.mxu0 %vm586_vm1, %v537_v12 }
 0x1c8   :  { %662 = vmatpush1.bf16.msra.mxu0 %v598_v14  ;;  %681 = vmatprep.mubr.bf16.mxu0 %v13597_v4  ;;  %p13473_p4 = por %p13472_p3, %p13471_p2 }
 0x1c9   :  { %663 = vmatprep.subr.bf16.mxu0 %v11395_v13 }
 0x1ca   :  { %p13474_p5 = pnand %p13473_p4, %p13467_p1 }
 0x1cc   :  { %664 = vmatpush1.bf16.msra.mxu0 %v11393_v15 }
 0x1cd   :  { %11200 = vmatprep.subr.bf16.mxu0 %v13598_v17 }
 0x1cf   :  { %10082 = vmatmul.mubr.msk.bf16.vlgmr.msra.gmra.mxu0 %vm586_vm1, %v537_v12 }
 0x1d0   :  { %11201 = vmatpush3.bf16.msra.mxu0 %v604_v18  ;;  %11204 = vmatprep.mubr.msk.bf16.mxu0 %vm13599_vm2, %v13598_v17 }
 0x1d1   :  { %11202 = vmatprep.subr.bf16.mxu0 %v13598_v17 }
 0x1d4   :  { %11203 = vmatpush3.bf16.msra.mxu0 %v11397_v19 }
 0x1d5   :  { %1802 = vmatprep.subr.bf16.mxu0 %v11400_v21 }
 0x1d7   :  { %11205 = vmatmul.mubr.msk.bf16.vlgmr.msra.gmra.mxu0 %vm586_vm1, %v537_v12  ;;  %vm2203_vm1 = vcmask 1041409  }
 0x1d8   :  { %1803 = vmatpush1.bf16.msra.mxu0 %v11398_v20  ;;  %v11401_v20 = vld [vmem:[#allocation25 + $0x90] ss:$12 sps:$4 sm:$0xff]  }
 0x1d9   :  { %1804 = vmatprep.subr.bf16.mxu0 %v11403_v16  ;;  %v11466_v16 = vld [vmem:[#allocation25 + $0x108] ss:$12 sps:$4 sm:$0xff]  }
 0x1dc   :  { %1805 = vmatpush1.bf16.msra.mxu0 %v11401_v20  ;;  %v11474_v20 = vld [vmem:[#allocation25 + $0xf4] ss:$12 sps:$4 sm:$0xff]  }
 0x287   :  { %v640_v22 = vpop.f32.mrf.mxu0 }
 0x288   :  { %v13901_v57 = vadd.f32 %v738_v44, %v640_v22  ;;  %v11404_v22 = vld [vmem:[#allocation15 + $0x74] ss:$8 sps:$4 sm:$0xff]  }
 0x289   :  { %v642_v24 = vpop.f32.mrf.mxu0  ;;  %1150 = vmatprep.subr.bf16.mxu1 %v11404_v22  ;;  %v11475_v22 = vld [vmem:[#allocation15 + $0x80] ss:$8 sps:$4 sm:$0xff]  }
 0x28a   :  { %v13896_v52 = vadd.f32 %v742_v41, %v642_v24  ;;  %v769_v7 = vmul.f32 %v13901_v57, %v13901_v57  ;;  %v11408_v24 = vld [vmem:[#allocation25 + $0x7c] ss:$12 sps:$4 sm:$0xff]  }
 0x28b   :  { %v644_v25 = vpop.f32.mrf.mxu0  ;;  %1806 = vmatprep.subr.bf16.mxu0 %v11408_v24  ;;  %v11478_v24 = vld [vmem:[#allocation25 + $0xdc] ss:$12 sps:$4 sm:$0xff]  }
 0x28c   :  { %v770_v0 = vmul.f32 %v13896_v52, %v13896_v52  ;;  %v13917_v2 = vadd.f32 %v738_v44, %v644_v25  ;;  %v758_v6 = vadd.f32 %v13896_v52, %v13901_v57  ;;  %v11406_v25 = vld [vmem:[#allocation25 + $0x78] ss:$12 sps:$4 sm:$0xff]   ;;  %v11427_v44 = vld [vmem:[#allocation15 + $0x40] ss:$8 sps:$4 sm:$0xff]  }
 0x28d   :  { %v646_v27 = vpop.f32.mrf.mxu0  ;;  %1807 = vmatpush1.bf16.msra.mxu0 %v11406_v25  ;;  %v11481_v25 = vld [vmem:[#allocation25 + $0x22c] ss:$12 sps:$4 sm:$0xff]  }
 0x28e   :  { %v13907_v60 = vadd.f32 %v742_v41, %v646_v27  ;;  %v772_v12 = vmul.f32 %v13917_v2, %v13917_v2  ;;  %v775_v14 = vadd.f32 %v770_v0, %v769_v7  ;;  %v11409_v27 = vld [vmem:[#allocation15 + $0x70] ss:$8 sps:$4 sm:$0xff]   ;;  %v11426_v41 = vld [vmem:[#allocation25 + $0x34] ss:$12 sps:$4 sm:$0xff]  }
 0x28f   :  { %v683_v29 = vpop.f32.mrf.mxu0  ;;  %1151 = vmatpush1.bf16.msra.mxu1 %v11409_v27  ;;  %v11450_v0 = vld [vmem:[#allocation25 + $0x154] ss:$12 sps:$4 sm:$0xff]   ;;  %v11456_v7 = vld [vmem:[#allocation25 + $0x13c] ss:$12 sps:$4 sm:$0xff]   ;;  %v11476_v27 = vld [vmem:[#allocation25 + $0xd8] ss:$12 sps:$4 sm:$0xff]  }
 0x290   :  { %v13909_v61 = vadd.f32 %v746_v47, %v683_v29  ;;  %v773_v8 = vmul.f32 %v13907_v60, %v13907_v60  ;;  %v762_v10 = vadd.f32 %v13907_v60, %v13917_v2  ;;  %v11414_v29 = vld [vmem:[#allocation25 + $0x64] ss:$12 sps:$4 sm:$0xff]   ;;  %1152 = vmatprep.subr.bf16.mxu1 %v11410_v28  ;;  %v11482_v28 = vld [vmem:[#allocation25 + $0xc0] ss:$12 sps:$4 sm:$0xff]  }
 0x291   :  { %v685_v31 = vpop.f32.mrf.mxu0  ;;  %1808 = vmatprep.subr.bf16.mxu0 %v11414_v29  ;;  %v11484_v29 = vld [vmem:[#allocation25 + $0xc4] ss:$12 sps:$4 sm:$0xff]  }
 0x292   :  { %v13880_v39 = vadd.f32 %v884_v33, %v685_v31  ;;  %v759_v9 = vadd.f32 %v758_v6, %v13909_v61  ;;  %v771_v11 = vmul.f32 %v13909_v61, %v13909_v61  ;;  %v779_v19 = vadd.f32 %v773_v8, %v772_v12  ;;  %v11412_v31 = vld [vmem:[#allocation25 + $0x60] ss:$12 sps:$4 sm:$0xff]   ;;  %v11454_v8 = vld [vmem:[#allocation25 + $0x138] ss:$12 sps:$4 sm:$0xff]  }
 0x293   :  { %v687_v34 = vpop.f32.mrf.mxu0  ;;  %1809 = vmatpush1.bf16.msra.mxu0 %v11412_v31  ;;  %v11452_v6 = vld [vmem:[#allocation15 + $0xb4] ss:$8 sps:$4 sm:$0xff]   ;;  %v11491_v31 = vld [vmem:[#allocation25 + $0x170] ss:$12 sps:$4 sm:$0xff]  }
 0x294   :  { %v909_v51 = vmul.f32 %v13880_v39, %v13880_v39  ;;  %v13919_v3 = vadd.f32 %v746_v47, %v687_v34  ;;  %v776_v18 = vadd.f32 %v775_v14, %v771_v11  ;;  %v11416_v34 = vld [vmem:[#allocation15 + $0x54] ss:$8 sps:$4 sm:$0xff]   ;;  %v11462_v11 = vld [vmem:[#allocation25 + $0x124] ss:$12 sps:$4 sm:$0xff]  }
 0x295   :  { %v689_v37 = vpop.f32.mrf.mxu0  ;;  %v11432_v47 = vld [vmem:[#allocation25 + $0x1c] ss:$12 sps:$4 sm:$0xff]   ;;  %v11460_v12 = vld [vmem:[#allocation25 + $0x120] ss:$12 sps:$4 sm:$0xff]  }
 0x296   :  { %v13891_v48 = vadd.f32 %v884_v33, %v689_v37  ;;  %v763_v13 = vadd.f32 %v762_v10, %v13919_v3  ;;  %v774_v15 = vmul.f32 %v13919_v3, %v13919_v3  ;;  %v11415_v33 = vld [vmem:[#allocation15 + $0x60] ss:$8 sps:$4 sm:$0xff]   ;;  %v11421_v37 = vld [vmem:[#allocation15 + $0x50] ss:$8 sps:$4 sm:$0xff]   ;;  %v11458_v10 = vld [vmem:[#allocation15 + $0xa4] ss:$8 sps:$4 sm:$0xff]  }
 0x297   :  { %v726_v40 = vpop.f32.mrf.mxu0  ;;  %1153 = vmatpush1.bf16.msra.mxu1 %v11415_v33  ;;  %v11464_v14 = vld [vmem:[#allocation15 + $0x94] ss:$8 sps:$4 sm:$0xff]  }
 0x298   :  { %v13883_v42 = vadd.f32 %v888_v35, %v726_v40  ;;  %v911_v63 = vmul.f32 %v13891_v48, %v13891_v48  ;;  %v780_v21 = vadd.f32 %v779_v19, %v774_v15  ;;  %1154 = vmatprep.subr.bf16.mxu1 %v11416_v34  ;;  %v11422_v40 = vld [vmem:[#allocation15 + $0x44] ss:$8 sps:$4 sm:$0xff]   ;;  %v535_v33 = vld [vmem:[%s14576_s9 + $0x8] sm:$0xff] }
 0x299   :  { %v11206_v43 = vpop.f32.mrf.mxu0  ;;  %v11468_v15 = vld [vmem:[#allocation25 + $0x10c] ss:$12 sps:$4 sm:$0xff]  }
 0x29a   :  { %v898_v45 = vsel %vm897_vm3, %v13883_v42, 0.0  ;;  %v910_v46 = vmul.f32 %v13883_v42, %v13883_v42  ;;  %v11424_v43 = vld [vmem:[#allocation25 + $0x30] ss:$12 sps:$4 sm:$0xff]  }
 0x29b   :  { %v729_v49 = vpop.f32.mrf.mxu0  ;;  %v899_v50 = vadd.f32 %v898_v45, %v13880_v39  ;;  %1155 = vmatpush1.bf16.msra.mxu1 %v11421_v37  ;;  %v11428_v45 = vld [vmem:[#allocation15 + $0x34] ss:$8 sps:$4 sm:$0xff]   ;;  %v11470_v19 = vld [vmem:[#allocation15 + $0x84] ss:$8 sps:$4 sm:$0xff]  }
 0x29c   :  { %v13898_v53 = vadd.f32 %v888_v35, %v729_v49  ;;  %v913_v54 = vsel %vm897_vm3, %v910_v46, 0.0  ;;  %v11420_v35 = vld [vmem:[#allocation25 + $0x4c] ss:$12 sps:$4 sm:$0xff]   ;;  %1156 = vmatprep.subr.bf16.mxu1 %v11422_v40  ;;  %v11433_v49 = vld [vmem:[#allocation15 + $0x30] ss:$8 sps:$4 sm:$0xff]  }
 0x29d   :  { %900 = vadd.xlane.f32.xlu0 %v899_v50  ;;  %v11207_v55 = vpop.f32.mrf.mxu0  ;;  %v914_v56 = vadd.f32 %v913_v54, %v909_v51  ;;  %1810 = vmatprep.subr.bf16.mxu0 %v11420_v35  ;;  %v11430_v46 = vld [vmem:[#allocation25 + $0x18] ss:$12 sps:$4 sm:$0xff]   ;;  %v11436_v54 = vld [vmem:[#allocation25] ss:$12 sps:$4 sm:$0xff]   ;;  %v13600_v35 = vmov 1  }
 0x29e   :  { %v902_v58 = vsel %vm897_vm3, %v13898_v53, 0.0  ;;  %v912_v59 = vmul.f32 %v13898_v53, %v13898_v53  ;;  %1811 = vmatpush1.bf16.msra.mxu0 %v11418_v36  ;;  %v11434_v50 = vld [vmem:[#allocation15 + $0x24] ss:$8 sps:$4 sm:$0xff]   ;;  %v11439_v55 = vld [vmem:[#allocation15 + $0x20] ss:$8 sps:$4 sm:$0xff]  }
 0x29f   :  { %915 = vadd.xlane.f32.xlu1 %v914_v56  ;;  %v903_v62 = vadd.f32 %v902_v58, %v13891_v48  ;;  %1812 = vmatprep.subr.bf16.mxu0 %v11426_v41  ;;  %v11438_v51 = vld [vmem:[#allocation25 + $0x4] ss:$12 sps:$4 sm:$0xff]   ;;  %v11440_v56 = vld [vmem:[#allocation15 + $0x14] ss:$8 sps:$4 sm:$0xff]   ;;  %v11444_v58 = vld [vmem:[#allocation25 + $0x16c] ss:$12 sps:$4 sm:$0xff]  }
 0x2a0   :  { %v917_v1 = vsel %vm897_vm3, %v912_v59, 0.0  ;;  %1157 = vmatpush1.bf16.msra.mxu1 %v11427_v44  ;;  %v11442_v59 = vld [vmem:[#allocation25 + $0x168] ss:$12 sps:$4 sm:$0xff]   ;;  %v534_v34 = vld [vmem:[%s14576_s9] sm:$0xff] }
 0x2a1   :  { %904 = vadd.xlane.f32.xlu0 %v903_v62  ;;  %v918_v5 = vadd.f32 %v917_v1, %v911_v63  ;;  %1158 = vmatprep.subr.bf16.mxu1 %v11428_v45  ;;  %v11445_v62 = vld [vmem:[#allocation15 + $0x10] ss:$8 sps:$4 sm:$0xff]   ;;  %v11446_v63 = vld [vmem:[#allocation15 + $0x4] ss:$8 sps:$4 sm:$0xff]  }
 0x2a2   :  { %1813 = vmatpush1.bf16.msra.mxu0 %v11424_v43  ;;  %v11448_v1 = vld [vmem:[#allocation25 + $0x150] ss:$12 sps:$4 sm:$0xff]  }
 0x2a3   :  { %919 = vadd.xlane.f32.xlu1 %v918_v5  ;;  %1814 = vmatprep.subr.bf16.mxu0 %v11432_v47  ;;  %v11451_v5 = vld [vmem:[#allocation15] ss:$8 sps:$4 sm:$0xff]  }
 0x2a4   :  { %1159 = vmatpush1.bf16.msra.mxu1 %v11433_v49  ;;  %v13601_v49 = vmov 2  }
 0x2a5   :  { %760 = vadd.xlane.f32.xlu0 %v759_v9  ;;  %1160 = vmatprep.subr.bf16.mxu1 %v11434_v50  ;;  %v11457_v9 = vld [vmem:[#allocation15 + $0xb0] ss:$8 sps:$4 sm:$0xff]  }
 0x2a6   :  { %1815 = vmatpush1.bf16.msra.mxu0 %v11430_v46 }
 0x2a7   :  { %764 = vadd.xlane.f32.xlu1 %v763_v13  ;;  %1816 = vmatprep.subr.bf16.mxu0 %v11438_v51  ;;  %v11463_v13 = vld [vmem:[#allocation15 + $0xa0] ss:$8 sps:$4 sm:$0xff]  }
 0x2a8   :  { %1161 = vmatpush1.bf16.msra.mxu1 %v11439_v55 }
 0x2a9   :  { %777 = vadd.xlane.f32.xlu0 %v776_v18  ;;  %1162 = vmatprep.subr.bf16.mxu1 %v11440_v56  ;;  %v11469_v18 = vld [vmem:[#allocation15 + $0x90] ss:$8 sps:$4 sm:$0xff]  }
 0x2aa   :  { %1817 = vmatpush1.bf16.msra.mxu0 %v11436_v54 }
 0x2ab   :  { %781 = vadd.xlane.f32.xlu1 %v780_v21  ;;  %1818 = vmatprep.subr.bf16.mxu0 %v11444_v58  ;;  %v11472_v21 = vld [vmem:[#allocation25 + $0xf0] ss:$12 sps:$4 sm:$0xff]  }
 0x2ac   :  { %1163 = vmatpush1.bf16.msra.mxu1 %v11445_v62 }
 0x2ad   :  { %1164 = vmatprep.subr.bf16.mxu1 %v11446_v63 }
 0x2ae   :  { %1819 = vmatpush2.bf16.msra.mxu0 %v11442_v59 }
 0x2af   :  { %1820 = vmatprep.subr.bf16.mxu0 %v11450_v0 }
 0x2b0   :  { %1165 = vmatpush1.bf16.msra.mxu1 %v11451_v5 }
 0x2b1   :  { %1174 = vmatprep.subr.bf16.mxu1 %v11452_v6 }
 0x2b2   :  { %1821 = vmatpush2.bf16.msra.mxu0 %v11448_v1 }
 0x2b3   :  { %1822 = vmatprep.subr.bf16.mxu0 %v11456_v7 }
 0x2b4   :  { %1175 = vmatpush2.bf16.msra.mxu1 %v11457_v9 }
 0x2b5   :  { %1176 = vmatprep.subr.bf16.mxu1 %v11458_v10  ;;  %v895_v10 = vld [vmem:[#allocation12] sm:$0x3] }
 0x2b6   :  { %1823 = vmatpush2.bf16.msra.mxu0 %v11454_v8 }
 0x2b7   :  { %1824 = vmatprep.subr.bf16.mxu0 %v11462_v11 }
 0x2b8   :  { %1177 = vmatpush2.bf16.msra.mxu1 %v11463_v13  ;;  %v896_v13 = vld [vmem:[#allocation13] sm:$0x3] }
 0x2b9   :  { %1178 = vmatprep.subr.bf16.mxu1 %v11464_v14 }
 0x2ba   :  { %1825 = vmatpush2.bf16.msra.mxu0 %v11460_v12 }
 0x2bb   :  { %1826 = vmatprep.subr.bf16.mxu0 %v11468_v15  ;;  %v943_v15 = vrot.slane %v895_v10, %v13870_v30 }
 0x2bc   :  { %1179 = vmatpush2.bf16.msra.mxu1 %v11469_v18  ;;  %1242 = vperm.xlu1 %11364, %v535_v33  }
 0x2bd   :  { %1180 = vmatprep.subr.bf16.mxu1 %v11470_v19  ;;  %v947_v19 = vrot.slane %v895_v10, %v13873_v32 }
 0x2be   :  { %1827 = vmatpush2.bf16.msra.mxu0 %v11466_v16 }
 0x2bf   :  { %1828 = vmatprep.subr.bf16.mxu0 %v11474_v20  ;;  %1237 = vperm.xlu0 %11363, %v534_v34  }
 0x2c0   :  { %1181 = vmatpush2.bf16.msra.mxu1 %v11475_v22  ;;  %11365 = vset.pattern.permute.xlu1 %v13600_v35  ;;  %v958_v22 = vrot.slane %v896_v13, %v13870_v30 }
 0x2c1   :  { %1845 = vmatprep.subr.bf16.mxu1 %v11481_v25  ;;  %1252 = vperm.xlu1 %11365, %v534_v34  }
 0x2c2   :  { %1829 = vmatpush2.bf16.msra.mxu0 %v11472_v21 }
 0x2c3   :  { %1830 = vmatprep.subr.bf16.mxu0 %v11478_v24  ;;  %v962_v24 = vrot.slane %v896_v13, %v13873_v32 }
 0x2c5   :  { %1256 = vperm.xlu1 %11365, %v535_v33  }
 0x2c6   :  { %1831 = vmatpush2.bf16.msra.mxu0 %v11476_v27 }
 0x2c7   :  { %1832 = vmatprep.subr.bf16.mxu0 %v11484_v29 }
 0x2c9   :  { %11366 = vset.pattern.permute.xlu1 %v13601_v49 }
 0x2ca   :  { %1833 = vmatpush2.bf16.msra.mxu0 %v11482_v28  ;;  %1268 = vperm.xlu1 %11366, %v534_v34   ;;  %v756_v34 = vld [vmem:[#allocation22] sm:$0x7] }
 0x2cb   :  { %11083 = vmatprep.subr.bf16.mxu0 %v11491_v31 }
 0x2ce   :  { %1272 = vperm.xlu1 %11366, %v535_v33  }
 0x2d2   :  { %11367 = vset.pattern.permute.xlu1 %v13597_v4 }
 0x326   :  { %v901_v36 = vpop.xlane.xlu0 %900 }
 0x327   :  { %v907_v37 = vmul.f32 0.0052083335, %v901_v36 }
 0x328   :  { %v916_v40 = vpop.xlane.xlu1 %915 }
 0x329   :  { %v921_v41 = vmul.f32 0.0052083335, %v916_v40  ;;  %v923_v43 = vmul.f32 %v907_v37, %v907_v37  ;;  %v927_v16 = vsub.f32 %v13880_v39, %v907_v37  ;;  %v928_v18 = vsub.f32 %v13883_v42, %v907_v37  ;;  %v757_v40 = vld [vmem:[#allocation24] sm:$0x7] }
 0x32a   :  { %v905_v44 = vpop.xlane.xlu0 %904 }
 0x32b   :  { %v925_v45 = vsub.f32 %v921_v41, %v923_v43  ;;  %v908_v46 = vmul.f32 0.0052083335, %v905_v44 }
 0x32c   :  { %v920_v47 = vpop.xlane.xlu1 %919 }
 0x32d   :  { %v931_v50 = vadd.f32 1e-06, %v925_v45  ;;  %v922_v51 = vmul.f32 0.0052083335, %v920_v47  ;;  %v924_v54 = vmul.f32 %v908_v46, %v908_v46  ;;  %v929_v29 = vsub.f32 %v13891_v48, %v908_v46 }
 0x32e   :  { %v761_v55 = vpop.xlane.xlu0 %760  ;;  %v930_v31 = vsub.f32 %v13898_v53, %v908_v46  ;;  %v813_v47 = vrot.slane %v756_v34, %v13873_v32  ;;  %v835_v46 = vrot.slane %v757_v40, %v13873_v32 }
 0x32f   :  { %12756 = vrsqrt.f32 %v931_v50  ;;  %v13941_v56 = vmul.f32 0.0026041667, %v761_v55  ;;  %v926_v58 = vsub.f32 %v922_v51, %v924_v54  ;;  %v809_v50 = vrot.slane %v756_v34, %v13870_v30 }
 0x330   :  { %v765_v59 = vpop.xlane.xlu1 %764 }
 0x331   :  { %v13943_v62 = vmul.f32 0.0026041667, %v765_v59  ;;  %v932_v63 = vadd.f32 1e-06, %v926_v58  ;;  %v785_v1 = vmul.f32 %v13941_v56, %v13941_v56  ;;  %v789_v48 = vsub.f32 %v13901_v57, %v13941_v56 }
 0x332   :  { %v778_v0 = vpop.xlane.xlu0 %777  ;;  %v790_v53 = vsub.f32 %v13896_v52, %v13941_v56 }
 0x333   :  { %v783_v5 = vmul.f32 0.0026041667, %v778_v0  ;;  %12758 = vrsqrt.f32 %v932_v63  ;;  %v786_v8 = vmul.f32 %v13943_v62, %v13943_v62  ;;  %v792_v54 = vsub.f32 %v13917_v2, %v13943_v62 }
 0x334   :  { %v782_v6 = vpop.xlane.xlu1 %781  ;;  %v793_v59 = vsub.f32 %v13907_v60, %v13943_v62 }
 0x335   :  { %v787_v7 = vsub.f32 %v783_v5, %v785_v1  ;;  %v784_v9 = vmul.f32 0.0026041667, %v782_v6  ;;  %v831_v5 = vrot.slane %v757_v40, %v13870_v30 }
 0x337   :  { %v795_v11 = vadd.f32 1e-06, %v787_v7  ;;  %v788_v12 = vsub.f32 %v784_v9, %v786_v8 }
 0x339   :  { %12760 = vrsqrt.f32 %v795_v11  ;;  %v796_v14 = vadd.f32 1e-06, %v788_v12 }
 0x33b   :  { %12762 = vrsqrt.f32 %v796_v14 }
 0x33c   :  { %v12757_v20 = vpop.eup %12756 }
 0x33d   :  { %v936_v21 = vmul.f32 %v12757_v20, %v928_v18  ;;  %v935_v25 = vmul.f32 %v12757_v20, %v927_v16  ;;  %v794_v20 = vsub.f32 %v13919_v3, %v13943_v62 }
 0x33f   :  { %v951_v27 = vmul.f32 %v947_v19, %v936_v21  ;;  %v950_v28 = vmul.f32 %v943_v15, %v935_v25 }
 0x340   :  { %v12759_v33 = vpop.eup %12758 }
 0x341   :  { %v13958_v39 = vadd.f32 %v962_v24, %v951_v27  ;;  %v13960_v42 = vadd.f32 %v958_v22, %v950_v28  ;;  %v938_v36 = vmul.f32 %v12759_v33, %v930_v31  ;;  %v937_v37 = vmul.f32 %v12759_v33, %v929_v29 }
 0x342   :  { %v817_v31 = vrot.slane %v756_v34, %v13878_v38 }
 0x343   :  { %v975_v41 = vmul.f32 1.442695, %v13958_v39  ;;  %v973_v43 = vmul.f32 1.442695, %v13960_v42  ;;  %v953_v44 = vmul.f32 %v947_v19, %v938_v36  ;;  %v952_v45 = vmul.f32 %v943_v15, %v937_v37 }
 0x344   :  { %v839_v37 = vrot.slane %v757_v40, %v13878_v38  ;;  %vm970_vm4 = vcmp.gt.f32.partialorder %v13958_v39, 0.0  ;;  %vm969_vm6 = vcmp.gt.f32.partialorder %v13960_v42, 0.0  ;;  %v11487_v40 = vld [vmem:[#allocation25 + $0x214] ss:$12 sps:$4 sm:$0xff]  }
 0x345   :  { %v968_v55 = vadd.f32 %v962_v24, %v953_v44  ;;  %12764 = vpow2.f32 %v975_v41  ;;  %v967_v58 = vadd.f32 %v958_v22, %v952_v45  ;;  %v791_v22 = vsub.f32 %v13909_v61, %v13941_v56  ;;  %v11479_v56 = vld [vmem:[#allocation25 + $0x228] ss:$12 sps:$4 sm:$0xff]  }
 0x346   :  { %v12761_v51 = vpop.eup %12760  ;;  %12766 = vpow2.f32 %v973_v43 }
 0x347   :  { %v800_v63 = vmul.f32 %v12761_v51, %v790_v53  ;;  %v799_v57 = vmul.f32 %v12761_v51, %v789_v48  ;;  %v979_v1 = vmul.f32 1.442695, %v968_v55  ;;  %v977_v52 = vmul.f32 1.442695, %v967_v58 }
 0x348   :  { %v12763_v0 = vpop.eup %12762  ;;  %v801_v29 = vmul.f32 %v12761_v51, %v791_v22  ;;  %vm972_vm5 = vcmp.gt.f32.partialorder %v968_v55, 0.0  ;;  %vm971_vm7 = vcmp.gt.f32.partialorder %v967_v58, 0.0  ;;  %v11511_v22 = vld [vmem:[#allocation25 + $0x110] ss:$12 sps:$4 sm:$0xff]  }
 0x349   :  { %v803_v6 = vmul.f32 %v12763_v0, %v793_v59  ;;  %v822_v7 = vmul.f32 %v813_v47, %v800_v63  ;;  %v802_v8 = vmul.f32 %v12763_v0, %v792_v54  ;;  %v821_v9 = vmul.f32 %v809_v50, %v799_v57 }
 0x34a   :  { %12768 = vpow2.f32 %v979_v1  ;;  %v804_v24 = vmul.f32 %v12763_v0, %v794_v20  ;;  %v823_v45 = vmul.f32 %v817_v31, %v801_v29  ;;  %v11507_v20 = vld [vmem:[#allocation25 + $0x68] ss:$12 sps:$4 sm:$0xff]   ;;  %v11516_v29 = vld [vmem:[#allocation25 + $0xf8] ss:$12 sps:$4 sm:$0xff]  }
 0x34b   :  { %12770 = vpow2.f32 %v977_v52  ;;  %v825_v2 = vmul.f32 %v813_v47, %v803_v6  ;;  %v844_v10 = vadd.f32 %v835_v46, %v822_v7  ;;  %v824_v11 = vmul.f32 %v809_v50, %v802_v8  ;;  %v11492_v7 = vld [vmem:[#allocation25 + $0xb0] ss:$12 sps:$4 sm:$0xff]   ;;  %v11488_v8 = vld [vmem:[#allocation25 + $0x1f8] ss:$12 sps:$4 sm:$0xff]  }
 0x34c   :  { %v13976_v12 = vadd.f32 %v831_v5, %v821_v9  ;;  %v826_v3 = vmul.f32 %v817_v31, %v804_v24  ;;  %v11510_v24 = vld [vmem:[#allocation25 + $0x19c] ss:$12 sps:$4 sm:$0xff]  }
 0x34d   :  { %v847_v60 = vadd.f32 %v835_v46, %v825_v2  ;;  %v857_v13 = vmul.f32 1.442695, %v844_v10  ;;  %v13978_v14 = vadd.f32 %v831_v5, %v824_v11  ;;  %vm850_vm8 = vcmp.gt.f32.partialorder %v844_v10, 0.0  ;;  %v11496_v2 = vld [vmem:[#allocation25 + $0x158] ss:$12 sps:$4 sm:$0xff]  }
 0x34e   :  { %v855_v15 = vmul.f32 1.442695, %v13976_v12  ;;  %v13993_v50 = vadd.f32 %v839_v37, %v826_v3  ;;  %vm849_vm10 = vcmp.gt.f32.partialorder %v13976_v12, 0.0 }
 0x34f   :  { %12772 = vpow2.f32 %v857_v13  ;;  %v863_v16 = vmul.f32 1.442695, %v847_v60  ;;  %v861_v18 = vmul.f32 1.442695, %v13978_v14  ;;  %vm853_vm9 = vcmp.gt.f32.partialorder %v847_v60, 0.0 }
 0x350   :  { %12774 = vpow2.f32 %v855_v15  ;;  %vm852_vm11 = vcmp.gt.f32.partialorder %v13978_v14, 0.0  ;;  %v865_v1 = vmul.f32 1.442695, %v13993_v50  ;;  %v11501_v13 = vld [vmem:[#allocation25 + $0x140] ss:$12 sps:$4 sm:$0xff]   ;;  %vm854_vm12 = vcmp.gt.f32.partialorder %v13993_v50, 0.0 }
 0x351   :  { %12776 = vpow2.f32 %v863_v16  ;;  %v11502_v15 = vld [vmem:[#allocation25 + $0x80] ss:$12 sps:$4 sm:$0xff]   ;;  %v11498_v16 = vld [vmem:[#allocation25 + $0x1c8] ss:$12 sps:$4 sm:$0xff]  }
 0x352   :  { %12778 = vpow2.f32 %v861_v18  ;;  %v12765_v19 = vpop.eup %12764  ;;  %v11506_v18 = vld [vmem:[#allocation25 + $0x128] ss:$12 sps:$4 sm:$0xff]  }
 0x353   :  { %v12767_v21 = vpop.eup %12766  ;;  %v10091_v25 = vadd.f32 -1.0, %v12765_v19  ;;  %12780 = vpow2.f32 %v865_v1  ;;  %v11505_v19 = vld [vmem:[#allocation25 + $0x1b4] ss:$12 sps:$4 sm:$0xff]   ;;  %v536_v1 = vld [vmem:[#allocation6] sm:$0x3] }
 0x354   :  { %v10090_v28 = vadd.f32 -1.0, %v12767_v21  ;;  %v11503_v21 = vld [vmem:[#allocation25 + $0x1b0] ss:$12 sps:$4 sm:$0xff]  }
 0x355   :  { %v986_v62 = vsel %vm970_vm4, %v13958_v39, %v10091_v25 }
 0x356   :  { %v985_v44 = vsel %vm969_vm6, %v13960_v42, %v10090_v28  ;;  %v13996_v42 = vadd.f32 %v839_v37, %v823_v45  ;;  %v11508_v28 = vld [vmem:[#allocation25 + $0x198] ss:$12 sps:$4 sm:$0xff]  }
 0x357   :  { %v12769_v27 = vpop.eup %12768  ;;  %v11517_v37 = vld [vmem:[#allocation25 + $0x38] ss:$12 sps:$4 sm:$0xff]  }
 0x358   :  { %v12771_v33 = vpop.eup %12770  ;;  %v10093_v36 = vadd.f32 -1.0, %v12769_v27  ;;  %v859_v11 = vmul.f32 1.442695, %v13996_v42  ;;  %v11512_v27 = vld [vmem:[#allocation25 + $0x50] ss:$12 sps:$4 sm:$0xff]   ;;  %vm851_vm13 = vcmp.gt.f32.partialorder %v13996_v42, 0.0 }
 0x359   :  { %v10092_v41 = vadd.f32 -1.0, %v12771_v33  ;;  %v11515_v33 = vld [vmem:[#allocation25 + $0x184] ss:$12 sps:$4 sm:$0xff]  }
 0x35a   :  { %v988_v43 = vsel %vm972_vm5, %v968_v55, %v10093_v36  ;;  %v11485_v55 = vld [vmem:[#allocation25 + $0x210] ss:$12 sps:$4 sm:$0xff]   ;;  %12782 = vpow2.f32 %v859_v11 }
 0x35b   :  { %v990_v61 = vpack.c.bf16 %v988_v43, %v986_v62  ;;  %v987_v34 = vsel %vm971_vm7, %v967_v58, %v10092_v41  ;;  %v11490_v58 = vld [vmem:[#allocation25 + $0x1fc] ss:$12 sps:$4 sm:$0xff]   ;;  %v11513_v41 = vld [vmem:[#allocation25 + $0x180] ss:$12 sps:$4 sm:$0xff]  }
 0x35c   :  { %v12773_v47 = vpop.eup %12772  ;;  %v989_v48 = vpack.c.bf16 %v987_v34, %v985_v44  ;;  %v11518_v62 = vld [vmem:[#allocation25 + $0xe0] ss:$12 sps:$4 sm:$0xff]   ;;  %v11520_v44 = vld [vmem:[#allocation25 + $0x230] ss:$12 sps:$4 sm:$0xff]   ;;  %v11521_v34 = vld [vmem:[#allocation25 + $0xc8] ss:$12 sps:$4 sm:$0xff]  }
 0x35d   :  { %v12775_v53 = vpop.eup %12774  ;;  %10118 = vmatprep.mubr.msk.bf16.mxu1 %vm897_vm3, %v990_v61  ;;  %v10085_v46 = vadd.f32 -1.0, %v12773_v47  ;;  %v11519_v61 = vld [vmem:[#allocation25 + $0x20] ss:$12 sps:$4 sm:$0xff]   ;;  %v11522_v47 = vld [vmem:[#allocation25 + $0x8] ss:$12 sps:$4 sm:$0xff]  }
 0x35e   :  { %v12777_v39 = vpop.eup %12776  ;;  %1183 = vmatmul.mubr.bf16.vlgmr.msra.gmra.mxu1 %v989_v48  ;;  %v10084_v51 = vadd.f32 -1.0, %v12775_v53  ;;  %v11523_v48 = vld [vmem:[#allocation25 + $0x218] ss:$12 sps:$4 sm:$0xff]   ;;  %v11525_v53 = vld [vmem:[#allocation25 + $0x1e8] ss:$12 sps:$4 sm:$0xff]  }
 0x35f   :  { %v12779_v54 = vpop.eup %12778  ;;  %1846 = vmatpush1.bf16.msra.mxu1 %v11479_v56  ;;  %v10088_v59 = vadd.f32 -1.0, %v12777_v39  ;;  %1877 = vmatprep.mubr.bf16.mxu1 %v13597_v4  ;;  %v874_v57 = vsel %vm850_vm8, %v844_v10, %v10085_v46  ;;  %v11495_v10 = vld [vmem:[#allocation25 + $0x1e4] ss:$12 sps:$4 sm:$0xff]   ;;  %v11528_v39 = vld [vmem:[#allocation25 + $0x1a0] ss:$12 sps:$4 sm:$0xff]  }
 0x360   :  { %1847 = vmatprep.subr.bf16.mxu1 %v11487_v40  ;;  %v10087_v63 = vadd.f32 -1.0, %v12779_v54  ;;  %v873_v5 = vsel %vm849_vm10, %v13976_v12, %v10084_v51  ;;  %v11493_v12 = vld [vmem:[#allocation25 + $0x1e0] ss:$12 sps:$4 sm:$0xff]   ;;  %v12781_v25 = vpop.eup %12780  ;;  %v11526_v46 = vld [vmem:[#allocation25 + $0x1d0] ss:$12 sps:$4 sm:$0xff]   ;;  %vm9007_vm10 = vcmask 1045504  }
 0x361   :  { %v877_v0 = vsel %vm853_vm9, %v847_v60, %v10088_v59  ;;  %v11497_v60 = vld [vmem:[#allocation25 + $0x98] ss:$12 sps:$4 sm:$0xff]   ;;  %v10089_v36 = vadd.f32 -1.0, %v12781_v25  ;;  %v11524_v40 = vld [vmem:[#allocation25 + $0x200] ss:$12 sps:$4 sm:$0xff]  }
 0x362   :  { %v1303_v52 = vpack.c.bf16 %v877_v0, %v874_v57  ;;  %v876_v6 = vsel %vm852_vm11, %v13978_v14, %v10087_v63  ;;  %v11500_v14 = vld [vmem:[#allocation25 + $0x1cc] ss:$12 sps:$4 sm:$0xff]   ;;  %v11529_v51 = vld [vmem:[#allocation25 + $0x188] ss:$12 sps:$4 sm:$0xff]   ;;  %vm9003_vm11 = vcmask 97280  }
 0x363   :  { %1848 = vmatpush1.bf16.msra.mxu1 %v11485_v55  ;;  %v14003_v9 = vpack.c.bf16 %v876_v6, %v873_v5  ;;  %v878_v43 = vsel %vm854_vm12, %v13993_v50, %v10089_v36  ;;  %v11527_v50 = vld [vmem:[#allocation25 + $0x1b8] ss:$12 sps:$4 sm:$0xff]   ;;  %v1015_v54 = vld [vmem:[#allocation16] sm:$0x3]  ;;  %v11535_v6 = vld [vmem:[#allocation30 + $0xc] ss:$16 sps:$4 sm:$0xff]  }
 0x364   :  { %1834 = vmatprep.mubr.bf16.mxu0 %v1303_v52  ;;  %1849 = vmatprep.subr.bf16.mxu1 %v11490_v58  ;;  %v1020_v55 = vrot.slane %v1015_v54, %v13870_v30  ;;  %v1024_v59 = vrot.slane %v1015_v54, %v13873_v32  ;;  %v11530_v57 = vld [vmem:[#allocation30] ss:$16 sps:$4 sm:$0xff]   ;;  %v11532_v0 = vld [vmem:[#allocation30 + $0x4] ss:$16 sps:$4 sm:$0xff]  }
 0x365   :  { %1835 = vmatmul.mubr.bf16.vlgmr.msra.gmra.mxu0 %v14003_v9 }
 0x366   :  { %11084 = vmatpush3.bf16.msra.mxu0 %v11492_v7  ;;  %1920 = vmatprep.mubr.bf16.mxu0 %v1303_v52  ;;  %v14025_v52 = vpop.permute.xlu1 %1242 }
 0x367   :  { %1850 = vmatpush1.bf16.msra.mxu1 %v11488_v8  ;;  %11085 = vmatprep.subr.bf16.mxu0 %v11496_v2  ;;  %v12783_v31 = vpop.eup %12782  ;;  %v1970_v8 = vpack.c.bf16 %v536_v1, %v536_v1  ;;  %v11538_v2 = vld [vmem:[#allocation28 + $0xe4] ss:$16 sps:$4 sm:$0xff]  }
 0x368   :  { %1851 = vmatprep.subr.bf16.mxu1 %v11495_v10  ;;  %v10086_v3 = vadd.f32 -1.0, %v12783_v31  ;;  %v11533_v10 = vld [vmem:[#allocation30 + $0x8] ss:$16 sps:$4 sm:$0xff]  }
 0x36a   :  { %11086 = vmatpush3.bf16.msra.mxu0 %v11497_v60  ;;  %v875_v56 = vsel %vm851_vm13, %v13996_v42, %v10086_v3 }
 0x36b   :  { %1852 = vmatpush1.bf16.msra.mxu1 %v11493_v12  ;;  %11087 = vmatprep.subr.bf16.mxu0 %v11501_v13  ;;  %v1304_v45 = vpack.c.bf16 %v878_v43, %v875_v56  ;;  %v11541_v12 = vld [vmem:[#allocation28 + $0xec] ss:$16 sps:$4 sm:$0xff]  }
 0x36c   :  { %1853 = vmatprep.subr.bf16.mxu1 %v11500_v14  ;;  %v1253_v14 = vpop.permute.xlu1 %1252 }
 0x36e   :  { %11088 = vmatpush3.bf16.msra.mxu0 %v11502_v15  ;;  %v1234_v15 = vld [vmem:[#allocation18] sm:$0x7] }
 0x36f   :  { %1854 = vmatpush1.bf16.msra.mxu1 %v11498_v16  ;;  %11089 = vmatprep.subr.bf16.mxu0 %v11506_v18  ;;  %v11539_v16 = vld [vmem:[#allocation28 + $0xe8] ss:$16 sps:$4 sm:$0xff]   ;;  %v1248_v18 = vrot.slane %v1234_v15, %v13870_v30 }
 0x370   :  { %1855 = vmatprep.subr.bf16.mxu1 %v11505_v19  ;;  %v1262_v19 = vrot.slane %v1234_v15, %v13873_v32 }
 0x372   :  { %11090 = vmatpush3.bf16.msra.mxu0 %v11507_v20  ;;  %v1257_v20 = vpop.permute.xlu1 %1256 }
 0x373   :  { %1856 = vmatpush1.bf16.msra.mxu1 %v11503_v21  ;;  %11091 = vmatprep.subr.bf16.mxu0 %v11511_v22  ;;  %v1238_v21 = vpop.permute.xlu0 %1237 }
 0x374   :  { %1857 = vmatprep.subr.bf16.mxu1 %v11510_v24  ;;  %v1205_v24 = vstv %s530_s27  ;;  %v1249_v31 = vmul.f32 %v1248_v18, %v1238_v21 }
 0x376   :  { %11092 = vmatpush3.bf16.msra.mxu0 %v11512_v27 }
 0x377   :  { %1858 = vmatpush1.bf16.msra.mxu1 %v11508_v28  ;;  %11093 = vmatprep.subr.bf16.mxu0 %v11516_v29  ;;  %v1263_v28 = vmul.f32 %v1262_v19, %v1253_v14  ;;  %v1278_v29 = vrot.slane %v1234_v15, %v13878_v38 }
 0x378   :  { %1859 = vmatprep.subr.bf16.mxu1 %v11515_v33 }
 0x37a   :  { %11094 = vmatpush3.bf16.msra.mxu0 %v11517_v37 }
 0x37b   :  { %1860 = vmatpush1.bf16.msra.mxu1 %v11513_v41  ;;  %11095 = vmatprep.subr.bf16.mxu0 %v11518_v62  ;;  %v1269_v62 = vpop.permute.xlu1 %1268 }
 0x37c   :  { %11208 = vmatprep.subr.bf16.mxu1 %v13598_v17 }
 0x37e   :  { %1878 = vmatmul.mubr.bf16.vlgmr.msra.gmra.mxu1 %v1304_v45  ;;  %11096 = vmatpush3.bf16.msra.mxu0 %v11519_v61 }
 0x37f   :  { %11209 = vmatpush3.bf16.msra.mxu1 %v11520_v44  ;;  %11097 = vmatprep.subr.bf16.mxu0 %v11521_v34  ;;  %v1279_v44 = vmul.f32 %v1278_v29, %v1269_v62  ;;  %v1265_v34 = vadd.f32 %v1263_v28, %v1249_v31 }
 0x380   :  { %11210 = vmatprep.subr.bf16.mxu1 %v13598_v17  ;;  %11224 = vmatprep.mubr.msk.bf16.mxu1 %vm13599_vm2, %v13598_v17 }
 0x382   :  { %11098 = vmatpush3.bf16.msra.mxu0 %v11522_v47 }
 0x383   :  { %11211 = vmatpush3.bf16.msra.mxu1 %v11523_v48  ;;  %2035 = vmatprep.subr.bf16.mxu0 %v11532_v0 }
 0x384   :  { %11212 = vmatprep.subr.bf16.mxu1 %v13598_v17 }
 0x385   :  { %1921 = vmatmul.mubr.bf16.vlgmr.msra.gmra.mxu0 %v14003_v9  ;;  %v11536_v9 = vld [vmem:[#allocation28 + $0xe0] ss:$16 sps:$4 sm:$0xff]  }
 0x386   :  { %2053 = vmatprep.mubr.bf16.mxu0 %v13597_v4  ;;  %2036 = vmatpush1.bf16.msra.mxu0 %v11530_v57 }
 0x387   :  { %11213 = vmatpush3.bf16.msra.mxu1 %v11524_v40  ;;  %2076 = vmatprep.subr.bf16.mxu0 %v11535_v6  ;;  %v14033_v40 = vld [vmem:[#allocation27] sm:$0x7] }
 0x388   :  { %11214 = vmatprep.subr.bf16.mxu1 %v13598_v17 }
 0x38b   :  { %11215 = vmatpush3.bf16.msra.mxu1 %v11525_v53 }
 0x38c   :  { %11216 = vmatprep.subr.bf16.mxu1 %v13598_v17 }
 0x38d   :  { %10202 = vmatmul.mubr.msk.bf16.vlgmr.msra.gmra.mxu0 %vm2017_vm14, %v1970_v8 }
 0x38e   :  { %2077 = vmatpush1.bf16.msra.mxu0 %v11533_v10  ;;  %2094 = vmatprep.mubr.bf16.mxu0 %v13597_v4 }
 0x38f   :  { %11217 = vmatpush3.bf16.msra.mxu1 %v11526_v46  ;;  %2493 = vmatprep.subr.bf16.mxu0 %v11541_v12 }
 0x390   :  { %11218 = vmatprep.subr.bf16.mxu1 %v13598_v17 }
 0x393   :  { %11219 = vmatpush3.bf16.msra.mxu1 %v11527_v50 }
 0x394   :  { %11220 = vmatprep.subr.bf16.mxu1 %v13598_v17 }
 0x395   :  { %10203 = vmatmul.mubr.msk.bf16.vlgmr.msra.gmra.mxu0 %vm2017_vm14, %v1970_v8 }
 0x396   :  { %2494 = vmatpush1.bf16.msra.mxu0 %v11539_v16 }
 0x397   :  { %11221 = vmatpush3.bf16.msra.mxu1 %v11528_v39  ;;  %v1281_v39 = vadd.f32 %v1279_v44, %v1265_v34  ;;  %v11542_v44 = vld [vmem:[#allocation28 + $0xc0] ss:$16 sps:$4 sm:$0xff]   ;;  %v11545_v34 = vld [vmem:[#allocation28 + $0xc8] ss:$16 sps:$4 sm:$0xff]  }
 0x398   :  { %11222 = vmatprep.subr.bf16.mxu1 %v13598_v17 }
 0x39b   :  { %11223 = vmatpush3.bf16.msra.mxu1 %v11529_v51  ;;  %v1250_v51 = vmul.f32 %v1248_v18, %v14025_v52 }
 0x39c   :  { %2452 = vmatprep.subr.bf16.mxu1 %v11538_v2 }
 0x39e   :  { %11225 = vmatmul.mubr.bf16.vlgmr.msra.gmra.mxu1 %v1304_v45 }
 0x39f   :  { %2453 = vmatpush1.bf16.msra.mxu1 %v11536_v9 }
 0x41e   :  { %v1184_v42 = vpop.f32.mrf.mxu1 }
 0x41f   :  { %v1185_v58 = vadd.f32 %v1184_v42, %v1020_v55  ;;  %v10123_v42 = vld [vmem:[#allocation19] ss:$0 sm:$0xff] }
 0x420   :  { %v1186_v63 = vpop.f32.mrf.mxu1  ;;  %v1290_v0 = vadd.f32 %v10123_v42, %v1281_v39  ;;  %v1414_v39 = vrot.slane %v14033_v40, %v13878_v38 }
 0x421   :  { %12784 = vtanh.f32 %v1185_v58  ;;  %v1187_v5 = vadd.f32 %v1186_v63, %v1024_v59  ;;  %v1273_v58 = vpop.permute.xlu1 %1272  ;;  %v1410_v63 = vrot.slane %v14033_v40, %v13873_v32 }
 0x422   :  { %v1188_v7 = vpop.f32.mrf.mxu1  ;;  %v1280_v6 = vmul.f32 %v1278_v29, %v1273_v58  ;;  %v1294_v2 = vmul.f32 1.442695, %v1290_v0  ;;  %vm1292_vm15 = vcmp.gt.f32.partialorder %v1290_v0, 0.0  ;;  %v11557_v58 = vld [vmem:[#allocation28 + $0x88] ss:$16 sps:$4 sm:$0xff]  }
 0x423   :  { %12786 = vtanh.f32 %v1187_v5  ;;  %v1189_v11 = vadd.f32 %v1188_v7, %v1020_v55  ;;  %v1406_v55 = vrot.slane %v14033_v40, %v13870_v30 }
 0x424   :  { %v1190_v60 = vpop.f32.mrf.mxu1 }
 0x425   :  { %12788 = vtanh.f32 %v1189_v11  ;;  %v1191_v13 = vadd.f32 %v1190_v60, %v1024_v59  ;;  %v1836_v56 = vpop.f32.mrf.mxu0  ;;  %v1264_v59 = vmul.f32 %v1262_v19, %v1257_v20 }
 0x426   :  { %v1837_v1 = vadd.f32 %v1836_v56, %v1406_v55 }
 0x427   :  { %12790 = vtanh.f32 %v1191_v13  ;;  %v1838_v50 = vpop.f32.mrf.mxu0  ;;  %v1266_v5 = vadd.f32 %v1264_v59, %v1250_v51  ;;  %v11559_v59 = vld [vmem:[#allocation28 + $0x8c] ss:$16 sps:$4 sm:$0xff]  }
 0x428   :  { %v1839_v8 = vadd.f32 %v1838_v50, %v1410_v63  ;;  %v11551_v50 = vld [vmem:[#allocation28 + $0xa8] ss:$16 sps:$4 sm:$0xff]  }
 0x429   :  { %v1840_v57 = vpop.f32.mrf.mxu0  ;;  %v1282_v60 = vadd.f32 %v1280_v6, %v1266_v5  ;;  %v11562_v5 = vld [vmem:[#allocation28 + $0x64] ss:$16 sps:$4 sm:$0xff]   ;;  %v11565_v6 = vld [vmem:[#allocation28 + $0x6c] ss:$16 sps:$4 sm:$0xff]  }
 0x42a   :  { %v1841_v10 = vadd.f32 %v1840_v57, %v1406_v55  ;;  %v11556_v55 = vld [vmem:[#allocation28 + $0x84] ss:$16 sps:$4 sm:$0xff]  }
 0x42b   :  { %v1842_v9 = vpop.f32.mrf.mxu0  ;;  %v14044_v20 = vadd.f32 %v10123_v42, %v1282_v60  ;;  %v11554_v42 = vld [vmem:[#allocation28 + $0x80] ss:$16 sps:$4 sm:$0xff]   ;;  %v11571_v60 = vld [vmem:[#allocation28 + $0x4c] ss:$16 sps:$4 sm:$0xff]  }
 0x42c   :  { %v1843_v14 = vadd.f32 %v1842_v9, %v1410_v63 }
 0x42d   :  { %vm1293_vm0 = vcmp.gt.f32.partialorder %v14044_v20, 0.0 }
 0x42e   :  { %v12785_v22 = vpop.eup %12784 }
 0x42f   :  { %v10119_v25 = vclamps-f32 %v12785_v22, 0.999999 }
 0x430   :  { %v12787_v27 = vpop.eup %12786 }
 0x431   :  { %v1206_v33 = vmul.f32 %v10119_v25, %v1205_v24  ;;  %v10120_v36 = vclamps-f32 %v12787_v27, 0.999999 }
 0x432   :  { %v12789_v37 = vpop.eup %12788 }
 0x433   :  { %v1207_v41 = vmul.f32 %v10120_v36, %v1205_v24  ;;  %v10121_v3 = vclamps-f32 %v12789_v37, 0.999999  ;;  %v1210_v61 = vmul.f32 1.442695, %v1206_v33  ;;  %v1296_v37 = vmul.f32 1.442695, %v14044_v20 }
 0x434   :  { %v12791_v43 = vpop.eup %12790 }
 0x435   :  { %v1212_v45 = vmul.f32 1.442695, %v1207_v41  ;;  %v1208_v47 = vmul.f32 %v10121_v3, %v1205_v24  ;;  %v10122_v48 = vclamps-f32 %v12791_v43, 0.999999  ;;  %v11544_v43 = vld [vmem:[#allocation28 + $0xc4] ss:$16 sps:$4 sm:$0xff]  }
 0x436   :  { %2454 = vmatprep.subr.bf16.mxu1 %v11544_v43  ;;  %v11578_v43 = vld [vmem:[#allocation28] ss:$16 sps:$4 sm:$0xff]  }
 0x437   :  { %12792 = vpow2.f32 %v1212_v45  ;;  %v1209_v53 = vmul.f32 %v10122_v48, %v1205_v24  ;;  %v1214_v46 = vmul.f32 1.442695, %v1208_v47  ;;  %2455 = vmatpush1.bf16.msra.mxu1 %v11542_v44  ;;  %v11550_v47 = vld [vmem:[#allocation28 + $0xa4] ss:$16 sps:$4 sm:$0xff]   ;;  %v11553_v48 = vld [vmem:[#allocation28 + $0xac] ss:$16 sps:$4 sm:$0xff]  }
 0x438   :  { %12794 = vpow2.f32 %v1210_v61  ;;  %v11547_v61 = vld [vmem:[#allocation28 + $0xcc] ss:$16 sps:$4 sm:$0xff]   ;;  %2456 = vmatprep.subr.bf16.mxu1 %v11550_v47  ;;  %v11586_v44 = vld [vmem:[#allocation28 + $0x164] ss:$16 sps:$4 sm:$0xff]   ;;  %v11587_v47 = vld [vmem:[#allocation28 + $0x168] ss:$16 sps:$4 sm:$0xff]  }
 0x439   :  { %v1216_v54 = vmul.f32 1.442695, %v1209_v53  ;;  %2495 = vmatprep.subr.bf16.mxu0 %v11547_v61  ;;  %v11581_v61 = vld [vmem:[#allocation28 + $0x8] ss:$16 sps:$4 sm:$0xff]  }
 0x43a   :  { %2496 = vmatpush1.bf16.msra.mxu0 %v11545_v34  ;;  %v11589_v34 = vld [vmem:[#allocation28 + $0x16c] ss:$16 sps:$4 sm:$0xff]  }
 0x43b   :  { %12796 = vpow2.f32 %v1216_v54  ;;  %2497 = vmatprep.subr.bf16.mxu0 %v11553_v48  ;;  %v11592_v48 = vld [vmem:[#allocation28 + $0x144] ss:$16 sps:$4 sm:$0xff]  }
 0x43c   :  { %12798 = vpow2.f32 %v1214_v46  ;;  %v11548_v46 = vld [vmem:[#allocation28 + $0xa0] ss:$16 sps:$4 sm:$0xff]  }
 0x43d   :  { %12800 = vpow2.f32 %v1294_v2  ;;  %2457 = vmatpush1.bf16.msra.mxu1 %v11548_v46  ;;  %v11595_v46 = vld [vmem:[#allocation28 + $0x14c] ss:$16 sps:$4 sm:$0xff]  }
 0x43e   :  { %v1879_v7 = vpop.f32.mrf.mxu1  ;;  %12802 = vpow2.f32 %v1296_v37  ;;  %2498 = vmatpush1.bf16.msra.mxu0 %v11551_v50  ;;  %2458 = vmatprep.subr.bf16.mxu1 %v11556_v55  ;;  %v13607_v37 = vmov 6   ;;  %v13610_v50 = vmov 9   ;;  %v11601_v55 = vld [vmem:[#allocation28 + $0x12c] ss:$16 sps:$4 sm:$0xff]  }
 0x43f   :  { %v1880_v52 = vadd.f32 %v1879_v7, %v1837_v1  ;;  %2499 = vmatprep.subr.bf16.mxu0 %v11559_v59  ;;  %v11596_v59 = vld [vmem:[#allocation28 + $0x120] ss:$16 sps:$4 sm:$0xff]  }
 0x440   :  { %v1881_v11 = vpop.f32.mrf.mxu1 }
 0x441   :  { %v1882_v12 = vadd.f32 %v1881_v11, %v1839_v8  ;;  %2459 = vmatpush1.bf16.msra.mxu1 %v11554_v42  ;;  %v11560_v8 = vld [vmem:[#allocation28 + $0x60] ss:$16 sps:$4 sm:$0xff]   ;;  %v11599_v42 = vld [vmem:[#allocation28 + $0x128] ss:$16 sps:$4 sm:$0xff]  }
 0x442   :  { %v1883_v13 = vpop.f32.mrf.mxu1  ;;  %2500 = vmatpush1.bf16.msra.mxu0 %v11557_v58  ;;  %2460 = vmatprep.subr.bf16.mxu1 %v11562_v5  ;;  %v11604_v58 = vld [vmem:[#allocation28 + $0x104] ss:$16 sps:$4 sm:$0xff]  }
 0x443   :  { %v1884_v15 = vadd.f32 %v1883_v13, %v1841_v10  ;;  %2501 = vmatprep.subr.bf16.mxu0 %v11565_v6  ;;  %v11568_v10 = vld [vmem:[#allocation28 + $0x44] ss:$16 sps:$4 sm:$0xff]   ;;  %v11566_v13 = vld [vmem:[#allocation28 + $0x40] ss:$16 sps:$4 sm:$0xff]  }
 0x444   :  { %v14040_v16 = vpop.eup %12792  ;;  %v1885_v18 = vpop.f32.mrf.mxu1 }
 0x445   :  { %v14042_v19 = vpop.eup %12794  ;;  %v14046_v21 = vpack.c.bf16 %v1884_v15, %v1880_v52  ;;  %v1886_v22 = vadd.f32 %v1885_v18, %v1843_v14  ;;  %v11099_v24 = vpop.f32.mrf.mxu0  ;;  %v1218_v25 = vsel %vm897_vm3, %v14040_v16, 0.0  ;;  %v11563_v52 = vld [vmem:[#allocation28 + $0x68] ss:$16 sps:$4 sm:$0xff]   ;;  %2461 = vmatpush1.bf16.msra.mxu1 %v11560_v8  ;;  %v13602_v18 = vmov 4  }
 0x446   :  { %v1219_v27 = vadd.f32 %v14042_v19, %v1218_v25  ;;  %2502 = vmatpush1.bf16.msra.mxu0 %v11563_v52  ;;  %v11569_v14 = vld [vmem:[#allocation28 + $0x48] ss:$16 sps:$4 sm:$0xff]   ;;  %2462 = vmatprep.subr.bf16.mxu1 %v11568_v10  ;;  %v11577_v25 = vld [vmem:[#allocation28 + $0x2c] ss:$16 sps:$4 sm:$0xff]  }
 0x447   :  { %v14051_v28 = vpack.c.bf16 %v1886_v22, %v1882_v12  ;;  %v11100_v29 = vpop.f32.mrf.mxu0  ;;  %2503 = vmatprep.subr.bf16.mxu0 %v11571_v60  ;;  %v13604_v22 = vmov 5  }
 0x448   :  { %v14053_v31 = vpop.eup %12796  ;;  %v11101_v33 = vadd.f32 %v11100_v29, %v11099_v24  ;;  %1220 = vadd.xlane.f32.xlu1 %v1219_v27  ;;  %v11574_v24 = vld [vmem:[#allocation28 + $0x24] ss:$16 sps:$4 sm:$0xff]   ;;  %v11572_v27 = vld [vmem:[#allocation28 + $0x20] ss:$16 sps:$4 sm:$0xff]   ;;  %v11575_v29 = vld [vmem:[#allocation28 + $0x28] ss:$16 sps:$4 sm:$0xff]  }
 0x449   :  { %v14055_v36 = vpop.eup %12798  ;;  %v1222_v41 = vsel %vm897_vm3, %v14053_v31, 0.0  ;;  %v11102_v45 = vpop.f32.mrf.mxu0  ;;  %2463 = vmatpush1.bf16.msra.mxu1 %v11566_v13 }
 0x44a   :  { %v1223_v3 = vadd.f32 %v14055_v36, %v1222_v41  ;;  %v12801_v62 = vpop.eup %12800  ;;  %2504 = vmatpush1.bf16.msra.mxu0 %v11569_v14  ;;  %2464 = vmatprep.subr.bf16.mxu1 %v11574_v24  ;;  %v11580_v41 = vld [vmem:[#allocation28 + $0x4] ss:$16 sps:$4 sm:$0xff]  }
 0x44b   :  { %v10124_v56 = vadd.f32 -1.0, %v12801_v62  ;;  %v12803_v51 = vpop.eup %12802  ;;  %v11103_v54 = vpop.f32.mrf.mxu0  ;;  %2505 = vmatprep.subr.bf16.mxu0 %v11577_v25  ;;  %v13608_v62 = vmov 10  }
 0x44c   :  { %1224 = vadd.xlane.f32.xlu0 %v1223_v3  ;;  %v10125_v63 = vadd.f32 -1.0, %v12803_v51  ;;  %v11104_v57 = vadd.f32 %v11103_v54, %v11102_v45  ;;  %v11583_v3 = vld [vmem:[#allocation28 + $0xc] ss:$16 sps:$4 sm:$0xff]   ;;  %v11584_v45 = vld [vmem:[#allocation28 + $0x160] ss:$16 sps:$4 sm:$0xff]  }
 0x44d   :  { %v14061_v53 = vsel %vm1292_vm15, %v1290_v0, %v10124_v56  ;;  %v1923_v0 = vadd.f32 %v11101_v33, %v1414_v39  ;;  %v13606_v33 = vmov 8   ;;  %2465 = vmatpush1.bf16.msra.mxu1 %v11572_v27  ;;  %v13609_v56 = vmov 11   ;;  %v11593_v51 = vld [vmem:[#allocation28 + $0x148] ss:$16 sps:$4 sm:$0xff]   ;;  %v11598_v54 = vld [vmem:[#allocation28 + $0x124] ss:$16 sps:$4 sm:$0xff]  }
 0x44e   :  { %v14070_v9 = vsel %vm1293_vm0, %v14044_v20, %v10125_v63  ;;  %v1926_v2 = vadd.f32 %v11104_v57, %v1414_v39  ;;  %v13603_v20 = vmov 3   ;;  %2506 = vmatpush1.bf16.msra.mxu0 %v11575_v29  ;;  %2466 = vmatprep.subr.bf16.mxu1 %v11580_v41  ;;  %v11590_v39 = vld [vmem:[#allocation28 + $0x140] ss:$16 sps:$4 sm:$0xff]   ;;  %v11607_v63 = vld [vmem:[#allocation28 + $0x10c] ss:$16 sps:$4 sm:$0xff]  }
 0x44f   :  { %2507 = vmatprep.subr.bf16.mxu0 %v11583_v3  ;;  %v11602_v57 = vld [vmem:[#allocation28 + $0x100] ss:$16 sps:$4 sm:$0xff]  }
 0x451   :  { %2467 = vmatpush1.bf16.msra.mxu1 %v11578_v43 }
 0x452   :  { %2508 = vmatpush1.bf16.msra.mxu0 %v11581_v61  ;;  %2476 = vmatprep.subr.bf16.mxu1 %v11586_v44 }
 0x453   :  { %2517 = vmatprep.subr.bf16.mxu0 %v11589_v34 }
 0x455   :  { %2477 = vmatpush2.bf16.msra.mxu1 %v11584_v45 }
 0x456   :  { %2518 = vmatpush2.bf16.msra.mxu0 %v11587_v47  ;;  %2478 = vmatprep.subr.bf16.mxu1 %v11592_v48 }
 0x457   :  { %2519 = vmatprep.subr.bf16.mxu0 %v11595_v46 }
 0x459   :  { %2105 = vperm.xlu1 %11367, %v14061_v53   ;;  %2479 = vmatpush2.bf16.msra.mxu1 %v11590_v39 }
 0x45a   :  { %2520 = vmatpush2.bf16.msra.mxu0 %v11593_v51  ;;  %2480 = vmatprep.subr.bf16.mxu1 %v11598_v54 }
 0x45b   :  { %2521 = vmatprep.subr.bf16.mxu0 %v11601_v55 }
 0x45d   :  { %11368 = vset.pattern.permute.xlu1 %v13600_v35  ;;  %2481 = vmatpush2.bf16.msra.mxu1 %v11596_v59 }
 0x45e   :  { %v1963_v1 = vpop.f32.mrf.mxu1  ;;  %2539 = vperm.xlu1 %11368, %v14061_v53   ;;  %2522 = vmatpush2.bf16.msra.mxu0 %v11599_v42 }
 0x45f   :  { %v1964_v40 = vadd.f32 %v1963_v1, %v1923_v0  ;;  %v11605_v0 = vld [vmem:[#allocation28 + $0x108] ss:$16 sps:$4 sm:$0xff]   ;;  %2482 = vmatprep.subr.bf16.mxu1 %v11604_v58  ;;  %2523 = vmatprep.subr.bf16.mxu0 %v11607_v63  ;;  %v11610_v1 = vld [vmem:[#allocation28 + $0x264] ss:$16 sps:$4 sm:$0xff]  }
 0x460   :  { %v11226_v7 = vpop.f32.mrf.mxu1 }
 0x461   :  { %2483 = vmatpush2.bf16.msra.mxu1 %v11602_v57 }
 0x462   :  { %v1966_v35 = vpop.f32.mrf.mxu1  ;;  %2110 = vperm.xlu0 %11363, %v14070_v9   ;;  %2543 = vperm.xlu1 %11368, %v14070_v9  }
 0x463   :  { %v1967_v11 = vadd.f32 %v1966_v35, %v1926_v2  ;;  %2524 = vmatpush2.bf16.msra.mxu0 %v11605_v0  ;;  %2885 = vmatprep.subr.bf16.mxu1 %v11610_v1 }
 0x464   :  { %v11227_v12 = vpop.f32.mrf.mxu1 }
 0x465   :  { %v14074_v15 = vpack.c.bf16 %v1967_v11, %v1964_v40  ;;  %v11613_v40 = vld [vmem:[#allocation28 + $0x26c] ss:$16 sps:$4 sm:$0xff]  }
 0x466   :  { %11370 = vset.pattern.permute.xlu0 %v13601_v49  ;;  %11369 = vset.pattern.permute.xlu1 %v13601_v49  ;;  %v13605_v49 = vmov 7  }
 0x467   :  { %2976 = vperm.xlu0 %11370, %v14070_v9   ;;  %2972 = vperm.xlu1 %11369, %v14061_v53  }
 0x468   :  { %2926 = vmatprep.subr.bf16.mxu0 %v11613_v40 }
 0x46b   :  { %11372 = vset.pattern.permute.xlu0 %v13602_v18  ;;  %11371 = vset.pattern.permute.xlu1 %v13603_v20 }
 0x46c   :  { %3838 = vperm.xlu0 %11372, %v14061_v53   ;;  %3405 = vperm.xlu1 %11371, %v14061_v53  }
 0x470   :  { %11375 = vset.pattern.permute.xlu0 %v13604_v22  ;;  %3409 = vperm.xlu1 %11371, %v14070_v9  }
 0x471   :  { %4275 = vperm.xlu0 %11375, %v14070_v9  }
 0x474   :  { %11373 = vset.pattern.permute.xlu1 %v13602_v18 }
 0x475   :  { %11377 = vset.pattern.permute.xlu0 %v13605_v49  ;;  %3842 = vperm.xlu1 %11373, %v14070_v9  }
 0x476   :  { %5137 = vperm.xlu0 %11377, %v14061_v53  }
 0x479   :  { %11374 = vset.pattern.permute.xlu1 %v13604_v22 }
 0x47a   :  { %11380 = vset.pattern.permute.xlu0 %v13606_v33  ;;  %4271 = vperm.xlu1 %11374, %v14061_v53  }
 0x47b   :  { %5574 = vperm.xlu0 %11380, %v14070_v9  }
 0x47e   :  { %11376 = vset.pattern.permute.xlu1 %v13607_v37 }
 0x47f   :  { %11382 = vset.pattern.permute.xlu0 %v13608_v62  ;;  %4704 = vperm.xlu1 %11376, %v14061_v53  }
 0x480   :  { %6436 = vperm.xlu0 %11382, %v14061_v53  }
 0x483   :  { %4708 = vperm.xlu1 %11376, %v14070_v9  }
 0x484   :  { %11385 = vset.pattern.permute.xlu0 %v13609_v56 }
 0x485   :  { %6873 = vperm.xlu0 %11385, %v14070_v9  }
 0x487   :  { %11378 = vset.pattern.permute.xlu1 %v13605_v49 }
 0x488   :  { %5141 = vperm.xlu1 %11378, %v14070_v9  }
 0x48c   :  { %11379 = vset.pattern.permute.xlu1 %v13606_v33 }
 0x48d   :  { %5570 = vperm.xlu1 %11379, %v14061_v53  }
 0x491   :  { %11381 = vset.pattern.permute.xlu1 %v13610_v50 }
 0x492   :  { %6003 = vperm.xlu1 %11381, %v14061_v53  }
 0x496   :  { %6007 = vperm.xlu1 %11381, %v14070_v9  }
 0x49a   :  { %11383 = vset.pattern.permute.xlu1 %v13608_v62 }
 0x49b   :  { %6440 = vperm.xlu1 %11383, %v14070_v9  }
 0x49f   :  { %11384 = vset.pattern.permute.xlu1 %v13609_v56 }
 0x4a0   :  { %6869 = vperm.xlu1 %11384, %v14061_v53  }
 0x4d1   :  { %v1221_v6 = vpop.xlane.xlu1 %1220 }
 0x4d2   :  { %v1226_v8 = vadd.f32 1e-06, %v1221_v6 }
 0x4d5   :  { %v1225_v5 = vpop.xlane.xlu0 %1224  ;;  %v2106_v11 = vpop.permute.xlu1 %2105 }
 0x4d6   :  { %v1227_v7 = vadd.f32 1e-06, %v1225_v5 }
 0x4d8   :  { %12804 = vrcp.f32 %v1227_v7 }
 0x4d9   :  { %12806 = vrcp.f32 %v1226_v8  ;;  %v14106_v14 = vpop.permute.xlu1 %2539 }
 0x4dd   :  { %v2111_v60 = vpop.permute.xlu0 %2110  ;;  %v14117_v25 = vpop.permute.xlu1 %2543 }
 0x4e5   :  { %v12805_v52 = vpop.eup %12804 }
 0x4e6   :  { %v12807_v2 = vpop.eup %12806  ;;  %v14099_v35 = vmul.f32 %v12805_v52, %v14053_v31  ;;  %v14110_v20 = vmul.f32 %v12805_v52, %v14055_v36 }
 0x4e7   :  { %v14102_v10 = vmul.f32 %v12807_v2, %v14040_v16  ;;  %v14114_v31 = vmul.f32 %v12807_v2, %v14042_v19 }
 0x4e8   :  { %v2116_v12 = vmul.f32 %v2111_v60, %v14099_v35  ;;  %v2115_v24 = vmul.f32 %v2111_v60, %v14110_v20  ;;  %v2549_v27 = vmul.f32 %v14117_v25, %v14099_v35 }
 0x4e9   :  { %v2114_v13 = vmul.f32 %v2106_v11, %v14102_v10  ;;  %v2113_v29 = vmul.f32 %v2106_v11, %v14114_v31  ;;  %v2547_v36 = vmul.f32 %v14106_v14, %v14102_v10 }
 0x4ea   :  { %v2136_v18 = vsel %vm897_vm3, %v2116_v12, 0.0  ;;  %v2130_v41 = vrot.slane %v2115_v24, 4  ;;  %v2569_v19 = vsel %vm897_vm3, %v2549_v27, 0.0 }
 0x4eb   :  { %v2123_v22 = vsel %vm897_vm3, %v2114_v13, 0.0  ;;  %v2137_v49 = vrot.slane %v2136_v18, 4  ;;  %v2117_v3 = vrot.slane %v2113_v29, 4  ;;  %v2556_v43 = vsel %vm897_vm3, %v2547_v36, 0.0 }
 0x4ec   :  { %v2124_v16 = vrot.slane %v2123_v22, 4  ;;  %v2131_v56 = vadd.f32 %v2130_v41, %v2115_v24  ;;  %v2570_v44 = vrot.slane %v2569_v19, 4  ;;  %v2557_v45 = vrot.slane %v2556_v43, 4 }
 0x4ed   :  { %v2138_v33 = vadd.f32 %v2137_v49, %v2136_v18  ;;  %v2118_v34 = vadd.f32 %v2117_v3, %v2113_v29  ;;  %v11608_v3 = vld [vmem:[#allocation28 + $0x260] ss:$16 sps:$4 sm:$0xff]  }
 0x4ee   :  { %v2125_v37 = vadd.f32 %v2124_v16, %v2123_v22  ;;  %v2132_v46 = vrot.slane %v2131_v56, 2  ;;  %v2571_v50 = vadd.f32 %v2570_v44, %v2569_v19  ;;  %v2558_v51 = vadd.f32 %v2557_v45, %v2556_v43  ;;  %v11619_v44 = vld [vmem:[#allocation28 + $0x24c] ss:$16 sps:$4 sm:$0xff]  }
 0x4ef   :  { %v2139_v62 = vrot.slane %v2138_v33, 2  ;;  %v2119_v39 = vrot.slane %v2118_v34, 2 }
 0x4f0   :  { %v2126_v61 = vrot.slane %v2125_v37, 2  ;;  %v2133_v59 = vadd.f32 %v2132_v46, %v2131_v56  ;;  %v2572_v42 = vrot.slane %v2571_v50, 2  ;;  %v2559_v63 = vrot.slane %v2558_v51, 2  ;;  %v11616_v56 = vld [vmem:[#allocation28 + $0x244] ss:$16 sps:$4 sm:$0xff]  }
 0x4f1   :  { %v2140_v47 = vadd.f32 %v2139_v62, %v2138_v33  ;;  %v2120_v58 = vadd.f32 %v2119_v39, %v2118_v34  ;;  %v11611_v62 = vld [vmem:[#allocation28 + $0x268] ss:$16 sps:$4 sm:$0xff]   ;;  %v11622_v46 = vld [vmem:[#allocation28 + $0x224] ss:$16 sps:$4 sm:$0xff]   ;;  %v14133_v39 = vpop.permute.xlu0 %2976 }
 0x4f2   :  { %v2127_v48 = vadd.f32 %v2126_v61, %v2125_v37  ;;  %v2134_v1 = vrot.slane %v2133_v59, 1  ;;  %v2573_v40 = vadd.f32 %v2572_v42, %v2571_v50  ;;  %v2560_v6 = vadd.f32 %v2559_v63, %v2558_v51  ;;  %v11625_v50 = vld [vmem:[#allocation28 + $0x22c] ss:$16 sps:$4 sm:$0xff]   ;;  %v14135_v51 = vpop.permute.xlu1 %2972  ;;  %v11628_v42 = vld [vmem:[#allocation28 + $0x204] ss:$16 sps:$4 sm:$0xff]   ;;  %v14139_v63 = vpop.f32.mrf.mxu0 }
 0x4f3   :  { %v2141_v54 = vrot.slane %v2140_v47, 1  ;;  %v2121_v5 = vrot.slane %v2120_v58, 1 }
 0x4f4   :  { %v2128_v55 = vrot.slane %v2127_v48, 1  ;;  %v2135_v52 = vadd.f32 %v2134_v1, %v2133_v59  ;;  %v2574_v2 = vrot.slane %v2573_v40, 1  ;;  %v2561_v60 = vrot.slane %v2560_v6, 1  ;;  %v11623_v59 = vld [vmem:[#allocation28 + $0x228] ss:$16 sps:$4 sm:$0xff]   ;;  %v14145_v1 = vpop.f32.mrf.mxu0 }
 0x4f5   :  { %v2142_v57 = vadd.f32 %v2141_v54, %v2140_v47  ;;  %v2122_v11 = vadd.f32 %v2121_v5, %v2120_v58  ;;  %v11614_v47 = vld [vmem:[#allocation28 + $0x240] ss:$16 sps:$4 sm:$0xff]   ;;  %v2982_v54 = vmul.f32 %v14133_v39, %v14099_v35  ;;  %v11631_v58 = vld [vmem:[#allocation28 + $0x20c] ss:$16 sps:$4 sm:$0xff]  }
 0x4f6   :  { %v2129_v0 = vadd.f32 %v2128_v55, %v2127_v48  ;;  %v2145_v18 = vpack.c.bf16 %v2135_v52, %v2135_v52  ;;  %v2575_v22 = vadd.f32 %v2574_v2, %v2573_v40  ;;  %v2562_v16 = vadd.f32 %v2561_v60, %v2560_v6  ;;  %v11617_v48 = vld [vmem:[#allocation28 + $0x248] ss:$16 sps:$4 sm:$0xff]   ;;  %v11620_v55 = vld [vmem:[#allocation28 + $0x220] ss:$16 sps:$4 sm:$0xff]   ;;  %v11637_v52 = vld [vmem:[#allocation28 + $0x1ec] ss:$16 sps:$4 sm:$0xff]   ;;  %v2059_v2 = vpop.f32.mrf.mxu0 }
 0x4f7   :  { %v2146_v7 = vpack.c.bf16 %v2142_v57, %v2142_v57  ;;  %v2143_v49 = vpack.c.bf16 %v2122_v11, %v2122_v11  ;;  %v2548_v57 = vmul.f32 %v14117_v25, %v14110_v20  ;;  %v2546_v40 = vmul.f32 %v14106_v14, %v14114_v31  ;;  %v11626_v6 = vld [vmem:[#allocation28 + $0x200] ss:$16 sps:$4 sm:$0xff]  }
 0x4f8   :  { %v2144_v8 = vpack.c.bf16 %v2129_v0, %v2129_v0  ;;  %v2201_v27 = vunpack.c.l.b16 %v2145_v18  ;;  %v2579_v29 = vpack.c.bf16 %v2575_v22, %v2575_v22  ;;  %v2577_v37 = vpack.c.bf16 %v2562_v16, %v2562_v16  ;;  %v11632_v14 = vld [vmem:[#allocation28 + $0x1e0] ss:$16 sps:$4 sm:$0xff]   ;;  %v11635_v18 = vld [vmem:[#allocation28 + $0x1e8] ss:$16 sps:$4 sm:$0xff]   ;;  %v11643_v16 = vld [vmem:[#allocation28 + $0x1cc] ss:$16 sps:$4 sm:$0xff]  }
 0x4f9   :  { %v2202_v12 = vunpack.c.l.b16 %v2146_v7  ;;  %v2199_v36 = vunpack.c.l.b16 %v2143_v49  ;;  %v2980_v0 = vmul.f32 %v14135_v51, %v14102_v10  ;;  %v3002_v5 = vsel %vm897_vm3, %v2982_v54, 0.0  ;;  %v11629_v7 = vld [vmem:[#allocation28 + $0x208] ss:$16 sps:$4 sm:$0xff]   ;;  %v11640_v49 = vld [vmem:[#allocation28 + $0x1c4] ss:$16 sps:$4 sm:$0xff]  }
 0x4fa   :  { %v2200_v13 = vunpack.c.l.b16 %v2144_v8  ;;  %v2636_v41 = vunpack.c.l.b16 %v2579_v29  ;;  %v2634_v43 = vunpack.c.l.b16 %v2577_v37  ;;  %v11634_v8 = vld [vmem:[#allocation28 + $0x1e4] ss:$16 sps:$4 sm:$0xff]   ;;  %v2563_v25 = vrot.slane %v2548_v57, 4  ;;  %v11641_v37 = vld [vmem:[#allocation28 + $0x1c8] ss:$16 sps:$4 sm:$0xff]  }
 0x4fb   :  { %v2204_v19 = vsel %vm2203_vm1, %v2201_v27, %v2199_v36  ;;  %v2989_v11 = vsel %vm897_vm3, %v2980_v0, 0.0  ;;  %v3003_v60 = vrot.slane %v3002_v5, 4  ;;  %v11638_v36 = vld [vmem:[#allocation28 + $0x1c0] ss:$16 sps:$4 sm:$0xff]   ;;  %v11658_v0 = vld [vmem:[#allocation28 + $0x2e4] ss:$16 sps:$4 sm:$0xff]  }
 0x4fc   :  { %v2205_v24 = vsel %vm2203_vm1, %v2202_v12, %v2200_v13  ;;  %v2206_v61 = vpack.c.b16 %v2204_v19, %v2204_v19  ;;  %v2638_v34 = vsel %vm2203_vm1, %v2636_v41, %v2634_v43  ;;  %v2060_v12 = vpop.f32.mrf.mxu0  ;;  %v2550_v13 = vrot.slane %v2546_v40, 4 }
 0x4fd   :  { %v2207_v33 = vpack.c.b16 %v2205_v24, %v2205_v24  ;;  %v2640_v45 = vpack.c.b16 %v2638_v34, %v2638_v34  ;;  %v2990_v22 = vrot.slane %v2989_v11, 4  ;;  %v2564_v27 = vadd.f32 %v2563_v25, %v2548_v57  ;;  %v11644_v34 = vld [vmem:[#allocation28 + $0x1a0] ss:$16 sps:$4 sm:$0xff]   ;;  %v11664_v25 = vld [vmem:[#allocation28 + $0x2c4] ss:$16 sps:$4 sm:$0xff]  }
 0x4fe   :  { %v14151_v24 = vpop.f32.mrf.mxu0  ;;  %v3004_v29 = vadd.f32 %v3003_v60, %v3002_v5 }
 0x4ff   :  { %10252 = vmatprep.mubr.msk.bf16.mxu1 %vm897_vm3, %v2207_v33  ;;  %10253 = vmatprep.mubr.msk.bf16.mxu0 %vm897_vm3, %v2207_v33  ;;  %v2551_v33 = vadd.f32 %v2550_v13, %v2546_v40  ;;  %v2991_v19 = vadd.f32 %v2990_v22, %v2989_v11  ;;  %v2565_v43 = vrot.slane %v2564_v27, 2  ;;  %v11661_v40 = vld [vmem:[#allocation28 + $0x2ec] ss:$16 sps:$4 sm:$0xff]  }
 0x500   :  { %2485 = vmatmul.mubr.bf16.vlgmr.msra.gmra.mxu1 %v2206_v61  ;;  %2526 = vmatmul.mubr.bf16.vlgmr.msra.gmra.mxu0 %v2206_v61  ;;  %v14153_v41 = vpop.f32.mrf.mxu0  ;;  %v11667_v11 = vld [vmem:[#allocation28 + $0x2cc] ss:$16 sps:$4 sm:$0xff]  }
 0x501   :  { %2886 = vmatpush1.bf16.msra.mxu1 %v11608_v3  ;;  %2927 = vmatpush1.bf16.msra.mxu0 %v11611_v62  ;;  %v11646_v3 = vld [vmem:[#allocation28 + $0x1a4] ss:$16 sps:$4 sm:$0xff]   ;;  %v11649_v62 = vld [vmem:[#allocation28 + $0x1ac] ss:$16 sps:$4 sm:$0xff]   ;;  %v2566_v54 = vadd.f32 %v2565_v43, %v2564_v27 }
 0x502   :  { %2887 = vmatprep.subr.bf16.mxu1 %v11616_v56  ;;  %2928 = vmatprep.subr.bf16.mxu0 %v11619_v44  ;;  %v2100_v61 = vpop.f32.mrf.mxu0  ;;  %v3005_v56 = vrot.slane %v3004_v29, 2  ;;  %v2552_v44 = vrot.slane %v2551_v33, 2 }
 0x503   :  { %10302 = vmatprep.mubr.msk.bf16.mxu1 %vm897_vm3, %v2640_v45  ;;  %10303 = vmatprep.mubr.msk.bf16.mxu0 %vm897_vm3, %v2640_v45  ;;  %v11647_v45 = vld [vmem:[#allocation28 + $0x1a8] ss:$16 sps:$4 sm:$0xff]   ;;  %v2567_v5 = vrot.slane %v2566_v54, 1 }
 0x505   :  { %2888 = vmatpush1.bf16.msra.mxu1 %v11614_v47  ;;  %2929 = vmatpush1.bf16.msra.mxu0 %v11617_v48  ;;  %v2101_v47 = vpop.f32.mrf.mxu0  ;;  %v2992_v48 = vrot.slane %v2991_v19, 2  ;;  %v2568_v60 = vadd.f32 %v2567_v5, %v2566_v54  ;;  %v14157_v54 = vpop.permute.xlu1 %3405  ;;  %v11689_v5 = vld [vmem:[#allocation28 + $0x3c8] ss:$16 sps:$4 sm:$0xff]  }
 0x506   :  { %2889 = vmatprep.subr.bf16.mxu1 %v11622_v46  ;;  %2930 = vmatprep.subr.bf16.mxu0 %v11625_v50  ;;  %v11652_v46 = vld [vmem:[#allocation28 + $0x184] ss:$16 sps:$4 sm:$0xff]   ;;  %v11655_v50 = vld [vmem:[#allocation28 + $0x18c] ss:$16 sps:$4 sm:$0xff]  }
 0x507   :  { %v2993_v57 = vadd.f32 %v2992_v48, %v2991_v19  ;;  %v2578_v27 = vpack.c.bf16 %v2568_v60, %v2568_v60  ;;  %v11682_v47 = vld [vmem:[#allocation28 + $0x3e4] ss:$16 sps:$4 sm:$0xff]   ;;  %v11685_v48 = vld [vmem:[#allocation28 + $0x3ec] ss:$16 sps:$4 sm:$0xff]   ;;  %v2981_v60 = vmul.f32 %v14133_v39, %v14110_v20 }
 0x509   :  { %2890 = vmatpush1.bf16.msra.mxu1 %v11620_v55  ;;  %2931 = vmatpush1.bf16.msra.mxu0 %v11623_v59  ;;  %v3006_v55 = vadd.f32 %v3005_v56, %v3004_v29  ;;  %v2553_v59 = vadd.f32 %v2552_v44, %v2551_v33  ;;  %v2994_v2 = vrot.slane %v2993_v57, 1  ;;  %v2635_v43 = vunpack.c.l.b16 %v2578_v27  ;;  %v11674_v44 = vld [vmem:[#allocation28 + $0x280] ss:$16 sps:$4 sm:$0xff]  }
 0x50a   :  { %2891 = vmatprep.subr.bf16.mxu1 %v11628_v42  ;;  %2932 = vmatprep.subr.bf16.mxu0 %v11631_v58  ;;  %v11650_v42 = vld [vmem:[#allocation28 + $0x180] ss:$16 sps:$4 sm:$0xff]   ;;  %v11653_v58 = vld [vmem:[#allocation28 + $0x188] ss:$16 sps:$4 sm:$0xff]   ;;  %v2996_v27 = vrot.slane %v2981_v60, 4 }
 0x50b   :  { %v2995_v22 = vadd.f32 %v2994_v2, %v2993_v57  ;;  %v11688_v57 = vld [vmem:[#allocation28 + $0x3c4] ss:$16 sps:$4 sm:$0xff]  }
 0x50d   :  { %2892 = vmatpush1.bf16.msra.mxu1 %v11626_v6  ;;  %2933 = vmatpush1.bf16.msra.mxu0 %v11629_v7  ;;  %v3007_v6 = vrot.slane %v3006_v55, 1  ;;  %v2554_v7 = vrot.slane %v2553_v59, 1  ;;  %v3010_v19 = vpack.c.bf16 %v2995_v22, %v2995_v22 }
 0x50e   :  { %2893 = vmatprep.subr.bf16.mxu1 %v11634_v8  ;;  %2934 = vmatprep.subr.bf16.mxu0 %v11637_v52  ;;  %v11656_v8 = vld [vmem:[#allocation28 + $0x2e0] ss:$16 sps:$4 sm:$0xff]   ;;  %v11659_v52 = vld [vmem:[#allocation28 + $0x2e8] ss:$16 sps:$4 sm:$0xff]  }
 0x50f   :  { %v3008_v12 = vadd.f32 %v3007_v6, %v3006_v55  ;;  %v2555_v13 = vadd.f32 %v2554_v7, %v2553_v59  ;;  %v11680_v55 = vld [vmem:[#allocation28 + $0x3e0] ss:$16 sps:$4 sm:$0xff]   ;;  %v11694_v6 = vld [vmem:[#allocation28 + $0x3a4] ss:$16 sps:$4 sm:$0xff]   ;;  %v14161_v7 = vpop.permute.xlu1 %3409 }
 0x510   :  { %v3415_v2 = vmul.f32 %v14161_v7, %v14099_v35 }
 0x511   :  { %2894 = vmatpush1.bf16.msra.mxu1 %v11632_v14  ;;  %2935 = vmatpush1.bf16.msra.mxu0 %v11635_v18  ;;  %v11662_v14 = vld [vmem:[#allocation28 + $0x2c0] ss:$16 sps:$4 sm:$0xff]   ;;  %v11665_v18 = vld [vmem:[#allocation28 + $0x2c8] ss:$16 sps:$4 sm:$0xff]   ;;  %v3012_v29 = vpack.c.bf16 %v3008_v12, %v3008_v12  ;;  %v2576_v33 = vpack.c.bf16 %v2555_v13, %v2555_v13  ;;  %v11703_v12 = vld [vmem:[#allocation28 + $0x38c] ss:$16 sps:$4 sm:$0xff]   ;;  %v3413_v13 = vmul.f32 %v14157_v54, %v14102_v10 }
 0x512   :  { %2895 = vmatprep.subr.bf16.mxu1 %v11640_v49  ;;  %2936 = vmatprep.subr.bf16.mxu0 %v11643_v16  ;;  %v11670_v49 = vld [vmem:[#allocation28 + $0x2a4] ss:$16 sps:$4 sm:$0xff]   ;;  %v11673_v16 = vld [vmem:[#allocation28 + $0x2ac] ss:$16 sps:$4 sm:$0xff]   ;;  %v3435_v22 = vsel %vm897_vm3, %v3415_v2, 0.0 }
 0x513   :  { %v3069_v61 = vunpack.c.l.b16 %v3012_v29  ;;  %v2633_v56 = vunpack.c.l.b16 %v2576_v33  ;;  %v11709_v29 = vld [vmem:[#allocation28 + $0x36c] ss:$16 sps:$4 sm:$0xff]   ;;  %v3422_v39 = vsel %vm897_vm3, %v3413_v13, 0.0  ;;  %v11730_v2 = vld [vmem:[#allocation28 + $0x464] ss:$16 sps:$4 sm:$0xff]  }
 0x515   :  { %2896 = vmatpush1.bf16.msra.mxu1 %v11638_v36  ;;  %2937 = vmatpush1.bf16.msra.mxu0 %v11641_v37  ;;  %v11668_v36 = vld [vmem:[#allocation28 + $0x2a0] ss:$16 sps:$4 sm:$0xff]   ;;  %v11671_v37 = vld [vmem:[#allocation28 + $0x2a8] ss:$16 sps:$4 sm:$0xff]  }
 0x516   :  { %2897 = vmatprep.subr.bf16.mxu1 %v11646_v3  ;;  %2938 = vmatprep.subr.bf16.mxu0 %v11649_v62  ;;  %v11676_v3 = vld [vmem:[#allocation28 + $0x284] ss:$16 sps:$4 sm:$0xff]   ;;  %v11679_v62 = vld [vmem:[#allocation28 + $0x28c] ss:$16 sps:$4 sm:$0xff]  }
 0x519   :  { %2898 = vmatpush1.bf16.msra.mxu1 %v11644_v34  ;;  %2939 = vmatpush1.bf16.msra.mxu0 %v11647_v45  ;;  %v11677_v34 = vld [vmem:[#allocation28 + $0x288] ss:$16 sps:$4 sm:$0xff]   ;;  %v3067_v45 = vunpack.c.l.b16 %v3010_v19  ;;  %v11712_v19 = vld [vmem:[#allocation28 + $0x344] ss:$16 sps:$4 sm:$0xff]  }
 0x51a   :  { %2899 = vmatprep.subr.bf16.mxu1 %v11652_v46  ;;  %2940 = vmatprep.subr.bf16.mxu0 %v11655_v50  ;;  %v2637_v46 = vsel %vm2203_vm1, %v2635_v43, %v2633_v56  ;;  %v11715_v43 = vld [vmem:[#allocation28 + $0x34c] ss:$16 sps:$4 sm:$0xff]  }
 0x51b   :  { %v3071_v50 = vsel %vm2203_vm1, %v3069_v61, %v3067_v45  ;;  %v2639_v59 = vpack.c.b16 %v2637_v46, %v2637_v46  ;;  %v11718_v45 = vld [vmem:[#allocation28 + $0x324] ss:$16 sps:$4 sm:$0xff]   ;;  %v11721_v46 = vld [vmem:[#allocation28 + $0x32c] ss:$16 sps:$4 sm:$0xff]  }
 0x51d   :  { %2900 = vmatpush1.bf16.msra.mxu1 %v11650_v42  ;;  %2941 = vmatpush1.bf16.msra.mxu0 %v11653_v58  ;;  %v11683_v42 = vld [vmem:[#allocation28 + $0x3e8] ss:$16 sps:$4 sm:$0xff]   ;;  %v3073_v58 = vpack.c.b16 %v3071_v50, %v3071_v50 }
 0x51e   :  { %2909 = vmatprep.subr.bf16.mxu1 %v11658_v0  ;;  %2950 = vmatprep.subr.bf16.mxu0 %v11661_v40  ;;  %v11691_v0 = vld [vmem:[#allocation28 + $0x3cc] ss:$16 sps:$4 sm:$0xff]   ;;  %v11686_v40 = vld [vmem:[#allocation28 + $0x3c0] ss:$16 sps:$4 sm:$0xff]  }
 0x521   :  { %2910 = vmatpush2.bf16.msra.mxu1 %v11656_v8  ;;  %2951 = vmatpush2.bf16.msra.mxu0 %v11659_v52  ;;  %v11697_v8 = vld [vmem:[#allocation28 + $0x3ac] ss:$16 sps:$4 sm:$0xff]   ;;  %v11692_v52 = vld [vmem:[#allocation28 + $0x3a0] ss:$16 sps:$4 sm:$0xff]  }
 0x522   :  { %2911 = vmatprep.subr.bf16.mxu1 %v11664_v25  ;;  %2952 = vmatprep.subr.bf16.mxu0 %v11667_v11  ;;  %v11695_v25 = vld [vmem:[#allocation28 + $0x3a8] ss:$16 sps:$4 sm:$0xff]   ;;  %v11700_v11 = vld [vmem:[#allocation28 + $0x384] ss:$16 sps:$4 sm:$0xff]  }
 0x525   :  { %2912 = vmatpush2.bf16.msra.mxu1 %v11662_v14  ;;  %2953 = vmatpush2.bf16.msra.mxu0 %v11665_v18  ;;  %v2979_v14 = vmul.f32 %v14135_v51, %v14114_v31  ;;  %v11698_v18 = vld [vmem:[#allocation28 + $0x380] ss:$16 sps:$4 sm:$0xff]   ;;  %v11707_v51 = vld [vmem:[#allocation28 + $0x368] ss:$16 sps:$4 sm:$0xff]  }
 0x526   :  { %2913 = vmatprep.subr.bf16.mxu1 %v11670_v49  ;;  %2954 = vmatprep.subr.bf16.mxu0 %v11673_v16  ;;  %v11701_v49 = vld [vmem:[#allocation28 + $0x388] ss:$16 sps:$4 sm:$0xff]   ;;  %v11706_v16 = vld [vmem:[#allocation28 + $0x364] ss:$16 sps:$4 sm:$0xff]  }
 0x527   :  { %v2983_v33 = vrot.slane %v2979_v14, 4 }
 0x529   :  { %2914 = vmatpush2.bf16.msra.mxu1 %v11668_v36  ;;  %2955 = vmatpush2.bf16.msra.mxu0 %v11671_v37  ;;  %v3436_v36 = vrot.slane %v3435_v22, 4  ;;  %v11704_v37 = vld [vmem:[#allocation28 + $0x360] ss:$16 sps:$4 sm:$0xff]   ;;  %v2984_v61 = vadd.f32 %v2983_v33, %v2979_v14 }
 0x52a   :  { %2915 = vmatprep.subr.bf16.mxu1 %v11676_v3  ;;  %2956 = vmatprep.subr.bf16.mxu0 %v11679_v62  ;;  %v2997_v3 = vadd.f32 %v2996_v27, %v2981_v60  ;;  %v3423_v62 = vrot.slane %v3422_v39, 4  ;;  %v11733_v60 = vld [vmem:[#allocation28 + $0x46c] ss:$16 sps:$4 sm:$0xff]   ;;  %v11728_v14 = vld [vmem:[#allocation28 + $0x460] ss:$16 sps:$4 sm:$0xff]  }
 0x52b   :  { %v3437_v56 = vadd.f32 %v3436_v36, %v3435_v22  ;;  %v2985_v50 = vrot.slane %v2984_v61, 2  ;;  %v11736_v22 = vld [vmem:[#allocation28 + $0x444] ss:$16 sps:$4 sm:$0xff]   ;;  %v11739_v27 = vld [vmem:[#allocation28 + $0x44c] ss:$16 sps:$4 sm:$0xff]  }
 0x52c   :  { %v11734_v33 = vld [vmem:[#allocation28 + $0x440] ss:$16 sps:$4 sm:$0xff]   ;;  %v11737_v36 = vld [vmem:[#allocation28 + $0x448] ss:$16 sps:$4 sm:$0xff]  }
 0x52d   :  { %2916 = vmatpush2.bf16.msra.mxu1 %v11674_v44  ;;  %2957 = vmatpush2.bf16.msra.mxu0 %v11677_v34  ;;  %v11710_v44 = vld [vmem:[#allocation28 + $0x340] ss:$16 sps:$4 sm:$0xff]   ;;  %v11713_v34 = vld [vmem:[#allocation28 + $0x348] ss:$16 sps:$4 sm:$0xff]  }
 0x52e   :  { %3318 = vmatprep.subr.bf16.mxu1 %v11682_v47  ;;  %3359 = vmatprep.subr.bf16.mxu0 %v11685_v48  ;;  %v2998_v47 = vrot.slane %v2997_v3, 2  ;;  %v3424_v48 = vadd.f32 %v3423_v62, %v3422_v39 }
 0x530   :  { %2918 = vmatmul.mubr.bf16.vlgmr.msra.gmra.mxu1 %v2639_v59  ;;  %2959 = vmatmul.mubr.bf16.vlgmr.msra.gmra.mxu0 %v2639_v59  ;;  %v11716_v59 = vld [vmem:[#allocation28 + $0x320] ss:$16 sps:$4 sm:$0xff]  }
 0x531   :  { %3319 = vmatpush1.bf16.msra.mxu1 %v11680_v55  ;;  %10352 = vmatprep.mubr.msk.bf16.mxu1 %vm897_vm3, %v3073_v58  ;;  %v3438_v55 = vrot.slane %v3437_v56, 2 }
 0x532   :  { %3360 = vmatpush1.bf16.msra.mxu0 %v11683_v42  ;;  %10353 = vmatprep.mubr.msk.bf16.mxu0 %vm897_vm3, %v3073_v58  ;;  %v11719_v42 = vld [vmem:[#allocation28 + $0x328] ss:$16 sps:$4 sm:$0xff]   ;;  %v11724_v58 = vld [vmem:[#allocation28 + $0x304] ss:$16 sps:$4 sm:$0xff]  }
 0x533   :  { %3320 = vmatprep.subr.bf16.mxu1 %v11688_v57  ;;  %3361 = vmatprep.subr.bf16.mxu0 %v11691_v0  ;;  %v2999_v57 = vadd.f32 %v2998_v47, %v2997_v3  ;;  %v3425_v0 = vrot.slane %v3424_v48, 2  ;;  %v11745_v3 = vld [vmem:[#allocation28 + $0x42c] ss:$16 sps:$4 sm:$0xff]  }
 0x534   :  { %v11751_v47 = vld [vmem:[#allocation28 + $0x40c] ss:$16 sps:$4 sm:$0xff]  }
 0x535   :  { %3321 = vmatpush1.bf16.msra.mxu1 %v11686_v40  ;;  %v11727_v40 = vld [vmem:[#allocation28 + $0x30c] ss:$16 sps:$4 sm:$0xff]  }
 0x536   :  { %3362 = vmatpush1.bf16.msra.mxu0 %v11689_v5  ;;  %3322 = vmatprep.subr.bf16.mxu1 %v11694_v6  ;;  %v2986_v5 = vadd.f32 %v2985_v50, %v2984_v61  ;;  %v3439_v6 = vadd.f32 %v3438_v55, %v3437_v56  ;;  %v11740_v61 = vld [vmem:[#allocation28 + $0x420] ss:$16 sps:$4 sm:$0xff]   ;;  %v11743_v56 = vld [vmem:[#allocation28 + $0x428] ss:$16 sps:$4 sm:$0xff]  }
 0x537   :  { %3363 = vmatprep.subr.bf16.mxu0 %v11697_v8  ;;  %v11722_v8 = vld [vmem:[#allocation28 + $0x300] ss:$16 sps:$4 sm:$0xff]   ;;  %v11749_v55 = vld [vmem:[#allocation28 + $0x408] ss:$16 sps:$4 sm:$0xff]  }
 0x538   :  { %v3440_v13 = vrot.slane %v3439_v6, 1  ;;  %v11746_v50 = vld [vmem:[#allocation28 + $0x400] ss:$16 sps:$4 sm:$0xff]  }
 0x539   :  { %3323 = vmatpush1.bf16.msra.mxu1 %v11692_v52  ;;  %v11725_v52 = vld [vmem:[#allocation28 + $0x308] ss:$16 sps:$4 sm:$0xff]  }
 0x53a   :  { %3364 = vmatpush1.bf16.msra.mxu0 %v11695_v25  ;;  %3324 = vmatprep.subr.bf16.mxu1 %v11700_v11  ;;  %v3000_v25 = vrot.slane %v2999_v57, 1  ;;  %v3426_v11 = vadd.f32 %v3425_v0, %v3424_v48  ;;  %v3441_v39 = vadd.f32 %v3440_v13, %v3439_v6  ;;  %v11752_v0 = vld [vmem:[#allocation28 + $0x560] ss:$16 sps:$4 sm:$0xff]   ;;  %v11755_v6 = vld [vmem:[#allocation28 + $0x568] ss:$16 sps:$4 sm:$0xff]  }
 0x53b   :  { %3365 = vmatprep.subr.bf16.mxu0 %v11703_v12  ;;  %v2987_v12 = vrot.slane %v2986_v5, 1  ;;  %v11769_v13 = vld [vmem:[#allocation28 + $0x52c] ss:$16 sps:$4 sm:$0xff]  }
 0x53d   :  { %3325 = vmatpush1.bf16.msra.mxu1 %v11698_v18  ;;  %v11731_v18 = vld [vmem:[#allocation28 + $0x468] ss:$16 sps:$4 sm:$0xff]  }
 0x53e   :  { %3366 = vmatpush1.bf16.msra.mxu0 %v11701_v49  ;;  %3326 = vmatprep.subr.bf16.mxu1 %v11706_v16  ;;  %v3001_v49 = vadd.f32 %v3000_v25, %v2999_v57  ;;  %v3427_v16 = vrot.slane %v3426_v11, 1  ;;  %v11757_v57 = vld [vmem:[#allocation28 + $0x56c] ss:$16 sps:$4 sm:$0xff]   ;;  %v11758_v25 = vld [vmem:[#allocation28 + $0x540] ss:$16 sps:$4 sm:$0xff]  }
 0x53f   :  { %3367 = vmatprep.subr.bf16.mxu0 %v11709_v29  ;;  %v2988_v29 = vadd.f32 %v2987_v12, %v2986_v5  ;;  %v14176_v12 = vpop.permute.xlu1 %3842 }
 0x541   :  { %3327 = vmatpush1.bf16.msra.mxu1 %v11704_v37  ;;  %v11742_v37 = vld [vmem:[#allocation28 + $0x424] ss:$16 sps:$4 sm:$0xff]   ;;  %v3009_v62 = vpack.c.bf16 %v2988_v29, %v2988_v29  ;;  %v11775_v29 = vld [vmem:[#allocation28 + $0x50c] ss:$16 sps:$4 sm:$0xff]  }
 0x542   :  { %3368 = vmatpush1.bf16.msra.mxu0 %v11707_v51  ;;  %3328 = vmatprep.subr.bf16.mxu1 %v11712_v19  ;;  %v3011_v51 = vpack.c.bf16 %v3001_v49, %v3001_v49  ;;  %v3428_v19 = vadd.f32 %v3427_v16, %v3426_v11  ;;  %v11761_v11 = vld [vmem:[#allocation28 + $0x548] ss:$16 sps:$4 sm:$0xff]   ;;  %v11772_v16 = vld [vmem:[#allocation28 + $0x504] ss:$16 sps:$4 sm:$0xff]  }
 0x543   :  { %3369 = vmatprep.subr.bf16.mxu0 %v11715_v43  ;;  %v3445_v43 = vpack.c.bf16 %v3441_v39, %v3441_v39  ;;  %v3066_v48 = vunpack.c.l.b16 %v3009_v62  ;;  %v11767_v49 = vld [vmem:[#allocation28 + $0x528] ss:$16 sps:$4 sm:$0xff]   ;;  %v11781_v62 = vld [vmem:[#allocation28 + $0x4ec] ss:$16 sps:$4 sm:$0xff]  }
 0x545   :  { %3329 = vmatpush1.bf16.msra.mxu1 %v11710_v44  ;;  %v11748_v44 = vld [vmem:[#allocation28 + $0x404] ss:$16 sps:$4 sm:$0xff]  }
 0x546   :  { %3370 = vmatpush1.bf16.msra.mxu0 %v11713_v34  ;;  %3330 = vmatprep.subr.bf16.mxu1 %v11718_v45  ;;  %v3068_v34 = vunpack.c.l.b16 %v3011_v51  ;;  %v3443_v45 = vpack.c.bf16 %v3428_v19, %v3428_v19  ;;  %v11773_v51 = vld [vmem:[#allocation28 + $0x508] ss:$16 sps:$4 sm:$0xff]   ;;  %v11778_v19 = vld [vmem:[#allocation28 + $0x4e4] ss:$16 sps:$4 sm:$0xff]  }
 0x547   :  { %3371 = vmatprep.subr.bf16.mxu0 %v11721_v46  ;;  %v3502_v46 = vunpack.c.l.b16 %v3445_v43 }
 0x549   :  { %3331 = vmatpush1.bf16.msra.mxu1 %v11716_v59  ;;  %v11754_v59 = vld [vmem:[#allocation28 + $0x564] ss:$16 sps:$4 sm:$0xff]  }
 0x54a   :  { %3372 = vmatpush1.bf16.msra.mxu0 %v11719_v42  ;;  %3332 = vmatprep.subr.bf16.mxu1 %v11724_v58  ;;  %v3500_v42 = vunpack.c.l.b16 %v3443_v45  ;;  %v3070_v58 = vsel %vm2203_vm1, %v3068_v34, %v3066_v48 }
 0x54b   :  { %3373 = vmatprep.subr.bf16.mxu0 %v11727_v40  ;;  %v3072_v5 = vpack.c.b16 %v3070_v58, %v3070_v58 }
 0x54c   :  { %v3504_v40 = vsel %vm2203_vm1, %v3502_v46, %v3500_v42 }
 0x54d   :  { %3333 = vmatpush1.bf16.msra.mxu1 %v11722_v8  ;;  %v11760_v8 = vld [vmem:[#allocation28 + $0x544] ss:$16 sps:$4 sm:$0xff]  }
 0x54e   :  { %3374 = vmatpush1.bf16.msra.mxu0 %v11725_v52  ;;  %3342 = vmatprep.subr.bf16.mxu1 %v11730_v2  ;;  %v3506_v52 = vpack.c.b16 %v3504_v40, %v3504_v40  ;;  %v11763_v2 = vld [vmem:[#allocation28 + $0x54c] ss:$16 sps:$4 sm:$0xff]  }
 0x54f   :  { %3383 = vmatprep.subr.bf16.mxu0 %v11733_v60  ;;  %v11766_v60 = vld [vmem:[#allocation28 + $0x524] ss:$16 sps:$4 sm:$0xff]  }
 0x551   :  { %3343 = vmatpush2.bf16.msra.mxu1 %v11728_v14  ;;  %v14179_v14 = vpop.permute.xlu0 %3838 }
 0x552   :  { %3384 = vmatpush2.bf16.msra.mxu0 %v11731_v18  ;;  %3344 = vmatprep.subr.bf16.mxu1 %v11736_v22  ;;  %v11764_v18 = vld [vmem:[#allocation28 + $0x520] ss:$16 sps:$4 sm:$0xff]   ;;  %v3848_v22 = vmul.f32 %v14176_v12, %v14099_v35  ;;  %v3846_v39 = vmul.f32 %v14179_v14, %v14102_v10 }
 0x553   :  { %3385 = vmatprep.subr.bf16.mxu0 %v11739_v27  ;;  %v3414_v27 = vmul.f32 %v14161_v7, %v14110_v20 }
 0x554   :  { %v3855_v7 = vsel %vm897_vm3, %v3846_v39, 0.0 }
 0x555   :  { %3345 = vmatpush2.bf16.msra.mxu1 %v11734_v33  ;;  %v3412_v33 = vmul.f32 %v14157_v54, %v14114_v31  ;;  %v11779_v54 = vld [vmem:[#allocation28 + $0x4e8] ss:$16 sps:$4 sm:$0xff]   ;;  %v3856_v34 = vrot.slane %v3855_v7, 4 }
 0x556   :  { %3386 = vmatpush2.bf16.msra.mxu0 %v11737_v36  ;;  %3346 = vmatprep.subr.bf16.mxu1 %v11742_v37  ;;  %v11770_v36 = vld [vmem:[#allocation28 + $0x500] ss:$16 sps:$4 sm:$0xff]   ;;  %v3868_v37 = vsel %vm897_vm3, %v3848_v22, 0.0  ;;  %v11802_v22 = vld [vmem:[#allocation28 + $0x5e4] ss:$16 sps:$4 sm:$0xff]  }
 0x557   :  { %3387 = vmatprep.subr.bf16.mxu0 %v11745_v3  ;;  %v3429_v3 = vrot.slane %v3414_v27, 4  ;;  %v3416_v43 = vrot.slane %v3412_v33, 4  ;;  %v3857_v42 = vadd.f32 %v3856_v34, %v3855_v7  ;;  %v11817_v34 = vld [vmem:[#allocation28 + $0x5ac] ss:$16 sps:$4 sm:$0xff]  }
 0x559   :  { %3347 = vmatpush2.bf16.msra.mxu1 %v11740_v61  ;;  %v3869_v61 = vrot.slane %v3868_v37, 4  ;;  %v3430_v45 = vadd.f32 %v3429_v3, %v3414_v27  ;;  %v3417_v48 = vadd.f32 %v3416_v43, %v3412_v33  ;;  %v11805_v27 = vld [vmem:[#allocation28 + $0x5ec] ss:$16 sps:$4 sm:$0xff]   ;;  %v11800_v33 = vld [vmem:[#allocation28 + $0x5e0] ss:$16 sps:$4 sm:$0xff]  }
 0x55a   :  { %3388 = vmatpush2.bf16.msra.mxu0 %v11743_v56  ;;  %3348 = vmatprep.subr.bf16.mxu1 %v11748_v44  ;;  %v11776_v56 = vld [vmem:[#allocation28 + $0x4e0] ss:$16 sps:$4 sm:$0xff]   ;;  %v11784_v44 = vld [vmem:[#allocation28 + $0x4c4] ss:$16 sps:$4 sm:$0xff]   ;;  %v11811_v3 = vld [vmem:[#allocation28 + $0x5cc] ss:$16 sps:$4 sm:$0xff]  }
 0x55b   :  { %3389 = vmatprep.subr.bf16.mxu0 %v11751_v47  ;;  %v11787_v47 = vld [vmem:[#allocation28 + $0x4cc] ss:$16 sps:$4 sm:$0xff]   ;;  %v3870_v46 = vadd.f32 %v3869_v61, %v3868_v37  ;;  %v3431_v58 = vrot.slane %v3430_v45, 2  ;;  %v11808_v37 = vld [vmem:[#allocation28 + $0x5c4] ss:$16 sps:$4 sm:$0xff]  }
 0x55c   :  { %v11806_v43 = vld [vmem:[#allocation28 + $0x5c0] ss:$16 sps:$4 sm:$0xff]   ;;  %v11809_v61 = vld [vmem:[#allocation28 + $0x5c8] ss:$16 sps:$4 sm:$0xff]  }
 0x55d   :  { %3349 = vmatpush2.bf16.msra.mxu1 %v11746_v50  ;;  %v11782_v50 = vld [vmem:[#allocation28 + $0x4c0] ss:$16 sps:$4 sm:$0xff]   ;;  %v3871_v40 = vrot.slane %v3870_v46, 2 }
 0x55e   :  { %3390 = vmatpush2.bf16.msra.mxu0 %v11749_v55  ;;  %3751 = vmatprep.subr.bf16.mxu1 %v11754_v59  ;;  %v11785_v55 = vld [vmem:[#allocation28 + $0x4c8] ss:$16 sps:$4 sm:$0xff]   ;;  %v11790_v59 = vld [vmem:[#allocation28 + $0x4a4] ss:$16 sps:$4 sm:$0xff]  }
 0x55f   :  { %3792 = vmatprep.subr.bf16.mxu0 %v11757_v57  ;;  %v11793_v57 = vld [vmem:[#allocation28 + $0x4ac] ss:$16 sps:$4 sm:$0xff]  }
 0x560   :  { %3351 = vmatmul.mubr.bf16.vlgmr.msra.gmra.mxu1 %v3072_v5 }
 0x561   :  { %3392 = vmatmul.mubr.bf16.vlgmr.msra.gmra.mxu0 %v3072_v5  ;;  %3752 = vmatpush1.bf16.msra.mxu1 %v11752_v0  ;;  %v3418_v0 = vrot.slane %v3417_v48, 2  ;;  %v11788_v5 = vld [vmem:[#allocation28 + $0x4a0] ss:$16 sps:$4 sm:$0xff]  }
 0x562   :  { %10402 = vmatprep.mubr.msk.bf16.mxu1 %vm897_vm3, %v3506_v52  ;;  %3793 = vmatpush1.bf16.msra.mxu0 %v11755_v6  ;;  %v11791_v6 = vld [vmem:[#allocation28 + $0x4a8] ss:$16 sps:$4 sm:$0xff]  }
 0x563   :  { %10403 = vmatprep.mubr.msk.bf16.mxu0 %vm897_vm3, %v3506_v52  ;;  %3753 = vmatprep.subr.bf16.mxu1 %v11760_v8  ;;  %v11796_v8 = vld [vmem:[#allocation28 + $0x484] ss:$16 sps:$4 sm:$0xff]   ;;  %v3858_v52 = vrot.slane %v3857_v42, 2 }
 0x564   :  { %3794 = vmatprep.subr.bf16.mxu0 %v11763_v2  ;;  %v3432_v2 = vadd.f32 %v3431_v58, %v3430_v45 }
 0x565   :  { %3754 = vmatpush1.bf16.msra.mxu1 %v11758_v25  ;;  %v11799_v25 = vld [vmem:[#allocation28 + $0x48c] ss:$16 sps:$4 sm:$0xff]  }
 0x566   :  { %3795 = vmatpush1.bf16.msra.mxu0 %v11761_v11  ;;  %3755 = vmatprep.subr.bf16.mxu1 %v11766_v60  ;;  %v3419_v11 = vadd.f32 %v3418_v0, %v3417_v48  ;;  %v3872_v60 = vadd.f32 %v3871_v40, %v3870_v46  ;;  %v11812_v48 = vld [vmem:[#allocation28 + $0x5a0] ss:$16 sps:$4 sm:$0xff]   ;;  %v11815_v46 = vld [vmem:[#allocation28 + $0x5a8] ss:$16 sps:$4 sm:$0xff]  }
 0x567   :  { %3796 = vmatprep.subr.bf16.mxu0 %v11769_v13  ;;  %v11794_v13 = vld [vmem:[#allocation28 + $0x480] ss:$16 sps:$4 sm:$0xff]   ;;  %v11821_v40 = vld [vmem:[#allocation28 + $0x588] ss:$16 sps:$4 sm:$0xff]  }
 0x568   :  { %v3873_v39 = vrot.slane %v3872_v60, 1  ;;  %v11818_v0 = vld [vmem:[#allocation28 + $0x580] ss:$16 sps:$4 sm:$0xff]  }
 0x569   :  { %3756 = vmatpush1.bf16.msra.mxu1 %v11764_v18  ;;  %v11797_v18 = vld [vmem:[#allocation28 + $0x488] ss:$16 sps:$4 sm:$0xff]  }
 0x56a   :  { %3797 = vmatpush1.bf16.msra.mxu0 %v11767_v49  ;;  %3757 = vmatprep.subr.bf16.mxu1 %v11772_v16  ;;  %v3859_v49 = vadd.f32 %v3858_v52, %v3857_v42  ;;  %v3433_v16 = vrot.slane %v3432_v2, 1  ;;  %v3874_v7 = vadd.f32 %v3873_v39, %v3872_v60  ;;  %v11823_v42 = vld [vmem:[#allocation28 + $0x58c] ss:$16 sps:$4 sm:$0xff]   ;;  %v11827_v60 = vld [vmem:[#allocation28 + $0x6e8] ss:$16 sps:$4 sm:$0xff]  }
 0x56b   :  { %3798 = vmatprep.subr.bf16.mxu0 %v11775_v29  ;;  %v3420_v29 = vrot.slane %v3419_v11, 1  ;;  %v11829_v52 = vld [vmem:[#allocation28 + $0x6ec] ss:$16 sps:$4 sm:$0xff]  }
 0x56c   :  { %v11841_v39 = vld [vmem:[#allocation28 + $0x6ac] ss:$16 sps:$4 sm:$0xff]  }
 0x56d   :  { %3758 = vmatpush1.bf16.msra.mxu1 %v11770_v36  ;;  %v11803_v36 = vld [vmem:[#allocation28 + $0x5e8] ss:$16 sps:$4 sm:$0xff]  }
 0x56e   :  { %3799 = vmatpush1.bf16.msra.mxu0 %v11773_v51  ;;  %3759 = vmatprep.subr.bf16.mxu1 %v11778_v19  ;;  %v3860_v51 = vrot.slane %v3859_v49, 1  ;;  %v3434_v19 = vadd.f32 %v3433_v16, %v3432_v2  ;;  %v11824_v2 = vld [vmem:[#allocation28 + $0x6e0] ss:$16 sps:$4 sm:$0xff]   ;;  %v11833_v16 = vld [vmem:[#allocation28 + $0x6c8] ss:$16 sps:$4 sm:$0xff]  }
 0x56f   :  { %3800 = vmatprep.subr.bf16.mxu0 %v11781_v62  ;;  %v3421_v62 = vadd.f32 %v3420_v29, %v3419_v11  ;;  %v14194_v29 = vpop.permute.xlu1 %4271 }
 0x571   :  { %3760 = vmatpush1.bf16.msra.mxu1 %v11776_v56  ;;  %v11814_v56 = vld [vmem:[#allocation28 + $0x5a4] ss:$16 sps:$4 sm:$0xff]   ;;  %v3442_v45 = vpack.c.bf16 %v3421_v62, %v3421_v62  ;;  %v11847_v62 = vld [vmem:[#allocation28 + $0x68c] ss:$16 sps:$4 sm:$0xff]  }
 0x572   :  { %3801 = vmatpush1.bf16.msra.mxu0 %v11779_v54  ;;  %3761 = vmatprep.subr.bf16.mxu1 %v11784_v44  ;;  %v3861_v54 = vadd.f32 %v3860_v51, %v3859_v49  ;;  %v3444_v44 = vpack.c.bf16 %v3434_v19, %v3434_v19  ;;  %v11830_v49 = vld [vmem:[#allocation28 + $0x6c0] ss:$16 sps:$4 sm:$0xff]   ;;  %v11839_v51 = vld [vmem:[#allocation28 + $0x6a8] ss:$16 sps:$4 sm:$0xff]   ;;  %v11844_v19 = vld [vmem:[#allocation28 + $0x684] ss:$16 sps:$4 sm:$0xff]  }
 0x573   :  { %3802 = vmatprep.subr.bf16.mxu0 %v11787_v47  ;;  %v3878_v47 = vpack.c.bf16 %v3874_v7, %v3874_v7  ;;  %v3499_v58 = vunpack.c.l.b16 %v3442_v45  ;;  %v11853_v45 = vld [vmem:[#allocation28 + $0x66c] ss:$16 sps:$4 sm:$0xff]  }
 0x575   :  { %3762 = vmatpush1.bf16.msra.mxu1 %v11782_v50  ;;  %v11820_v50 = vld [vmem:[#allocation28 + $0x584] ss:$16 sps:$4 sm:$0xff]  }
 0x576   :  { %3803 = vmatpush1.bf16.msra.mxu0 %v11785_v55  ;;  %3763 = vmatprep.subr.bf16.mxu1 %v11790_v59  ;;  %v3876_v55 = vpack.c.bf16 %v3861_v54, %v3861_v54  ;;  %v3501_v59 = vunpack.c.l.b16 %v3444_v44  ;;  %v11845_v54 = vld [vmem:[#allocation28 + $0x688] ss:$16 sps:$4 sm:$0xff]   ;;  %v11850_v44 = vld [vmem:[#allocation28 + $0x664] ss:$16 sps:$4 sm:$0xff]  }
 0x577   :  { %3804 = vmatprep.subr.bf16.mxu0 %v11793_v57  ;;  %v3935_v57 = vunpack.c.l.b16 %v3878_v47 }
 0x579   :  { %3764 = vmatpush1.bf16.msra.mxu1 %v11788_v5  ;;  %v11826_v5 = vld [vmem:[#allocation28 + $0x6e4] ss:$16 sps:$4 sm:$0xff]  }
 0x57a   :  { %3805 = vmatpush1.bf16.msra.mxu0 %v11791_v6  ;;  %3765 = vmatprep.subr.bf16.mxu1 %v11796_v8  ;;  %v3933_v6 = vunpack.c.l.b16 %v3876_v55  ;;  %v3503_v8 = vsel %vm2203_vm1, %v3501_v59, %v3499_v58 }
 0x57b   :  { %3806 = vmatprep.subr.bf16.mxu0 %v11799_v25  ;;  %v3505_v11 = vpack.c.b16 %v3503_v8, %v3503_v8 }
 0x57c   :  { %v3937_v25 = vsel %vm2203_vm1, %v3935_v57, %v3933_v6 }
 0x57d   :  { %3766 = vmatpush1.bf16.msra.mxu1 %v11794_v13  ;;  %v11832_v13 = vld [vmem:[#allocation28 + $0x6c4] ss:$16 sps:$4 sm:$0xff]  }
 0x57e   :  { %3807 = vmatpush1.bf16.msra.mxu0 %v11797_v18  ;;  %3775 = vmatprep.subr.bf16.mxu1 %v11802_v22  ;;  %v3939_v18 = vpack.c.b16 %v3937_v25, %v3937_v25  ;;  %v11835_v22 = vld [vmem:[#allocation28 + $0x6cc] ss:$16 sps:$4 sm:$0xff]  }
 0x57f   :  { %3816 = vmatprep.subr.bf16.mxu0 %v11805_v27  ;;  %v11838_v27 = vld [vmem:[#allocation28 + $0x6a4] ss:$16 sps:$4 sm:$0xff]  }
 0x581   :  { %3776 = vmatpush2.bf16.msra.mxu1 %v11800_v33  ;;  %v14197_v33 = vpop.permute.xlu0 %4275 }
 0x582   :  { %3817 = vmatpush2.bf16.msra.mxu0 %v11803_v36  ;;  %3777 = vmatprep.subr.bf16.mxu1 %v11808_v37  ;;  %v11836_v36 = vld [vmem:[#allocation28 + $0x6a0] ss:$16 sps:$4 sm:$0xff]   ;;  %v4279_v37 = vmul.f32 %v14194_v29, %v14102_v10  ;;  %v4281_v7 = vmul.f32 %v14197_v33, %v14099_v35 }
 0x583   :  { %3818 = vmatprep.subr.bf16.mxu0 %v11811_v3  ;;  %v3847_v3 = vmul.f32 %v14176_v12, %v14110_v20 }
 0x584   :  { %v4301_v12 = vsel %vm897_vm3, %v4281_v7, 0.0 }
 0x585   :  { %3778 = vmatpush2.bf16.msra.mxu1 %v11806_v43  ;;  %v3845_v43 = vmul.f32 %v14179_v14, %v14114_v31  ;;  %v11851_v14 = vld [vmem:[#allocation28 + $0x668] ss:$16 sps:$4 sm:$0xff]   ;;  %v4302_v55 = vrot.slane %v4301_v12, 4 }
 0x586   :  { %3819 = vmatpush2.bf16.msra.mxu0 %v11809_v61  ;;  %3779 = vmatprep.subr.bf16.mxu1 %v11814_v56  ;;  %v11842_v61 = vld [vmem:[#allocation28 + $0x680] ss:$16 sps:$4 sm:$0xff]   ;;  %v4288_v56 = vsel %vm897_vm3, %v4279_v37, 0.0  ;;  %v11874_v37 = vld [vmem:[#allocation28 + $0x764] ss:$16 sps:$4 sm:$0xff]  }
 0x587   :  { %3820 = vmatprep.subr.bf16.mxu0 %v11817_v34  ;;  %v3862_v34 = vrot.slane %v3847_v3, 4  ;;  %v3849_v47 = vrot.slane %v3845_v43, 4  ;;  %v4303_v6 = vadd.f32 %v4302_v55, %v4301_v12  ;;  %v11889_v55 = vld [vmem:[#allocation28 + $0x72c] ss:$16 sps:$4 sm:$0xff]  }
 0x589   :  { %3780 = vmatpush2.bf16.msra.mxu1 %v11812_v48  ;;  %v4289_v48 = vrot.slane %v4288_v56, 4  ;;  %v3863_v59 = vadd.f32 %v3862_v34, %v3847_v3  ;;  %v3850_v58 = vadd.f32 %v3849_v47, %v3845_v43  ;;  %v11877_v3 = vld [vmem:[#allocation28 + $0x76c] ss:$16 sps:$4 sm:$0xff]   ;;  %v11872_v43 = vld [vmem:[#allocation28 + $0x760] ss:$16 sps:$4 sm:$0xff]  }
 0x58a   :  { %3821 = vmatpush2.bf16.msra.mxu0 %v11815_v46  ;;  %3781 = vmatprep.subr.bf16.mxu1 %v11820_v50  ;;  %v11848_v46 = vld [vmem:[#allocation28 + $0x660] ss:$16 sps:$4 sm:$0xff]   ;;  %v11856_v50 = vld [vmem:[#allocation28 + $0x644] ss:$16 sps:$4 sm:$0xff]   ;;  %v11883_v34 = vld [vmem:[#allocation28 + $0x74c] ss:$16 sps:$4 sm:$0xff]  }
 0x58b   :  { %3822 = vmatprep.subr.bf16.mxu0 %v11823_v42  ;;  %v11859_v42 = vld [vmem:[#allocation28 + $0x64c] ss:$16 sps:$4 sm:$0xff]   ;;  %v4290_v57 = vadd.f32 %v4289_v48, %v4288_v56  ;;  %v3864_v8 = vrot.slane %v3863_v59, 2  ;;  %v11880_v56 = vld [vmem:[#allocation28 + $0x744] ss:$16 sps:$4 sm:$0xff]  }
 0x58c   :  { %v11878_v47 = vld [vmem:[#allocation28 + $0x740] ss:$16 sps:$4 sm:$0xff]   ;;  %v11881_v48 = vld [vmem:[#allocation28 + $0x748] ss:$16 sps:$4 sm:$0xff]  }
 0x58d   :  { %3782 = vmatpush2.bf16.msra.mxu1 %v11818_v0  ;;  %v11854_v0 = vld [vmem:[#allocation28 + $0x640] ss:$16 sps:$4 sm:$0xff]   ;;  %v4291_v25 = vrot.slane %v4290_v57, 2 }
 0x58e   :  { %3823 = vmatpush2.bf16.msra.mxu0 %v11821_v40  ;;  %4184 = vmatprep.subr.bf16.mxu1 %v11826_v5  ;;  %v11857_v40 = vld [vmem:[#allocation28 + $0x648] ss:$16 sps:$4 sm:$0xff]   ;;  %v11862_v5 = vld [vmem:[#allocation28 + $0x624] ss:$16 sps:$4 sm:$0xff]  }
 0x58f   :  { %4225 = vmatprep.subr.bf16.mxu0 %v11829_v52  ;;  %v11865_v52 = vld [vmem:[#allocation28 + $0x62c] ss:$16 sps:$4 sm:$0xff]  }
 0x590   :  { %3784 = vmatmul.mubr.bf16.vlgmr.msra.gmra.mxu1 %v3505_v11 }
 0x591   :  { %3825 = vmatmul.mubr.bf16.vlgmr.msra.gmra.mxu0 %v3505_v11  ;;  %4185 = vmatpush1.bf16.msra.mxu1 %v11824_v2  ;;  %v3851_v2 = vrot.slane %v3850_v58, 2  ;;  %v11860_v11 = vld [vmem:[#allocation28 + $0x620] ss:$16 sps:$4 sm:$0xff]  }
 0x592   :  { %10452 = vmatprep.mubr.msk.bf16.mxu1 %vm897_vm3, %v3939_v18  ;;  %4226 = vmatpush1.bf16.msra.mxu0 %v11827_v60  ;;  %v11863_v60 = vld [vmem:[#allocation28 + $0x628] ss:$16 sps:$4 sm:$0xff]  }
 0x593   :  { %10453 = vmatprep.mubr.msk.bf16.mxu0 %vm897_vm3, %v3939_v18  ;;  %4186 = vmatprep.subr.bf16.mxu1 %v11832_v13  ;;  %v11868_v13 = vld [vmem:[#allocation28 + $0x604] ss:$16 sps:$4 sm:$0xff]   ;;  %v4304_v18 = vrot.slane %v4303_v6, 2 }
 0x594   :  { %4227 = vmatprep.subr.bf16.mxu0 %v11835_v22  ;;  %v3865_v22 = vadd.f32 %v3864_v8, %v3863_v59  ;;  %v1975_v8 = vld [vmem:[#allocation31] sm:$0xf] }
 0x595   :  { %4187 = vmatpush1.bf16.msra.mxu1 %v11830_v49  ;;  %v11871_v49 = vld [vmem:[#allocation28 + $0x60c] ss:$16 sps:$4 sm:$0xff]  }
 0x596   :  { %4228 = vmatpush1.bf16.msra.mxu0 %v11833_v16  ;;  %4188 = vmatprep.subr.bf16.mxu1 %v11838_v27  ;;  %v3852_v16 = vadd.f32 %v3851_v2, %v3850_v58  ;;  %v4292_v27 = vadd.f32 %v4291_v25, %v4290_v57  ;;  %v11884_v58 = vld [vmem:[#allocation28 + $0x720] ss:$16 sps:$4 sm:$0xff]   ;;  %v11887_v57 = vld [vmem:[#allocation28 + $0x728] ss:$16 sps:$4 sm:$0xff]   ;;  %v14210_v25 = vsub.s32 3, %v13867_v26 }
 0x597   :  { %4229 = vmatprep.subr.bf16.mxu0 %v11841_v39  ;;  %v11866_v39 = vld [vmem:[#allocation28 + $0x600] ss:$16 sps:$4 sm:$0xff]  }
 0x598   :  { %v4293_v7 = vrot.slane %v4292_v27, 1 }
 0x599   :  { %4189 = vmatpush1.bf16.msra.mxu1 %v11836_v36  ;;  %v11869_v36 = vld [vmem:[#allocation28 + $0x608] ss:$16 sps:$4 sm:$0xff]  }
 0x59a   :  { %4230 = vmatpush1.bf16.msra.mxu0 %v11839_v51  ;;  %4190 = vmatprep.subr.bf16.mxu1 %v11844_v19  ;;  %v4305_v51 = vadd.f32 %v4304_v18, %v4303_v6  ;;  %v3866_v19 = vrot.slane %v3865_v22, 1  ;;  %v4294_v12 = vadd.f32 %v4293_v7, %v4292_v27  ;;  %v11895_v6 = vld [vmem:[#allocation28 + $0x70c] ss:$16 sps:$4 sm:$0xff]  }
 0x59b   :  { %4231 = vmatprep.subr.bf16.mxu0 %v11847_v62  ;;  %v3853_v62 = vrot.slane %v3852_v16, 1  ;;  %v11901_v27 = vld [vmem:[#allocation28 + $0x86c] ss:$16 sps:$4 sm:$0xff]  }
 0x59d   :  { %4191 = vmatpush1.bf16.msra.mxu1 %v11842_v61  ;;  %v11875_v61 = vld [vmem:[#allocation28 + $0x768] ss:$16 sps:$4 sm:$0xff]  }
 0x59e   :  { %4232 = vmatpush1.bf16.msra.mxu0 %v11845_v54  ;;  %4192 = vmatprep.subr.bf16.mxu1 %v11850_v44  ;;  %v4306_v54 = vrot.slane %v4305_v51, 1  ;;  %v3867_v44 = vadd.f32 %v3866_v19, %v3865_v22  ;;  %v1980_v22 = vrot.slane %v1975_v8, %v13870_v30 }
 0x59f   :  { %4233 = vmatprep.subr.bf16.mxu0 %v11853_v45  ;;  %v3854_v45 = vadd.f32 %v3853_v62, %v3852_v16  ;;  %v11899_v62 = vld [vmem:[#allocation28 + $0x868] ss:$16 sps:$4 sm:$0xff]  }
 0x5a0   :  { %v2056_v7 = vadd.f32 %v14139_v63, %v1980_v22  ;;  %v11902_v63 = vld [vmem:[#allocation28 + $0x840] ss:$16 sps:$4 sm:$0xff]   ;;  %v11917_v22 = vld [vmem:[#allocation28 + $0x808] ss:$16 sps:$4 sm:$0xff]  }
 0x5a1   :  { %4193 = vmatpush1.bf16.msra.mxu1 %v11848_v46  ;;  %v11886_v46 = vld [vmem:[#allocation28 + $0x724] ss:$16 sps:$4 sm:$0xff]   ;;  %v3875_v59 = vpack.c.bf16 %v3854_v45, %v3854_v45  ;;  %v11907_v45 = vld [vmem:[#allocation28 + $0x84c] ss:$16 sps:$4 sm:$0xff]  }
 0x5a2   :  { %4234 = vmatpush1.bf16.msra.mxu0 %v11851_v14  ;;  %4194 = vmatprep.subr.bf16.mxu1 %v11856_v50  ;;  %v4307_v14 = vadd.f32 %v4306_v54, %v4305_v51  ;;  %v3877_v50 = vpack.c.bf16 %v3867_v44, %v3867_v44  ;;  %v11896_v51 = vld [vmem:[#allocation28 + $0x860] ss:$16 sps:$4 sm:$0xff]  }
 0x5a3   :  { %4235 = vmatprep.subr.bf16.mxu0 %v11859_v42  ;;  %v4309_v42 = vpack.c.bf16 %v4294_v12, %v4294_v12 }
 0x5a5   :  { %4195 = vmatpush1.bf16.msra.mxu1 %v11854_v0  ;;  %v11892_v0 = vld [vmem:[#allocation28 + $0x704] ss:$16 sps:$4 sm:$0xff]   ;;  %v4366_v2 = vunpack.c.l.b16 %v4309_v42 }
 0x5a6   :  { %4236 = vmatpush1.bf16.msra.mxu0 %v11857_v40  ;;  %4196 = vmatprep.subr.bf16.mxu1 %v11862_v5  ;;  %v4311_v40 = vpack.c.bf16 %v4307_v14, %v4307_v14  ;;  %v3934_v5 = vunpack.c.l.b16 %v3877_v50  ;;  %v11910_v14 = vld [vmem:[#allocation28 + $0x824] ss:$16 sps:$4 sm:$0xff]  }
 0x5a7   :  { %4237 = vmatprep.subr.bf16.mxu0 %v11865_v52  ;;  %v3932_v52 = vunpack.c.l.b16 %v3875_v59  ;;  %v11913_v59 = vld [vmem:[#allocation28 + $0x82c] ss:$16 sps:$4 sm:$0xff]  }
 0x5a8   :  { %v4368_v18 = vunpack.c.l.b16 %v4311_v40 }
 0x5a9   :  { %4197 = vmatpush1.bf16.msra.mxu1 %v11860_v11  ;;  %v11890_v11 = vld [vmem:[#allocation28 + $0x700] ss:$16 sps:$4 sm:$0xff]   ;;  %v3936_v16 = vsel %vm2203_vm1, %v3934_v5, %v3932_v52  ;;  %v4278_v52 = vmul.f32 %v14194_v29, %v14114_v31 }
 0x5aa   :  { %4238 = vmatpush1.bf16.msra.mxu0 %v11863_v60  ;;  %4198 = vmatprep.subr.bf16.mxu1 %v11868_v13  ;;  %v11893_v60 = vld [vmem:[#allocation28 + $0x708] ss:$16 sps:$4 sm:$0xff]   ;;  %v11898_v13 = vld [vmem:[#allocation28 + $0x864] ss:$16 sps:$4 sm:$0xff]   ;;  %v4370_v19 = vsel %vm2203_vm1, %v4368_v18, %v4366_v2  ;;  %v11919_v2 = vld [vmem:[#allocation28 + $0x80c] ss:$16 sps:$4 sm:$0xff]  }
 0x5ab   :  { %4239 = vmatprep.subr.bf16.mxu0 %v11871_v49  ;;  %v1988_v49 = vrot.slane %v1975_v8, %v13878_v38 }
 0x5ad   :  { %4199 = vmatpush1.bf16.msra.mxu1 %v11866_v39  ;;  %v1984_v39 = vrot.slane %v1975_v8, %v13873_v32 }
 0x5ae   :  { %4240 = vmatpush1.bf16.msra.mxu0 %v11869_v36  ;;  %4208 = vmatprep.subr.bf16.mxu1 %v11874_v37  ;;  %v14216_v36 = vpop.permute.xlu1 %4704  ;;  %v1992_v37 = vrot.slane %v1975_v8, %v14210_v25  ;;  %v11916_v8 = vld [vmem:[#allocation28 + $0x804] ss:$16 sps:$4 sm:$0xff]  }
 0x5af   :  { %4249 = vmatprep.subr.bf16.mxu0 %v11877_v3  ;;  %v3938_v3 = vpack.c.b16 %v3936_v16, %v3936_v16  ;;  %v4282_v16 = vrot.slane %v4278_v52, 4 }
 0x5b0   :  { %v2099_v12 = vadd.f32 %v14153_v41, %v1992_v37 }
 0x5b1   :  { %4209 = vmatpush2.bf16.msra.mxu1 %v11872_v43  ;;  %v2097_v43 = vadd.f32 %v14151_v24, %v1988_v49  ;;  %v11922_v49 = vld [vmem:[#allocation28 + $0x7e4] ss:$16 sps:$4 sm:$0xff]  }
 0x5b2   :  { %4250 = vmatpush2.bf16.msra.mxu0 %v11875_v61  ;;  %4210 = vmatprep.subr.bf16.mxu1 %v11880_v56  ;;  %v11904_v61 = vld [vmem:[#allocation28 + $0x844] ss:$16 sps:$4 sm:$0xff]   ;;  %v2058_v56 = vadd.f32 %v14145_v1, %v1984_v39  ;;  %v11905_v1 = vld [vmem:[#allocation28 + $0x848] ss:$16 sps:$4 sm:$0xff]   ;;  %v14229_v50 = vpop.permute.xlu1 %4708 }
 0x5b3   :  { %4251 = vmatprep.subr.bf16.mxu0 %v11883_v34  ;;  %v4372_v34 = vpack.c.b16 %v4370_v19, %v4370_v19  ;;  %v11928_v19 = vld [vmem:[#allocation28 + $0x7c4] ss:$16 sps:$4 sm:$0xff]  }
 0x5b5   :  { %4211 = vmatpush2.bf16.msra.mxu1 %v11878_v47 }
 0x5b6   :  { %4252 = vmatpush2.bf16.msra.mxu0 %v11881_v48  ;;  %4212 = vmatprep.subr.bf16.mxu1 %v11886_v46 }
 0x5b7   :  { %4253 = vmatprep.subr.bf16.mxu0 %v11889_v55 }
 0x5b9   :  { %4213 = vmatpush2.bf16.msra.mxu1 %v11884_v58 }
 0x5ba   :  { %4254 = vmatpush2.bf16.msra.mxu0 %v11887_v57  ;;  %4214 = vmatprep.subr.bf16.mxu1 %v11892_v0  ;;  %v11908_v57 = vld [vmem:[#allocation28 + $0x820] ss:$16 sps:$4 sm:$0xff]   ;;  %v4714_v0 = vmul.f32 %v14229_v50, %v14099_v35 }
 0x5bb   :  { %4255 = vmatprep.subr.bf16.mxu0 %v11895_v6  ;;  %v11911_v6 = vld [vmem:[#allocation28 + $0x828] ss:$16 sps:$4 sm:$0xff]  }
 0x5bc   :  { %v4734_v18 = vsel %vm897_vm3, %v4714_v0, 0.0 }
 0x5bd   :  { %4215 = vmatpush2.bf16.msra.mxu1 %v11890_v11  ;;  %v4712_v11 = vmul.f32 %v14216_v36, %v14102_v10  ;;  %v4735_v37 = vrot.slane %v4734_v18, 4 }
 0x5be   :  { %4256 = vmatpush2.bf16.msra.mxu0 %v11893_v60  ;;  %4617 = vmatprep.subr.bf16.mxu1 %v11898_v13  ;;  %v4280_v60 = vmul.f32 %v14197_v33, %v14110_v20  ;;  %v11914_v13 = vld [vmem:[#allocation28 + $0x800] ss:$16 sps:$4 sm:$0xff]   ;;  %v11923_v33 = vld [vmem:[#allocation28 + $0x7e8] ss:$16 sps:$4 sm:$0xff]  }
 0x5bf   :  { %4658 = vmatprep.subr.bf16.mxu0 %v11901_v27  ;;  %v11925_v27 = vld [vmem:[#allocation28 + $0x7ec] ss:$16 sps:$4 sm:$0xff]   ;;  %v4721_v29 = vsel %vm897_vm3, %v4712_v11, 0.0 }
 0x5c0   :  { %4217 = vmatmul.mubr.bf16.vlgmr.msra.gmra.mxu1 %v3938_v3  ;;  %v2486_v54 = vpop.f32.mrf.mxu1  ;;  %v2527_v44 = vpop.f32.mrf.mxu0  ;;  %v4295_v39 = vrot.slane %v4280_v60, 4 }
 0x5c1   :  { %4258 = vmatmul.mubr.bf16.vlgmr.msra.gmra.mxu0 %v3938_v3  ;;  %v14224_v47 = vadd.f32 %v2486_v54, %v2056_v7  ;;  %v14226_v48 = vadd.f32 %v2527_v44, %v2097_v43  ;;  %4618 = vmatpush1.bf16.msra.mxu1 %v11896_v51  ;;  %v11920_v51 = vld [vmem:[#allocation28 + $0x7e0] ss:$16 sps:$4 sm:$0xff]   ;;  %v4283_v3 = vadd.f32 %v4282_v16, %v4278_v52  ;;  %v11931_v7 = vld [vmem:[#allocation28 + $0x7cc] ss:$16 sps:$4 sm:$0xff]   ;;  %v11929_v54 = vld [vmem:[#allocation28 + $0x7c8] ss:$16 sps:$4 sm:$0xff]  }
 0x5c2   :  { %10502 = vmatprep.mubr.msk.bf16.mxu1 %vm897_vm3, %v4372_v34  ;;  %4659 = vmatpush1.bf16.msra.mxu0 %v11899_v62  ;;  %v2488_v24 = vpop.f32.mrf.mxu1  ;;  %v2529_v46 = vpop.f32.mrf.mxu0  ;;  %v4722_v62 = vrot.slane %v4721_v29, 4  ;;  %v4296_v43 = vadd.f32 %v4295_v39, %v4280_v60  ;;  %v11934_v44 = vld [vmem:[#allocation28 + $0x7a4] ss:$16 sps:$4 sm:$0xff]  }
 0x5c3   :  { %10503 = vmatprep.mubr.msk.bf16.mxu0 %vm897_vm3, %v4372_v34  ;;  %v14232_v55 = vadd.f32 %v2488_v24, %v2058_v56  ;;  %v14234_v41 = vadd.f32 %v2529_v46, %v2099_v12  ;;  %4619 = vmatprep.subr.bf16.mxu1 %v11904_v61  ;;  %v4736_v61 = vadd.f32 %v4735_v37, %v4734_v18  ;;  %v11926_v56 = vld [vmem:[#allocation28 + $0x7c0] ss:$16 sps:$4 sm:$0xff]   ;;  %v4284_v34 = vrot.slane %v4283_v3, 2  ;;  %v11937_v12 = vld [vmem:[#allocation28 + $0x7ac] ss:$16 sps:$4 sm:$0xff]  }
 0x5c4   :  { %4660 = vmatprep.subr.bf16.mxu0 %v11907_v45  ;;  %v2490_v42 = vpop.f32.mrf.mxu1  ;;  %v2531_v58 = vpop.f32.mrf.mxu0  ;;  %v4723_v45 = vadd.f32 %v4722_v62, %v4721_v29  ;;  %v11932_v46 = vld [vmem:[#allocation28 + $0x7a0] ss:$16 sps:$4 sm:$0xff]   ;;  %v11947_v18 = vld [vmem:[#allocation28 + $0x8e8] ss:$16 sps:$4 sm:$0xff]   ;;  %v11961_v62 = vld [vmem:[#allocation28 + $0x8ac] ss:$16 sps:$4 sm:$0xff]  }
 0x5c5   :  { %4620 = vmatpush1.bf16.msra.mxu1 %v11902_v63  ;;  %v4297_v63 = vrot.slane %v4296_v43, 2  ;;  %v4737_v24 = vrot.slane %v4736_v61, 2  ;;  %v11943_v58 = vld [vmem:[#allocation28 + $0x78c] ss:$16 sps:$4 sm:$0xff]   ;;  %v11950_v37 = vld [vmem:[#allocation28 + $0x8c0] ss:$16 sps:$4 sm:$0xff]  }
 0x5c6   :  { %4661 = vmatpush1.bf16.msra.mxu0 %v11905_v1  ;;  %v2491_v40 = vpop.f32.mrf.mxu1  ;;  %v2532_v5 = vpop.f32.mrf.mxu0  ;;  %4621 = vmatprep.subr.bf16.mxu1 %v11910_v14  ;;  %v11935_v1 = vld [vmem:[#allocation28 + $0x7a8] ss:$16 sps:$4 sm:$0xff]   ;;  %v11940_v14 = vld [vmem:[#allocation28 + $0x784] ss:$16 sps:$4 sm:$0xff]   ;;  %v4724_v42 = vrot.slane %v4723_v45, 2 }
 0x5c7   :  { %4662 = vmatprep.subr.bf16.mxu0 %v11913_v59  ;;  %v4285_v59 = vadd.f32 %v4284_v34, %v4283_v3  ;;  %v4738_v0 = vadd.f32 %v4737_v24, %v4736_v61  ;;  %v11938_v40 = vld [vmem:[#allocation28 + $0x780] ss:$16 sps:$4 sm:$0xff]   ;;  %v11941_v5 = vld [vmem:[#allocation28 + $0x788] ss:$16 sps:$4 sm:$0xff]  }
 0x5c8   :  { %v4725_v52 = vadd.f32 %v4724_v42, %v4723_v45  ;;  %v11956_v61 = vld [vmem:[#allocation28 + $0x8a0] ss:$16 sps:$4 sm:$0xff]   ;;  %v11967_v45 = vld [vmem:[#allocation28 + $0x88c] ss:$16 sps:$4 sm:$0xff]  }
 0x5c9   :  { %4622 = vmatpush1.bf16.msra.mxu1 %v11908_v57  ;;  %v4298_v57 = vadd.f32 %v4297_v63, %v4296_v43  ;;  %v4739_v60 = vrot.slane %v4738_v0, 1  ;;  %v11962_v24 = vld [vmem:[#allocation28 + $0x880] ss:$16 sps:$4 sm:$0xff]   ;;  %v11973_v42 = vld [vmem:[#allocation28 + $0x9ec] ss:$16 sps:$4 sm:$0xff]  }
 0x5ca   :  { %4663 = vmatpush1.bf16.msra.mxu0 %v11911_v6  ;;  %4623 = vmatprep.subr.bf16.mxu1 %v11916_v8  ;;  %v11946_v6 = vld [vmem:[#allocation28 + $0x8e4] ss:$16 sps:$4 sm:$0xff]   ;;  %v4286_v8 = vrot.slane %v4285_v59, 1  ;;  %v4726_v16 = vrot.slane %v4725_v52, 1 }
 0x5cb   :  { %4664 = vmatprep.subr.bf16.mxu0 %v11919_v2  ;;  %v11949_v2 = vld [vmem:[#allocation28 + $0x8ec] ss:$16 sps:$4 sm:$0xff]   ;;  %v4299_v11 = vrot.slane %v4298_v57, 1  ;;  %v4740_v39 = vadd.f32 %v4739_v60, %v4738_v0 }
 0x5cc   :  { %v4727_v3 = vadd.f32 %v4726_v16, %v4725_v52  ;;  %v11982_v16 = vld [vmem:[#allocation28 + $0x9a4] ss:$16 sps:$4 sm:$0xff]  }
 0x5cd   :  { %4624 = vmatpush1.bf16.msra.mxu1 %v11914_v13  ;;  %v11944_v13 = vld [vmem:[#allocation28 + $0x8e0] ss:$16 sps:$4 sm:$0xff]   ;;  %v4300_v29 = vadd.f32 %v4299_v11, %v4298_v57  ;;  %v4744_v43 = vpack.c.bf16 %v4740_v39, %v4740_v39 }
 0x5ce   :  { %4665 = vmatpush1.bf16.msra.mxu0 %v11917_v22  ;;  %4625 = vmatprep.subr.bf16.mxu1 %v11922_v49  ;;  %v11952_v22 = vld [vmem:[#allocation28 + $0x8c4] ss:$16 sps:$4 sm:$0xff]   ;;  %v4287_v49 = vadd.f32 %v4286_v8, %v4285_v59  ;;  %v4742_v34 = vpack.c.bf16 %v4727_v3, %v4727_v3 }
 0x5cf   :  { %4666 = vmatprep.subr.bf16.mxu0 %v11925_v27  ;;  %v11955_v27 = vld [vmem:[#allocation28 + $0x8cc] ss:$16 sps:$4 sm:$0xff]   ;;  %v4801_v63 = vunpack.c.l.b16 %v4744_v43 }
 0x5d0   :  { %v11991_v43 = vld [vmem:[#allocation28 + $0x98c] ss:$16 sps:$4 sm:$0xff]  }
 0x5d1   :  { %4626 = vmatpush1.bf16.msra.mxu1 %v11920_v51  ;;  %v11953_v51 = vld [vmem:[#allocation28 + $0x8c8] ss:$16 sps:$4 sm:$0xff]  }
 0x5d2   :  { %4667 = vmatpush1.bf16.msra.mxu0 %v11923_v33  ;;  %4627 = vmatprep.subr.bf16.mxu1 %v11928_v19  ;;  %v11958_v33 = vld [vmem:[#allocation28 + $0x8a4] ss:$16 sps:$4 sm:$0xff]   ;;  %v4308_v19 = vpack.c.bf16 %v4287_v49, %v4287_v49  ;;  %v11977_v49 = vld [vmem:[#allocation28 + $0x9c8] ss:$16 sps:$4 sm:$0xff]  }
 0x5d3   :  { %4668 = vmatprep.subr.bf16.mxu0 %v11931_v7  ;;  %v4310_v7 = vpack.c.bf16 %v4300_v29, %v4300_v29  ;;  %v11985_v29 = vld [vmem:[#allocation28 + $0x9ac] ss:$16 sps:$4 sm:$0xff]  }
 0x5d5   :  { %4628 = vmatpush1.bf16.msra.mxu1 %v11926_v56  ;;  %v11959_v56 = vld [vmem:[#allocation28 + $0x8a8] ss:$16 sps:$4 sm:$0xff]  }
 0x5d6   :  { %4669 = vmatpush1.bf16.msra.mxu0 %v11929_v54  ;;  %4629 = vmatprep.subr.bf16.mxu1 %v11934_v44  ;;  %v11964_v54 = vld [vmem:[#allocation28 + $0x884] ss:$16 sps:$4 sm:$0xff]   ;;  %v4365_v44 = vunpack.c.l.b16 %v4308_v19 }
 0x5d7   :  { %4670 = vmatprep.subr.bf16.mxu0 %v11937_v12  ;;  %v4367_v12 = vunpack.c.l.b16 %v4310_v7  ;;  %v11988_v7 = vld [vmem:[#allocation28 + $0x984] ss:$16 sps:$4 sm:$0xff]  }
 0x5d9   :  { %4630 = vmatpush1.bf16.msra.mxu1 %v11932_v46  ;;  %v11965_v46 = vld [vmem:[#allocation28 + $0x888] ss:$16 sps:$4 sm:$0xff]   ;;  %v4369_v59 = vsel %vm2203_vm1, %v4367_v12, %v4365_v44 }
 0x5da   :  { %4671 = vmatpush1.bf16.msra.mxu0 %v11935_v1  ;;  %4631 = vmatprep.subr.bf16.mxu1 %v11940_v14  ;;  %v11970_v1 = vld [vmem:[#allocation28 + $0x9e4] ss:$16 sps:$4 sm:$0xff]   ;;  %v4799_v14 = vunpack.c.l.b16 %v4742_v34  ;;  %v4371_v0 = vpack.c.b16 %v4369_v59, %v4369_v59  ;;  %v11989_v34 = vld [vmem:[#allocation28 + $0x988] ss:$16 sps:$4 sm:$0xff]  }
 0x5db   :  { %4672 = vmatprep.subr.bf16.mxu0 %v11943_v58  ;;  %v11968_v58 = vld [vmem:[#allocation28 + $0x9e0] ss:$16 sps:$4 sm:$0xff]  }
 0x5dc   :  { %v4803_v57 = vsel %vm2203_vm1, %v4801_v63, %v4799_v14  ;;  %v11997_v63 = vld [vmem:[#allocation28 + $0x96c] ss:$16 sps:$4 sm:$0xff]   ;;  %v12000_v14 = vld [vmem:[#allocation28 + $0x944] ss:$16 sps:$4 sm:$0xff]  }
 0x5dd   :  { %4632 = vmatpush1.bf16.msra.mxu1 %v11938_v40  ;;  %v11971_v40 = vld [vmem:[#allocation28 + $0x9e8] ss:$16 sps:$4 sm:$0xff]   ;;  %v4805_v52 = vpack.c.b16 %v4803_v57, %v4803_v57 }
 0x5de   :  { %4673 = vmatpush1.bf16.msra.mxu0 %v11941_v5  ;;  %4641 = vmatprep.subr.bf16.mxu1 %v11946_v6  ;;  %v11976_v5 = vld [vmem:[#allocation28 + $0x9c4] ss:$16 sps:$4 sm:$0xff]  }
 0x5df   :  { %4682 = vmatprep.subr.bf16.mxu0 %v11949_v2  ;;  %v11979_v2 = vld [vmem:[#allocation28 + $0x9cc] ss:$16 sps:$4 sm:$0xff]  }
 0x5e1   :  { %4642 = vmatpush2.bf16.msra.mxu1 %v11944_v13  ;;  %v11974_v13 = vld [vmem:[#allocation28 + $0x9c0] ss:$16 sps:$4 sm:$0xff]  }
 0x5e2   :  { %4683 = vmatpush2.bf16.msra.mxu0 %v11947_v18  ;;  %4643 = vmatprep.subr.bf16.mxu1 %v11952_v22 }
 0x5e3   :  { %4684 = vmatprep.subr.bf16.mxu0 %v11955_v27  ;;  %v14255_v27 = vpop.permute.xlu1 %5141 }
 0x5e4   :  { %v5147_v19 = vmul.f32 %v14255_v27, %v14099_v35 }
 0x5e5   :  { %4644 = vmatpush2.bf16.msra.mxu1 %v11950_v37 }
 0x5e6   :  { %4685 = vmatpush2.bf16.msra.mxu0 %v11953_v51  ;;  %4645 = vmatprep.subr.bf16.mxu1 %v11958_v33  ;;  %v14264_v51 = vpop.permute.xlu0 %5137  ;;  %v11980_v33 = vld [vmem:[#allocation28 + $0x9a0] ss:$16 sps:$4 sm:$0xff]   ;;  %v5167_v44 = vsel %vm897_vm3, %v5147_v19, 0.0 }
 0x5e7   :  { %4686 = vmatprep.subr.bf16.mxu0 %v11961_v62 }
 0x5e9   :  { %4646 = vmatpush2.bf16.msra.mxu1 %v11956_v61  ;;  %v5145_v61 = vmul.f32 %v14264_v51, %v14102_v10 }
 0x5ea   :  { %4687 = vmatpush2.bf16.msra.mxu0 %v11959_v56  ;;  %4647 = vmatprep.subr.bf16.mxu1 %v11964_v54  ;;  %v4711_v56 = vmul.f32 %v14216_v36, %v14114_v31  ;;  %v11986_v54 = vld [vmem:[#allocation28 + $0x980] ss:$16 sps:$4 sm:$0xff]   ;;  %v11995_v36 = vld [vmem:[#allocation28 + $0x968] ss:$16 sps:$4 sm:$0xff]  }
 0x5eb   :  { %4688 = vmatprep.subr.bf16.mxu0 %v11967_v45  ;;  %v11994_v45 = vld [vmem:[#allocation28 + $0x964] ss:$16 sps:$4 sm:$0xff]  }
 0x5ed   :  { %4648 = vmatpush2.bf16.msra.mxu1 %v11962_v24  ;;  %v4715_v24 = vrot.slane %v4711_v56, 4 }
 0x5ee   :  { %4689 = vmatpush2.bf16.msra.mxu0 %v11965_v46  ;;  %5050 = vmatprep.subr.bf16.mxu1 %v11970_v1  ;;  %v5168_v46 = vrot.slane %v5167_v44, 4  ;;  %v11992_v1 = vld [vmem:[#allocation28 + $0x960] ss:$16 sps:$4 sm:$0xff]  }
 0x5ef   :  { %5091 = vmatprep.subr.bf16.mxu0 %v11973_v42  ;;  %v4716_v57 = vadd.f32 %v4715_v24, %v4711_v56 }
 0x5f0   :  { %v2919_v6 = vpop.f32.mrf.mxu1  ;;  %v2960_v8 = vpop.f32.mrf.mxu0  ;;  %4650 = vmatmul.mubr.bf16.vlgmr.msra.gmra.mxu1 %v4371_v0 }
 0x5f1   :  { %v14249_v11 = vadd.f32 %v2919_v6, %v14224_v47  ;;  %v14252_v60 = vadd.f32 %v2960_v8, %v14226_v48  ;;  %4691 = vmatmul.mubr.bf16.vlgmr.msra.gmra.mxu0 %v4371_v0  ;;  %5051 = vmatpush1.bf16.msra.mxu1 %v11968_v58  ;;  %v12003_v58 = vld [vmem:[#allocation28 + $0x94c] ss:$16 sps:$4 sm:$0xff]   ;;  %v5169_v0 = vadd.f32 %v5168_v46, %v5167_v44  ;;  %v12006_v6 = vld [vmem:[#allocation28 + $0x924] ss:$16 sps:$4 sm:$0xff]   ;;  %v12019_v44 = vld [vmem:[#allocation28 + $0xa68] ss:$16 sps:$4 sm:$0xff]  }
 0x5f2   :  { %10552 = vmatprep.mubr.msk.bf16.mxu1 %vm897_vm3, %v4805_v52  ;;  %5092 = vmatpush1.bf16.msra.mxu0 %v11971_v40  ;;  %v2921_v18 = vpop.f32.mrf.mxu1  ;;  %v2962_v22 = vpop.f32.mrf.mxu0  ;;  %v11998_v40 = vld [vmem:[#allocation28 + $0x940] ss:$16 sps:$4 sm:$0xff]  }
 0x5f3   :  { %10553 = vmatprep.mubr.msk.bf16.mxu0 %vm897_vm3, %v4805_v52  ;;  %v14259_v47 = vadd.f32 %v2921_v18, %v14232_v55  ;;  %v14262_v48 = vadd.f32 %v2962_v22, %v14234_v41  ;;  %5052 = vmatprep.subr.bf16.mxu1 %v11976_v5  ;;  %v11983_v55 = vld [vmem:[#allocation28 + $0x9a8] ss:$16 sps:$4 sm:$0xff]   ;;  %v4713_v41 = vmul.f32 %v14229_v50, %v14110_v20  ;;  %v5154_v50 = vsel %vm897_vm3, %v5145_v61, 0.0  ;;  %v12004_v22 = vld [vmem:[#allocation28 + $0x920] ss:$16 sps:$4 sm:$0xff]  }
 0x5f4   :  { %v2923_v39 = vpop.f32.mrf.mxu1  ;;  %v2964_v37 = vpop.f32.mrf.mxu0  ;;  %5093 = vmatprep.subr.bf16.mxu0 %v11979_v2  ;;  %v5155_v59 = vrot.slane %v5154_v50, 4  ;;  %v12001_v5 = vld [vmem:[#allocation28 + $0x948] ss:$16 sps:$4 sm:$0xff]   ;;  %v12009_v2 = vld [vmem:[#allocation28 + $0x92c] ss:$16 sps:$4 sm:$0xff]   ;;  %v5170_v18 = vrot.slane %v5169_v0, 2 }
 0x5f5   :  { %5053 = vmatpush1.bf16.msra.mxu1 %v11974_v13  ;;  %v4728_v12 = vrot.slane %v4713_v41, 4  ;;  %v4717_v13 = vrot.slane %v4716_v57, 2  ;;  %v12015_v37 = vld [vmem:[#allocation28 + $0x90c] ss:$16 sps:$4 sm:$0xff]   ;;  %v12022_v46 = vld [vmem:[#allocation28 + $0xa40] ss:$16 sps:$4 sm:$0xff]  }
 0x5f6   :  { %5094 = vmatpush1.bf16.msra.mxu0 %v11977_v49  ;;  %v2924_v3 = vpop.f32.mrf.mxu1  ;;  %v2965_v62 = vpop.f32.mrf.mxu0  ;;  %5054 = vmatprep.subr.bf16.mxu1 %v11982_v16  ;;  %v5156_v8 = vadd.f32 %v5155_v59, %v5154_v50  ;;  %v12007_v49 = vld [vmem:[#allocation28 + $0x928] ss:$16 sps:$4 sm:$0xff]   ;;  %v12012_v16 = vld [vmem:[#allocation28 + $0x904] ss:$16 sps:$4 sm:$0xff]   ;;  %v5171_v19 = vadd.f32 %v5170_v18, %v5169_v0  ;;  %v12028_v0 = vld [vmem:[#allocation28 + $0xa20] ss:$16 sps:$4 sm:$0xff]  }
 0x5f7   :  { %5095 = vmatprep.subr.bf16.mxu0 %v11985_v29  ;;  %v4729_v42 = vadd.f32 %v4728_v12, %v4713_v41  ;;  %v12010_v3 = vld [vmem:[#allocation28 + $0x900] ss:$16 sps:$4 sm:$0xff]   ;;  %v12013_v62 = vld [vmem:[#allocation28 + $0x908] ss:$16 sps:$4 sm:$0xff]  }
 0x5f8   :  { %v5157_v29 = vrot.slane %v5156_v8, 2  ;;  %v5172_v56 = vrot.slane %v5171_v19, 1  ;;  %v12034_v18 = vld [vmem:[#allocation28 + $0xa00] ss:$16 sps:$4 sm:$0xff]  }
 0x5f9   :  { %5055 = vmatpush1.bf16.msra.mxu1 %v11980_v33  ;;  %v4730_v52 = vrot.slane %v4729_v42, 2  ;;  %v4718_v33 = vadd.f32 %v4717_v13, %v4716_v57 }
 0x5fa   :  { %5096 = vmatpush1.bf16.msra.mxu0 %v11983_v55  ;;  %5056 = vmatprep.subr.bf16.mxu1 %v11988_v7  ;;  %v12018_v55 = vld [vmem:[#allocation28 + $0xa64] ss:$16 sps:$4 sm:$0xff]   ;;  %v5158_v7 = vadd.f32 %v5157_v29, %v5156_v8  ;;  %v5173_v24 = vadd.f32 %v5172_v56, %v5171_v19  ;;  %v12046_v56 = vld [vmem:[#allocation28 + $0xb40] ss:$16 sps:$4 sm:$0xff]  }
 0x5fb   :  { %5097 = vmatprep.subr.bf16.mxu0 %v11991_v43  ;;  %v4731_v39 = vadd.f32 %v4730_v52, %v4729_v42  ;;  %v12021_v43 = vld [vmem:[#allocation28 + $0xa6c] ss:$16 sps:$4 sm:$0xff]   ;;  %v4719_v61 = vrot.slane %v4718_v33, 1 }
 0x5fc   :  { %v12033_v42 = vld [vmem:[#allocation28 + $0xa2c] ss:$16 sps:$4 sm:$0xff]   ;;  %v5177_v57 = vpack.c.bf16 %v5173_v24, %v5173_v24 }
 0x5fd   :  { %5057 = vmatpush1.bf16.msra.mxu1 %v11986_v54  ;;  %v4732_v41 = vrot.slane %v4731_v39, 1  ;;  %v12016_v54 = vld [vmem:[#allocation28 + $0xa60] ss:$16 sps:$4 sm:$0xff]   ;;  %v4720_v50 = vadd.f32 %v4719_v61, %v4718_v33  ;;  %v12039_v52 = vld [vmem:[#allocation28 + $0xa0c] ss:$16 sps:$4 sm:$0xff]  }
 0x5fe   :  { %5098 = vmatpush1.bf16.msra.mxu0 %v11989_v34  ;;  %5058 = vmatprep.subr.bf16.mxu1 %v11994_v45  ;;  %v12024_v34 = vld [vmem:[#allocation28 + $0xa44] ss:$16 sps:$4 sm:$0xff]   ;;  %v5159_v45 = vrot.slane %v5158_v7, 1  ;;  %v5234_v13 = vunpack.c.l.b16 %v5177_v57  ;;  %v12063_v57 = vld [vmem:[#allocation28 + $0xb0c] ss:$16 sps:$4 sm:$0xff]  }
 0x5ff   :  { %5099 = vmatprep.subr.bf16.mxu0 %v11997_v63  ;;  %v4733_v12 = vadd.f32 %v4732_v41, %v4731_v39  ;;  %v12027_v63 = vld [vmem:[#allocation28 + $0xa4c] ss:$16 sps:$4 sm:$0xff]  }
 0x600   :  { %v12045_v39 = vld [vmem:[#allocation28 + $0xb6c] ss:$16 sps:$4 sm:$0xff]  }
 0x601   :  { %5059 = vmatpush1.bf16.msra.mxu1 %v11992_v1  ;;  %v12025_v1 = vld [vmem:[#allocation28 + $0xa48] ss:$16 sps:$4 sm:$0xff]   ;;  %v4743_v59 = vpack.c.bf16 %v4733_v12, %v4733_v12  ;;  %v12051_v41 = vld [vmem:[#allocation28 + $0xb4c] ss:$16 sps:$4 sm:$0xff]   ;;  %v14285_v12 = vpop.permute.xlu1 %5570 }
 0x602   :  { %5100 = vmatpush1.bf16.msra.mxu0 %v11995_v36  ;;  %5060 = vmatprep.subr.bf16.mxu1 %v12000_v14  ;;  %v12030_v36 = vld [vmem:[#allocation28 + $0xa24] ss:$16 sps:$4 sm:$0xff]   ;;  %v5160_v14 = vadd.f32 %v5159_v45, %v5158_v7 }
 0x603   :  { %5101 = vmatprep.subr.bf16.mxu0 %v12003_v58  ;;  %v4741_v58 = vpack.c.bf16 %v4720_v50, %v4720_v50  ;;  %v4800_v8 = vunpack.c.l.b16 %v4743_v59  ;;  %v12054_v45 = vld [vmem:[#allocation28 + $0xb24] ss:$16 sps:$4 sm:$0xff]   ;;  %v12057_v50 = vld [vmem:[#allocation28 + $0xb2c] ss:$16 sps:$4 sm:$0xff]  }
 0x605   :  { %5061 = vmatpush1.bf16.msra.mxu1 %v11998_v40  ;;  %v12031_v40 = vld [vmem:[#allocation28 + $0xa28] ss:$16 sps:$4 sm:$0xff]  }
 0x606   :  { %5102 = vmatpush1.bf16.msra.mxu0 %v12001_v5  ;;  %5062 = vmatprep.subr.bf16.mxu1 %v12006_v6  ;;  %v12036_v5 = vld [vmem:[#allocation28 + $0xa04] ss:$16 sps:$4 sm:$0xff]   ;;  %v5175_v6 = vpack.c.bf16 %v5160_v14, %v5160_v14  ;;  %v5578_v14 = vmul.f32 %v14285_v12, %v14102_v10 }
 0x607   :  { %5103 = vmatprep.subr.bf16.mxu0 %v12009_v2  ;;  %v4798_v2 = vunpack.c.l.b16 %v4741_v58  ;;  %v5146_v58 = vmul.f32 %v14255_v27, %v14110_v20  ;;  %v12069_v27 = vld [vmem:[#allocation28 + $0xaec] ss:$16 sps:$4 sm:$0xff]  }
 0x609   :  { %5063 = vmatpush1.bf16.msra.mxu1 %v12004_v22  ;;  %v12037_v22 = vld [vmem:[#allocation28 + $0xa08] ss:$16 sps:$4 sm:$0xff]   ;;  %v4802_v29 = vsel %vm2203_vm1, %v4800_v8, %v4798_v2  ;;  %v5161_v2 = vrot.slane %v5146_v58, 4 }
 0x60a   :  { %5104 = vmatpush1.bf16.msra.mxu0 %v12007_v49  ;;  %5064 = vmatprep.subr.bf16.mxu1 %v12012_v16  ;;  %v12042_v49 = vld [vmem:[#allocation28 + $0xb64] ss:$16 sps:$4 sm:$0xff]   ;;  %v5232_v16 = vunpack.c.l.b16 %v5175_v6  ;;  %v4804_v19 = vpack.c.b16 %v4802_v29, %v4802_v29  ;;  %v5587_v6 = vsel %vm897_vm3, %v5578_v14, 0.0  ;;  %v12061_v8 = vld [vmem:[#allocation28 + $0xb08] ss:$16 sps:$4 sm:$0xff]  }
 0x60b   :  { %5105 = vmatprep.subr.bf16.mxu0 %v12015_v37  ;;  %v12040_v37 = vld [vmem:[#allocation28 + $0xb60] ss:$16 sps:$4 sm:$0xff]  }
 0x60c   :  { %v5236_v33 = vsel %vm2203_vm1, %v5234_v13, %v5232_v16  ;;  %v12072_v16 = vld [vmem:[#allocation28 + $0xac4] ss:$16 sps:$4 sm:$0xff]  }
 0x60d   :  { %5065 = vmatpush1.bf16.msra.mxu1 %v12010_v3  ;;  %v12043_v3 = vld [vmem:[#allocation28 + $0xb68] ss:$16 sps:$4 sm:$0xff]   ;;  %v5238_v7 = vpack.c.b16 %v5236_v33, %v5236_v33 }
 0x60e   :  { %5106 = vmatpush1.bf16.msra.mxu0 %v12013_v62  ;;  %5074 = vmatprep.subr.bf16.mxu1 %v12018_v55  ;;  %v12048_v62 = vld [vmem:[#allocation28 + $0xb44] ss:$16 sps:$4 sm:$0xff]  }
 0x60f   :  { %5115 = vmatprep.subr.bf16.mxu0 %v12021_v43 }
 0x611   :  { %5075 = vmatpush2.bf16.msra.mxu1 %v12016_v54 }
 0x612   :  { %5116 = vmatpush2.bf16.msra.mxu0 %v12019_v44  ;;  %5076 = vmatprep.subr.bf16.mxu1 %v12024_v34  ;;  %v12049_v34 = vld [vmem:[#allocation28 + $0xb48] ss:$16 sps:$4 sm:$0xff]  }
 0x613   :  { %5117 = vmatprep.subr.bf16.mxu0 %v12027_v63 }
 0x615   :  { %5077 = vmatpush2.bf16.msra.mxu1 %v12022_v46  ;;  %v14294_v46 = vpop.permute.xlu0 %5574 }
 0x616   :  { %5118 = vmatpush2.bf16.msra.mxu0 %v12025_v1  ;;  %5078 = vmatprep.subr.bf16.mxu1 %v12030_v36  ;;  %v12052_v36 = vld [vmem:[#allocation28 + $0xb20] ss:$16 sps:$4 sm:$0xff]  }
 0x617   :  { %5119 = vmatprep.subr.bf16.mxu0 %v12033_v42  ;;  %v12060_v42 = vld [vmem:[#allocation28 + $0xb04] ss:$16 sps:$4 sm:$0xff]  }
 0x619   :  { %5079 = vmatpush2.bf16.msra.mxu1 %v12028_v0  ;;  %v5580_v0 = vmul.f32 %v14294_v46, %v14099_v35 }
 0x61a   :  { %5120 = vmatpush2.bf16.msra.mxu0 %v12031_v40  ;;  %5080 = vmatprep.subr.bf16.mxu1 %v12036_v5  ;;  %v5144_v40 = vmul.f32 %v14264_v51, %v14114_v31  ;;  %v12058_v5 = vld [vmem:[#allocation28 + $0xb00] ss:$16 sps:$4 sm:$0xff]   ;;  %v12067_v51 = vld [vmem:[#allocation28 + $0xae8] ss:$16 sps:$4 sm:$0xff]  }
 0x61b   :  { %5121 = vmatprep.subr.bf16.mxu0 %v12039_v52  ;;  %v12066_v52 = vld [vmem:[#allocation28 + $0xae4] ss:$16 sps:$4 sm:$0xff]   ;;  %v5600_v13 = vsel %vm897_vm3, %v5580_v0, 0.0 }
 0x61c   :  { %v5601_v29 = vrot.slane %v5600_v13, 4 }
 0x61d   :  { %5081 = vmatpush2.bf16.msra.mxu1 %v12034_v18  ;;  %v5148_v18 = vrot.slane %v5144_v40, 4 }
 0x61e   :  { %5122 = vmatpush2.bf16.msra.mxu0 %v12037_v22  ;;  %5483 = vmatprep.subr.bf16.mxu1 %v12042_v49  ;;  %v5588_v22 = vrot.slane %v5587_v6, 4  ;;  %v12064_v49 = vld [vmem:[#allocation28 + $0xae0] ss:$16 sps:$4 sm:$0xff]  }
 0x61f   :  { %5524 = vmatprep.subr.bf16.mxu0 %v12045_v39  ;;  %v5162_v39 = vadd.f32 %v5161_v2, %v5146_v58  ;;  %v5149_v33 = vadd.f32 %v5148_v18, %v5144_v40 }
 0x620   :  { %v3352_v55 = vpop.f32.mrf.mxu1  ;;  %5083 = vmatmul.mubr.bf16.vlgmr.msra.gmra.mxu1 %v4804_v19 }
 0x621   :  { %v14279_v43 = vadd.f32 %v3352_v55, %v14249_v11  ;;  %v3393_v61 = vpop.f32.mrf.mxu0  ;;  %5124 = vmatmul.mubr.bf16.vlgmr.msra.gmra.mxu0 %v4804_v19  ;;  %5484 = vmatpush1.bf16.msra.mxu1 %v12040_v37  ;;  %v12075_v37 = vld [vmem:[#allocation28 + $0xacc] ss:$16 sps:$4 sm:$0xff]   ;;  %v5589_v19 = vadd.f32 %v5588_v22, %v5587_v6  ;;  %v12078_v55 = vld [vmem:[#allocation28 + $0xaa4] ss:$16 sps:$4 sm:$0xff]   ;;  %v12091_v6 = vld [vmem:[#allocation28 + $0xbe8] ss:$16 sps:$4 sm:$0xff]  }
 0x622   :  { %v14282_v54 = vadd.f32 %v3393_v61, %v14252_v60  ;;  %10602 = vmatprep.mubr.msk.bf16.mxu1 %vm897_vm3, %v5238_v7  ;;  %5525 = vmatpush1.bf16.msra.mxu0 %v12043_v3  ;;  %v3354_v44 = vpop.f32.mrf.mxu1  ;;  %v12070_v3 = vld [vmem:[#allocation28 + $0xac0] ss:$16 sps:$4 sm:$0xff]   ;;  %v12081_v61 = vld [vmem:[#allocation28 + $0xaac] ss:$16 sps:$4 sm:$0xff]  }
 0x623   :  { %10603 = vmatprep.mubr.msk.bf16.mxu0 %vm897_vm3, %v5238_v7  ;;  %v14289_v11 = vadd.f32 %v3354_v44, %v14259_v47  ;;  %v3395_v63 = vpop.f32.mrf.mxu0  ;;  %5485 = vmatprep.subr.bf16.mxu1 %v12048_v62  ;;  %v12055_v47 = vld [vmem:[#allocation28 + $0xb28] ss:$16 sps:$4 sm:$0xff]   ;;  %v5602_v7 = vadd.f32 %v5601_v29, %v5600_v13  ;;  %v5590_v44 = vrot.slane %v5589_v19, 2  ;;  %v12094_v22 = vld [vmem:[#allocation28 + $0xbc0] ss:$16 sps:$4 sm:$0xff]  }
 0x624   :  { %v14292_v24 = vadd.f32 %v3395_v63, %v14262_v48  ;;  %v3356_v60 = vpop.f32.mrf.mxu1  ;;  %5526 = vmatprep.subr.bf16.mxu0 %v12051_v41  ;;  %v12073_v62 = vld [vmem:[#allocation28 + $0xac8] ss:$16 sps:$4 sm:$0xff]   ;;  %v5163_v41 = vrot.slane %v5162_v39, 2  ;;  %v12084_v63 = vld [vmem:[#allocation28 + $0xa84] ss:$16 sps:$4 sm:$0xff]  }
 0x625   :  { %v3397_v1 = vpop.f32.mrf.mxu0  ;;  %5486 = vmatpush1.bf16.msra.mxu1 %v12046_v56  ;;  %v5150_v56 = vrot.slane %v5149_v33, 2  ;;  %v5591_v14 = vadd.f32 %v5590_v44, %v5589_v19  ;;  %v12100_v19 = vld [vmem:[#allocation28 + $0xba0] ss:$16 sps:$4 sm:$0xff]  }
 0x626   :  { %5527 = vmatpush1.bf16.msra.mxu0 %v12049_v34  ;;  %v3357_v59 = vpop.f32.mrf.mxu1  ;;  %5487 = vmatprep.subr.bf16.mxu1 %v12054_v45  ;;  %v12076_v34 = vld [vmem:[#allocation28 + $0xaa0] ss:$16 sps:$4 sm:$0xff]   ;;  %v12079_v45 = vld [vmem:[#allocation28 + $0xaa8] ss:$16 sps:$4 sm:$0xff]   ;;  %v5164_v60 = vadd.f32 %v5163_v41, %v5162_v39  ;;  %v12087_v1 = vld [vmem:[#allocation28 + $0xa8c] ss:$16 sps:$4 sm:$0xff]  }
 0x627   :  { %v3398_v48 = vpop.f32.mrf.mxu0  ;;  %5528 = vmatprep.subr.bf16.mxu0 %v12057_v50  ;;  %v5603_v50 = vrot.slane %v5602_v7, 2  ;;  %v12082_v59 = vld [vmem:[#allocation28 + $0xa80] ss:$16 sps:$4 sm:$0xff]   ;;  %v5592_v40 = vrot.slane %v5591_v14, 1  ;;  %v12105_v39 = vld [vmem:[#allocation28 + $0xbac] ss:$16 sps:$4 sm:$0xff]  }
 0x628   :  { %v5165_v48 = vrot.slane %v5164_v60, 1  ;;  %v12111_v41 = vld [vmem:[#allocation28 + $0xb8c] ss:$16 sps:$4 sm:$0xff]   ;;  %v12106_v44 = vld [vmem:[#allocation28 + $0xb80] ss:$16 sps:$4 sm:$0xff]  }
 0x629   :  { %5488 = vmatpush1.bf16.msra.mxu1 %v12052_v36  ;;  %v5151_v36 = vadd.f32 %v5150_v56, %v5149_v33  ;;  %v5604_v58 = vadd.f32 %v5603_v50, %v5602_v7  ;;  %v5593_v18 = vadd.f32 %v5592_v40, %v5591_v14 }
 0x62a   :  { %5529 = vmatpush1.bf16.msra.mxu0 %v12055_v47  ;;  %5489 = vmatprep.subr.bf16.mxu1 %v12060_v42  ;;  %v12085_v47 = vld [vmem:[#allocation28 + $0xa88] ss:$16 sps:$4 sm:$0xff]   ;;  %v12090_v42 = vld [vmem:[#allocation28 + $0xbe4] ss:$16 sps:$4 sm:$0xff]   ;;  %v5166_v2 = vadd.f32 %v5165_v48, %v5164_v60  ;;  %v12117_v60 = vld [vmem:[#allocation28 + $0xcec] ss:$16 sps:$4 sm:$0xff]  }
 0x62b   :  { %5530 = vmatprep.subr.bf16.mxu0 %v12063_v57  ;;  %v12093_v57 = vld [vmem:[#allocation28 + $0xbec] ss:$16 sps:$4 sm:$0xff]   ;;  %v5152_v0 = vrot.slane %v5151_v36, 1  ;;  %v5608_v33 = vpack.c.bf16 %v5593_v18, %v5593_v18 }
 0x62c   :  { %v5176_v29 = vpack.c.bf16 %v5166_v2, %v5166_v2  ;;  %v12126_v2 = vld [vmem:[#allocation28 + $0xca4] ss:$16 sps:$4 sm:$0xff]   ;;  %v12129_v18 = vld [vmem:[#allocation28 + $0xcac] ss:$16 sps:$4 sm:$0xff]  }
 0x62d   :  { %5490 = vmatpush1.bf16.msra.mxu1 %v12058_v5  ;;  %v12088_v5 = vld [vmem:[#allocation28 + $0xbe0] ss:$16 sps:$4 sm:$0xff]   ;;  %v5153_v13 = vadd.f32 %v5152_v0, %v5151_v36  ;;  %v5665_v56 = vunpack.c.l.b16 %v5608_v33 }
 0x62e   :  { %5531 = vmatpush1.bf16.msra.mxu0 %v12061_v8  ;;  %5491 = vmatprep.subr.bf16.mxu1 %v12066_v52  ;;  %v12096_v8 = vld [vmem:[#allocation28 + $0xbc4] ss:$16 sps:$4 sm:$0xff]   ;;  %v5605_v52 = vrot.slane %v5604_v58, 1  ;;  %v5233_v7 = vunpack.c.l.b16 %v5176_v29  ;;  %v12112_v36 = vld [vmem:[#allocation28 + $0xce0] ss:$16 sps:$4 sm:$0xff]  }
 0x62f   :  { %5532 = vmatprep.subr.bf16.mxu0 %v12069_v27  ;;  %v12099_v27 = vld [vmem:[#allocation28 + $0xbcc] ss:$16 sps:$4 sm:$0xff]  }
 0x631   :  { %5492 = vmatpush1.bf16.msra.mxu1 %v12064_v49  ;;  %v12097_v49 = vld [vmem:[#allocation28 + $0xbc8] ss:$16 sps:$4 sm:$0xff]  }
 0x632   :  { %5533 = vmatpush1.bf16.msra.mxu0 %v12067_v51  ;;  %5493 = vmatprep.subr.bf16.mxu1 %v12072_v16  ;;  %v12102_v51 = vld [vmem:[#allocation28 + $0xba4] ss:$16 sps:$4 sm:$0xff]   ;;  %v5606_v16 = vadd.f32 %v5605_v52, %v5604_v58  ;;  %v12121_v52 = vld [vmem:[#allocation28 + $0xcc8] ss:$16 sps:$4 sm:$0xff]  }
 0x633   :  { %5534 = vmatprep.subr.bf16.mxu0 %v12075_v37  ;;  %v5174_v37 = vpack.c.bf16 %v5153_v13, %v5153_v13 }
 0x635   :  { %5494 = vmatpush1.bf16.msra.mxu1 %v12070_v3  ;;  %v12103_v3 = vld [vmem:[#allocation28 + $0xba8] ss:$16 sps:$4 sm:$0xff]  }
 0x636   :  { %5535 = vmatpush1.bf16.msra.mxu0 %v12073_v62  ;;  %5495 = vmatprep.subr.bf16.mxu1 %v12078_v55  ;;  %v12108_v62 = vld [vmem:[#allocation28 + $0xb84] ss:$16 sps:$4 sm:$0xff]   ;;  %v5610_v55 = vpack.c.bf16 %v5606_v16, %v5606_v16 }
 0x637   :  { %5536 = vmatprep.subr.bf16.mxu0 %v12081_v61  ;;  %v5231_v61 = vunpack.c.l.b16 %v5174_v37  ;;  %v5577_v37 = vmul.f32 %v14285_v12, %v14114_v31  ;;  %v12141_v12 = vld [vmem:[#allocation28 + $0xc6c] ss:$16 sps:$4 sm:$0xff]  }
 0x639   :  { %5496 = vmatpush1.bf16.msra.mxu1 %v12076_v34  ;;  %v12109_v34 = vld [vmem:[#allocation28 + $0xb88] ss:$16 sps:$4 sm:$0xff]   ;;  %v5235_v50 = vsel %vm2203_vm1, %v5233_v7, %v5231_v61  ;;  %v5581_v61 = vrot.slane %v5577_v37, 4 }
 0x63a   :  { %5537 = vmatpush1.bf16.msra.mxu0 %v12079_v45  ;;  %5497 = vmatprep.subr.bf16.mxu1 %v12084_v63  ;;  %v12114_v45 = vld [vmem:[#allocation28 + $0xce4] ss:$16 sps:$4 sm:$0xff]   ;;  %v5667_v63 = vunpack.c.l.b16 %v5610_v55  ;;  %v12133_v7 = vld [vmem:[#allocation28 + $0xc88] ss:$16 sps:$4 sm:$0xff]  }
 0x63b   :  { %5538 = vmatprep.subr.bf16.mxu0 %v12087_v1  ;;  %v14307_v1 = vpop.permute.xlu1 %6003 }
 0x63c   :  { %v5669_v14 = vsel %vm2203_vm1, %v5667_v63, %v5665_v56  ;;  %v12144_v63 = vld [vmem:[#allocation28 + $0xc44] ss:$16 sps:$4 sm:$0xff]  }
 0x63d   :  { %5498 = vmatpush1.bf16.msra.mxu1 %v12082_v59  ;;  %v5237_v59 = vpack.c.b16 %v5235_v50, %v5235_v50  ;;  %v5671_v48 = vpack.c.b16 %v5669_v14, %v5669_v14  ;;  %v5582_v50 = vadd.f32 %v5581_v61, %v5577_v37 }
 0x63e   :  { %5539 = vmatpush1.bf16.msra.mxu0 %v12085_v47  ;;  %5507 = vmatprep.subr.bf16.mxu1 %v12090_v42  ;;  %v12115_v47 = vld [vmem:[#allocation28 + $0xce8] ss:$16 sps:$4 sm:$0xff]   ;;  %v12120_v42 = vld [vmem:[#allocation28 + $0xcc4] ss:$16 sps:$4 sm:$0xff]  }
 0x63f   :  { %5548 = vmatprep.subr.bf16.mxu0 %v12093_v57  ;;  %v12123_v57 = vld [vmem:[#allocation28 + $0xccc] ss:$16 sps:$4 sm:$0xff]  }
 0x641   :  { %5508 = vmatpush2.bf16.msra.mxu1 %v12088_v5  ;;  %v12118_v5 = vld [vmem:[#allocation28 + $0xcc0] ss:$16 sps:$4 sm:$0xff]  }
 0x642   :  { %5549 = vmatpush2.bf16.msra.mxu0 %v12091_v6  ;;  %5509 = vmatprep.subr.bf16.mxu1 %v12096_v8 }
 0x643   :  { %5550 = vmatprep.subr.bf16.mxu0 %v12099_v27  ;;  %v14317_v27 = vpop.permute.xlu1 %6007 }
 0x644   :  { %v6013_v16 = vmul.f32 %v14317_v27, %v14099_v35 }
 0x645   :  { %5510 = vmatpush2.bf16.msra.mxu1 %v12094_v22 }
 0x646   :  { %5551 = vmatpush2.bf16.msra.mxu0 %v12097_v49  ;;  %5511 = vmatprep.subr.bf16.mxu1 %v12102_v51  ;;  %v12124_v51 = vld [vmem:[#allocation28 + $0xca0] ss:$16 sps:$4 sm:$0xff]   ;;  %v6033_v55 = vsel %vm897_vm3, %v6013_v16, 0.0 }
 0x647   :  { %5552 = vmatprep.subr.bf16.mxu0 %v12105_v39  ;;  %v12127_v39 = vld [vmem:[#allocation28 + $0xca8] ss:$16 sps:$4 sm:$0xff]  }
 0x649   :  { %5512 = vmatpush2.bf16.msra.mxu1 %v12100_v19  ;;  %v6011_v19 = vmul.f32 %v14307_v1, %v14102_v10 }
 0x64a   :  { %5553 = vmatpush2.bf16.msra.mxu0 %v12103_v3  ;;  %5513 = vmatprep.subr.bf16.mxu1 %v12108_v62  ;;  %v5579_v3 = vmul.f32 %v14294_v46, %v14110_v20  ;;  %v12130_v62 = vld [vmem:[#allocation28 + $0xc80] ss:$16 sps:$4 sm:$0xff]   ;;  %v12139_v46 = vld [vmem:[#allocation28 + $0xc68] ss:$16 sps:$4 sm:$0xff]  }
 0x64b   :  { %5554 = vmatprep.subr.bf16.mxu0 %v12111_v41  ;;  %v12138_v41 = vld [vmem:[#allocation28 + $0xc64] ss:$16 sps:$4 sm:$0xff]   ;;  %v6020_v56 = vsel %vm897_vm3, %v6011_v19, 0.0 }
 0x64d   :  { %5514 = vmatpush2.bf16.msra.mxu1 %v12106_v44  ;;  %v5594_v44 = vrot.slane %v5579_v3, 4 }
 0x64e   :  { %5555 = vmatpush2.bf16.msra.mxu0 %v12109_v34  ;;  %5916 = vmatprep.subr.bf16.mxu1 %v12114_v45  ;;  %v6034_v34 = vrot.slane %v6033_v55, 4  ;;  %v12136_v45 = vld [vmem:[#allocation28 + $0xc60] ss:$16 sps:$4 sm:$0xff]  }
 0x64f   :  { %5957 = vmatprep.subr.bf16.mxu0 %v12117_v60  ;;  %v6021_v60 = vrot.slane %v6020_v56, 4  ;;  %v5595_v14 = vadd.f32 %v5594_v44, %v5579_v3 }
 0x650   :  { %v3785_v58 = vpop.f32.mrf.mxu1  ;;  %5516 = vmatmul.mubr.bf16.vlgmr.msra.gmra.mxu1 %v5237_v59 }
 0x651   :  { %v14311_v0 = vadd.f32 %v3785_v58, %v14279_v43  ;;  %v3826_v40 = vpop.f32.mrf.mxu0  ;;  %5557 = vmatmul.mubr.bf16.vlgmr.msra.gmra.mxu0 %v5237_v59  ;;  %5917 = vmatpush1.bf16.msra.mxu1 %v12112_v36  ;;  %v12147_v36 = vld [vmem:[#allocation28 + $0xc4c] ss:$16 sps:$4 sm:$0xff]   ;;  %v6035_v59 = vadd.f32 %v6034_v34, %v6033_v55  ;;  %v12150_v58 = vld [vmem:[#allocation28 + $0xc24] ss:$16 sps:$4 sm:$0xff]   ;;  %v12163_v55 = vld [vmem:[#allocation28 + $0xd68] ss:$16 sps:$4 sm:$0xff]  }
 0x652   :  { %v14314_v6 = vadd.f32 %v3826_v40, %v14282_v54  ;;  %10652 = vmatprep.mubr.msk.bf16.mxu1 %vm897_vm3, %v5671_v48  ;;  %5958 = vmatpush1.bf16.msra.mxu0 %v12115_v47  ;;  %v3787_v8 = vpop.f32.mrf.mxu1  ;;  %v12142_v47 = vld [vmem:[#allocation28 + $0xc40] ss:$16 sps:$4 sm:$0xff]   ;;  %v12153_v40 = vld [vmem:[#allocation28 + $0xc2c] ss:$16 sps:$4 sm:$0xff]  }
 0x653   :  { %10653 = vmatprep.mubr.msk.bf16.mxu0 %vm897_vm3, %v5671_v48  ;;  %v14321_v43 = vadd.f32 %v3787_v8, %v14289_v11  ;;  %v3828_v13 = vpop.f32.mrf.mxu0  ;;  %5918 = vmatprep.subr.bf16.mxu1 %v12120_v42  ;;  %v12132_v11 = vld [vmem:[#allocation28 + $0xc84] ss:$16 sps:$4 sm:$0xff]   ;;  %v12145_v42 = vld [vmem:[#allocation28 + $0xc48] ss:$16 sps:$4 sm:$0xff]   ;;  %v5583_v48 = vrot.slane %v5582_v50, 2  ;;  %v6036_v8 = vrot.slane %v6035_v59, 2 }
 0x654   :  { %v14324_v22 = vadd.f32 %v3828_v13, %v14292_v24  ;;  %v3789_v54 = vpop.f32.mrf.mxu1  ;;  %5959 = vmatprep.subr.bf16.mxu0 %v12123_v57  ;;  %v12135_v24 = vld [vmem:[#allocation28 + $0xc8c] ss:$16 sps:$4 sm:$0xff]   ;;  %v6022_v57 = vadd.f32 %v6021_v60, %v6020_v56  ;;  %v12156_v13 = vld [vmem:[#allocation28 + $0xc04] ss:$16 sps:$4 sm:$0xff]   ;;  %v12166_v34 = vld [vmem:[#allocation28 + $0xd40] ss:$16 sps:$4 sm:$0xff]  }
 0x655   :  { %v3830_v49 = vpop.f32.mrf.mxu0  ;;  %5919 = vmatpush1.bf16.msra.mxu1 %v12118_v5  ;;  %v5596_v5 = vrot.slane %v5595_v14, 2  ;;  %v6037_v16 = vadd.f32 %v6036_v8, %v6035_v59  ;;  %v12177_v60 = vld [vmem:[#allocation28 + $0xd2c] ss:$16 sps:$4 sm:$0xff]   ;;  %v12172_v59 = vld [vmem:[#allocation28 + $0xd20] ss:$16 sps:$4 sm:$0xff]  }
 0x656   :  { %5960 = vmatpush1.bf16.msra.mxu0 %v12121_v52  ;;  %v3790_v29 = vpop.f32.mrf.mxu1  ;;  %5920 = vmatprep.subr.bf16.mxu1 %v12126_v2  ;;  %v12148_v52 = vld [vmem:[#allocation28 + $0xc20] ss:$16 sps:$4 sm:$0xff]   ;;  %v12151_v2 = vld [vmem:[#allocation28 + $0xc28] ss:$16 sps:$4 sm:$0xff]   ;;  %v6023_v54 = vrot.slane %v6022_v57, 2 }
 0x657   :  { %v3831_v33 = vpop.f32.mrf.mxu0  ;;  %5961 = vmatprep.subr.bf16.mxu0 %v12129_v18  ;;  %v5584_v18 = vadd.f32 %v5583_v48, %v5582_v50  ;;  %v12159_v49 = vld [vmem:[#allocation28 + $0xc0c] ss:$16 sps:$4 sm:$0xff]   ;;  %v12154_v29 = vld [vmem:[#allocation28 + $0xc00] ss:$16 sps:$4 sm:$0xff]   ;;  %v6038_v3 = vrot.slane %v6037_v16, 1 }
 0x658   :  { %v6024_v33 = vadd.f32 %v6023_v54, %v6022_v57  ;;  %v12183_v57 = vld [vmem:[#allocation28 + $0xd0c] ss:$16 sps:$4 sm:$0xff]   ;;  %v12178_v8 = vld [vmem:[#allocation28 + $0xd00] ss:$16 sps:$4 sm:$0xff]  }
 0x659   :  { %5921 = vmatpush1.bf16.msra.mxu1 %v12124_v51  ;;  %v5597_v51 = vadd.f32 %v5596_v5, %v5595_v14  ;;  %v5585_v37 = vrot.slane %v5584_v18, 1  ;;  %v6039_v44 = vadd.f32 %v6038_v3, %v6037_v16  ;;  %v12189_v54 = vld [vmem:[#allocation28 + $0xe6c] ss:$16 sps:$4 sm:$0xff]   ;;  %v12190_v3 = vld [vmem:[#allocation28 + $0xe40] ss:$16 sps:$4 sm:$0xff]  }
 0x65a   :  { %5962 = vmatpush1.bf16.msra.mxu0 %v12127_v39  ;;  %5922 = vmatprep.subr.bf16.mxu1 %v12132_v11  ;;  %v12157_v39 = vld [vmem:[#allocation28 + $0xc08] ss:$16 sps:$4 sm:$0xff]   ;;  %v12162_v11 = vld [vmem:[#allocation28 + $0xd64] ss:$16 sps:$4 sm:$0xff]   ;;  %v6025_v61 = vrot.slane %v6024_v33, 1 }
 0x65b   :  { %5963 = vmatprep.subr.bf16.mxu0 %v12135_v24  ;;  %v12165_v24 = vld [vmem:[#allocation28 + $0xd6c] ss:$16 sps:$4 sm:$0xff]   ;;  %v5598_v19 = vrot.slane %v5597_v51, 1  ;;  %v6043_v14 = vpack.c.bf16 %v6039_v44, %v6039_v44 }
 0x65c   :  { %v6026_v50 = vadd.f32 %v6025_v61, %v6024_v33  ;;  %v12195_v33 = vld [vmem:[#allocation28 + $0xe4c] ss:$16 sps:$4 sm:$0xff]   ;;  %v14345_v61 = vpop.permute.xlu1 %6440 }
 0x65d   :  { %5923 = vmatpush1.bf16.msra.mxu1 %v12130_v62  ;;  %v12160_v62 = vld [vmem:[#allocation28 + $0xd60] ss:$16 sps:$4 sm:$0xff]   ;;  %v5599_v56 = vadd.f32 %v5598_v19, %v5597_v51  ;;  %v6100_v5 = vunpack.c.l.b16 %v6043_v14  ;;  %v12207_v14 = vld [vmem:[#allocation28 + $0xe0c] ss:$16 sps:$4 sm:$0xff]  }
 0x65e   :  { %5964 = vmatpush1.bf16.msra.mxu0 %v12133_v7  ;;  %5924 = vmatprep.subr.bf16.mxu1 %v12138_v41  ;;  %v12168_v7 = vld [vmem:[#allocation28 + $0xd44] ss:$16 sps:$4 sm:$0xff]   ;;  %v5586_v41 = vadd.f32 %v5585_v37, %v5584_v18  ;;  %v6041_v48 = vpack.c.bf16 %v6026_v50, %v6026_v50 }
 0x65f   :  { %5965 = vmatprep.subr.bf16.mxu0 %v12141_v12  ;;  %v12171_v12 = vld [vmem:[#allocation28 + $0xd4c] ss:$16 sps:$4 sm:$0xff]  }
 0x661   :  { %5925 = vmatpush1.bf16.msra.mxu1 %v12136_v45  ;;  %v12169_v45 = vld [vmem:[#allocation28 + $0xd48] ss:$16 sps:$4 sm:$0xff]  }
 0x662   :  { %5966 = vmatpush1.bf16.msra.mxu0 %v12139_v46  ;;  %5926 = vmatprep.subr.bf16.mxu1 %v12144_v63  ;;  %v12174_v46 = vld [vmem:[#allocation28 + $0xd24] ss:$16 sps:$4 sm:$0xff]   ;;  %v5607_v63 = vpack.c.bf16 %v5586_v41, %v5586_v41 }
 0x663   :  { %5967 = vmatprep.subr.bf16.mxu0 %v12147_v36  ;;  %v5609_v36 = vpack.c.bf16 %v5599_v56, %v5599_v56  ;;  %v12198_v41 = vld [vmem:[#allocation28 + $0xe24] ss:$16 sps:$4 sm:$0xff]   ;;  %v12201_v56 = vld [vmem:[#allocation28 + $0xe2c] ss:$16 sps:$4 sm:$0xff]  }
 0x665   :  { %5927 = vmatpush1.bf16.msra.mxu1 %v12142_v47  ;;  %v12175_v47 = vld [vmem:[#allocation28 + $0xd28] ss:$16 sps:$4 sm:$0xff]  }
 0x666   :  { %5968 = vmatpush1.bf16.msra.mxu0 %v12145_v42  ;;  %5928 = vmatprep.subr.bf16.mxu1 %v12150_v58  ;;  %v12180_v42 = vld [vmem:[#allocation28 + $0xd04] ss:$16 sps:$4 sm:$0xff]   ;;  %v5664_v58 = vunpack.c.l.b16 %v5607_v63  ;;  %v6446_v63 = vmul.f32 %v14345_v61, %v14099_v35 }
 0x667   :  { %5969 = vmatprep.subr.bf16.mxu0 %v12153_v40  ;;  %v5666_v40 = vunpack.c.l.b16 %v5609_v36  ;;  %v6012_v36 = vmul.f32 %v14317_v27, %v14110_v20  ;;  %v12213_v27 = vld [vmem:[#allocation28 + $0xdec] ss:$16 sps:$4 sm:$0xff]  }
 0x669   :  { %5929 = vmatpush1.bf16.msra.mxu1 %v12148_v52  ;;  %v12181_v52 = vld [vmem:[#allocation28 + $0xd08] ss:$16 sps:$4 sm:$0xff]   ;;  %v5668_v18 = vsel %vm2203_vm1, %v5666_v40, %v5664_v58  ;;  %v6466_v58 = vsel %vm897_vm3, %v6446_v63, 0.0  ;;  %v6027_v40 = vrot.slane %v6012_v36, 4 }
 0x66a   :  { %5970 = vmatpush1.bf16.msra.mxu0 %v12151_v2  ;;  %5930 = vmatprep.subr.bf16.mxu1 %v12156_v13  ;;  %v12186_v2 = vld [vmem:[#allocation28 + $0xe64] ss:$16 sps:$4 sm:$0xff]   ;;  %v6098_v13 = vunpack.c.l.b16 %v6041_v48  ;;  %v5670_v16 = vpack.c.b16 %v5668_v18, %v5668_v18  ;;  %v12205_v48 = vld [vmem:[#allocation28 + $0xe08] ss:$16 sps:$4 sm:$0xff]  }
 0x66b   :  { %5971 = vmatprep.subr.bf16.mxu0 %v12159_v49  ;;  %v12184_v49 = vld [vmem:[#allocation28 + $0xe60] ss:$16 sps:$4 sm:$0xff]  }
 0x66c   :  { %v6102_v51 = vsel %vm2203_vm1, %v6100_v5, %v6098_v13  ;;  %v12216_v13 = vld [vmem:[#allocation28 + $0xdc4] ss:$16 sps:$4 sm:$0xff]  }
 0x66d   :  { %5931 = vmatpush1.bf16.msra.mxu1 %v12154_v29  ;;  %v12187_v29 = vld [vmem:[#allocation28 + $0xe68] ss:$16 sps:$4 sm:$0xff]   ;;  %v6104_v37 = vpack.c.b16 %v6102_v51, %v6102_v51 }
 0x66e   :  { %5972 = vmatpush1.bf16.msra.mxu0 %v12157_v39  ;;  %5940 = vmatprep.subr.bf16.mxu1 %v12162_v11  ;;  %v12192_v39 = vld [vmem:[#allocation28 + $0xe44] ss:$16 sps:$4 sm:$0xff]  }
 0x66f   :  { %5981 = vmatprep.subr.bf16.mxu0 %v12165_v24 }
 0x671   :  { %5941 = vmatpush2.bf16.msra.mxu1 %v12160_v62 }
 0x672   :  { %5982 = vmatpush2.bf16.msra.mxu0 %v12163_v55  ;;  %5942 = vmatprep.subr.bf16.mxu1 %v12168_v7  ;;  %v12193_v7 = vld [vmem:[#allocation28 + $0xe48] ss:$16 sps:$4 sm:$0xff]  }
 0x673   :  { %5983 = vmatprep.subr.bf16.mxu0 %v12171_v12 }
 0x675   :  { %5943 = vmatpush2.bf16.msra.mxu1 %v12166_v34  ;;  %v14354_v34 = vpop.permute.xlu0 %6436 }
 0x676   :  { %5984 = vmatpush2.bf16.msra.mxu0 %v12169_v45  ;;  %5944 = vmatprep.subr.bf16.mxu1 %v12174_v46  ;;  %v12196_v46 = vld [vmem:[#allocation28 + $0xe20] ss:$16 sps:$4 sm:$0xff]  }
 0x677   :  { %5985 = vmatprep.subr.bf16.mxu0 %v12177_v60  ;;  %v12204_v60 = vld [vmem:[#allocation28 + $0xe04] ss:$16 sps:$4 sm:$0xff]  }
 0x679   :  { %5945 = vmatpush2.bf16.msra.mxu1 %v12172_v59  ;;  %v6444_v59 = vmul.f32 %v14354_v34, %v14102_v10 }
 0x67a   :  { %5986 = vmatpush2.bf16.msra.mxu0 %v12175_v47  ;;  %5946 = vmatprep.subr.bf16.mxu1 %v12180_v42  ;;  %v6010_v47 = vmul.f32 %v14307_v1, %v14114_v31  ;;  %v12202_v42 = vld [vmem:[#allocation28 + $0xe00] ss:$16 sps:$4 sm:$0xff]   ;;  %v12211_v1 = vld [vmem:[#allocation28 + $0xde8] ss:$16 sps:$4 sm:$0xff]  }
 0x67b   :  { %5987 = vmatprep.subr.bf16.mxu0 %v12183_v57  ;;  %v12210_v57 = vld [vmem:[#allocation28 + $0xde4] ss:$16 sps:$4 sm:$0xff]   ;;  %v6453_v5 = vsel %vm897_vm3, %v6444_v59, 0.0 }
 0x67c   :  { %v6454_v18 = vrot.slane %v6453_v5, 4 }
 0x67d   :  { %5947 = vmatpush2.bf16.msra.mxu1 %v12178_v8  ;;  %v6014_v8 = vrot.slane %v6010_v47, 4 }
 0x67e   :  { %5988 = vmatpush2.bf16.msra.mxu0 %v12181_v52  ;;  %6349 = vmatprep.subr.bf16.mxu1 %v12186_v2  ;;  %v6467_v52 = vrot.slane %v6466_v58, 4  ;;  %v12208_v2 = vld [vmem:[#allocation28 + $0xde0] ss:$16 sps:$4 sm:$0xff]  }
 0x67f   :  { %6390 = vmatprep.subr.bf16.mxu0 %v12189_v54  ;;  %v6028_v54 = vadd.f32 %v6027_v40, %v6012_v36  ;;  %v6015_v51 = vadd.f32 %v6014_v8, %v6010_v47 }
 0x680   :  { %v4218_v11 = vpop.f32.mrf.mxu1  ;;  %5949 = vmatmul.mubr.bf16.vlgmr.msra.gmra.mxu1 %v5670_v16 }
 0x681   :  { %v14339_v24 = vadd.f32 %v4218_v11, %v14311_v0  ;;  %v4259_v19 = vpop.f32.mrf.mxu0  ;;  %5990 = vmatmul.mubr.bf16.vlgmr.msra.gmra.mxu0 %v5670_v16  ;;  %6350 = vmatpush1.bf16.msra.mxu1 %v12184_v49  ;;  %v12219_v49 = vld [vmem:[#allocation28 + $0xdcc] ss:$16 sps:$4 sm:$0xff]   ;;  %v6468_v16 = vadd.f32 %v6467_v52, %v6466_v58  ;;  %v12222_v11 = vld [vmem:[#allocation28 + $0xda4] ss:$16 sps:$4 sm:$0xff]   ;;  %v12235_v58 = vld [vmem:[#allocation28 + $0xee8] ss:$16 sps:$4 sm:$0xff]  }
 0x682   :  { %v14342_v62 = vadd.f32 %v4259_v19, %v14314_v6  ;;  %10702 = vmatprep.mubr.msk.bf16.mxu1 %vm897_vm3, %v6104_v37  ;;  %6391 = vmatpush1.bf16.msra.mxu0 %v12187_v29  ;;  %v4220_v55 = vpop.f32.mrf.mxu1  ;;  %v12214_v29 = vld [vmem:[#allocation28 + $0xdc0] ss:$16 sps:$4 sm:$0xff]   ;;  %v12225_v19 = vld [vmem:[#allocation28 + $0xdac] ss:$16 sps:$4 sm:$0xff]  }
 0x683   :  { %10703 = vmatprep.mubr.msk.bf16.mxu0 %vm897_vm3, %v6104_v37  ;;  %v14349_v0 = vadd.f32 %v4220_v55, %v14321_v43  ;;  %v4261_v12 = vpop.f32.mrf.mxu0  ;;  %6351 = vmatprep.subr.bf16.mxu1 %v12192_v39  ;;  %v12199_v43 = vld [vmem:[#allocation28 + $0xe28] ss:$16 sps:$4 sm:$0xff]   ;;  %v6455_v37 = vadd.f32 %v6454_v18, %v6453_v5  ;;  %v6469_v55 = vrot.slane %v6468_v16, 2  ;;  %v12238_v52 = vld [vmem:[#allocation28 + $0xec0] ss:$16 sps:$4 sm:$0xff]  }
 0x684   :  { %v14352_v44 = vadd.f32 %v4261_v12, %v14324_v22  ;;  %v4222_v6 = vpop.f32.mrf.mxu1  ;;  %6392 = vmatprep.subr.bf16.mxu0 %v12195_v33  ;;  %v12217_v39 = vld [vmem:[#allocation28 + $0xdc8] ss:$16 sps:$4 sm:$0xff]   ;;  %v6029_v33 = vrot.slane %v6028_v54, 2  ;;  %v12228_v12 = vld [vmem:[#allocation28 + $0xd84] ss:$16 sps:$4 sm:$0xff]  }
 0x685   :  { %v4263_v45 = vpop.f32.mrf.mxu0  ;;  %6352 = vmatpush1.bf16.msra.mxu1 %v12190_v3  ;;  %v6016_v3 = vrot.slane %v6015_v51, 2  ;;  %v6470_v63 = vadd.f32 %v6469_v55, %v6468_v16  ;;  %v12244_v16 = vld [vmem:[#allocation28 + $0xea0] ss:$16 sps:$4 sm:$0xff]  }
 0x686   :  { %6393 = vmatpush1.bf16.msra.mxu0 %v12193_v7  ;;  %v4223_v50 = vpop.f32.mrf.mxu1  ;;  %6353 = vmatprep.subr.bf16.mxu1 %v12198_v41  ;;  %v12220_v7 = vld [vmem:[#allocation28 + $0xda0] ss:$16 sps:$4 sm:$0xff]   ;;  %v12223_v41 = vld [vmem:[#allocation28 + $0xda8] ss:$16 sps:$4 sm:$0xff]   ;;  %v6030_v6 = vadd.f32 %v6029_v33, %v6028_v54  ;;  %v12231_v45 = vld [vmem:[#allocation28 + $0xd8c] ss:$16 sps:$4 sm:$0xff]  }
 0x687   :  { %v4264_v22 = vpop.f32.mrf.mxu0  ;;  %6394 = vmatprep.subr.bf16.mxu0 %v12201_v56  ;;  %v6456_v56 = vrot.slane %v6455_v37, 2  ;;  %v12226_v50 = vld [vmem:[#allocation28 + $0xd80] ss:$16 sps:$4 sm:$0xff]   ;;  %v6471_v47 = vrot.slane %v6470_v63, 1  ;;  %v12249_v54 = vld [vmem:[#allocation28 + $0xeac] ss:$16 sps:$4 sm:$0xff]  }
 0x688   :  { %v6031_v22 = vrot.slane %v6030_v6, 1  ;;  %v12255_v33 = vld [vmem:[#allocation28 + $0xe8c] ss:$16 sps:$4 sm:$0xff]   ;;  %v12250_v55 = vld [vmem:[#allocation28 + $0xe80] ss:$16 sps:$4 sm:$0xff]  }
 0x689   :  { %6354 = vmatpush1.bf16.msra.mxu1 %v12196_v46  ;;  %v6017_v46 = vadd.f32 %v6016_v3, %v6015_v51  ;;  %v6457_v36 = vadd.f32 %v6456_v56, %v6455_v37  ;;  %v6472_v8 = vadd.f32 %v6471_v47, %v6470_v63  ;;  %v12262_v47 = vld [vmem:[#allocation28 + $0xfc0] ss:$16 sps:$4 sm:$0xff]  }
 0x68a   :  { %6395 = vmatpush1.bf16.msra.mxu0 %v12199_v43  ;;  %6355 = vmatprep.subr.bf16.mxu1 %v12204_v60  ;;  %v12229_v43 = vld [vmem:[#allocation28 + $0xd88] ss:$16 sps:$4 sm:$0xff]   ;;  %v12234_v60 = vld [vmem:[#allocation28 + $0xee4] ss:$16 sps:$4 sm:$0xff]   ;;  %v6032_v40 = vadd.f32 %v6031_v22, %v6030_v6  ;;  %v12261_v6 = vld [vmem:[#allocation28 + $0xfec] ss:$16 sps:$4 sm:$0xff]  }
 0x68b   :  { %6396 = vmatprep.subr.bf16.mxu0 %v12207_v14  ;;  %v12237_v14 = vld [vmem:[#allocation28 + $0xeec] ss:$16 sps:$4 sm:$0xff]   ;;  %v6018_v59 = vrot.slane %v6017_v46, 1  ;;  %v6476_v51 = vpack.c.bf16 %v6472_v8, %v6472_v8 }
 0x68c   :  { %v6042_v18 = vpack.c.bf16 %v6032_v40, %v6032_v40  ;;  %v12267_v22 = vld [vmem:[#allocation28 + $0xfcc] ss:$16 sps:$4 sm:$0xff]   ;;  %v14375_v40 = vpop.permute.xlu1 %6869 }
 0x68d   :  { %6356 = vmatpush1.bf16.msra.mxu1 %v12202_v42  ;;  %v12232_v42 = vld [vmem:[#allocation28 + $0xee0] ss:$16 sps:$4 sm:$0xff]   ;;  %v6019_v5 = vadd.f32 %v6018_v59, %v6017_v46  ;;  %v6533_v3 = vunpack.c.l.b16 %v6476_v51  ;;  %v12279_v51 = vld [vmem:[#allocation28 + $0xf8c] ss:$16 sps:$4 sm:$0xff]  }
 0x68e   :  { %6397 = vmatpush1.bf16.msra.mxu0 %v12205_v48  ;;  %6357 = vmatprep.subr.bf16.mxu1 %v12210_v57  ;;  %v12240_v48 = vld [vmem:[#allocation28 + $0xec4] ss:$16 sps:$4 sm:$0xff]   ;;  %v6458_v57 = vrot.slane %v6457_v36, 1  ;;  %v6099_v37 = vunpack.c.l.b16 %v6042_v18 }
 0x68f   :  { %6398 = vmatprep.subr.bf16.mxu0 %v12213_v27  ;;  %v12243_v27 = vld [vmem:[#allocation28 + $0xecc] ss:$16 sps:$4 sm:$0xff]  }
 0x691   :  { %6358 = vmatpush1.bf16.msra.mxu1 %v12208_v2  ;;  %v12241_v2 = vld [vmem:[#allocation28 + $0xec8] ss:$16 sps:$4 sm:$0xff]  }
 0x692   :  { %6399 = vmatpush1.bf16.msra.mxu0 %v12211_v1  ;;  %6359 = vmatprep.subr.bf16.mxu1 %v12216_v13  ;;  %v12246_v1 = vld [vmem:[#allocation28 + $0xea4] ss:$16 sps:$4 sm:$0xff]   ;;  %v6459_v13 = vadd.f32 %v6458_v57, %v6457_v36 }
 0x693   :  { %6400 = vmatprep.subr.bf16.mxu0 %v12219_v49  ;;  %v6040_v49 = vpack.c.bf16 %v6019_v5, %v6019_v5  ;;  %v12270_v57 = vld [vmem:[#allocation28 + $0xfa4] ss:$16 sps:$4 sm:$0xff]   ;;  %v12273_v5 = vld [vmem:[#allocation28 + $0xfac] ss:$16 sps:$4 sm:$0xff]  }
 0x695   :  { %6360 = vmatpush1.bf16.msra.mxu1 %v12214_v29  ;;  %v12247_v29 = vld [vmem:[#allocation28 + $0xea8] ss:$16 sps:$4 sm:$0xff]  }
 0x696   :  { %6401 = vmatpush1.bf16.msra.mxu0 %v12217_v39  ;;  %6361 = vmatprep.subr.bf16.mxu1 %v12222_v11  ;;  %v12252_v39 = vld [vmem:[#allocation28 + $0xe84] ss:$16 sps:$4 sm:$0xff]   ;;  %v6474_v11 = vpack.c.bf16 %v6459_v13, %v6459_v13  ;;  %v6877_v13 = vmul.f32 %v14375_v40, %v14102_v10 }
 0x697   :  { %6402 = vmatprep.subr.bf16.mxu0 %v12225_v19  ;;  %v6097_v19 = vunpack.c.l.b16 %v6040_v49  ;;  %v6445_v49 = vmul.f32 %v14345_v61, %v14110_v20  ;;  %v12285_v61 = vld [vmem:[#allocation28 + $0xf6c] ss:$16 sps:$4 sm:$0xff]  }
 0x698   :  { %v6886_v10 = vsel %vm897_vm3, %v6877_v13, 0.0  ;;  %v12301_v13 = vld [vmem:[#allocation28 + $0xf08] ss:$16 sps:$4 sm:$0xff]  }
 0x699   :  { %6362 = vmatpush1.bf16.msra.mxu1 %v12220_v7  ;;  %v12253_v7 = vld [vmem:[#allocation28 + $0xe88] ss:$16 sps:$4 sm:$0xff]   ;;  %v6101_v56 = vsel %vm2203_vm1, %v6099_v37, %v6097_v19  ;;  %v12282_v37 = vld [vmem:[#allocation28 + $0xf64] ss:$16 sps:$4 sm:$0xff]  }
 0x69a   :  { %6403 = vmatpush1.bf16.msra.mxu0 %v12223_v41  ;;  %6363 = vmatprep.subr.bf16.mxu1 %v12228_v12  ;;  %v12258_v41 = vld [vmem:[#allocation28 + $0xfe4] ss:$16 sps:$4 sm:$0xff]   ;;  %v6531_v12 = vunpack.c.l.b16 %v6474_v11  ;;  %v6103_v63 = vpack.c.b16 %v6101_v56, %v6101_v56  ;;  %v12277_v11 = vld [vmem:[#allocation28 + $0xf88] ss:$16 sps:$4 sm:$0xff]   ;;  %v12291_v56 = vld [vmem:[#allocation28 + $0xf4c] ss:$16 sps:$4 sm:$0xff]  }
 0x69b   :  { %6404 = vmatprep.subr.bf16.mxu0 %v12231_v45  ;;  %v12256_v45 = vld [vmem:[#allocation28 + $0xfe0] ss:$16 sps:$4 sm:$0xff]  }
 0x69c   :  { %v6535_v46 = vsel %vm2203_vm1, %v6533_v3, %v6531_v12 }
 0x69d   :  { %6364 = vmatpush1.bf16.msra.mxu1 %v12226_v50  ;;  %v12259_v50 = vld [vmem:[#allocation28 + $0xfe8] ss:$16 sps:$4 sm:$0xff]   ;;  %v6537_v36 = vpack.c.b16 %v6535_v46, %v6535_v46  ;;  %v12286_v46 = vld [vmem:[#allocation28 + $0xf40] ss:$16 sps:$4 sm:$0xff]  }
 0x69e   :  { %6405 = vmatpush1.bf16.msra.mxu0 %v12229_v43  ;;  %6373 = vmatprep.subr.bf16.mxu1 %v12234_v60  ;;  %v12264_v43 = vld [vmem:[#allocation28 + $0xfc4] ss:$16 sps:$4 sm:$0xff]  }
 0x69f   :  { %6414 = vmatprep.subr.bf16.mxu0 %v12237_v14 }
 0x6a1   :  { %6374 = vmatpush2.bf16.msra.mxu1 %v12232_v42 }
 0x6a2   :  { %6415 = vmatpush2.bf16.msra.mxu0 %v12235_v58  ;;  %6375 = vmatprep.subr.bf16.mxu1 %v12240_v48  ;;  %v12265_v48 = vld [vmem:[#allocation28 + $0xfc8] ss:$16 sps:$4 sm:$0xff]  }
 0x6a3   :  { %6416 = vmatprep.subr.bf16.mxu0 %v12243_v27 }
 0x6a5   :  { %6376 = vmatpush2.bf16.msra.mxu1 %v12238_v52  ;;  %v14384_v52 = vpop.permute.xlu0 %6873 }
 0x6a6   :  { %6417 = vmatpush2.bf16.msra.mxu0 %v12241_v2  ;;  %6377 = vmatprep.subr.bf16.mxu1 %v12246_v1  ;;  %v12268_v1 = vld [vmem:[#allocation28 + $0xfa0] ss:$16 sps:$4 sm:$0xff]  }
 0x6a7   :  { %6418 = vmatprep.subr.bf16.mxu0 %v12249_v54  ;;  %v12276_v54 = vld [vmem:[#allocation28 + $0xf84] ss:$16 sps:$4 sm:$0xff]  }
 0x6a9   :  { %6378 = vmatpush2.bf16.msra.mxu1 %v12244_v16  ;;  %v6879_v16 = vmul.f32 %v14384_v52, %v14099_v35  ;;  %v12280_v35 = vld [vmem:[#allocation28 + $0xf60] ss:$16 sps:$4 sm:$0xff]  }
 0x6aa   :  { %6419 = vmatpush2.bf16.msra.mxu0 %v12247_v29  ;;  %6379 = vmatprep.subr.bf16.mxu1 %v12252_v39  ;;  %v6443_v29 = vmul.f32 %v14354_v34, %v14114_v31  ;;  %v12274_v39 = vld [vmem:[#allocation28 + $0xf80] ss:$16 sps:$4 sm:$0xff]   ;;  %v12283_v34 = vld [vmem:[#allocation28 + $0xf68] ss:$16 sps:$4 sm:$0xff]  }
 0x6ab   :  { %6420 = vmatprep.subr.bf16.mxu0 %v12255_v33  ;;  %v6460_v33 = vrot.slane %v6445_v49, 4  ;;  %v6899_v19 = vsel %vm897_vm3, %v6879_v16, 0.0  ;;  %v12304_v16 = vld [vmem:[#allocation28 + $0x1060] ss:$16 sps:$4 sm:$0xff]  }
 0x6ac   :  { %v6447_v3 = vrot.slane %v6443_v29, 4 }
 0x6ad   :  { %6380 = vmatpush2.bf16.msra.mxu1 %v12250_v55  ;;  %v6887_v55 = vrot.slane %v6886_v10, 4  ;;  %v6461_v12 = vadd.f32 %v6460_v33, %v6445_v49  ;;  %v12309_v49 = vld [vmem:[#allocation28 + $0x106c] ss:$16 sps:$4 sm:$0xff]  }
 0x6ae   :  { %6421 = vmatpush2.bf16.msra.mxu0 %v12253_v7  ;;  %6782 = vmatprep.subr.bf16.mxu1 %v12258_v41  ;;  %v12288_v7 = vld [vmem:[#allocation28 + $0xf44] ss:$16 sps:$4 sm:$0xff]   ;;  %v6900_v41 = vrot.slane %v6899_v19, 4 }
 0x6af   :  { %6823 = vmatprep.subr.bf16.mxu0 %v12261_v6  ;;  %v6448_v6 = vadd.f32 %v6447_v3, %v6443_v29  ;;  %v12307_v29 = vld [vmem:[#allocation28 + $0x1068] ss:$16 sps:$4 sm:$0xff]  }
 0x6b0   :  { %v4651_v60 = vpop.f32.mrf.mxu1  ;;  %6382 = vmatmul.mubr.bf16.vlgmr.msra.gmra.mxu1 %v6103_v63  ;;  %v12313_v3 = vld [vmem:[#allocation28 + $0x1048] ss:$16 sps:$4 sm:$0xff]  }
 0x6b1   :  { %v14369_v14 = vadd.f32 %v4651_v60, %v14339_v24  ;;  %v4692_v59 = vpop.f32.mrf.mxu0  ;;  %6423 = vmatmul.mubr.bf16.vlgmr.msra.gmra.mxu0 %v6103_v63  ;;  %6783 = vmatpush1.bf16.msra.mxu1 %v12256_v45  ;;  %v6888_v45 = vadd.f32 %v6887_v55, %v6886_v10  ;;  %v12289_v63 = vld [vmem:[#allocation28 + $0xf48] ss:$16 sps:$4 sm:$0xff]   ;;  %v6462_v60 = vrot.slane %v6461_v12, 2  ;;  %v12318_v55 = vld [vmem:[#allocation28 + $0x1024] ss:$16 sps:$4 sm:$0xff]  }
 0x6b2   :  { %v14372_v42 = vadd.f32 %v4692_v59, %v14342_v62  ;;  %10752 = vmatprep.mubr.msk.bf16.mxu1 %vm897_vm3, %v6537_v36  ;;  %6824 = vmatpush1.bf16.msra.mxu0 %v12259_v50  ;;  %v4653_v58 = vpop.f32.mrf.mxu1  ;;  %v12294_v50 = vld [vmem:[#allocation28 + $0xf24] ss:$16 sps:$4 sm:$0xff]  }
 0x6b3   :  { %10753 = vmatprep.mubr.msk.bf16.mxu0 %vm897_vm3, %v6537_v36  ;;  %v14379_v24 = vadd.f32 %v4653_v58, %v14349_v0  ;;  %v4694_v27 = vpop.f32.mrf.mxu0  ;;  %6784 = vmatprep.subr.bf16.mxu1 %v12264_v43  ;;  %v12271_v0 = vld [vmem:[#allocation28 + $0xfa8] ss:$16 sps:$4 sm:$0xff]   ;;  %v6901_v43 = vadd.f32 %v6900_v41, %v6899_v19  ;;  %v12297_v36 = vld [vmem:[#allocation28 + $0xf2c] ss:$16 sps:$4 sm:$0xff]   ;;  %v6889_v59 = vrot.slane %v6888_v45, 2 }
 0x6b4   :  { %v14382_v8 = vadd.f32 %v4694_v27, %v14352_v44  ;;  %v4655_v62 = vpop.f32.mrf.mxu1  ;;  %6825 = vmatprep.subr.bf16.mxu0 %v12267_v22  ;;  %v6449_v22 = vrot.slane %v6448_v6, 2  ;;  %v12295_v58 = vld [vmem:[#allocation28 + $0xf28] ss:$16 sps:$4 sm:$0xff]   ;;  %v6463_v27 = vadd.f32 %v6462_v60, %v6461_v12  ;;  %v12310_v19 = vld [vmem:[#allocation28 + $0x1040] ss:$16 sps:$4 sm:$0xff]  }
 0x6b5   :  { %v4696_v2 = vpop.f32.mrf.mxu0  ;;  %6785 = vmatpush1.bf16.msra.mxu1 %v12262_v47  ;;  %v12292_v47 = vld [vmem:[#allocation28 + $0xf20] ss:$16 sps:$4 sm:$0xff]  }
 0x6b6   :  { %6826 = vmatpush1.bf16.msra.mxu0 %v12265_v48  ;;  %v4656_v18 = vpop.f32.mrf.mxu1  ;;  %6786 = vmatprep.subr.bf16.mxu1 %v12270_v57  ;;  %v12300_v48 = vld [vmem:[#allocation28 + $0xf04] ss:$16 sps:$4 sm:$0xff]   ;;  %v6902_v57 = vrot.slane %v6901_v43, 2  ;;  %v6450_v62 = vadd.f32 %v6449_v22, %v6448_v6  ;;  %v6890_v2 = vadd.f32 %v6889_v59, %v6888_v45  ;;  %v12319_v6 = vld [vmem:[#allocation28 + $0x1028] ss:$16 sps:$4 sm:$0xff]  }
 0x6b7   :  { %v4697_v44 = vpop.f32.mrf.mxu0  ;;  %6827 = vmatprep.subr.bf16.mxu0 %v12273_v5  ;;  %v12303_v5 = vld [vmem:[#allocation28 + $0xf0c] ss:$16 sps:$4 sm:$0xff]   ;;  %v12306_v18 = vld [vmem:[#allocation28 + $0x1064] ss:$16 sps:$4 sm:$0xff]   ;;  %v12325_v22 = vld [vmem:[#allocation28 + $0x1008] ss:$16 sps:$4 sm:$0xff]  }
 0x6b8   :  { %v6451_v44 = vrot.slane %v6450_v62, 1  ;;  %v12324_v45 = vld [vmem:[#allocation28 + $0x1004] ss:$16 sps:$4 sm:$0xff]  }
 0x6b9   :  { %6787 = vmatpush1.bf16.msra.mxu1 %v12268_v1  ;;  %v12298_v1 = vld [vmem:[#allocation28 + $0xf00] ss:$16 sps:$4 sm:$0xff]   ;;  %v12330_v59 = vld [vmem:[#allocation28 + $0x1164] ss:$16 sps:$4 sm:$0xff]  }
 0x6ba   :  { %6828 = vmatpush1.bf16.msra.mxu0 %v12271_v0  ;;  %6788 = vmatprep.subr.bf16.mxu1 %v12276_v54  ;;  %v6903_v0 = vadd.f32 %v6902_v57, %v6901_v43  ;;  %v6464_v54 = vrot.slane %v6463_v27, 1  ;;  %v6452_v33 = vadd.f32 %v6451_v44, %v6450_v62  ;;  %v12328_v57 = vld [vmem:[#allocation28 + $0x1160] ss:$16 sps:$4 sm:$0xff]   ;;  %v12331_v62 = vld [vmem:[#allocation28 + $0x1168] ss:$16 sps:$4 sm:$0xff]  }
 0x6bb   :  { %6829 = vmatprep.subr.bf16.mxu0 %v12279_v51  ;;  %v6891_v51 = vrot.slane %v6890_v2, 1 }
 0x6bc   :  { %v6904_v10 = vrot.slane %v6903_v0, 1  ;;  %v6473_v41 = vpack.c.bf16 %v6452_v33, %v6452_v33  ;;  %v12340_v33 = vld [vmem:[#allocation28 + $0x1120] ss:$16 sps:$4 sm:$0xff]  }
 0x6bd   :  { %6789 = vmatpush1.bf16.msra.mxu1 %v12274_v39  ;;  %v12312_v39 = vld [vmem:[#allocation28 + $0x1044] ss:$16 sps:$4 sm:$0xff]  }
 0x6be   :  { %6830 = vmatpush1.bf16.msra.mxu0 %v12277_v11  ;;  %6790 = vmatprep.subr.bf16.mxu1 %v12282_v37  ;;  %v6465_v11 = vadd.f32 %v6464_v54, %v6463_v27  ;;  %v12315_v37 = vld [vmem:[#allocation28 + $0x104c] ss:$16 sps:$4 sm:$0xff]   ;;  %v6530_v43 = vunpack.c.l.b16 %v6473_v41  ;;  %v12354_v41 = vld [vmem:[#allocation28 + $0x10e4] ss:$16 sps:$4 sm:$0xff]  }
 0x6bf   :  { %6831 = vmatprep.subr.bf16.mxu0 %v12285_v61  ;;  %v6892_v61 = vadd.f32 %v6891_v51, %v6890_v2  ;;  %v12336_v2 = vld [vmem:[#allocation28 + $0x1144] ss:$16 sps:$4 sm:$0xff]  }
 0x6c1   :  { %6791 = vmatpush1.bf16.msra.mxu1 %v12280_v35  ;;  %v6905_v35 = vadd.f32 %v6904_v10, %v6903_v0  ;;  %v6907_v12 = vpack.c.bf16 %v6892_v61, %v6892_v61  ;;  %v12345_v10 = vld [vmem:[#allocation28 + $0x112c] ss:$16 sps:$4 sm:$0xff]  }
 0x6c2   :  { %6832 = vmatpush1.bf16.msra.mxu0 %v12283_v34  ;;  %6792 = vmatprep.subr.bf16.mxu1 %v12288_v7  ;;  %v6475_v34 = vpack.c.bf16 %v6465_v11, %v6465_v11  ;;  %v12321_v7 = vld [vmem:[#allocation28 + $0x102c] ss:$16 sps:$4 sm:$0xff]  }
 0x6c3   :  { %6833 = vmatprep.subr.bf16.mxu0 %v12291_v56  ;;  %v12316_v56 = vld [vmem:[#allocation28 + $0x1020] ss:$16 sps:$4 sm:$0xff]   ;;  %v6964_v60 = vunpack.c.l.b16 %v6907_v12 }
 0x6c5   :  { %6793 = vmatpush1.bf16.msra.mxu1 %v12286_v46  ;;  %v6909_v46 = vpack.c.bf16 %v6905_v35, %v6905_v35  ;;  %v12351_v35 = vld [vmem:[#allocation28 + $0x110c] ss:$16 sps:$4 sm:$0xff]  }
 0x6c6   :  { %6834 = vmatpush1.bf16.msra.mxu0 %v12289_v63  ;;  %6794 = vmatprep.subr.bf16.mxu1 %v12294_v50  ;;  %v6532_v63 = vunpack.c.l.b16 %v6475_v34  ;;  %v12327_v50 = vld [vmem:[#allocation28 + $0x100c] ss:$16 sps:$4 sm:$0xff]   ;;  %v12346_v34 = vld [vmem:[#allocation28 + $0x1100] ss:$16 sps:$4 sm:$0xff]  }
 0x6c7   :  { %6835 = vmatprep.subr.bf16.mxu0 %v12297_v36  ;;  %v12322_v36 = vld [vmem:[#allocation28 + $0x1000] ss:$16 sps:$4 sm:$0xff]  }
 0x6c9   :  { %6795 = vmatpush1.bf16.msra.mxu1 %v12292_v47  ;;  %v6966_v47 = vunpack.c.l.b16 %v6909_v46 }
 0x6ca   :  { %6836 = vmatpush1.bf16.msra.mxu0 %v12295_v58  ;;  %6796 = vmatprep.subr.bf16.mxu1 %v12300_v48  ;;  %v6534_v58 = vsel %vm2203_vm1, %v6532_v63, %v6530_v43  ;;  %v12333_v48 = vld [vmem:[#allocation28 + $0x116c] ss:$16 sps:$4 sm:$0xff]   ;;  %v12366_v43 = vld [vmem:[#allocation28 + $0x10a4] ss:$16 sps:$4 sm:$0xff]  }
 0x6cb   :  { %6837 = vmatprep.subr.bf16.mxu0 %v12303_v5  ;;  %v6968_v27 = vsel %vm2203_vm1, %v6966_v47, %v6964_v60  ;;  %v6536_v5 = vpack.c.b16 %v6534_v58, %v6534_v58  ;;  %v12363_v63 = vld [vmem:[#allocation28 + $0x10cc] ss:$16 sps:$4 sm:$0xff]   ;;  %v12367_v47 = vld [vmem:[#allocation28 + $0x10a8] ss:$16 sps:$4 sm:$0xff]   ;;  %v12372_v58 = vld [vmem:[#allocation28 + $0x1084] ss:$16 sps:$4 sm:$0xff]  }
 0x6cd   :  { %6797 = vmatpush1.bf16.msra.mxu1 %v12298_v1 }
 0x6ce   :  { %6838 = vmatpush1.bf16.msra.mxu0 %v12301_v13  ;;  %6806 = vmatprep.subr.bf16.mxu1 %v12306_v18  ;;  %v6970_v13 = vpack.c.b16 %v6968_v27, %v6968_v27  ;;  %v12339_v18 = vld [vmem:[#allocation28 + $0x114c] ss:$16 sps:$4 sm:$0xff]  }
 0x6cf   :  { %6847 = vmatprep.subr.bf16.mxu0 %v12309_v49  ;;  %v12334_v49 = vld [vmem:[#allocation28 + $0x1140] ss:$16 sps:$4 sm:$0xff]  }
 0x6d1   :  { %6807 = vmatpush2.bf16.msra.mxu1 %v12304_v16  ;;  %v12337_v16 = vld [vmem:[#allocation28 + $0x1148] ss:$16 sps:$4 sm:$0xff]  }
 0x6d2   :  { %6848 = vmatpush2.bf16.msra.mxu0 %v12307_v29  ;;  %6808 = vmatprep.subr.bf16.mxu1 %v12312_v39  ;;  %v12342_v29 = vld [vmem:[#allocation28 + $0x1124] ss:$16 sps:$4 sm:$0xff]  }
 0x6d3   :  { %6849 = vmatprep.subr.bf16.mxu0 %v12315_v37 }
 0x6d5   :  { %6809 = vmatpush2.bf16.msra.mxu1 %v12310_v19  ;;  %v12343_v19 = vld [vmem:[#allocation28 + $0x1128] ss:$16 sps:$4 sm:$0xff]  }
 0x6d6   :  { %6850 = vmatpush2.bf16.msra.mxu0 %v12313_v3  ;;  %6810 = vmatprep.subr.bf16.mxu1 %v12318_v55  ;;  %v12348_v3 = vld [vmem:[#allocation28 + $0x1104] ss:$16 sps:$4 sm:$0xff]  }
 0x6d7   :  { %6851 = vmatprep.subr.bf16.mxu0 %v12321_v7  ;;  %v12349_v7 = vld [vmem:[#allocation28 + $0x1108] ss:$16 sps:$4 sm:$0xff]  }
 0x6d9   :  { %6811 = vmatpush2.bf16.msra.mxu1 %v12316_v56  ;;  %v12357_v56 = vld [vmem:[#allocation28 + $0x10ec] ss:$16 sps:$4 sm:$0xff]  }
 0x6da   :  { %6852 = vmatpush2.bf16.msra.mxu0 %v12319_v6  ;;  %6812 = vmatprep.subr.bf16.mxu1 %v12324_v45  ;;  %v12352_v45 = vld [vmem:[#allocation28 + $0x10e0] ss:$16 sps:$4 sm:$0xff]  }
 0x6db   :  { %6853 = vmatprep.subr.bf16.mxu0 %v12327_v50  ;;  %v12361_v50 = vld [vmem:[#allocation28 + $0x10c8] ss:$16 sps:$4 sm:$0xff]  }
 0x6dd   :  { %6813 = vmatpush2.bf16.msra.mxu1 %v12322_v36  ;;  %v12369_v36 = vld [vmem:[#allocation28 + $0x10ac] ss:$16 sps:$4 sm:$0xff]  }
 0x6de   :  { %6854 = vmatpush2.bf16.msra.mxu0 %v12325_v22  ;;  %7215 = vmatprep.subr.bf16.mxu1 %v12330_v59  ;;  %v12364_v59 = vld [vmem:[#allocation28 + $0x10a0] ss:$16 sps:$4 sm:$0xff]  }
 0x6df   :  { %7256 = vmatprep.subr.bf16.mxu0 %v12333_v48 }
 0x6e0   :  { %v5084_v1 = vpop.f32.mrf.mxu1  ;;  %6815 = vmatmul.mubr.bf16.vlgmr.msra.gmra.mxu1 %v6536_v5 }
 0x6e1   :  { %v14399_v0 = vadd.f32 %v5084_v1, %v14369_v14  ;;  %v5125_v54 = vpop.f32.mrf.mxu0  ;;  %6856 = vmatmul.mubr.bf16.vlgmr.msra.gmra.mxu0 %v6536_v5  ;;  %7216 = vmatpush1.bf16.msra.mxu1 %v12328_v57  ;;  %v12375_v57 = vld [vmem:[#allocation28 + $0x108c] ss:$16 sps:$4 sm:$0xff]   ;;  %v12370_v5 = vld [vmem:[#allocation28 + $0x1080] ss:$16 sps:$4 sm:$0xff]  }
 0x6e2   :  { %v14402_v44 = vadd.f32 %v5125_v54, %v14372_v42  ;;  %10802 = vmatprep.mubr.msk.bf16.mxu1 %vm897_vm3, %v6970_v13  ;;  %7257 = vmatpush1.bf16.msra.mxu0 %v12331_v62  ;;  %v5086_v51 = vpop.f32.mrf.mxu1  ;;  %v12373_v62 = vld [vmem:[#allocation28 + $0x1088] ss:$16 sps:$4 sm:$0xff]   ;;  %v12376_v54 = vld [vmem:[#allocation28 + $0x11e0] ss:$16 sps:$4 sm:$0xff]  }
 0x6e3   :  { %10803 = vmatprep.mubr.msk.bf16.mxu0 %vm897_vm3, %v6970_v13  ;;  %v14407_v39 = vadd.f32 %v5086_v51, %v14379_v24  ;;  %v5127_v14 = vpop.f32.mrf.mxu0  ;;  %7217 = vmatprep.subr.bf16.mxu1 %v12336_v2  ;;  %v6876_v24 = vmul.f32 %v14375_v40, %v14114_v31  ;;  %v12355_v31 = vld [vmem:[#allocation28 + $0x10e8] ss:$16 sps:$4 sm:$0xff]   ;;  %v12360_v40 = vld [vmem:[#allocation28 + $0x10c4] ss:$16 sps:$4 sm:$0xff]   ;;  %v12381_v13 = vld [vmem:[#allocation28 + $0x11ec] ss:$16 sps:$4 sm:$0xff]  }
 0x6e4   :  { %v14410_v11 = vadd.f32 %v5127_v14, %v14382_v8  ;;  %v5088_v37 = vpop.f32.mrf.mxu1  ;;  %7258 = vmatprep.subr.bf16.mxu0 %v12339_v18  ;;  %v6878_v8 = vmul.f32 %v14384_v52, %v14110_v20  ;;  %v12358_v52 = vld [vmem:[#allocation28 + $0x10c0] ss:$16 sps:$4 sm:$0xff]   ;;  %v12378_v2 = vld [vmem:[#allocation28 + $0x11e4] ss:$16 sps:$4 sm:$0xff]   ;;  %vm7303_vm3 = vcmask 1041408  }
 0x6e5   :  { %v5129_v42 = vpop.f32.mrf.mxu0  ;;  %7218 = vmatpush1.bf16.msra.mxu1 %v12334_v49  ;;  %v6880_v12 = vrot.slane %v6876_v24, 4  ;;  %v12379_v49 = vld [vmem:[#allocation28 + $0x11e8] ss:$16 sps:$4 sm:$0xff]   ;;  %v12384_v51 = vld [vmem:[#allocation28 + $0x11c4] ss:$16 sps:$4 sm:$0xff]  }
 0x6e6   :  { %7259 = vmatpush1.bf16.msra.mxu0 %v12337_v16  ;;  %v5089_v61 = vpop.f32.mrf.mxu1  ;;  %7219 = vmatprep.subr.bf16.mxu1 %v12342_v29  ;;  %v6893_v6 = vrot.slane %v6878_v8, 4  ;;  %v12387_v29 = vld [vmem:[#allocation28 + $0x11cc] ss:$16 sps:$4 sm:$0xff]   ;;  %v12385_v37 = vld [vmem:[#allocation28 + $0x11c8] ss:$16 sps:$4 sm:$0xff]  }
 0x6e7   :  { %v5130_v55 = vpop.f32.mrf.mxu0  ;;  %7260 = vmatprep.subr.bf16.mxu0 %v12345_v10  ;;  %v6881_v46 = vadd.f32 %v6880_v12, %v6876_v24  ;;  %v12382_v10 = vld [vmem:[#allocation28 + $0x11c0] ss:$16 sps:$4 sm:$0xff]   ;;  %v12390_v42 = vld [vmem:[#allocation28 + $0x11a4] ss:$16 sps:$4 sm:$0xff]   ;;  %v12393_v61 = vld [vmem:[#allocation28 + $0x11ac] ss:$16 sps:$4 sm:$0xff]  }
 0x6e8   :  { %v6894_v20 = vadd.f32 %v6893_v6, %v6878_v8  ;;  %v12391_v24 = vld [vmem:[#allocation28 + $0x11a8] ss:$16 sps:$4 sm:$0xff]   ;;  %v12396_v55 = vld [vmem:[#allocation28 + $0x1184] ss:$16 sps:$4 sm:$0xff]   ;;  %v12399_v8 = vld [vmem:[#allocation28 + $0x118c] ss:$16 sps:$4 sm:$0xff]  }
 0x6e9   :  { %7220 = vmatpush1.bf16.msra.mxu1 %v12340_v33  ;;  %v6882_v60 = vrot.slane %v6881_v46, 2 }
 0x6ea   :  { %7261 = vmatpush1.bf16.msra.mxu0 %v12343_v19  ;;  %7221 = vmatprep.subr.bf16.mxu1 %v12348_v3  ;;  %v6895_v22 = vrot.slane %v6894_v20, 2  ;;  %v12388_v3 = vld [vmem:[#allocation28 + $0x11a0] ss:$16 sps:$4 sm:$0xff]  }
 0x6eb   :  { %7262 = vmatprep.subr.bf16.mxu0 %v12351_v35  ;;  %v6883_v48 = vadd.f32 %v6882_v60, %v6881_v46 }
 0x6ec   :  { %v6896_v27 = vadd.f32 %v6895_v22, %v6894_v20 }
 0x6ed   :  { %7222 = vmatpush1.bf16.msra.mxu1 %v12346_v34  ;;  %v6884_v1 = vrot.slane %v6883_v48, 1 }
 0x6ee   :  { %7263 = vmatpush1.bf16.msra.mxu0 %v12349_v7  ;;  %7223 = vmatprep.subr.bf16.mxu1 %v12354_v41  ;;  %v6897_v18 = vrot.slane %v6896_v27, 1  ;;  %v12394_v7 = vld [vmem:[#allocation28 + $0x1180] ss:$16 sps:$4 sm:$0xff]   ;;  %v12397_v41 = vld [vmem:[#allocation28 + $0x1188] ss:$16 sps:$4 sm:$0xff]  }
 0x6ef   :  { %7264 = vmatprep.subr.bf16.mxu0 %v12357_v56  ;;  %v6885_v16 = vadd.f32 %v6884_v1, %v6883_v48  ;;  %v12402_v1 = vld [vmem:[#allocation36 + $0x74] ss:$8 sps:$4 sm:$0xff]  }
 0x6f0   :  { %v6898_v14 = vadd.f32 %v6897_v18, %v6896_v27  ;;  %v12408_v18 = vld [vmem:[#allocation36 + $0x64] ss:$8 sps:$4 sm:$0xff]  }
 0x6f1   :  { %7224 = vmatpush1.bf16.msra.mxu1 %v12352_v45  ;;  %v6906_v33 = vpack.c.bf16 %v6885_v16, %v6885_v16  ;;  %v12414_v16 = vld [vmem:[#allocation36 + $0x54] ss:$8 sps:$4 sm:$0xff]  }
 0x6f2   :  { %7265 = vmatpush1.bf16.msra.mxu0 %v12355_v31  ;;  %7225 = vmatprep.subr.bf16.mxu1 %v12360_v40  ;;  %v6908_v19 = vpack.c.bf16 %v6898_v14, %v6898_v14  ;;  %v12412_v14 = vld [vmem:[#allocation36 + $0x50] ss:$8 sps:$4 sm:$0xff]  }
 0x6f3   :  { %7266 = vmatprep.subr.bf16.mxu0 %v12363_v63  ;;  %v6963_v35 = vunpack.c.l.b16 %v6906_v33  ;;  %v12418_v33 = vld [vmem:[#allocation36 + $0x40] ss:$8 sps:$4 sm:$0xff]  }
 0x6f4   :  { %v6965_v34 = vunpack.c.l.b16 %v6908_v19 }
 0x6f5   :  { %7226 = vmatpush1.bf16.msra.mxu1 %v12358_v52 }
 0x6f6   :  { %7267 = vmatpush1.bf16.msra.mxu0 %v12361_v50  ;;  %7227 = vmatprep.subr.bf16.mxu1 %v12366_v43  ;;  %v6967_v12 = vsel %vm2203_vm1, %v6965_v34, %v6963_v35 }
 0x6f7   :  { %7268 = vmatprep.subr.bf16.mxu0 %v12369_v36  ;;  %v6969_v56 = vpack.c.b16 %v6967_v12, %v6967_v12 }
 0x6f9   :  { %7228 = vmatpush1.bf16.msra.mxu1 %v12364_v59 }
 0x6fa   :  { %7269 = vmatpush1.bf16.msra.mxu0 %v12367_v47  ;;  %7229 = vmatprep.subr.bf16.mxu1 %v12372_v58 }
 0x6fb   :  { %7270 = vmatprep.subr.bf16.mxu0 %v12375_v57 }
 0x6fd   :  { %7230 = vmatpush1.bf16.msra.mxu1 %v12370_v5 }
 0x6fe   :  { %7271 = vmatpush1.bf16.msra.mxu0 %v12373_v62  ;;  %7239 = vmatprep.subr.bf16.mxu1 %v12378_v2 }
 0x6ff   :  { %7280 = vmatprep.subr.bf16.mxu0 %v12381_v13  ;;  %v12403_v13 = vld [vmem:[#allocation36 + $0x170] ss:$8 sps:$4 sm:$0xff]  }
 0x701   :  { %7240 = vmatpush2.bf16.msra.mxu1 %v12376_v54  ;;  %v12411_v54 = vld [vmem:[#allocation36 + $0x164] ss:$8 sps:$4 sm:$0xff]  }
 0x702   :  { %7281 = vmatpush2.bf16.msra.mxu0 %v12379_v49  ;;  %7241 = vmatprep.subr.bf16.mxu1 %v12384_v51  ;;  %v12406_v49 = vld [vmem:[#allocation36 + $0x60] ss:$8 sps:$4 sm:$0xff]  }
 0x703   :  { %7282 = vmatprep.subr.bf16.mxu0 %v12387_v29  ;;  %v12409_v51 = vld [vmem:[#allocation36 + $0x160] ss:$8 sps:$4 sm:$0xff]   ;;  %v12417_v29 = vld [vmem:[#allocation36 + $0x154] ss:$8 sps:$4 sm:$0xff]  }
 0x705   :  { %7242 = vmatpush2.bf16.msra.mxu1 %v12382_v10  ;;  %v12415_v10 = vld [vmem:[#allocation36 + $0x150] ss:$8 sps:$4 sm:$0xff]  }
 0x706   :  { %7283 = vmatpush2.bf16.msra.mxu0 %v12385_v37  ;;  %7243 = vmatprep.subr.bf16.mxu1 %v12390_v42  ;;  %v12420_v37 = vld [vmem:[#allocation36 + $0x44] ss:$8 sps:$4 sm:$0xff]  }
 0x707   :  { %7284 = vmatprep.subr.bf16.mxu0 %v12393_v61  ;;  %v12423_v42 = vld [vmem:[#allocation36 + $0x144] ss:$8 sps:$4 sm:$0xff]   ;;  %v12421_v61 = vld [vmem:[#allocation36 + $0x140] ss:$8 sps:$4 sm:$0xff]  }
 0x709   :  { %7244 = vmatpush2.bf16.msra.mxu1 %v12388_v3 }
 0x70a   :  { %7285 = vmatpush2.bf16.msra.mxu0 %v12391_v24  ;;  %7245 = vmatprep.subr.bf16.mxu1 %v12396_v55 }
 0x70b   :  { %7286 = vmatprep.subr.bf16.mxu0 %v12399_v8 }
 0x70d   :  { %7246 = vmatpush2.bf16.msra.mxu1 %v12394_v7 }
 0x70e   :  { %7287 = vmatpush2.bf16.msra.mxu0 %v12397_v41  ;;  %7811 = vmatprep.subr.bf16.mxu1 %v12402_v1 }
 0x710   :  { %v5517_v6 = vpop.f32.mrf.mxu1  ;;  %7248 = vmatmul.mubr.bf16.vlgmr.msra.gmra.mxu1 %v6969_v56 }
 0x711   :  { %v5565_v45 = vadd.f32 %v5517_v6, %v14399_v0  ;;  %v5558_v31 = vpop.f32.mrf.mxu0  ;;  %7289 = vmatmul.mubr.bf16.vlgmr.msra.gmra.mxu0 %v6969_v56 }
 0x712   :  { %v5567_v40 = vadd.f32 %v5558_v31, %v14402_v44  ;;  %v5519_v46 = vpop.f32.mrf.mxu1 }
 0x713   :  { %v5566_v63 = vadd.f32 %v5519_v46, %v14407_v39  ;;  %v5560_v20 = vpop.f32.mrf.mxu0  ;;  %v12400_v39 = vld [vmem:[#allocation36 + $0x70] ss:$8 sps:$4 sm:$0xff]  }
 0x714   :  { %v5568_v52 = vadd.f32 %v5560_v20, %v14410_v11  ;;  %v5521_v50 = vpop.f32.mrf.mxu1  ;;  %v12405_v11 = vld [vmem:[#allocation36 + $0x174] ss:$8 sps:$4 sm:$0xff]   ;;  %7812 = vmatpush1.bf16.msra.mxu1 %v12400_v39 }
 0x715   :  { %v5562_v43 = vpop.f32.mrf.mxu0  ;;  %7852 = vmatprep.subr.bf16.mxu0 %v12405_v11  ;;  %7813 = vmatprep.subr.bf16.mxu1 %v12408_v18 }
 0x716   :  { %v5522_v60 = vpop.f32.mrf.mxu1  ;;  %7853 = vmatpush1.bf16.msra.mxu0 %v12403_v13 }
 0x717   :  { %v5563_v36 = vpop.f32.mrf.mxu0  ;;  %7854 = vmatprep.subr.bf16.mxu0 %v12411_v54 }
 0x718   :  { %7814 = vmatpush1.bf16.msra.mxu1 %v12406_v49 }
 0x719   :  { %7815 = vmatprep.subr.bf16.mxu1 %v12414_v16 }
 0x71a   :  { %7855 = vmatpush1.bf16.msra.mxu0 %v12409_v51 }
 0x71b   :  { %7856 = vmatprep.subr.bf16.mxu0 %v12417_v29 }
 0x71c   :  { %7816 = vmatpush1.bf16.msra.mxu1 %v12412_v14 }
 0x71d   :  { %7817 = vmatprep.subr.bf16.mxu1 %v12420_v37 }
 0x71e   :  { %7857 = vmatpush1.bf16.msra.mxu0 %v12415_v10 }
 0x71f   :  { %7858 = vmatprep.subr.bf16.mxu0 %v12423_v42 }
 0x720   :  { %7818 = vmatpush1.bf16.msra.mxu1 %v12418_v33 }
 0x722   :  { %7859 = vmatpush1.bf16.msra.mxu0 %v12421_v61 }
 0x740   :  { %v5950_v22 = vpop.f32.mrf.mxu1 }
 0x741   :  { %v5998_v59 = vadd.f32 %v5950_v22, %v5565_v45  ;;  %v5991_v47 = vpop.f32.mrf.mxu0 }
 0x742   :  { %v6000_v58 = vadd.f32 %v5991_v47, %v5567_v40  ;;  %v5952_v48 = vpop.f32.mrf.mxu1 }
 0x743   :  { %v5999_v0 = vadd.f32 %v5952_v48, %v5566_v63  ;;  %v5993_v57 = vpop.f32.mrf.mxu0 }
 0x744   :  { %v6001_v27 = vadd.f32 %v5993_v57, %v5568_v52  ;;  %v5954_v5 = vpop.f32.mrf.mxu1 }
 0x745   :  { %v5995_v44 = vpop.f32.mrf.mxu0 }
 0x746   :  { %v5955_v62 = vpop.f32.mrf.mxu1 }
 0x747   :  { %v5996_v2 = vpop.f32.mrf.mxu0 }
 0x770   :  { %v6383_v19 = vpop.f32.mrf.mxu1 }
 0x771   :  { %v6431_v3 = vadd.f32 %v6383_v19, %v5998_v59  ;;  %v6424_v24 = vpop.f32.mrf.mxu0 }
 0x772   :  { %v6433_v55 = vadd.f32 %v6424_v24, %v6000_v58  ;;  %v6385_v35 = vpop.f32.mrf.mxu1 }
 0x773   :  { %v6432_v8 = vadd.f32 %v6385_v35, %v5999_v0  ;;  %v6426_v34 = vpop.f32.mrf.mxu0  ;;  %v12426_v35 = vld [vmem:[#allocation36 + $0x34] ss:$8 sps:$4 sm:$0xff]  }
 0x774   :  { %v6434_v7 = vadd.f32 %v6426_v34, %v6001_v27  ;;  %v6387_v41 = vpop.f32.mrf.mxu1  ;;  %v12429_v34 = vld [vmem:[#allocation36 + $0x134] ss:$8 sps:$4 sm:$0xff]   ;;  %7819 = vmatprep.subr.bf16.mxu1 %v12426_v35 }
 0x775   :  { %v6428_v12 = vpop.f32.mrf.mxu0  ;;  %v12435_v41 = vld [vmem:[#allocation36 + $0x124] ss:$8 sps:$4 sm:$0xff]   ;;  %7860 = vmatprep.subr.bf16.mxu0 %v12429_v34 }
 0x776   :  { %v6388_v56 = vpop.f32.mrf.mxu1  ;;  %v12430_v12 = vld [vmem:[#allocation36 + $0x20] ss:$8 sps:$4 sm:$0xff]   ;;  %v12498_v35 = vld [vmem:[#allocation39 + $0xac] ss:$12 sps:$4 sm:$0xff]  }
 0x777   :  { %v6429_v6 = vpop.f32.mrf.mxu0  ;;  %v12433_v56 = vld [vmem:[#allocation36 + $0x120] ss:$8 sps:$4 sm:$0xff]  }
 0x778   :  { %v12438_v6 = vld [vmem:[#allocation36 + $0x14] ss:$8 sps:$4 sm:$0xff]  }
 0x7a0   :  { %v6816_v45 = vpop.f32.mrf.mxu1 }
 0x7a1   :  { %v6857_v31 = vpop.f32.mrf.mxu0  ;;  %v6864_v43 = vadd.f32 %v6816_v45, %v6431_v3  ;;  %v12441_v45 = vld [vmem:[#allocation36 + $0x114] ss:$8 sps:$4 sm:$0xff]  }
 0x7a2   :  { %v6818_v40 = vpop.f32.mrf.mxu1  ;;  %v6866_v60 = vadd.f32 %v6857_v31, %v6433_v55  ;;  %v12424_v55 = vld [vmem:[#allocation36 + $0x30] ss:$8 sps:$4 sm:$0xff]  }
 0x7a3   :  { %v6859_v46 = vpop.f32.mrf.mxu0  ;;  %v6865_v22 = vadd.f32 %v6818_v40, %v6432_v8  ;;  %v12427_v8 = vld [vmem:[#allocation36 + $0x130] ss:$8 sps:$4 sm:$0xff]   ;;  %7820 = vmatpush1.bf16.msra.mxu1 %v12424_v55  ;;  %v12493_v55 = vld [vmem:[#allocation36 + $0x180] ss:$8 sps:$4 sm:$0xff]  }
 0x7a4   :  { %v6820_v63 = vpop.f32.mrf.mxu1  ;;  %v6867_v58 = vadd.f32 %v6859_v46, %v6434_v7  ;;  %v12432_v7 = vld [vmem:[#allocation36 + $0x24] ss:$8 sps:$4 sm:$0xff]   ;;  %7861 = vmatpush1.bf16.msra.mxu0 %v12427_v8  ;;  %v12436_v31 = vld [vmem:[#allocation36 + $0x10] ss:$8 sps:$4 sm:$0xff]  }
 0x7a5   :  { %v6861_v20 = vpop.f32.mrf.mxu0  ;;  %7821 = vmatprep.subr.bf16.mxu1 %v12432_v7  ;;  %7862 = vmatprep.subr.bf16.mxu0 %v12435_v41  ;;  %v12439_v40 = vld [vmem:[#allocation36 + $0x110] ss:$8 sps:$4 sm:$0xff]   ;;  %v12444_v46 = vld [vmem:[#allocation36 + $0x4] ss:$8 sps:$4 sm:$0xff]  }
 0x7a6   :  { %v6821_v52 = vpop.f32.mrf.mxu1  ;;  %v12447_v63 = vld [vmem:[#allocation36 + $0x104] ss:$8 sps:$4 sm:$0xff]   ;;  %v12442_v20 = vld [vmem:[#allocation36] ss:$8 sps:$4 sm:$0xff]  }
 0x7a7   :  { %v6862_v50 = vpop.f32.mrf.mxu0  ;;  %7822 = vmatpush1.bf16.msra.mxu1 %v12430_v12  ;;  %v12445_v52 = vld [vmem:[#allocation36 + $0x100] ss:$8 sps:$4 sm:$0xff]  }
 0x7a8   :  { %7863 = vmatpush1.bf16.msra.mxu0 %v12433_v56  ;;  %7823 = vmatprep.subr.bf16.mxu1 %v12438_v6  ;;  %v12450_v50 = vld [vmem:[#allocation36 + $0xf4] ss:$8 sps:$4 sm:$0xff]  }
 0x7a9   :  { %7864 = vmatprep.subr.bf16.mxu0 %v12441_v45  ;;  %v12523_v8 = vld [vmem:[#allocation39 + $0x170] ss:$12 sps:$4 sm:$0xff]  }
 0x7ab   :  { %7824 = vmatpush1.bf16.msra.mxu1 %v12436_v31  ;;  %v7301_v31 = vld [vmem:[#allocation33] sm:$0xf] }
 0x7ac   :  { %7865 = vmatpush1.bf16.msra.mxu0 %v12439_v40  ;;  %7825 = vmatprep.subr.bf16.mxu1 %v12444_v46  ;;  %v7302_v40 = vld [vmem:[#allocation34] sm:$0xf]  ;;  %v7357_v46 = vrot.slane %v7301_v31, %v14210_v25 }
 0x7ad   :  { %7866 = vmatprep.subr.bf16.mxu0 %v12447_v63  ;;  %v7349_v63 = vrot.slane %v7301_v31, %v13873_v32 }
 0x7af   :  { %7826 = vmatpush1.bf16.msra.mxu1 %v12442_v20  ;;  %v7345_v20 = vrot.slane %v7301_v31, %v13870_v30 }
 0x7b0   :  { %7867 = vmatpush1.bf16.msra.mxu0 %v12445_v52  ;;  %7827 = vmatprep.subr.bf16.mxu1 %v12450_v50  ;;  %v7353_v52 = vrot.slane %v7301_v31, %v13878_v38  ;;  %v12502_v31 = vld [vmem:[#allocation39 + $0x78] ss:$12 sps:$4 sm:$0xff]  }
 0x7d0   :  { %v7249_v36 = vpop.f32.mrf.mxu1 }
 0x7d1   :  { %v14421_v59 = vadd.f32 %v7249_v36, %v6864_v43  ;;  %v7290_v47 = vpop.f32.mrf.mxu0  ;;  %v12453_v43 = vld [vmem:[#allocation36 + $0x1f4] ss:$8 sps:$4 sm:$0xff]   ;;  %v12451_v36 = vld [vmem:[#allocation36 + $0x1f0] ss:$8 sps:$4 sm:$0xff]  }
 0x7d2   :  { %v14423_v48 = vadd.f32 %v7290_v47, %v6866_v60  ;;  %v7251_v0 = vpop.f32.mrf.mxu1  ;;  %v12448_v60 = vld [vmem:[#allocation36 + $0xf0] ss:$8 sps:$4 sm:$0xff]   ;;  %7868 = vmatprep.subr.bf16.mxu0 %v12453_v43  ;;  %v12459_v47 = vld [vmem:[#allocation36 + $0x1e4] ss:$8 sps:$4 sm:$0xff]  }
 0x7d3   :  { %v7315_v57 = vmul.f32 %v14421_v59, %v14421_v59  ;;  %v14427_v27 = vadd.f32 %v7251_v0, %v6865_v22  ;;  %v7292_v5 = vpop.f32.mrf.mxu0  ;;  %v7304_v2 = vsel %vm7303_vm3, %v14421_v59, 0.0  ;;  %v12456_v22 = vld [vmem:[#allocation36 + $0xe4] ss:$8 sps:$4 sm:$0xff]   ;;  %7828 = vmatpush2.bf16.msra.mxu1 %v12448_v60  ;;  %7869 = vmatpush2.bf16.msra.mxu0 %v12451_v36  ;;  %v12457_v0 = vld [vmem:[#allocation36 + $0x1e0] ss:$8 sps:$4 sm:$0xff]  }
 0x7d4   :  { %v14429_v44 = vadd.f32 %v7292_v5, %v6867_v58  ;;  %v7253_v62 = vpop.f32.mrf.mxu1  ;;  %v7317_v39 = vmul.f32 %v14423_v48, %v14423_v48  ;;  %v7307_v51 = vsel %vm7303_vm3, %v14423_v48, 0.0  ;;  %v12454_v58 = vld [vmem:[#allocation36 + $0xe0] ss:$8 sps:$4 sm:$0xff]   ;;  %7829 = vmatprep.subr.bf16.mxu1 %v12456_v22  ;;  %7870 = vmatprep.subr.bf16.mxu0 %v12459_v47  ;;  %v12465_v5 = vld [vmem:[#allocation36 + $0x1d4] ss:$8 sps:$4 sm:$0xff]   ;;  %v7374_v47 = vrot.slane %v7302_v40, %v13873_v32 }
 0x7d5   :  { %v7305_v1 = vsel %vm7303_vm3, %v14427_v27, 0.0  ;;  %v7316_v13 = vmul.f32 %v14427_v27, %v14427_v27  ;;  %v7294_v11 = vpop.f32.mrf.mxu0  ;;  %v7319_v29 = vsel %vm7303_vm3, %v7315_v57, 0.0  ;;  %v12462_v57 = vld [vmem:[#allocation36 + $0xd4] ss:$8 sps:$4 sm:$0xff]   ;;  %v12460_v62 = vld [vmem:[#allocation36 + $0xd0] ss:$8 sps:$4 sm:$0xff]  }
 0x7d6   :  { %v7254_v18 = vpop.f32.mrf.mxu1  ;;  %v7306_v54 = vadd.f32 %v7305_v1, %v7304_v2  ;;  %v7318_v16 = vmul.f32 %v14429_v44, %v14429_v44  ;;  %v7309_v42 = vsel %vm7303_vm3, %v14429_v44, 0.0  ;;  %v7322_v33 = vsel %vm7303_vm3, %v7317_v39, 0.0  ;;  %v12463_v2 = vld [vmem:[#allocation36 + $0x1d0] ss:$8 sps:$4 sm:$0xff]   ;;  %v12468_v39 = vld [vmem:[#allocation36 + $0xc4] ss:$8 sps:$4 sm:$0xff]  }
 0x7d7   :  { %v7295_v49 = vpop.f32.mrf.mxu0  ;;  %v7320_v14 = vsel %vm7303_vm3, %v7316_v13, 0.0  ;;  %7830 = vmatpush2.bf16.msra.mxu1 %v12454_v58  ;;  %7871 = vmatpush2.bf16.msra.mxu0 %v12457_v0  ;;  %v12471_v1 = vld [vmem:[#allocation36 + $0x1c4] ss:$8 sps:$4 sm:$0xff]   ;;  %v12466_v13 = vld [vmem:[#allocation36 + $0xc0] ss:$8 sps:$4 sm:$0xff]   ;;  %v7382_v58 = vrot.slane %v7302_v40, %v14210_v25  ;;  %v7370_v0 = vrot.slane %v7302_v40, %v13870_v30 }
 0x7d8   :  { %v7308_v10 = vadd.f32 %v7307_v51, %v7306_v54  ;;  %v7321_v37 = vadd.f32 %v7320_v14, %v7319_v29  ;;  %v7324_v3 = vsel %vm7303_vm3, %v7318_v16, 0.0  ;;  %7831 = vmatprep.subr.bf16.mxu1 %v12462_v57  ;;  %7872 = vmatprep.subr.bf16.mxu0 %v12465_v5  ;;  %v12469_v11 = vld [vmem:[#allocation36 + $0x1c0] ss:$8 sps:$4 sm:$0xff]   ;;  %v12474_v18 = vld [vmem:[#allocation36 + $0xb4] ss:$8 sps:$4 sm:$0xff]   ;;  %v7378_v57 = vrot.slane %v7302_v40, %v13878_v38 }
 0x7d9   :  { %v12477_v54 = vld [vmem:[#allocation36 + $0x1b4] ss:$8 sps:$4 sm:$0xff]   ;;  %v12472_v49 = vld [vmem:[#allocation36 + $0xb0] ss:$8 sps:$4 sm:$0xff]   ;;  %v12480_v16 = vld [vmem:[#allocation36 + $0xa4] ss:$8 sps:$4 sm:$0xff]  }
 0x7da   :  { %v7310_v61 = vadd.f32 %v7309_v42, %v7308_v10  ;;  %v7323_v19 = vadd.f32 %v7322_v33, %v7321_v37  ;;  %v12475_v51 = vld [vmem:[#allocation36 + $0x1b0] ss:$8 sps:$4 sm:$0xff]   ;;  %v12483_v29 = vld [vmem:[#allocation36 + $0x1a4] ss:$8 sps:$4 sm:$0xff]   ;;  %v12478_v14 = vld [vmem:[#allocation36 + $0xa0] ss:$8 sps:$4 sm:$0xff]  }
 0x7db   :  { %7832 = vmatpush2.bf16.msra.mxu1 %v12460_v62  ;;  %7873 = vmatpush2.bf16.msra.mxu0 %v12463_v2  ;;  %v12481_v10 = vld [vmem:[#allocation36 + $0x1a0] ss:$8 sps:$4 sm:$0xff]   ;;  %v12486_v37 = vld [vmem:[#allocation36 + $0x94] ss:$8 sps:$4 sm:$0xff]   ;;  %v12484_v33 = vld [vmem:[#allocation36 + $0x90] ss:$8 sps:$4 sm:$0xff]  }
 0x7dc   :  { %7311 = vadd.xlane.f32.xlu1 %v7310_v61  ;;  %v7325_v24 = vadd.f32 %v7324_v3, %v7323_v19  ;;  %7833 = vmatprep.subr.bf16.mxu1 %v12468_v39  ;;  %v12489_v42 = vld [vmem:[#allocation36 + $0x194] ss:$8 sps:$4 sm:$0xff]   ;;  %v12487_v61 = vld [vmem:[#allocation36 + $0x190] ss:$8 sps:$4 sm:$0xff]   ;;  %v12492_v19 = vld [vmem:[#allocation36 + $0x84] ss:$8 sps:$4 sm:$0xff]  }
 0x7dd   :  { %7874 = vmatprep.subr.bf16.mxu0 %v12471_v1  ;;  %v12495_v3 = vld [vmem:[#allocation36 + $0x184] ss:$8 sps:$4 sm:$0xff]   ;;  %vm10002_vm3 = vcmask 58368  }
 0x7de   :  { %7326 = vadd.xlane.f32.xlu0 %v7325_v24  ;;  %v12490_v24 = vld [vmem:[#allocation36 + $0x80] ss:$8 sps:$4 sm:$0xff]  }
 0x7df   :  { %7834 = vmatpush2.bf16.msra.mxu1 %v12466_v13  ;;  %7875 = vmatpush2.bf16.msra.mxu0 %v12469_v11  ;;  %v12507_v40 = vld [vmem:[#allocation39 + $0x64] ss:$12 sps:$4 sm:$0xff]  }
 0x7e0   :  { %7835 = vmatprep.subr.bf16.mxu1 %v12474_v18  ;;  %7876 = vmatprep.subr.bf16.mxu0 %v12477_v54 }
 0x7e3   :  { %7836 = vmatpush2.bf16.msra.mxu1 %v12472_v49  ;;  %7877 = vmatpush2.bf16.msra.mxu0 %v12475_v51 }
 0x7e4   :  { %7837 = vmatprep.subr.bf16.mxu1 %v12480_v16  ;;  %7878 = vmatprep.subr.bf16.mxu0 %v12483_v29 }
 0x7e7   :  { %7838 = vmatpush2.bf16.msra.mxu1 %v12478_v14  ;;  %7879 = vmatpush2.bf16.msra.mxu0 %v12481_v10 }
 0x7e8   :  { %7839 = vmatprep.subr.bf16.mxu1 %v12486_v37  ;;  %7880 = vmatprep.subr.bf16.mxu0 %v12489_v42 }
 0x7eb   :  { %7840 = vmatpush2.bf16.msra.mxu1 %v12484_v33  ;;  %7881 = vmatpush2.bf16.msra.mxu0 %v12487_v61 }
 0x7ec   :  { %7841 = vmatprep.subr.bf16.mxu1 %v12492_v19  ;;  %7882 = vmatprep.subr.bf16.mxu0 %v12495_v3 }
 0x7ef   :  { %7842 = vmatpush2.bf16.msra.mxu1 %v12490_v24  ;;  %7883 = vmatpush2.bf16.msra.mxu0 %v12493_v55 }
 0x7f0   :  { %8242 = vmatprep.subr.bf16.mxu1 %v12498_v35  ;;  %11114 = vmatprep.subr.bf16.mxu0 %v12523_v8  ;;  %v12496_v8 = vld [vmem:[#allocation39 + $0xa8] ss:$12 sps:$4 sm:$0xff]  }
 0x865   :  { %v7312_v34 = vpop.xlane.xlu1 %7311 }
 0x866   :  { %v7314_v7 = vmul.f32 0.001953125, %v7312_v34 }
 0x867   :  { %v7327_v41 = vpop.xlane.xlu0 %7326 }
 0x868   :  { %v7328_v12 = vmul.f32 0.001953125, %v7327_v41  ;;  %v7329_v56 = vmul.f32 %v7314_v7, %v7314_v7  ;;  %v7331_v50 = vsub.f32 %v14421_v59, %v7314_v7  ;;  %v7332_v43 = vsub.f32 %v14427_v27, %v7314_v7  ;;  %v12501_v41 = vld [vmem:[#allocation39 + $0x94] ss:$12 sps:$4 sm:$0xff]  }
 0x869   :  { %v7333_v60 = vsub.f32 %v14423_v48, %v7314_v7  ;;  %v7334_v36 = vsub.f32 %v14429_v44, %v7314_v7 }
 0x86a   :  { %v7330_v6 = vsub.f32 %v7328_v12, %v7329_v56  ;;  %v12524_v12 = vld [vmem:[#allocation39 + $0xb0] ss:$12 sps:$4 sm:$0xff]  }
 0x86c   :  { %v7335_v45 = vadd.f32 1e-06, %v7330_v6  ;;  %v12499_v6 = vld [vmem:[#allocation39 + $0x90] ss:$12 sps:$4 sm:$0xff]  }
 0x86e   :  { %12808 = vrsqrt.f32 %v7335_v45  ;;  %v12504_v45 = vld [vmem:[#allocation39 + $0x7c] ss:$12 sps:$4 sm:$0xff]  }
 0x87b   :  { %v12809_v22 = vpop.eup %12808 }
 0x87c   :  { %v7338_v5 = vmul.f32 %v12809_v22, %v7332_v43  ;;  %v7340_v62 = vmul.f32 %v12809_v22, %v7334_v36  ;;  %v7337_v2 = vmul.f32 %v12809_v22, %v7331_v50  ;;  %v7339_v39 = vmul.f32 %v12809_v22, %v7333_v60  ;;  %v12511_v50 = vld [vmem:[#allocation39 + $0x30] ss:$12 sps:$4 sm:$0xff]   ;;  %v12514_v60 = vld [vmem:[#allocation39 + $0x18] ss:$12 sps:$4 sm:$0xff]   ;;  %v12517_v22 = vld [vmem:[#allocation39] ss:$12 sps:$4 sm:$0xff]  }
 0x87d   :  { %v12516_v43 = vld [vmem:[#allocation39 + $0x1c] ss:$12 sps:$4 sm:$0xff]   ;;  %v12519_v36 = vld [vmem:[#allocation39 + $0x4] ss:$12 sps:$4 sm:$0xff]  }
 0x87e   :  { %v7363_v59 = vmul.f32 %v7349_v63, %v7338_v5  ;;  %v7365_v1 = vmul.f32 %v7357_v46, %v7340_v62  ;;  %v7362_v27 = vmul.f32 %v7345_v20, %v7337_v2  ;;  %v7364_v13 = vmul.f32 %v7353_v52, %v7339_v39  ;;  %v12505_v46 = vld [vmem:[#allocation39 + $0x60] ss:$12 sps:$4 sm:$0xff]   ;;  %v12508_v20 = vld [vmem:[#allocation39 + $0x48] ss:$12 sps:$4 sm:$0xff]   ;;  %v12528_v5 = vld [vmem:[#allocation39 + $0x158] ss:$12 sps:$4 sm:$0xff]  }
 0x87f   :  { %v12510_v63 = vld [vmem:[#allocation39 + $0x4c] ss:$12 sps:$4 sm:$0xff]   ;;  %v12513_v52 = vld [vmem:[#allocation39 + $0x34] ss:$12 sps:$4 sm:$0xff]   ;;  %v12532_v2 = vld [vmem:[#allocation39 + $0x13c] ss:$12 sps:$4 sm:$0xff]  }
 0x880   :  { %v7388_v48 = vadd.f32 %v7374_v47, %v7363_v59  ;;  %v7390_v11 = vadd.f32 %v7382_v58, %v7365_v1  ;;  %v7387_v44 = vadd.f32 %v7370_v0, %v7362_v27  ;;  %v7389_v18 = vadd.f32 %v7378_v57, %v7364_v13  ;;  %v12522_v47 = vld [vmem:[#allocation39 + $0x16c] ss:$12 sps:$4 sm:$0xff]   ;;  %v12520_v58 = vld [vmem:[#allocation39 + $0x168] ss:$12 sps:$4 sm:$0xff]   ;;  %v12525_v0 = vld [vmem:[#allocation39 + $0x150] ss:$12 sps:$4 sm:$0xff]  }
 0x881   :  { %v12527_v57 = vld [vmem:[#allocation39 + $0x154] ss:$12 sps:$4 sm:$0xff]   ;;  %v12529_v62 = vld [vmem:[#allocation39 + $0x98] ss:$12 sps:$4 sm:$0xff]  }
 0x882   :  { %v7397_v54 = vmul.f32 1.442695, %v7388_v48  ;;  %v7401_v49 = vmul.f32 1.442695, %v7390_v11  ;;  %v7395_v51 = vmul.f32 1.442695, %v7387_v44 }
 0x883   :  { %v7399_v25 = vmul.f32 1.442695, %v7389_v18  ;;  %vm7392_vm4 = vcmp.gt.f32.partialorder %v7388_v48, 0.0  ;;  %vm7394_vm5 = vcmp.gt.f32.partialorder %v7390_v11, 0.0  ;;  %vm7391_vm6 = vcmp.gt.f32.partialorder %v7387_v44, 0.0 }
 0x884   :  { %12810 = vpow2.f32 %v7397_v54  ;;  %vm7393_vm7 = vcmp.gt.f32.partialorder %v7389_v18, 0.0  ;;  %v12533_v39 = vld [vmem:[#allocation39 + $0x140] ss:$12 sps:$4 sm:$0xff]   ;;  %v12530_v59 = vld [vmem:[#allocation39 + $0x138] ss:$12 sps:$4 sm:$0xff]  }
 0x885   :  { %12812 = vpow2.f32 %v7401_v49  ;;  %v12534_v1 = vld [vmem:[#allocation39 + $0x80] ss:$12 sps:$4 sm:$0xff]   ;;  %v12537_v27 = vld [vmem:[#allocation39 + $0x124] ss:$12 sps:$4 sm:$0xff]   ;;  %v12538_v13 = vld [vmem:[#allocation39 + $0x128] ss:$12 sps:$4 sm:$0xff]  }
 0x886   :  { %12814 = vpow2.f32 %v7395_v51  ;;  %v12540_v54 = vld [vmem:[#allocation39 + $0x108] ss:$12 sps:$4 sm:$0xff]   ;;  %v12544_v49 = vld [vmem:[#allocation39 + $0x50] ss:$12 sps:$4 sm:$0xff]  }
 0x887   :  { %12816 = vpow2.f32 %v7399_v25  ;;  %v12547_v51 = vld [vmem:[#allocation39 + $0xf4] ss:$12 sps:$4 sm:$0xff]   ;;  %v12548_v25 = vld [vmem:[#allocation39 + $0xf8] ss:$12 sps:$4 sm:$0xff]  }
 0x891   :  { %v12811_v16 = vpop.eup %12810 }
 0x892   :  { %v12813_v29 = vpop.eup %12812  ;;  %v10805_v14 = vadd.f32 -1.0, %v12811_v16  ;;  %v12545_v16 = vld [vmem:[#allocation39 + $0xf0] ss:$12 sps:$4 sm:$0xff]  }
 0x893   :  { %v12815_v10 = vpop.eup %12814  ;;  %v10807_v37 = vadd.f32 -1.0, %v12813_v29  ;;  %v12549_v29 = vld [vmem:[#allocation39 + $0x38] ss:$12 sps:$4 sm:$0xff]  }
 0x894   :  { %v12817_v42 = vpop.eup %12816  ;;  %v7408_v33 = vsel %vm7392_vm4, %v7388_v48, %v10805_v14  ;;  %v10804_v61 = vadd.f32 -1.0, %v12815_v10  ;;  %v12535_v48 = vld [vmem:[#allocation39 + $0x120] ss:$12 sps:$4 sm:$0xff]   ;;  %v12552_v14 = vld [vmem:[#allocation39 + $0xdc] ss:$12 sps:$4 sm:$0xff]  }
 0x895   :  { %v7412_v19 = vpack.c.bf16 %v7408_v33, %v7408_v33  ;;  %v7410_v3 = vsel %vm7394_vm5, %v7390_v11, %v10807_v37  ;;  %v10806_v24 = vadd.f32 -1.0, %v12817_v42  ;;  %v12539_v11 = vld [vmem:[#allocation39 + $0x68] ss:$12 sps:$4 sm:$0xff]   ;;  %v12553_v10 = vld [vmem:[#allocation39 + $0xe0] ss:$12 sps:$4 sm:$0xff]  }
 0x896   :  { %v7414_v55 = vpack.c.bf16 %v7410_v3, %v7410_v3  ;;  %v7407_v35 = vsel %vm7391_vm6, %v7387_v44, %v10804_v61  ;;  %v12542_v44 = vld [vmem:[#allocation39 + $0x10c] ss:$12 sps:$4 sm:$0xff]   ;;  %v12557_v33 = vld [vmem:[#allocation39 + $0xc4] ss:$12 sps:$4 sm:$0xff]   ;;  %v12558_v61 = vld [vmem:[#allocation39 + $0xc8] ss:$12 sps:$4 sm:$0xff]  }
 0x897   :  { %7843 = vmatprep.mubr.bf16.mxu1 %v7412_v19  ;;  %v7411_v34 = vpack.c.bf16 %v7407_v35, %v7407_v35  ;;  %v7409_v7 = vsel %vm7393_vm7, %v7389_v18, %v10806_v24  ;;  %v12543_v18 = vld [vmem:[#allocation39 + $0x110] ss:$12 sps:$4 sm:$0xff]   ;;  %v12550_v37 = vld [vmem:[#allocation39 + $0xd8] ss:$12 sps:$4 sm:$0xff]   ;;  %v12554_v42 = vld [vmem:[#allocation39 + $0x20] ss:$12 sps:$4 sm:$0xff]  }
 0x898   :  { %7884 = vmatprep.mubr.bf16.mxu0 %v7414_v55  ;;  %v7413_v56 = vpack.c.bf16 %v7409_v7, %v7409_v7  ;;  %v12555_v19 = vld [vmem:[#allocation39 + $0xc0] ss:$12 sps:$4 sm:$0xff]   ;;  %v12559_v3 = vld [vmem:[#allocation39 + $0x8] ss:$12 sps:$4 sm:$0xff]   ;;  %v12562_v24 = vld [vmem:[#allocation42 + $0xac] ss:$12 sps:$4 sm:$0xff]  }
 0x899   :  { %7844 = vmatmul.mubr.bf16.vlgmr.msra.gmra.mxu1 %v7411_v34  ;;  %v12589_v55 = vld [vmem:[#allocation42 + $0x22c] ss:$12 sps:$4 sm:$0xff]  }
 0x89a   :  { %7885 = vmatmul.mubr.bf16.vlgmr.msra.gmra.mxu0 %v7413_v56  ;;  %8243 = vmatpush1.bf16.msra.mxu1 %v12496_v8  ;;  %v7479_v35 = vld [vmem:[#allocation37] sm:$0x3] }
 0x89b   :  { %8244 = vmatprep.subr.bf16.mxu1 %v12501_v41  ;;  %11115 = vmatpush3.bf16.msra.mxu0 %v12524_v12  ;;  %v7484_v8 = vrot.slane %v7479_v35, %v13870_v30  ;;  %v7488_v34 = vrot.slane %v7479_v35, %v13873_v32  ;;  %v12584_v35 = vld [vmem:[#allocation42 + $0x168] ss:$12 sps:$4 sm:$0xff]  }
 0x89c   :  { %11116 = vmatprep.subr.bf16.mxu0 %v12528_v5  ;;  %v12560_v5 = vld [vmem:[#allocation42 + $0xa8] ss:$12 sps:$4 sm:$0xff]  }
 0x89e   :  { %8245 = vmatpush1.bf16.msra.mxu1 %v12499_v6 }
 0x89f   :  { %8246 = vmatprep.subr.bf16.mxu1 %v12504_v45  ;;  %11117 = vmatpush3.bf16.msra.mxu0 %v12529_v62  ;;  %v12587_v62 = vld [vmem:[#allocation42 + $0x228] ss:$12 sps:$4 sm:$0xff]  }
 0x8a0   :  { %11118 = vmatprep.subr.bf16.mxu0 %v12533_v39  ;;  %v12565_v39 = vld [vmem:[#allocation42 + $0x94] ss:$12 sps:$4 sm:$0xff]  }
 0x8a2   :  { %8247 = vmatpush1.bf16.msra.mxu1 %v12502_v31 }
 0x8a3   :  { %8248 = vmatprep.subr.bf16.mxu1 %v12507_v40  ;;  %11119 = vmatpush3.bf16.msra.mxu0 %v12534_v1  ;;  %v12563_v1 = vld [vmem:[#allocation42 + $0x90] ss:$12 sps:$4 sm:$0xff]  }
 0x8a4   :  { %11120 = vmatprep.subr.bf16.mxu0 %v12538_v13  ;;  %v12568_v13 = vld [vmem:[#allocation42 + $0x7c] ss:$12 sps:$4 sm:$0xff]  }
 0x8a6   :  { %8249 = vmatpush1.bf16.msra.mxu1 %v12505_v46 }
 0x8a7   :  { %8250 = vmatprep.subr.bf16.mxu1 %v12510_v63  ;;  %11121 = vmatpush3.bf16.msra.mxu0 %v12539_v11  ;;  %v12566_v11 = vld [vmem:[#allocation42 + $0x78] ss:$12 sps:$4 sm:$0xff]  }
 0x8a8   :  { %11122 = vmatprep.subr.bf16.mxu0 %v12543_v18  ;;  %v12571_v18 = vld [vmem:[#allocation42 + $0x64] ss:$12 sps:$4 sm:$0xff]  }
 0x8aa   :  { %8251 = vmatpush1.bf16.msra.mxu1 %v12508_v20 }
 0x8ab   :  { %8252 = vmatprep.subr.bf16.mxu1 %v12513_v52  ;;  %11123 = vmatpush3.bf16.msra.mxu0 %v12544_v49  ;;  %v12569_v49 = vld [vmem:[#allocation42 + $0x60] ss:$12 sps:$4 sm:$0xff]  }
 0x8ac   :  { %11124 = vmatprep.subr.bf16.mxu0 %v12548_v25  ;;  %v12574_v25 = vld [vmem:[#allocation42 + $0x4c] ss:$12 sps:$4 sm:$0xff]  }
 0x8ae   :  { %8253 = vmatpush1.bf16.msra.mxu1 %v12511_v50 }
 0x8af   :  { %8254 = vmatprep.subr.bf16.mxu1 %v12516_v43  ;;  %11125 = vmatpush3.bf16.msra.mxu0 %v12549_v29  ;;  %v12572_v29 = vld [vmem:[#allocation42 + $0x48] ss:$12 sps:$4 sm:$0xff]  }
 0x8b0   :  { %11126 = vmatprep.subr.bf16.mxu0 %v12553_v10  ;;  %v12577_v10 = vld [vmem:[#allocation42 + $0x34] ss:$12 sps:$4 sm:$0xff]  }
 0x8b2   :  { %8255 = vmatpush1.bf16.msra.mxu1 %v12514_v60 }
 0x8b3   :  { %8256 = vmatprep.subr.bf16.mxu1 %v12519_v36  ;;  %11127 = vmatpush3.bf16.msra.mxu0 %v12554_v42  ;;  %v12575_v42 = vld [vmem:[#allocation42 + $0x30] ss:$12 sps:$4 sm:$0xff]  }
 0x8b4   :  { %11128 = vmatprep.subr.bf16.mxu0 %v12558_v61  ;;  %v12580_v61 = vld [vmem:[#allocation42 + $0x1c] ss:$12 sps:$4 sm:$0xff]  }
 0x8b6   :  { %8257 = vmatpush1.bf16.msra.mxu1 %v12517_v22 }
 0x8b7   :  { %8258 = vmatprep.subr.bf16.mxu1 %v12522_v47  ;;  %11129 = vmatpush3.bf16.msra.mxu0 %v12559_v3  ;;  %v12583_v3 = vld [vmem:[#allocation42 + $0x4] ss:$12 sps:$4 sm:$0xff]  }
 0x8b8   :  { %8823 = vmatprep.subr.bf16.mxu0 %v12562_v24  ;;  %v12581_v24 = vld [vmem:[#allocation42] ss:$12 sps:$4 sm:$0xff]  }
 0x8ba   :  { %8259 = vmatpush2.bf16.msra.mxu1 %v12520_v58 }
 0x8bb   :  { %8260 = vmatprep.subr.bf16.mxu1 %v12527_v57 }
 0x8be   :  { %8261 = vmatpush2.bf16.msra.mxu1 %v12525_v0 }
 0x8bf   :  { %8262 = vmatprep.subr.bf16.mxu1 %v12532_v2 }
 0x8c2   :  { %8263 = vmatpush2.bf16.msra.mxu1 %v12530_v59  ;;  %v12595_v59 = vld [vmem:[#allocation42 + $0x214] ss:$12 sps:$4 sm:$0xff]  }
 0x8c3   :  { %8264 = vmatprep.subr.bf16.mxu1 %v12537_v27  ;;  %v12593_v27 = vld [vmem:[#allocation42 + $0x210] ss:$12 sps:$4 sm:$0xff]  }
 0x8c6   :  { %8265 = vmatpush2.bf16.msra.mxu1 %v12535_v48  ;;  %v12601_v48 = vld [vmem:[#allocation42 + $0x1fc] ss:$12 sps:$4 sm:$0xff]  }
 0x8c7   :  { %8266 = vmatprep.subr.bf16.mxu1 %v12542_v44  ;;  %v12599_v44 = vld [vmem:[#allocation42 + $0x1f8] ss:$12 sps:$4 sm:$0xff]  }
 0x8ca   :  { %8267 = vmatpush2.bf16.msra.mxu1 %v12540_v54  ;;  %v12607_v54 = vld [vmem:[#allocation42 + $0x1e4] ss:$12 sps:$4 sm:$0xff]  }
 0x8cb   :  { %8268 = vmatprep.subr.bf16.mxu1 %v12547_v51  ;;  %v12605_v51 = vld [vmem:[#allocation42 + $0x1e0] ss:$12 sps:$4 sm:$0xff]  }
 0x8ce   :  { %8269 = vmatpush2.bf16.msra.mxu1 %v12545_v16  ;;  %v12613_v16 = vld [vmem:[#allocation42 + $0x1cc] ss:$12 sps:$4 sm:$0xff]  }
 0x8cf   :  { %8270 = vmatprep.subr.bf16.mxu1 %v12552_v14  ;;  %v12611_v14 = vld [vmem:[#allocation42 + $0x1c8] ss:$12 sps:$4 sm:$0xff]  }
 0x8d2   :  { %8271 = vmatpush2.bf16.msra.mxu1 %v12550_v37  ;;  %v12619_v37 = vld [vmem:[#allocation42 + $0x1b4] ss:$12 sps:$4 sm:$0xff]  }
 0x8d3   :  { %8272 = vmatprep.subr.bf16.mxu1 %v12557_v33  ;;  %v12617_v33 = vld [vmem:[#allocation42 + $0x1b0] ss:$12 sps:$4 sm:$0xff]  }
 0x8d6   :  { %8273 = vmatpush2.bf16.msra.mxu1 %v12555_v19  ;;  %v12578_v19 = vld [vmem:[#allocation42 + $0x18] ss:$12 sps:$4 sm:$0xff]  }
 0x8d7   :  { %8864 = vmatprep.subr.bf16.mxu1 %v12589_v55  ;;  %v12586_v55 = vld [vmem:[#allocation42 + $0x16c] ss:$12 sps:$4 sm:$0xff]  }
 0x959   :  { %v7845_v7 = vpop.f32.mrf.mxu1 }
 0x95a   :  { %v7846_v41 = vadd.f32 %v7845_v7, %v7484_v8  ;;  %v7886_v12 = vpop.f32.mrf.mxu0  ;;  %v12592_v8 = vld [vmem:[#allocation42 + $0x154] ss:$12 sps:$4 sm:$0xff]   ;;  %v12598_v7 = vld [vmem:[#allocation42 + $0x13c] ss:$12 sps:$4 sm:$0xff]  }
 0x95b   :  { %v7847_v56 = vpop.f32.mrf.mxu1 }
 0x95c   :  { %v7887_v6 = vadd.f32 %v7886_v12, %v7846_v41  ;;  %v7848_v45 = vadd.f32 %v7847_v56, %v7488_v34  ;;  %v7888_v31 = vpop.f32.mrf.mxu0  ;;  %v12590_v34 = vld [vmem:[#allocation42 + $0x150] ss:$12 sps:$4 sm:$0xff]   ;;  %v12596_v41 = vld [vmem:[#allocation42 + $0x138] ss:$12 sps:$4 sm:$0xff]   ;;  %v12602_v56 = vld [vmem:[#allocation42 + $0x120] ss:$12 sps:$4 sm:$0xff]  }
 0x95d   :  { %v7849_v40 = vpop.f32.mrf.mxu1  ;;  %v12604_v12 = vld [vmem:[#allocation42 + $0x124] ss:$12 sps:$4 sm:$0xff]  }
 0x95e   :  { %v7895_v46 = vmul.f32 1.442695, %v7887_v6  ;;  %v7889_v63 = vadd.f32 %v7888_v31, %v7848_v45  ;;  %v7890_v20 = vpop.f32.mrf.mxu0  ;;  %vm7893_vm8 = vcmp.gt.f32.partialorder %v7887_v6, 0.0  ;;  %v12608_v45 = vld [vmem:[#allocation42 + $0x108] ss:$12 sps:$4 sm:$0xff]  }
 0x95f   :  { %v7850_v52 = vpop.f32.mrf.mxu1  ;;  %v12616_v31 = vld [vmem:[#allocation42 + $0xf4] ss:$12 sps:$4 sm:$0xff]   ;;  %v12614_v40 = vld [vmem:[#allocation42 + $0xf0] ss:$12 sps:$4 sm:$0xff]   ;;  %v12623_v20 = vld [vmem:[#allocation42 + $0x198] ss:$12 sps:$4 sm:$0xff]  }
 0x960   :  { %12818 = vpow2.f32 %v7895_v46  ;;  %v7897_v50 = vmul.f32 1.442695, %v7889_v63  ;;  %v7891_v43 = vpop.f32.mrf.mxu0  ;;  %vm7894_vm9 = vcmp.gt.f32.partialorder %v7889_v63, 0.0  ;;  %v12622_v46 = vld [vmem:[#allocation42 + $0xdc] ss:$12 sps:$4 sm:$0xff]  }
 0x961   :  { %v12625_v52 = vld [vmem:[#allocation42 + $0x19c] ss:$12 sps:$4 sm:$0xff]   ;;  %v12628_v43 = vld [vmem:[#allocation42 + $0xc4] ss:$12 sps:$4 sm:$0xff]  }
 0x962   :  { %12820 = vpow2.f32 %v7897_v50  ;;  %v12626_v50 = vld [vmem:[#allocation42 + $0xc0] ss:$12 sps:$4 sm:$0xff]  }
 0x96d   :  { %v12819_v60 = vpop.eup %12818 }
 0x96e   :  { %v10872_v36 = vadd.f32 -1.0, %v12819_v60  ;;  %v12629_v60 = vld [vmem:[#allocation42 + $0x180] ss:$12 sps:$4 sm:$0xff]  }
 0x96f   :  { %v12821_v22 = vpop.eup %12820 }
 0x970   :  { %v10873_v47 = vadd.f32 -1.0, %v12821_v22  ;;  %v7901_v58 = vsel %vm7893_vm8, %v7887_v6, %v10872_v36  ;;  %v12610_v6 = vld [vmem:[#allocation42 + $0x10c] ss:$12 sps:$4 sm:$0xff]   ;;  %v12631_v36 = vld [vmem:[#allocation42 + $0x184] ss:$12 sps:$4 sm:$0xff]  }
 0x971   :  { %v7903_v2 = vpack.c.bf16 %v7901_v58, %v7901_v58  ;;  %v12632_v22 = vld [vmem:[#allocation42 + $0x170] ss:$12 sps:$4 sm:$0xff]  }
 0x972   :  { %v7902_v0 = vsel %vm7894_vm9, %v7889_v63, %v10873_v47  ;;  %v12620_v63 = vld [vmem:[#allocation42 + $0xd8] ss:$12 sps:$4 sm:$0xff]   ;;  %v7969_v47 = vld [vmem:[#allocation40] sm:$0x7] }
 0x973   :  { %v7904_v57 = vpack.c.bf16 %v7902_v0, %v7902_v0  ;;  %v7974_v58 = vrot.slane %v7969_v47, %v13870_v30  ;;  %v7978_v0 = vrot.slane %v7969_v47, %v13873_v32 }
 0x975   :  { %8274 = vmatprep.mubr.bf16.mxu1 %v7904_v57  ;;  %8315 = vmatprep.mubr.bf16.mxu0 %v7904_v57 }
 0x976   :  { %8275 = vmatmul.mubr.bf16.vlgmr.msra.gmra.mxu1 %v7903_v2  ;;  %8316 = vmatmul.mubr.bf16.vlgmr.msra.gmra.mxu0 %v7903_v2 }
 0x977   :  { %8824 = vmatpush1.bf16.msra.mxu0 %v12560_v5  ;;  %8865 = vmatpush1.bf16.msra.mxu1 %v12587_v62  ;;  %v7982_v62 = vrot.slane %v7969_v47, %v13878_v38  ;;  %v12668_v47 = vld [vmem:[#allocation45 + $0x214] ss:$12 sps:$4 sm:$0xff]  }
 0x978   :  { %8825 = vmatprep.subr.bf16.mxu0 %v12565_v39  ;;  %8866 = vmatprep.subr.bf16.mxu1 %v12595_v59 }
 0x979   :  { %8896 = vmatprep.mubr.bf16.mxu1 %v13597_v4 }
 0x97b   :  { %8826 = vmatpush1.bf16.msra.mxu0 %v12563_v1  ;;  %8867 = vmatpush1.bf16.msra.mxu1 %v12593_v27 }
 0x97c   :  { %8827 = vmatprep.subr.bf16.mxu0 %v12568_v13  ;;  %8868 = vmatprep.subr.bf16.mxu1 %v12601_v48 }
 0x97f   :  { %8828 = vmatpush1.bf16.msra.mxu0 %v12566_v11  ;;  %8869 = vmatpush1.bf16.msra.mxu1 %v12599_v44 }
 0x980   :  { %8829 = vmatprep.subr.bf16.mxu0 %v12571_v18  ;;  %8870 = vmatprep.subr.bf16.mxu1 %v12607_v54  ;;  %v12633_v18 = vld [vmem:[#allocation42 + $0x230] ss:$12 sps:$4 sm:$0xff]  }
 0x983   :  { %8830 = vmatpush1.bf16.msra.mxu0 %v12569_v49  ;;  %8871 = vmatpush1.bf16.msra.mxu1 %v12605_v51 }
 0x984   :  { %8831 = vmatprep.subr.bf16.mxu0 %v12574_v25  ;;  %8872 = vmatprep.subr.bf16.mxu1 %v12613_v16  ;;  %v12634_v25 = vld [vmem:[#allocation42 + $0xb0] ss:$12 sps:$4 sm:$0xff]  }
 0x987   :  { %8832 = vmatpush1.bf16.msra.mxu0 %v12572_v29  ;;  %8873 = vmatpush1.bf16.msra.mxu1 %v12611_v14  ;;  %v12635_v29 = vld [vmem:[#allocation42 + $0x158] ss:$12 sps:$4 sm:$0xff]  }
 0x988   :  { %8833 = vmatprep.subr.bf16.mxu0 %v12577_v10  ;;  %8874 = vmatprep.subr.bf16.mxu1 %v12619_v37  ;;  %v12636_v14 = vld [vmem:[#allocation42 + $0x218] ss:$12 sps:$4 sm:$0xff]   ;;  %v12638_v37 = vld [vmem:[#allocation42 + $0x140] ss:$12 sps:$4 sm:$0xff]  }
 0x989   :  { %v12637_v10 = vld [vmem:[#allocation42 + $0x98] ss:$12 sps:$4 sm:$0xff]  }
 0x98b   :  { %8834 = vmatpush1.bf16.msra.mxu0 %v12575_v42  ;;  %8875 = vmatpush1.bf16.msra.mxu1 %v12617_v33  ;;  %v12639_v42 = vld [vmem:[#allocation42 + $0x200] ss:$12 sps:$4 sm:$0xff]  }
 0x98c   :  { %8835 = vmatprep.subr.bf16.mxu0 %v12580_v61  ;;  %8876 = vmatprep.subr.bf16.mxu1 %v12625_v52  ;;  %v12640_v33 = vld [vmem:[#allocation42 + $0x80] ss:$12 sps:$4 sm:$0xff]   ;;  %v12641_v61 = vld [vmem:[#allocation42 + $0x128] ss:$12 sps:$4 sm:$0xff]  }
 0x98f   :  { %8836 = vmatpush1.bf16.msra.mxu0 %v12578_v19  ;;  %8877 = vmatpush1.bf16.msra.mxu1 %v12623_v20  ;;  %v12642_v19 = vld [vmem:[#allocation42 + $0x1e8] ss:$12 sps:$4 sm:$0xff]  }
 0x990   :  { %8837 = vmatprep.subr.bf16.mxu0 %v12583_v3  ;;  %8878 = vmatprep.subr.bf16.mxu1 %v12631_v36  ;;  %v12643_v3 = vld [vmem:[#allocation42 + $0x68] ss:$12 sps:$4 sm:$0xff]   ;;  %v8985_v36 = vpack.c.bf16 %v14070_v9, %v14061_v53  ;;  %v12675_v53 = vld [vmem:[#allocation45 + $0x78] ss:$12 sps:$4 sm:$0xff]  }
 0x991   :  { %v12680_v9 = vld [vmem:[#allocation45 + $0x1e4] ss:$12 sps:$4 sm:$0xff]  }
 0x993   :  { %8838 = vmatpush1.bf16.msra.mxu0 %v12581_v24  ;;  %8879 = vmatpush1.bf16.msra.mxu1 %v12629_v60  ;;  %v12644_v24 = vld [vmem:[#allocation42 + $0x110] ss:$12 sps:$4 sm:$0xff]   ;;  %v12660_v60 = vld [vmem:[#allocation45 + $0x228] ss:$12 sps:$4 sm:$0xff]  }
 0x994   :  { %8839 = vmatprep.subr.bf16.mxu0 %v12586_v55  ;;  %11136 = vmatprep.subr.bf16.mxu1 %v12632_v22  ;;  %v12645_v55 = vld [vmem:[#allocation42 + $0x1d0] ss:$12 sps:$4 sm:$0xff]   ;;  %v12663_v22 = vld [vmem:[#allocation45 + $0xa8] ss:$12 sps:$4 sm:$0xff]  }
 0x997   :  { %8840 = vmatpush2.bf16.msra.mxu0 %v12584_v35  ;;  %v12646_v35 = vld [vmem:[#allocation42 + $0x50] ss:$12 sps:$4 sm:$0xff]  }
 0x998   :  { %8841 = vmatprep.subr.bf16.mxu0 %v12592_v8  ;;  %v12647_v8 = vld [vmem:[#allocation42 + $0xf8] ss:$12 sps:$4 sm:$0xff]  }
 0x99b   :  { %8842 = vmatpush2.bf16.msra.mxu0 %v12590_v34  ;;  %v12648_v34 = vld [vmem:[#allocation42 + $0x1b8] ss:$12 sps:$4 sm:$0xff]  }
 0x99c   :  { %8843 = vmatprep.subr.bf16.mxu0 %v12598_v7  ;;  %v12649_v7 = vld [vmem:[#allocation42 + $0x38] ss:$12 sps:$4 sm:$0xff]  }
 0x99f   :  { %8844 = vmatpush2.bf16.msra.mxu0 %v12596_v41  ;;  %v12650_v41 = vld [vmem:[#allocation42 + $0xe0] ss:$12 sps:$4 sm:$0xff]  }
 0x9a0   :  { %8845 = vmatprep.subr.bf16.mxu0 %v12604_v12  ;;  %v12651_v12 = vld [vmem:[#allocation42 + $0x1a0] ss:$12 sps:$4 sm:$0xff]  }
 0x9a3   :  { %8846 = vmatpush2.bf16.msra.mxu0 %v12602_v56  ;;  %v12652_v56 = vld [vmem:[#allocation42 + $0x20] ss:$12 sps:$4 sm:$0xff]  }
 0x9a4   :  { %8847 = vmatprep.subr.bf16.mxu0 %v12610_v6  ;;  %v12653_v6 = vld [vmem:[#allocation42 + $0xc8] ss:$12 sps:$4 sm:$0xff]  }
 0x9a7   :  { %8848 = vmatpush2.bf16.msra.mxu0 %v12608_v45  ;;  %v12654_v45 = vld [vmem:[#allocation42 + $0x188] ss:$12 sps:$4 sm:$0xff]  }
 0x9a8   :  { %8849 = vmatprep.subr.bf16.mxu0 %v12616_v31  ;;  %v12655_v31 = vld [vmem:[#allocation42 + $0x8] ss:$12 sps:$4 sm:$0xff]  }
 0x9ab   :  { %8850 = vmatpush2.bf16.msra.mxu0 %v12614_v40  ;;  %v12656_v40 = vld [vmem:[#allocation43 + $0x4] ss:$12 sps:$4 sm:$0x3f]  }
 0x9ac   :  { %8851 = vmatprep.subr.bf16.mxu0 %v12622_v46  ;;  %v12659_v46 = vld [vmem:[#allocation43 + $0x8] ss:$12 sps:$4 sm:$0x3f]  }
 0x9ad   :  { %v9015_v20 = vsel %vm9007_vm10, %v12659_v46, 0  ;;  %v12729_v46 = vld [vmem:[#allocation45 + $0x108] ss:$12 sps:$4 sm:$0xff]  }
 0x9af   :  { %8852 = vmatpush2.bf16.msra.mxu0 %v12620_v63  ;;  %v12658_v63 = vld [vmem:[#allocation43] ss:$12 sps:$4 sm:$0x3f]  }
 0x9b0   :  { %8853 = vmatprep.subr.bf16.mxu0 %v12628_v43  ;;  %v9009_v52 = vsel %vm9007_vm10, %v12658_v63, 0  ;;  %v12665_v43 = vld [vmem:[#allocation45 + $0xac] ss:$12 sps:$4 sm:$0xff]  }
 0x9b1   :  { %v12733_v63 = vld [vmem:[#allocation45 + $0xf8] ss:$12 sps:$4 sm:$0xff]  }
 0x9b3   :  { %8854 = vmatpush2.bf16.msra.mxu0 %v12626_v50  ;;  %v12662_v50 = vld [vmem:[#allocation45 + $0x22c] ss:$12 sps:$4 sm:$0xff]  }
 0x9b4   :  { %11228 = vmatprep.subr.bf16.mxu0 %v13598_v17 }
 0xa36   :  { %v8276_v57 = vpop.f32.mrf.mxu1  ;;  %v11130_v5 = vpop.f32.mrf.mxu0 }
 0xa37   :  { %v8277_v2 = vadd.f32 %v8276_v57, %v7974_v58  ;;  %v12671_v58 = vld [vmem:[#allocation45 + $0x94] ss:$12 sps:$4 sm:$0xff]   ;;  %v12669_v57 = vld [vmem:[#allocation45 + $0x90] ss:$12 sps:$4 sm:$0xff]  }
 0xa38   :  { %v8278_v39 = vpop.f32.mrf.mxu1  ;;  %v11131_v59 = vpop.f32.mrf.mxu0 }
 0xa39   :  { %v8279_v1 = vadd.f32 %v8278_v39, %v7978_v0  ;;  %v11132_v27 = vadd.f32 %v11131_v59, %v11130_v5  ;;  %v14468_v54 = vpack.c.bf16 %v8277_v2, %v8277_v2  ;;  %v12666_v0 = vld [vmem:[#allocation45 + $0x210] ss:$12 sps:$4 sm:$0xff]   ;;  %v12672_v2 = vld [vmem:[#allocation45 + $0x1f8] ss:$12 sps:$4 sm:$0xff]   ;;  %v12678_v59 = vld [vmem:[#allocation45 + $0x1e0] ss:$12 sps:$4 sm:$0xff]  }
 0xa3a   :  { %v8280_v13 = vpop.f32.mrf.mxu1  ;;  %v11133_v48 = vpop.f32.mrf.mxu0  ;;  %v12674_v5 = vld [vmem:[#allocation45 + $0x1fc] ss:$12 sps:$4 sm:$0xff]   ;;  %v12683_v39 = vld [vmem:[#allocation45 + $0x64] ss:$12 sps:$4 sm:$0xff]  }
 0xa3b   :  { %v8324_v11 = vpack.c.bf16 %v8279_v1, %v8279_v1  ;;  %v8318_v44 = vadd.f32 %v11132_v27, %v7982_v62  ;;  %v12677_v62 = vld [vmem:[#allocation45 + $0x7c] ss:$12 sps:$4 sm:$0xff]   ;;  %v12681_v1 = vld [vmem:[#allocation45 + $0x60] ss:$12 sps:$4 sm:$0xff]  }
 0xa3c   :  { %v8281_v49 = vpop.f32.mrf.mxu1  ;;  %v11134_v51 = vpop.f32.mrf.mxu0  ;;  %v12686_v27 = vld [vmem:[#allocation45 + $0x1cc] ss:$12 sps:$4 sm:$0xff]   ;;  %v12684_v48 = vld [vmem:[#allocation45 + $0x1c8] ss:$12 sps:$4 sm:$0xff]  }
 0xa3d   :  { %v14470_v16 = vpack.c.bf16 %v8318_v44, %v8318_v44  ;;  %8855 = vmatprep.mubr.bf16.mxu0 %v8324_v11  ;;  %v12689_v13 = vld [vmem:[#allocation45 + $0x4c] ss:$12 sps:$4 sm:$0xff]   ;;  %v12695_v44 = vld [vmem:[#allocation45 + $0x34] ss:$12 sps:$4 sm:$0xff]   ;;  %v12698_v49 = vld [vmem:[#allocation45 + $0x19c] ss:$12 sps:$4 sm:$0xff]  }
 0xa3e   :  { %8856 = vmatmul.mubr.bf16.vlgmr.msra.gmra.mxu0 %v14468_v54  ;;  %v12701_v51 = vld [vmem:[#allocation45 + $0x1c] ss:$12 sps:$4 sm:$0xff]  }
 0xa3f   :  { %11229 = vmatpush3.bf16.msra.mxu0 %v12633_v18  ;;  %8897 = vmatmul.mubr.bf16.vlgmr.msra.gmra.mxu1 %v14470_v16  ;;  %v12690_v18 = vld [vmem:[#allocation45 + $0x1b0] ss:$12 sps:$4 sm:$0xff]  }
 0xa40   :  { %11137 = vmatpush3.bf16.msra.mxu1 %v12634_v25  ;;  %8937 = vmatprep.mubr.bf16.mxu1 %v8324_v11  ;;  %v12692_v11 = vld [vmem:[#allocation45 + $0x1b4] ss:$12 sps:$4 sm:$0xff]   ;;  %v12696_v25 = vld [vmem:[#allocation45 + $0x198] ss:$12 sps:$4 sm:$0xff]  }
 0xa41   :  { %11230 = vmatprep.subr.bf16.mxu0 %v13598_v17  ;;  %11138 = vmatprep.subr.bf16.mxu1 %v12635_v29  ;;  %v12704_v29 = vld [vmem:[#allocation45 + $0x184] ss:$12 sps:$4 sm:$0xff]  }
 0xa42   :  { %11244 = vmatprep.mubr.msk.bf16.mxu0 %vm13599_vm2, %v13598_v17 }
 0xa43   :  { %11231 = vmatpush3.bf16.msra.mxu0 %v12636_v14  ;;  %v12707_v14 = vld [vmem:[#allocation45 + $0x4] ss:$12 sps:$4 sm:$0xff]  }
 0xa44   :  { %11139 = vmatpush3.bf16.msra.mxu1 %v12637_v10  ;;  %11232 = vmatprep.subr.bf16.mxu0 %v13598_v17  ;;  %v12702_v10 = vld [vmem:[#allocation45 + $0x180] ss:$12 sps:$4 sm:$0xff]  }
 0xa45   :  { %11140 = vmatprep.subr.bf16.mxu1 %v12638_v37  ;;  %v12705_v37 = vld [vmem:[#allocation45] ss:$12 sps:$4 sm:$0xff]  }
 0xa47   :  { %11233 = vmatpush3.bf16.msra.mxu0 %v12639_v42  ;;  %v12708_v42 = vld [vmem:[#allocation45 + $0x170] ss:$12 sps:$4 sm:$0xff]  }
 0xa48   :  { %11141 = vmatpush3.bf16.msra.mxu1 %v12640_v33  ;;  %11234 = vmatprep.subr.bf16.mxu0 %v13598_v17  ;;  %v12711_v33 = vld [vmem:[#allocation45 + $0x16c] ss:$12 sps:$4 sm:$0xff]  }
 0xa49   :  { %11142 = vmatprep.subr.bf16.mxu1 %v12641_v61  ;;  %v12712_v61 = vld [vmem:[#allocation45 + $0xb0] ss:$12 sps:$4 sm:$0xff]  }
 0xa4b   :  { %11235 = vmatpush3.bf16.msra.mxu0 %v12642_v19  ;;  %v12709_v19 = vld [vmem:[#allocation45 + $0x168] ss:$12 sps:$4 sm:$0xff]  }
 0xa4c   :  { %11143 = vmatpush3.bf16.msra.mxu1 %v12643_v3  ;;  %11236 = vmatprep.subr.bf16.mxu0 %v13598_v17  ;;  %v12713_v3 = vld [vmem:[#allocation45 + $0x158] ss:$12 sps:$4 sm:$0xff]  }
 0xa4d   :  { %11144 = vmatprep.subr.bf16.mxu1 %v12644_v24  ;;  %v12716_v24 = vld [vmem:[#allocation45 + $0x154] ss:$12 sps:$4 sm:$0xff]  }
 0xa4f   :  { %11237 = vmatpush3.bf16.msra.mxu0 %v12645_v55  ;;  %v12717_v55 = vld [vmem:[#allocation45 + $0x98] ss:$12 sps:$4 sm:$0xff]  }
 0xa50   :  { %11145 = vmatpush3.bf16.msra.mxu1 %v12646_v35  ;;  %11238 = vmatprep.subr.bf16.mxu0 %v13598_v17  ;;  %v12714_v35 = vld [vmem:[#allocation45 + $0x150] ss:$12 sps:$4 sm:$0xff]  }
 0xa51   :  { %11146 = vmatprep.subr.bf16.mxu1 %v12647_v8  ;;  %v12718_v8 = vld [vmem:[#allocation45 + $0x140] ss:$12 sps:$4 sm:$0xff]  }
 0xa53   :  { %11239 = vmatpush3.bf16.msra.mxu0 %v12648_v34  ;;  %v12721_v34 = vld [vmem:[#allocation45 + $0x13c] ss:$12 sps:$4 sm:$0xff]  }
 0xa54   :  { %11147 = vmatpush3.bf16.msra.mxu1 %v12649_v7  ;;  %11240 = vmatprep.subr.bf16.mxu0 %v13598_v17  ;;  %v12722_v7 = vld [vmem:[#allocation45 + $0x80] ss:$12 sps:$4 sm:$0xff]  }
 0xa55   :  { %11148 = vmatprep.subr.bf16.mxu1 %v12650_v41  ;;  %v12719_v41 = vld [vmem:[#allocation45 + $0x138] ss:$12 sps:$4 sm:$0xff]  }
 0xa57   :  { %11241 = vmatpush3.bf16.msra.mxu0 %v12651_v12  ;;  %v12723_v12 = vld [vmem:[#allocation45 + $0x128] ss:$12 sps:$4 sm:$0xff]  }
 0xa58   :  { %11149 = vmatpush3.bf16.msra.mxu1 %v12652_v56  ;;  %11242 = vmatprep.subr.bf16.mxu0 %v13598_v17  ;;  %v12726_v56 = vld [vmem:[#allocation45 + $0x124] ss:$12 sps:$4 sm:$0xff]  }
 0xa59   :  { %11150 = vmatprep.subr.bf16.mxu1 %v12653_v6  ;;  %v12727_v6 = vld [vmem:[#allocation45 + $0x68] ss:$12 sps:$4 sm:$0xff]  }
 0xa5b   :  { %11243 = vmatpush3.bf16.msra.mxu0 %v12654_v45  ;;  %v12728_v45 = vld [vmem:[#allocation45 + $0x110] ss:$12 sps:$4 sm:$0xff]  }
 0xa5c   :  { %11151 = vmatpush3.bf16.msra.mxu1 %v12655_v31  ;;  %11248 = vmatprep.subr.bf16.mxu0 %v13598_v17  ;;  %v12731_v31 = vld [vmem:[#allocation45 + $0x10c] ss:$12 sps:$4 sm:$0xff]  }
 0xa5d   :  { %10997 = vmatprep.subr.msk.bf16.mxu1 %vm9007_vm10, %v12656_v40  ;;  %v12732_v40 = vld [vmem:[#allocation45 + $0x50] ss:$12 sps:$4 sm:$0xff]  }
 0xa5e   :  { %11245 = vmatmul.mubr.bf16.vlgmr.msra.gmra.mxu0 %v14470_v16  ;;  %v12699_v16 = vld [vmem:[#allocation45 + $0x18] ss:$12 sps:$4 sm:$0xff]  }
 0xa5f   :  { %8938 = vmatmul.mubr.bf16.vlgmr.msra.gmra.mxu1 %v14468_v54  ;;  %11249 = vmatpush3.bf16.msra.mxu0 %v9015_v20  ;;  %v12693_v54 = vld [vmem:[#allocation45 + $0x30] ss:$12 sps:$4 sm:$0xff]   ;;  %v12736_v20 = vld [vmem:[#allocation45 + $0xf4] ss:$12 sps:$4 sm:$0xff]  }
 0xa60   :  { %9032 = vmatpush1.bf16.msra.mxu1 %v9009_v52  ;;  %11250 = vmatprep.mubr.msk.bf16.mxu0 %vm13599_vm2, %v13598_v17  ;;  %v12737_v52 = vld [vmem:[#allocation45 + $0x38] ss:$12 sps:$4 sm:$0xff]  }
 0xa61   :  { %9627 = vmatprep.subr.bf16.mxu0 %v12662_v50  ;;  %9049 = vmatprep.mubr.bf16.mxu1 %v13597_v4  ;;  %v12734_v50 = vld [vmem:[#allocation45 + $0xf0] ss:$12 sps:$4 sm:$0xff]  }
 0xa62   :  { %9584 = vmatprep.subr.bf16.mxu1 %v12665_v43  ;;  %v12738_v43 = vld [vmem:[#allocation45 + $0xe0] ss:$12 sps:$4 sm:$0xff]  }
 0xa66   :  { %11251 = vmatmul.mubr.msk.bf16.vlgmr.msra.gmra.mxu0 %vm9003_vm11, %v8985_v36 }
 0xa67   :  { %9628 = vmatpush1.bf16.msra.mxu0 %v12660_v60  ;;  %10998 = vmatmul.mubr.msk.bf16.vlgmr.msra.gmra.mxu1 %vm9003_vm11, %v8985_v36  ;;  %v12741_v60 = vld [vmem:[#allocation45 + $0xdc] ss:$12 sps:$4 sm:$0xff]   ;;  %v12742_v36 = vld [vmem:[#allocation45 + $0x20] ss:$12 sps:$4 sm:$0xff]  }
 0xa68   :  { %9585 = vmatpush1.bf16.msra.mxu1 %v12663_v22  ;;  %9616 = vmatprep.mubr.bf16.mxu1 %v14051_v28  ;;  %v12739_v22 = vld [vmem:[#allocation45 + $0xd8] ss:$12 sps:$4 sm:$0xff]  }
 0xa69   :  { %9629 = vmatprep.subr.bf16.mxu0 %v12668_v47  ;;  %9586 = vmatprep.subr.bf16.mxu1 %v12671_v58  ;;  %v12743_v47 = vld [vmem:[#allocation45 + $0xc8] ss:$12 sps:$4 sm:$0xff]   ;;  %v12746_v58 = vld [vmem:[#allocation45 + $0xc4] ss:$12 sps:$4 sm:$0xff]  }
 0xa6a   :  { %9659 = vmatprep.mubr.bf16.mxu0 %v13597_v4  ;;  %v12687_v4 = vld [vmem:[#allocation45 + $0x48] ss:$12 sps:$4 sm:$0xff]  }
 0xa6b   :  { %9630 = vmatpush1.bf16.msra.mxu0 %v12666_v0  ;;  %v12747_v0 = vld [vmem:[#allocation45 + $0x8] ss:$12 sps:$4 sm:$0xff]  }
 0xa6c   :  { %9587 = vmatpush1.bf16.msra.mxu1 %v12669_v57  ;;  %9631 = vmatprep.subr.bf16.mxu0 %v12674_v5  ;;  %v12744_v57 = vld [vmem:[#allocation45 + $0xc0] ss:$12 sps:$4 sm:$0xff]   ;;  %v12748_v5 = vld [vmem:[#allocation45 + $0x230] ss:$12 sps:$4 sm:$0xff]  }
 0xa6d   :  { %9588 = vmatprep.subr.bf16.mxu1 %v12677_v62  ;;  %v12749_v62 = vld [vmem:[#allocation45 + $0x218] ss:$12 sps:$4 sm:$0xff]  }
 0xa6f   :  { %9632 = vmatpush1.bf16.msra.mxu0 %v12672_v2  ;;  %v12750_v2 = vld [vmem:[#allocation45 + $0x200] ss:$12 sps:$4 sm:$0xff]  }
 0xa70   :  { %9589 = vmatpush1.bf16.msra.mxu1 %v12675_v53  ;;  %9633 = vmatprep.subr.bf16.mxu0 %v12680_v9  ;;  %v12751_v53 = vld [vmem:[#allocation45 + $0x1e8] ss:$12 sps:$4 sm:$0xff]   ;;  %v12752_v9 = vld [vmem:[#allocation45 + $0x1d0] ss:$12 sps:$4 sm:$0xff]  }
 0xa71   :  { %9590 = vmatprep.subr.bf16.mxu1 %v12683_v39  ;;  %v12754_v39 = vld [vmem:[#allocation45 + $0x1a0] ss:$12 sps:$4 sm:$0xff]  }
 0xa73   :  { %9634 = vmatpush1.bf16.msra.mxu0 %v12678_v59  ;;  %v12755_v59 = vld [vmem:[#allocation45 + $0x188] ss:$12 sps:$4 sm:$0xff]  }
 0xa74   :  { %9591 = vmatpush1.bf16.msra.mxu1 %v12681_v1  ;;  %9635 = vmatprep.subr.bf16.mxu0 %v12686_v27  ;;  %v8422_v1 = vld [vmem:[#allocation46] sm:$0x7] }
 0xa75   :  { %9592 = vmatprep.subr.bf16.mxu1 %v12689_v13  ;;  %v8427_v27 = vrot.slane %v8422_v1, %v13870_v30  ;;  %v8431_v13 = vrot.slane %v8422_v1, %v13873_v32 }
 0xa77   :  { %9636 = vmatpush1.bf16.msra.mxu0 %v12684_v48 }
 0xa78   :  { %9593 = vmatpush1.bf16.msra.mxu1 %v12687_v4  ;;  %9637 = vmatprep.subr.bf16.mxu0 %v12692_v11 }
 0xa79   :  { %9594 = vmatprep.subr.bf16.mxu1 %v12695_v44 }
 0xa7b   :  { %9638 = vmatpush1.bf16.msra.mxu0 %v12690_v18 }
 0xa7c   :  { %9595 = vmatpush1.bf16.msra.mxu1 %v12693_v54  ;;  %9639 = vmatprep.subr.bf16.mxu0 %v12698_v49 }
 0xa7d   :  { %9596 = vmatprep.subr.bf16.mxu1 %v12701_v51 }
 0xa7f   :  { %9640 = vmatpush1.bf16.msra.mxu0 %v12696_v25 }
 0xa80   :  { %9597 = vmatpush1.bf16.msra.mxu1 %v12699_v16  ;;  %9641 = vmatprep.subr.bf16.mxu0 %v12704_v29 }
 0xa81   :  { %9598 = vmatprep.subr.bf16.mxu1 %v12707_v14 }
 0xa83   :  { %9642 = vmatpush1.bf16.msra.mxu0 %v12702_v10  ;;  %v13611_v10 = vmov 1966171168  }
 0xa84   :  { %9599 = vmatpush1.bf16.msra.mxu1 %v12705_v37  ;;  %11169 = vmatprep.subr.bf16.mxu0 %v12708_v42 }
 0xa85   :  { %9600 = vmatprep.subr.bf16.mxu1 %v12711_v33 }
 0xa86   :  { %9660 = vmatmul.mubr.bf16.vlgmr.msra.gmra.mxu0 %v14074_v15 }
 0xa87   :  { %11170 = vmatpush3.bf16.msra.mxu0 %v12712_v61  ;;  %9702 = vmatprep.mubr.bf16.mxu0 %v14051_v28  ;;  %v12724_v28 = vld [vmem:[#allocation45 + $0x120] ss:$12 sps:$4 sm:$0xff]  }
 0xa88   :  { %9601 = vmatpush2.bf16.msra.mxu1 %v12709_v19  ;;  %11171 = vmatprep.subr.bf16.mxu0 %v12713_v3  ;;  %v8435_v19 = vrot.slane %v8422_v1, %v13878_v38 }
 0xa89   :  { %9602 = vmatprep.subr.bf16.mxu1 %v12716_v24 }
 0xa8b   :  { %11172 = vmatpush3.bf16.msra.mxu0 %v12717_v55 }
 0xa8c   :  { %9603 = vmatpush2.bf16.msra.mxu1 %v12714_v35  ;;  %11173 = vmatprep.subr.bf16.mxu0 %v12718_v8 }
 0xa8d   :  { %9604 = vmatprep.subr.bf16.mxu1 %v12721_v34 }
 0xa8f   :  { %11174 = vmatpush3.bf16.msra.mxu0 %v12722_v7 }
 0xa90   :  { %9605 = vmatpush2.bf16.msra.mxu1 %v12719_v41  ;;  %11175 = vmatprep.subr.bf16.mxu0 %v12723_v12 }
 0xa91   :  { %9606 = vmatprep.subr.bf16.mxu1 %v12726_v56 }
 0xa93   :  { %11176 = vmatpush3.bf16.msra.mxu0 %v12727_v6 }
 0xa94   :  { %9607 = vmatpush2.bf16.msra.mxu1 %v12724_v28  ;;  %11177 = vmatprep.subr.bf16.mxu0 %v12728_v45 }
 0xa95   :  { %9608 = vmatprep.subr.bf16.mxu1 %v12731_v31 }
 0xa97   :  { %11178 = vmatpush3.bf16.msra.mxu0 %v12732_v40 }
 0xa98   :  { %9609 = vmatpush2.bf16.msra.mxu1 %v12729_v46  ;;  %11179 = vmatprep.subr.bf16.mxu0 %v12733_v63 }
 0xa99   :  { %9610 = vmatprep.subr.bf16.mxu1 %v12736_v20 }
 0xa9b   :  { %11180 = vmatpush3.bf16.msra.mxu0 %v12737_v52 }
 0xa9c   :  { %9611 = vmatpush2.bf16.msra.mxu1 %v12734_v50  ;;  %11181 = vmatprep.subr.bf16.mxu0 %v12738_v43 }
 0xa9d   :  { %9612 = vmatprep.subr.bf16.mxu1 %v12741_v60 }
 0xa9f   :  { %11182 = vmatpush3.bf16.msra.mxu0 %v12742_v36 }
 0xaa0   :  { %9613 = vmatpush2.bf16.msra.mxu1 %v12739_v22  ;;  %11183 = vmatprep.subr.bf16.mxu0 %v12743_v47 }
 0xaa1   :  { %9614 = vmatprep.subr.bf16.mxu1 %v12746_v58 }
 0xaa3   :  { %11184 = vmatpush3.bf16.msra.mxu0 %v12747_v0 }
 0xaa4   :  { %9615 = vmatpush2.bf16.msra.mxu1 %v12744_v57 }
 0xaa5   :  { %11254 = vmatprep.subr.bf16.mxu1 %v13598_v17 }
 0xaa6   :  { %9703 = vmatmul.mubr.bf16.vlgmr.msra.gmra.mxu0 %v14046_v21 }
 0xaa7   :  { %9617 = vmatmul.mubr.bf16.vlgmr.msra.gmra.mxu1 %v14046_v21  ;;  %v12753_v21 = vld [vmem:[#allocation45 + $0x1b8] ss:$12 sps:$4 sm:$0xff]  }
 0xaa8   :  { %11255 = vmatpush3.bf16.msra.mxu1 %v12748_v5  ;;  %11270 = vmatprep.mubr.msk.bf16.mxu1 %vm13599_vm2, %v13598_v17 }
 0xaa9   :  { %11256 = vmatprep.subr.bf16.mxu1 %v13598_v17 }
 0xaac   :  { %11257 = vmatpush3.bf16.msra.mxu1 %v12749_v62 }
 0xaad   :  { %11258 = vmatprep.subr.bf16.mxu1 %v13598_v17 }
 0xab0   :  { %11259 = vmatpush3.bf16.msra.mxu1 %v12750_v2 }
 0xab1   :  { %11260 = vmatprep.subr.bf16.mxu1 %v13598_v17 }
 0xab4   :  { %11261 = vmatpush3.bf16.msra.mxu1 %v12751_v53 }
 0xab5   :  { %11262 = vmatprep.subr.bf16.mxu1 %v13598_v17 }
 0xab8   :  { %11263 = vmatpush3.bf16.msra.mxu1 %v12752_v9 }
 0xab9   :  { %11264 = vmatprep.subr.bf16.mxu1 %v13598_v17 }
 0xabc   :  { %11265 = vmatpush3.bf16.msra.mxu1 %v12753_v21 }
 0xabd   :  { %11266 = vmatprep.subr.bf16.mxu1 %v13598_v17 }
 0xac0   :  { %11267 = vmatpush3.bf16.msra.mxu1 %v12754_v39 }
 0xac1   :  { %11268 = vmatprep.subr.bf16.mxu1 %v13598_v17 }
 0xac4   :  { %11269 = vmatpush3.bf16.msra.mxu1 %v12755_v59 }
 0xac7   :  { %11271 = vmatmul.mubr.bf16.vlgmr.msra.gmra.mxu1 %v14074_v15  ;;  %v9757_v15 = vunpack.c.l.s4 %v13611_v10 }
 0xac9   :  { %v9758_v33 = vunpack.c.0.s8 %v9757_v15 }
 0xacb   :  { %v9761_v8 = vsub.s32 %v9758_v33, %v13867_v26 }
 0xafe   :  { %v8857_v48 = vpop.f32.mrf.mxu0 }
 0xaff   :  { %v8858_v4 = vadd.f32 %v8857_v48, %v8427_v27  ;;  %v8898_v11 = vpop.f32.mrf.mxu1 }
 0xb00   :  { %v8859_v44 = vpop.f32.mrf.mxu0 }
 0xb01   :  { %v8899_v18 = vadd.f32 %v8898_v11, %v8858_v4  ;;  %v8860_v54 = vadd.f32 %v8859_v44, %v8431_v13  ;;  %v8900_v49 = vpop.f32.mrf.mxu1 }
 0xb02   :  { %v8861_v51 = vpop.f32.mrf.mxu0 }
 0xb03   :  { %v8901_v25 = vadd.f32 %v8900_v49, %v8860_v54  ;;  %v8902_v16 = vpop.f32.mrf.mxu1 }
 0xb04   :  { %v8862_v29 = vpop.f32.mrf.mxu0 }
 0xb05   :  { %v9755_v17 = vcombine.low %v8899_v18, %v8901_v25  ;;  %v8903_v14 = vpop.f32.mrf.mxu1 }
 0xb07   :  { %v9762_v6 = vrot.slane %v9755_v17, %v9761_v8 }
 0xb1e   :  { %v8979_v37 = vpop.f32.mrf.mxu0 }
 0xb1f   :  { %v11152_v42 = vpop.f32.mrf.mxu1 }
 0xb20   :  { %v11246_v61 = vpop.f32.mrf.mxu0 }
 0xb21   :  { %v11153_v3 = vpop.f32.mrf.mxu1 }
 0xb22   :  { %v11154_v24 = vadd.f32 %v11153_v3, %v11152_v42  ;;  %v8982_v55 = vpop.f32.mrf.mxu0 }
 0xb23   :  { %v11155_v35 = vpop.f32.mrf.mxu1 }
 0xb24   :  { %v8940_v34 = vadd.f32 %v11154_v24, %v8435_v19  ;;  %v11247_v7 = vpop.f32.mrf.mxu0 }
 0xb25   :  { %v11156_v41 = vpop.f32.mrf.mxu1 }
 0xb26   :  { %v8980_v12 = vadd.f32 %v8979_v37, %v8940_v34  ;;  %v9094_v56 = vpop.f32.mrf.mxu0 }
 0xb27   :  { %v9051_v22 = vpop.f32.mrf.mxu1 }
 0xb28   :  { %v9769_v28 = vrot.slane %v8980_v12, %v9761_v8  ;;  %v11252_v45 = vpop.f32.mrf.mxu0 }
 0xb29   :  { %v9053_v58 = vpop.f32.mrf.mxu1 }
 0xb2a   :  { %v9770_v31 = vcombine.low %v9762_v6, %v9769_v28  ;;  %v9771_v40 = vcombine.high %v9762_v6, %v9769_v28  ;;  %v9097_v46 = vpop.f32.mrf.mxu0 }
 0xb2b   :  { %v9055_v57 = vpop.f32.mrf.mxu1 }
 0xb2c   :  { %v9778_v63 = vrot.slane %v9770_v31, %v9761_v8  ;;  %v9785_v20 = vrot.slane %v9771_v40, %v9761_v8  ;;  %v11253_v52 = vpop.f32.mrf.mxu0 }
 0xb2d   :  { %v9057_v62 = vpop.f32.mrf.mxu1 }
 0xb2e   :  { %v9797_v50 = vrot.slane %v9778_v63, %v13878_v38  ;;  %v9809_v43 = vrot.slane %v9785_v20, %v13878_v38  ;;  %v9793_v1 = vrot.slane %v9778_v63, %v13873_v32  ;;  %v9789_v27 = vrot.slane %v9778_v63, %v13870_v30 }
 0xb2f   :  { %v9805_v18 = vrot.slane %v9785_v20, %v13873_v32  ;;  %v9801_v49 = vrot.slane %v9785_v20, %v13870_v30 }
 0xb30   :  { %v9818_v60 = vadd.f32 %v9797_v50, %v9094_v56  ;;  %v9821_v36 = vadd.f32 %v9809_v43, %v9097_v46  ;;  %v9817_v44 = vadd.f32 %v9793_v1, %v9053_v58  ;;  %v9816_v54 = vadd.f32 %v9789_v27, %v9051_v22 }
 0xb31   :  { %v9820_v10 = vadd.f32 %v9805_v18, %v9057_v62  ;;  %v9819_v42 = vadd.f32 %v9801_v49, %v9055_v57 }
 0xb46   :  { %v9661_v47 = vpop.f32.mrf.mxu0 }
 0xb48   :  { %v9663_v0 = vpop.f32.mrf.mxu0 }
 0xb4a   :  { %v9665_v5 = vpop.f32.mrf.mxu0 }
 0xb4c   :  { %v9667_v53 = vpop.f32.mrf.mxu0 }
 0xb66   :  { %v11185_v9 = vpop.f32.mrf.mxu0 }
 0xb67   :  { %v9618_v2 = vpop.f32.mrf.mxu1 }
 0xb68   :  { %v11186_v39 = vpop.f32.mrf.mxu0  ;;  %v9662_v4 = vadd.f32 %v9661_v47, %v9618_v2 }
 0xb69   :  { %v9620_v21 = vpop.f32.mrf.mxu1  ;;  %v11187_v51 = vadd.f32 %v11186_v39, %v11185_v9  ;;  %v9828_v39 = vld [vmem:[#allocation48] sm:$0x7] }
 0xb6a   :  { %v9664_v13 = vadd.f32 %v9663_v0, %v9620_v21  ;;  %v11188_v48 = vpop.f32.mrf.mxu0  ;;  %v9822_v17 = vadd.f32 %v9816_v54, %v9662_v4  ;;  %v9880_v1 = vrot.slane %v9828_v39, %v13870_v30  ;;  %v9884_v27 = vrot.slane %v9828_v39, %v13873_v32 }
 0xb6b   :  { %v9622_v59 = vpop.f32.mrf.mxu1 }
 0xb6c   :  { %v14518_v25 = vadd.f32 %v9817_v44, %v9664_v13  ;;  %v11189_v16 = vpop.f32.mrf.mxu0  ;;  %v9666_v15 = vadd.f32 %v9665_v5, %v9622_v59  ;;  %v9840_v8 = vmul.f32 %v9822_v17, %v9822_v17  ;;  %v9829_v59 = vld [vmem:[#allocation49] sm:$0x7] }
 0xb6d   :  { %v9624_v11 = vpop.f32.mrf.mxu1  ;;  %v11190_v33 = vadd.f32 %v11189_v16, %v11188_v48  ;;  %v9902_v18 = vrot.slane %v9829_v59, %v13870_v30  ;;  %v9906_v54 = vrot.slane %v9829_v59, %v13873_v32 }
 0xb6e   :  { %v9668_v29 = vadd.f32 %v9667_v53, %v9624_v11  ;;  %v9830_v24 = vadd.f32 %v14518_v25, %v9822_v17  ;;  %v9841_v55 = vmul.f32 %v14518_v25, %v14518_v25  ;;  %v9825_v34 = vadd.f32 %v9819_v42, %v9666_v15 }
 0xb6f   :  { %v9888_v11 = vrot.slane %v9828_v39, %v13878_v38 }
 0xb70   :  { %v14520_v19 = vadd.f32 %v9820_v10, %v9668_v29  ;;  %v9846_v45 = vadd.f32 %v9841_v55, %v9840_v8  ;;  %v9843_v63 = vmul.f32 %v9825_v34, %v9825_v34  ;;  %v9910_v29 = vrot.slane %v9829_v59, %v13878_v38 }
 0xb72   :  { %v9834_v28 = vadd.f32 %v14520_v19, %v9825_v34  ;;  %v9844_v31 = vmul.f32 %v14520_v19, %v14520_v19 }
 0xb74   :  { %v9850_v52 = vadd.f32 %v9844_v31, %v9843_v63 }
 0xb87   :  { %v9745_v14 = vpop.f32.mrf.mxu1 }
 0xb88   :  { %v9746_v37 = vadd.f32 %v11187_v51, %v9745_v14 }
 0xb89   :  { %v11272_v61 = vpop.f32.mrf.mxu1 }
 0xb8a   :  { %v9824_v3 = vadd.f32 %v9818_v60, %v9746_v37 }
 0xb8b   :  { %v9748_v35 = vpop.f32.mrf.mxu1 }
 0xb8c   :  { %v9749_v7 = vadd.f32 %v11190_v33, %v9748_v35  ;;  %v9831_v41 = vadd.f32 %v9830_v24, %v9824_v3  ;;  %v9842_v12 = vmul.f32 %v9824_v3, %v9824_v3 }
 0xb8d   :  { %v11273_v56 = vpop.f32.mrf.mxu1 }
 0xb8e   :  { %v9827_v6 = vadd.f32 %v9821_v36, %v9749_v7  ;;  %9832 = vadd.xlane.f32.xlu1 %v9831_v41  ;;  %v9847_v46 = vadd.f32 %v9846_v45, %v9842_v12 }
 0xb90   :  { %v9835_v40 = vadd.f32 %v9834_v28, %v9827_v6  ;;  %v9845_v20 = vmul.f32 %v9827_v6, %v9827_v6 }
 0xb92   :  { %9836 = vadd.xlane.f32.xlu0 %v9835_v40  ;;  %9848 = vadd.xlane.f32.xlu1 %v9847_v46  ;;  %v9851_v50 = vadd.f32 %v9850_v52, %v9845_v20  ;;  %v9950_v46 = vld [vmem:[#allocation51] sm:$0x7] }
 0xb93   :  { %v9955_v20 = vrot.slane %v9950_v46, %v13870_v30 }
 0xb96   :  { %9852 = vadd.xlane.f32.xlu0 %v9851_v50 }
 0xc17   :  { %v9833_v43 = vpop.xlane.xlu1 %9832 }
 0xc18   :  { %v9838_v60 = vmul.f32 0.0026041667, %v9833_v43  ;;  %v9959_v43 = vrot.slane %v9950_v46, %v13873_v32 }
 0xc1a   :  { %v9856_v58 = vmul.f32 %v9838_v60, %v9838_v60  ;;  %v9860_v13 = vsub.f32 %v9822_v17, %v9838_v60  ;;  %v9861_v48 = vsub.f32 %v14518_v25, %v9838_v60  ;;  %v9862_v4 = vsub.f32 %v9824_v3, %v9838_v60 }
 0xc1b   :  { %v9837_v22 = vpop.xlane.xlu0 %9836  ;;  %v9849_v36 = vpop.xlane.xlu1 %9848 }
 0xc1c   :  { %v9839_v47 = vmul.f32 0.0026041667, %v9837_v22  ;;  %v9854_v0 = vmul.f32 0.0026041667, %v9849_v36 }
 0xc1e   :  { %v9858_v57 = vsub.f32 %v9854_v0, %v9856_v58  ;;  %v9857_v2 = vmul.f32 %v9839_v47, %v9839_v47  ;;  %v9863_v14 = vsub.f32 %v9825_v34, %v9839_v47  ;;  %v9864_v25 = vsub.f32 %v14520_v19, %v9839_v47 }
 0xc1f   :  { %v9853_v5 = vpop.xlane.xlu0 %9852  ;;  %v9865_v42 = vsub.f32 %v9827_v6, %v9839_v47  ;;  %v9963_v58 = vrot.slane %v9950_v46, %v13878_v38 }
 0xc20   :  { %v9866_v62 = vadd.f32 1e-06, %v9858_v57  ;;  %v9855_v53 = vmul.f32 0.0026041667, %v9853_v5 }
 0xc22   :  { %12822 = vrsqrt.f32 %v9866_v62  ;;  %v9859_v9 = vsub.f32 %v9855_v53, %v9857_v2 }
 0xc24   :  { %v9867_v21 = vadd.f32 1e-06, %v9859_v9 }
 0xc26   :  { %12824 = vrsqrt.f32 %v9867_v21 }
 0xc2f   :  { %v12823_v44 = vpop.eup %12822 }
 0xc30   :  { %v9870_v49 = vmul.f32 %v12823_v44, %v9860_v13  ;;  %v9871_v51 = vmul.f32 %v12823_v44, %v9861_v48  ;;  %v9872_v16 = vmul.f32 %v12823_v44, %v9862_v4 }
 0xc32   :  { %v9892_v10 = vmul.f32 %v9880_v1, %v9870_v49  ;;  %v9893_v15 = vmul.f32 %v9884_v27, %v9871_v51  ;;  %v9894_v37 = vmul.f32 %v9888_v11, %v9872_v16  ;;  %v9991_v51 = vand.u32 127, %v735_v23 }
 0xc33   :  { %v12825_v17 = vpop.eup %12824 }
 0xc34   :  { %v9914_v33 = vadd.f32 %v9902_v18, %v9892_v10  ;;  %v9915_v61 = vadd.f32 %v9906_v54, %v9893_v15  ;;  %v9916_v3 = vadd.f32 %v9910_v29, %v9894_v37  ;;  %v9873_v24 = vmul.f32 %v12825_v17, %v9863_v14 }
 0xc35   :  { %v9874_v55 = vmul.f32 %v12825_v17, %v9864_v25  ;;  %v9875_v35 = vmul.f32 %v12825_v17, %v9865_v42  ;;  %v9994_v14 = vsub.s32 %v9991_v51, %v13867_v26 }
 0xc36   :  { %v9926_v8 = vmul.f32 1.442695, %v9914_v33  ;;  %v9928_v7 = vmul.f32 1.442695, %v9915_v61  ;;  %v9930_v41 = vmul.f32 1.442695, %v9916_v3  ;;  %v9895_v12 = vmul.f32 %v9880_v1, %v9873_v24 }
 0xc37   :  { %v9896_v56 = vmul.f32 %v9884_v27, %v9874_v55  ;;  %v9897_v34 = vmul.f32 %v9888_v11, %v9875_v35  ;;  %vm9920_vm2 = vcmp.gt.f32.partialorder %v9914_v33, 0.0  ;;  %vm9921_vm12 = vcmp.gt.f32.partialorder %v9915_v61, 0.0 }
 0xc38   :  { %12826 = vpow2.f32 %v9926_v8  ;;  %v9917_v28 = vadd.f32 %v9902_v18, %v9895_v12  ;;  %vm9922_vm13 = vcmp.gt.f32.partialorder %v9916_v3, 0.0 }
 0xc39   :  { %12828 = vpow2.f32 %v9928_v7  ;;  %v9918_v45 = vadd.f32 %v9906_v54, %v9896_v56  ;;  %v9919_v31 = vadd.f32 %v9910_v29, %v9897_v34  ;;  %v9981_v54 = vstv %s10068_s24 }
 0xc3a   :  { %12830 = vpow2.f32 %v9930_v41  ;;  %v9932_v19 = vmul.f32 1.442695, %v9917_v28  ;;  %vm9923_vm14 = vcmp.gt.f32.partialorder %v9917_v28, 0.0 }
 0xc3b   :  { %v9934_v6 = vmul.f32 1.442695, %v9918_v45  ;;  %v9936_v40 = vmul.f32 1.442695, %v9919_v31  ;;  %vm9924_vm15 = vcmp.gt.f32.partialorder %v9918_v45, 0.0  ;;  %vm9925_vm0 = vcmp.gt.f32.partialorder %v9919_v31, 0.0 }
 0xc3c   :  { %12832 = vpow2.f32 %v9932_v19 }
 0xc3d   :  { %12834 = vpow2.f32 %v9934_v6 }
 0xc3e   :  { %12836 = vpow2.f32 %v9936_v40 }
 0xc45   :  { %v12827_v63 = vpop.eup %12826 }
 0xc46   :  { %v12829_v52 = vpop.eup %12828  ;;  %v11072_v50 = vadd.f32 -1.0, %v12827_v63 }
 0xc47   :  { %v12831_v60 = vpop.eup %12830  ;;  %v11073_v22 = vadd.f32 -1.0, %v12829_v52 }
 0xc48   :  { %v11074_v36 = vadd.f32 -1.0, %v12831_v60  ;;  %v9944_v47 = vsel %vm9920_vm2, %v9914_v33, %v11072_v50 }
 0xc49   :  { %v9945_v0 = vsel %vm9921_vm12, %v9915_v61, %v11073_v22  ;;  %v9967_v57 = vmul.f32 %v9955_v20, %v9944_v47  ;;  %v12833_v5 = vpop.eup %12832 }
 0xc4a   :  { %v9946_v62 = vsel %vm9922_vm13, %v9916_v3, %v11074_v36  ;;  %v9968_v2 = vmul.f32 %v9959_v43, %v9945_v0  ;;  %v12835_v53 = vpop.eup %12834  ;;  %v11075_v30 = vadd.f32 -1.0, %v12833_v5 }
 0xc4b   :  { %v12837_v9 = vpop.eup %12836  ;;  %v9969_v21 = vmul.f32 %v9963_v58, %v9946_v62  ;;  %v11076_v32 = vadd.f32 -1.0, %v12835_v53 }
 0xc4c   :  { %v9973_v39 = vadd.f32 %v9968_v2, %v9967_v57  ;;  %v11077_v59 = vadd.f32 -1.0, %v12837_v9  ;;  %v9947_v1 = vsel %vm9923_vm14, %v9917_v28, %v11075_v30 }
 0xc4d   :  { %v9948_v13 = vsel %vm9924_vm15, %v9918_v45, %v11076_v32  ;;  %v9970_v38 = vmul.f32 %v9955_v20, %v9947_v1 }
 0xc4e   :  { %v9974_v27 = vadd.f32 %v9973_v39, %v9969_v21  ;;  %v9949_v48 = vsel %vm9925_vm0, %v9919_v31, %v11077_v59  ;;  %v9971_v4 = vmul.f32 %v9959_v43, %v9948_v13 }
 0xc4f   :  { %v9972_v11 = vmul.f32 %v9963_v58, %v9949_v48 }
 0xc50   :  { %9975 = vadd.xlane.f32.xlu1 %v9974_v27  ;;  %v9977_v44 = vadd.f32 %v9971_v4, %v9970_v38 }
 0xc52   :  { %v9978_v18 = vadd.f32 %v9977_v44, %v9972_v11 }
 0xc54   :  { %9979 = vadd.xlane.f32.xlu0 %v9978_v18 }
 0xcd9   :  { %v9976_v49 = vpop.xlane.xlu1 %9975 }
 0xcda   :  { %v9982_v16 = vadd.f32 %v9981_v54, %v9976_v49 }
 0xcdc   :  { %v11078_v10 = vclamps-f32 %v9982_v16, 10.0 }
 0xcdd   :  { %v9980_v29 = vpop.xlane.xlu0 %9979 }
 0xcde   :  { %v9983_v15 = vadd.f32 %v9981_v54, %v9980_v29  ;;  %v9995_v17 = vrot.slane %v11078_v10, %v9994_v14 }
 0xce0   :  { %v11079_v37 = vclamps-f32 %v9983_v15, 10.0 }
 0xce2   :  { %v9999_v25 = vrot.slane %v11079_v37, %v9994_v14 }
 0xce4   :  { %v10000_v42 = vsel %vm2203_vm1, %v9999_v25, %v9995_v17 }
 0xce5   :  { %10003 = vst.msk [vmem:[#allocation52] sm:$0x3] %vm10002_vm3, %v10000_v42 }
 0xce6   :  { %13477 = shalt.err (!%p13474_p5)
}
 0xce7   :  { %10013 = dma.vmem_to_hbm [thread:$0]  %s10011_s2, 32, %s13786_s5, [#allocation4]  }
 0xce8   :  { %13522 = dma.done.wait [#allocation4], 32  }
 0xce9   :  { %13523 = vsyncadd [#allocation4], 4294967264 }
 0xcea   :  { %10017 = vsyncpa [#allocation3], 1 }
 0xceb   :  { %10018 = vsyncpa [#allocation7], 1 }
 0xcec   :  { %10019 = vsyncpa [#allocation11], 1 }
 0xced   :  { %10020 = vsyncpa [#allocation14], 1 }
 0xcee   :  { %10021 = vsyncpa [#allocation17], 1 }
 0xcef   :  { %10022 = vsyncpa [#allocation20], 1 }
 0xcf0   :  { %10023 = vsyncpa [#allocation23], 1 }
 0xcf1   :  { %10024 = vsyncpa [#allocation26], 1 }
 0xcf2   :  { %10025 = vsyncpa [#allocation29], 1 }
 0xcf3   :  { %10026 = vsyncpa [#allocation32], 1 }
 0xcf4   :  { %10027 = vsyncpa [#allocation35], 1 }
 0xcf5   :  { %10028 = vsyncpa [#allocation38], 1 }
 0xcf6   :  { %10029 = vsyncpa [#allocation41], 1 }
 0xcf7   :  { %10030 = vsyncpa [#allocation44], 1 }
 0xcf8   :  { %10031 = vsyncpa [#allocation47], 1 }
 0xcf9   :  { %10032 = vsyncpa [#allocation50], 1 }
 0xcfa   :  { %10033 = vsyncpa [#allocation4], 1 }
 0xcfb   :  { %10034 = vsyncpa [#allocation5], 1 }

</bundles_post_ra>
